<compile_context>
chip_gen: v7x
topology: tpu7x:2x2x1
jax: 0.10.0
libtpu: 0.0.40
codegen_flags: <defaults>
</compile_context>

<pallas_src>
import functools

import jax
import jax.numpy as jnp
from jax import lax
from jax.experimental import pallas as pl
from jax.experimental.pallas import tpu as pltpu


# Set to jnp.bfloat16 on v6e/v7x for 2x MXU throughput and half the HBM traffic of the
# matmul operands (accumulation stays f32). Kept f32 to match reference numerics / v5e.
MXU_DTYPE = jnp.float32

BN_EPS = 1e-5


# ----------------------------------------------------------------------------
# helpers
# ----------------------------------------------------------------------------
def _pick_tm(m, cap=512):
    """Largest row tile (multiple of 8) dividing m -> no activation padding / slicing."""
    if m % 8 != 0:
        return m                        # single full block (block dim == full dim is allowed)
    t = min(cap, m)
    t -= t % 8
    while m % t != 0:
        t -= 8
    return t


# ----------------------------------------------------------------------------
# Kernel 1: matmul (single K block) + fused BN affine + optional residual + ReLU
# Covers the 7x7 stem (via im2col), every 1x1 conv and the downsample convs.
# ----------------------------------------------------------------------------
def _mm_1step_kernel(a_ref, b_ref, *rest, relu, has_affine, has_res):
    i = 0
    s_ref = t_ref = r_ref = None
    if has_affine:
        s_ref, t_ref = rest[i], rest[i + 1]
        i += 2
    if has_res:
        r_ref = rest[i]
        i += 1
    o_ref = rest[i]
    y = jnp.dot(a_ref[...], b_ref[...], preferred_element_type=jnp.float32)
    if has_affine:
        y = y * s_ref[...] + t_ref[...]
    if has_res:
        y = y + r_ref[...]
    if relu:
        y = jnp.maximum(y, 0.0)
    o_ref[...] = y.astype(o_ref.dtype)


def fused_matmul_2d(a, b, scale=None, shift=None, residual=None, relu=False, tm_cap=512):
    m, k = a.shape
    _, n = b.shape
    tm = _pick_tm(m, tm_cap)
    has_affine = scale is not None
    has_res = residual is not None
    in_specs = [pl.BlockSpec((tm, k), lambda i: (i, 0)),
                pl.BlockSpec((k, n), lambda i: (0, 0))]
    args = [a.astype(MXU_DTYPE), b.astype(MXU_DTYPE)]
    if has_affine:
        in_specs += [pl.BlockSpec((1, n), lambda i: (0, 0)),
                     pl.BlockSpec((1, n), lambda i: (0, 0))]
        args += [scale.reshape(1, n), shift.reshape(1, n)]
    if has_res:
        in_specs.append(pl.BlockSpec((tm, n), lambda i: (i, 0)))
        args.append(residual)
    return pl.pallas_call(
        functools.partial(_mm_1step_kernel, relu=relu,
                          has_affine=has_affine, has_res=has_res),
        out_shape=jax.ShapeDtypeStruct((m, n), jnp.float32),
        grid=(m // tm,),
        in_specs=in_specs,
        out_specs=pl.BlockSpec((tm, n), lambda i: (i, 0)),
        compiler_params=pltpu.CompilerParams(dimension_semantics=("parallel",)),
    )(*args)


# ----------------------------------------------------------------------------
# Kernel 2: grouped matmul (group = parallel grid axis) + fused BN + ReLU
# Used by the grouped 3x3 conv2; output stays group-major (G, M, Cout_g).
# ----------------------------------------------------------------------------
def _grouped_mm_kernel(a_ref, b_ref, s_ref, t_ref, o_ref, *, relu):
    y = jnp.dot(a_ref[0], b_ref[0], preferred_element_type=jnp.float32)
    y = y * s_ref[0] + t_ref[0]
    if relu:
        y = jnp.maximum(y, 0.0)
    o_ref[0] = y.astype(o_ref.dtype)


def grouped_matmul_bn(a3, b3, scale, shift, relu=True, tm_cap=512):
    g, m, kg = a3.shape
    _, _, ng = b3.shape
    tm = _pick_tm(m, tm_cap)
    return pl.pallas_call(
        functools.partial(_grouped_mm_kernel, relu=relu),
        out_shape=jax.ShapeDtypeStruct((g, m, ng), jnp.float32),
        grid=(m // tm, g),
        in_specs=[pl.BlockSpec((1, tm, kg), lambda i, gg: (gg, i, 0)),
                  pl.BlockSpec((1, kg, ng), lambda i, gg: (gg, 0, 0)),
                  pl.BlockSpec((1, 1, ng), lambda i, gg: (gg, 0, 0)),
                  pl.BlockSpec((1, 1, ng), lambda i, gg: (gg, 0, 0))],
        out_specs=pl.BlockSpec((1, tm, ng), lambda i, gg: (gg, i, 0)),
        compiler_params=pltpu.CompilerParams(
            dimension_semantics=("parallel", "parallel")),
    )(a3.astype(MXU_DTYPE), b3.astype(MXU_DTYPE),
      scale.reshape(g, 1, ng), shift.reshape(g, 1, ng))


# ----------------------------------------------------------------------------
# Kernel 3: matmul with a K-step (group) reduction axis + fused BN + residual + ReLU
# Used by conv3: it consumes conv2's group-major output directly (groups = K steps).
# ----------------------------------------------------------------------------
def _reduce_mm_kernel(a_ref, b_ref, s_ref, t_ref, *rest, relu, has_res):
    if has_res:
        r_ref, o_ref, acc_ref = rest
    else:
        r_ref = None
        o_ref, acc_ref = rest
    k = pl.program_id(1)

    @pl.when(k == 0)
    def _():
        acc_ref[...] = jnp.zeros_like(acc_ref)

    acc_ref[...] += jnp.dot(a_ref[0], b_ref[0], preferred_element_type=jnp.float32)

    @pl.when(k == pl.num_programs(1) - 1)
    def _():
        y = acc_ref[...] * s_ref[...] + t_ref[...]
        if has_res:
            y = y + r_ref[...]
        if relu:
            y = jnp.maximum(y, 0.0)
        o_ref[...] = y.astype(o_ref.dtype)


def reduce_matmul_fused(a3, b3, scale, shift, residual=None, relu=False, tm_cap=512):
    s, m, k = a3.shape
    _, _, n = b3.shape
    if s == 1:  # specialize: no scratch accumulator needed
        return fused_matmul_2d(a3[0], b3[0], scale, shift, residual, relu, tm_cap)
    tm = _pick_tm(m, tm_cap)
    has_res = residual is not None
    in_specs = [pl.BlockSpec((1, tm, k), lambda i, kk: (kk, i, 0)),
                pl.BlockSpec((1, k, n), lambda i, kk: (kk, 0, 0)),
                pl.BlockSpec((1, n), lambda i, kk: (0, 0)),
                pl.BlockSpec((1, n), lambda i, kk: (0, 0))]
    args = [a3.astype(MXU_DTYPE), b3.astype(MXU_DTYPE),
            scale.reshape(1, n), shift.reshape(1, n)]
    if has_res:
        in_specs.append(pl.BlockSpec((tm, n), lambda i, kk: (i, 0)))
        args.append(residual)
    return pl.pallas_call(
        functools.partial(_reduce_mm_kernel, relu=relu, has_res=has_res),
        out_shape=jax.ShapeDtypeStruct((m, n), jnp.float32),
        grid=(m // tm, s),
        in_specs=in_specs,
        out_specs=pl.BlockSpec((tm, n), lambda i, kk: (i, 0)),
        scratch_shapes=[pltpu.VMEM((tm, n), jnp.float32)],
        compiler_params=pltpu.CompilerParams(
            dimension_semantics=("parallel", "arbitrary")),
    )(*args)


# ----------------------------------------------------------------------------
# Kernel 4: IBN-a over the FULL channel dim (per-lane mask selects instance stats
# for the IN half vs running stats for the BN half) + affine + ReLU.
# ----------------------------------------------------------------------------
def _ibn_kernel(x_ref, g_ref, b_ref, rm_ref, rv_ref, m_ref, o_ref, *, eps, relu):
    x = x_ref[0]                                       # (HW, C)
    mu = jnp.mean(x, axis=0, keepdims=True)            # per-sample spatial mean (all lanes)
    var = jnp.mean(jnp.square(x - mu), axis=0, keepdims=True)
    use_in = m_ref[...] > 0.5
    mean = jnp.where(use_in, mu, rm_ref[...])
    v = jnp.where(use_in, var, rv_ref[...])
    y = (x - mean) * lax.rsqrt(v + eps) * g_ref[...] + b_ref[...]
    if relu:
        y = jnp.maximum(y, 0.0)
    o_ref[0] = y.astype(o_ref.dtype)


def ibn_a_pallas(x3, p, relu=True, eps=BN_EPS):
    n, hw, c = x3.shape
    par = pl.BlockSpec((1, c), lambda b: (0, 0))
    return pl.pallas_call(
        functools.partial(_ibn_kernel, eps=eps, relu=relu),
        out_shape=jax.ShapeDtypeStruct((n, hw, c), jnp.float32),
        grid=(n,),
        in_specs=[pl.BlockSpec((1, hw, c), lambda b: (b, 0, 0)),
                  par, par, par, par, par],
        out_specs=pl.BlockSpec((1, hw, c), lambda b: (b, 0, 0)),
        compiler_params=pltpu.CompilerParams(dimension_semantics=("parallel",)),
    )(x3, p['gamma'].reshape(1, c), p['beta'].reshape(1, c),
      p['rmean'].reshape(1, c), p['rvar'].reshape(1, c), p['mask'].reshape(1, c))


# ----------------------------------------------------------------------------
# Kernel 5: maxpool 3x3/2 — window-max reduction, tiled (pipelined) over output rows
# ----------------------------------------------------------------------------
def _maxpool_kernel(x_ref, o_ref):
    o_ref[...] = jnp.max(x_ref[...], axis=0)


def maxpool2d_pallas(x, kernel=3, stride=2, padding=1):
    n, h, w, c = x.shape
    neg = jnp.finfo(x.dtype).min
    xp = jnp.pad(x, ((0, 0), (padding, padding), (padding, padding), (0, 0)),
                 constant_values=neg)
    ho = (h + 2 * padding - kernel) // stride + 1
    wo = (w + 2 * padding - kernel) // stride + 1
    wins = [xp[:, kh:kh + stride * ho:stride, kw:kw + stride * wo:stride, :]
            for kh in range(kernel) for kw in range(kernel)]
    kk = kernel * kernel
    m = n * ho * wo
    stacked = jnp.stack(wins, axis=0).reshape(kk, m, c)
    tm = _pick_tm(m)
    out = pl.pallas_call(
        _maxpool_kernel,
        out_shape=jax.ShapeDtypeStruct((m, c), x.dtype),
        grid=(m // tm,),
        in_specs=[pl.BlockSpec((kk, tm, c), lambda i: (0, i, 0))],
        out_specs=pl.BlockSpec((tm, c), lambda i: (i, 0)),
        compiler_params=pltpu.CompilerParams(dimension_semantics=("parallel",)),
    )(stacked)
    return out.reshape(n, ho, wo, c)


# ----------------------------------------------------------------------------
# Kernel 6: global average pool (AdaptiveAvgPool2d(1) + view), grid over batch
# ----------------------------------------------------------------------------
def _gap_kernel(x_ref, o_ref):
    o_ref[...] = jnp.mean(x_ref[...], axis=1, keepdims=True)


def global_avg_pool_pallas(x):
    n, h, w, c = x.shape
    x3 = x.reshape(n, h * w, c)
    out = pl.pallas_call(
        _gap_kernel,
        out_shape=jax.ShapeDtypeStruct((n, 1, c), x.dtype),
        grid=(n,),
        in_specs=[pl.BlockSpec((1, h * w, c), lambda b: (b, 0, 0))],
        out_specs=pl.BlockSpec((1, 1, c), lambda b: (b, 0, 0)),
        compiler_params=pltpu.CompilerParams(dimension_semantics=("parallel",)),
    )(x3)
    return out.reshape(n, c)


# ----------------------------------------------------------------------------
# Kernel 7: feat_bn (eval BatchNorm1d) + F.normalize fused
# ----------------------------------------------------------------------------
def _featbn_l2_kernel(x_ref, s_ref, t_ref, o_ref, *, eps):
    y = x_ref[...] * s_ref[...] + t_ref[...]
    norm = jnp.sqrt(jnp.sum(y * y, axis=1, keepdims=True))
    o_ref[...] = y / jnp.maximum(norm, eps)


def featbn_l2norm_pallas(x, scale, shift, eps=1e-12):
    n, c = x.shape
    return pl.pallas_call(
        functools.partial(_featbn_l2_kernel, eps=eps),
        out_shape=jax.ShapeDtypeStruct((n, c), x.dtype),
        grid=(1,),
        in_specs=[pl.BlockSpec((n, c), lambda i: (0, 0)),
                  pl.BlockSpec((1, c), lambda i: (0, 0)),
                  pl.BlockSpec((1, c), lambda i: (0, 0))],
        out_specs=pl.BlockSpec((n, c), lambda i: (0, 0)),
    )(x, scale.reshape(1, c), shift.reshape(1, c))


# ----------------------------------------------------------------------------
# conv glue (im2col taps only; weights are pre-reshaped at param-build time)
# ----------------------------------------------------------------------------
def _conv_patches(x, kh_kw, stride, padding):
    # TODO(synk): taps are still materialized in XLA; a strided tap window cannot be
    # expressed as a rectangular BlockSpec index_map, so a fully DMA-indexed im2col is
    # not implemented here.
    n, h, w, c = x.shape
    kh, kw = kh_kw
    xp = jnp.pad(x, ((0, 0), (padding, padding), (padding, padding), (0, 0)))
    ho = (h + 2 * padding - kh) // stride + 1
    wo = (w + 2 * padding - kw) // stride + 1
    taps = [xp[:, i:i + stride * ho:stride, j:j + stride * wo:stride, :]
            for i in range(kh) for j in range(kw)]
    return jnp.stack(taps, axis=3), (n, ho, wo)        # (N, Ho, Wo, KK, Cin)


def stem_conv_bn_relu(x, w_mat, scale, shift):
    pat, (n, ho, wo) = _conv_patches(x, (7, 7), stride=2, padding=3)
    c = x.shape[-1]
    a = pat.reshape(n * ho * wo, 7 * 7 * c)
    y = fused_matmul_2d(a, w_mat, scale, shift, relu=True)
    return y.reshape(n, ho, wo, w_mat.shape[1])


def grouped_conv3x3_bn_relu(x, w3d, scale, shift, groups, stride):
    """3x3 grouped conv + BN + ReLU in one pallas_call. Returns group-major (G, M, Cout_g)."""
    n, h, w, cin = x.shape
    g = groups
    cin_g = cin // g
    pat, (n, ho, wo) = _conv_patches(x, (3, 3), stride=stride, padding=1)
    m = n * ho * wo
    a = pat.reshape(m, 9, g, cin_g)
    a = jnp.transpose(a, (2, 0, 1, 3)).reshape(g, m, 9 * cin_g)
    out3 = grouped_matmul_bn(a, w3d, scale, shift, relu=True)
    return out3, (n, ho, wo)


# ----------------------------------------------------------------------------
# ResNeXt-IBN-a bottleneck block (all post-conv ops fused into matmul epilogues,
# except the IN half of IBN-a which needs per-sample spatial statistics)
# ----------------------------------------------------------------------------
def bottleneck_forward(x, p):
    n, h, w, cin = x.shape
    g = p['groups']
    width = p['w1'].shape[1]
    out_planes = p['w3'].shape[2]

    # conv1 (1x1)
    a1 = x.reshape(n * h * w, cin)
    if p['ibn']:
        y1 = fused_matmul_2d(a1, p['w1'])                                  # raw conv
        y1 = ibn_a_pallas(y1.reshape(n, h * w, width), p['bn1'], relu=True)
        y1 = y1.reshape(n, h, w, width)
    else:
        y1 = fused_matmul_2d(a1, p['w1'], p['bn1']['scale'], p['bn1']['shift'],
                             relu=True).reshape(n, h, w, width)

    # conv2 (grouped 3x3, stride) + bn2 + relu, group carried on the grid
    y2, (n2, ho, wo) = grouped_conv3x3_bn_relu(
        y1, p['w2'], p['bn2']['scale'], p['bn2']['shift'], g, p['stride'])
    m2 = n2 * ho * wo

    # residual branch (downsample 1x1 conv + bn fused when present)
    if p['downsample'] is not None:
        d = p['downsample']
        xs = x[:, ::d['stride'], ::d['stride'], :] if d['stride'] > 1 else x
        res = fused_matmul_2d(xs.reshape(m2, cin), d['w'],
                              d['bn']['scale'], d['bn']['shift'], relu=False)
    else:
        res = x.reshape(m2, out_planes)

    # conv3 (1x1) + bn3 + residual add + relu; groups are the K reduction steps
    y = reduce_matmul_fused(y2, p['w3'], p['bn3']['scale'], p['bn3']['shift'],
                            residual=res, relu=True)
    return y.reshape(n, ho, wo, out_planes)


# ----------------------------------------------------------------------------
# parameter construction (deterministic, synthetic; BN folded to scale/shift)
# ----------------------------------------------------------------------------
STEM = 8                     # full ResNeXt-101-IBN-a: 64
PLANES = (8, 16, 32, 64)     # full: (64, 128, 256, 512)
LAYERS = (1, 1, 1, 1)        # full: (3, 4, 23, 3)
GROUPS = 4                   # full: cardinality 32
EXPANSION = 4
STRIDES = (1, 2, 2, 1)       # layer4 stride removed (rmds=True)
IBN_CFG = (True, True, True, False)


class ParamGen:
    def __init__(self, key):
        self.key = key

    def _next(self):
        self.key, k = jax.random.split(self.key)
        return k

    def conv(self, cout, cin, kh, kw):
        fan_out = cout * kh * kw                       # kaiming_normal_(mode='fan_out')
        std = (2.0 / fan_out) ** 0.5
        return std * jax.random.normal(self._next(), (cout, cin, kh, kw), jnp.float32)

    def bn(self, c):
        return dict(
            weight=1.0 + 0.1 * jax.random.normal(self._next(), (c,), jnp.float32),
            bias=0.1 * jax.random.normal(self._next(), (c,), jnp.float32),
            mean=0.1 * jax.random.normal(self._next(), (c,), jnp.float32),
            var=jnp.abs(1.0 + 0.1 * jax.random.normal(self._next(), (c,), jnp.float32)),
        )

    def inorm(self, c):
        return dict(
            weight=1.0 + 0.1 * jax.random.normal(self._next(), (c,), jnp.float32),
            bias=0.1 * jax.random.normal(self._next(), (c,), jnp.float32),
        )


def _fold_bn(raw, eps=BN_EPS):
    scale = raw['weight'] / jnp.sqrt(raw['var'] + eps)
    shift = raw['bias'] - raw['mean'] * scale
    return dict(scale=scale, shift=shift)


def _fold_ibn(half, inorm, bn_raw):
    c_bn = bn_raw['weight'].shape[0]
    return dict(
        gamma=jnp.concatenate([inorm['weight'], bn_raw['weight']]),
        beta=jnp.concatenate([inorm['bias'], bn_raw['bias']]),
        rmean=jnp.concatenate([jnp.zeros((half,), jnp.float32), bn_raw['mean']]),
        rvar=jnp.concatenate([jnp.ones((half,), jnp.float32), bn_raw['var']]),
        mask=jnp.concatenate([jnp.ones((half,), jnp.float32),
                              jnp.zeros((c_bn,), jnp.float32)]),
    )


def _make_layer(gen, inplanes, planes, blocks, stride, ibn, groups):
    width = 2 * planes
    out_planes = planes * EXPANSION
    cin_g = width // groups
    cout_g = width // groups
    layer = []
    for b in range(blocks):
        s = stride if b == 0 else 1
        p = dict(stride=s, ibn=ibn, groups=groups)
        w1 = gen.conv(width, inplanes, 1, 1)
        p['w1'] = w1.reshape(width, inplanes).T                              # (Cin, width)
        if ibn:
            half = width // 2
            p['bn1'] = _fold_ibn(half, gen.inorm(half), gen.bn(width - half))
        else:
            p['bn1'] = _fold_bn(gen.bn(width))
        w2 = gen.conv(width, cin_g, 3, 3)
        p['w2'] = jnp.transpose(w2.reshape(groups, cout_g, cin_g, 3, 3),
                                (0, 3, 4, 2, 1)).reshape(groups, 9 * cin_g, cout_g)
        p['bn2'] = _fold_bn(gen.bn(width))
        w3 = gen.conv(out_planes, width, 1, 1)
        p['w3'] = jnp.transpose(w3.reshape(out_planes, groups, cout_g), (1, 2, 0))
        p['bn3'] = _fold_bn(gen.bn(out_planes))
        if s != 1 or inplanes != out_planes:
            wd = gen.conv(out_planes, inplanes, 1, 1)
            p['downsample'] = dict(w=wd.reshape(out_planes, inplanes).T,
                                   bn=_fold_bn(gen.bn(out_planes)), stride=s)
        else:
            p['downsample'] = None
        layer.append(p)
        inplanes = out_planes
    return layer, inplanes


def build_resnext_ibn_params(key):
    gen = ParamGen(key)
    params = dict()
    w_stem = gen.conv(STEM, 3, 7, 7)
    params['w_stem'] = jnp.transpose(w_stem, (2, 3, 1, 0)).reshape(7 * 7 * 3, STEM)
    params['bn_stem'] = _fold_bn(gen.bn(STEM))
    inplanes = STEM
    layers = []
    for planes, blocks, stride, ibn in zip(PLANES, LAYERS, STRIDES, IBN_CFG):
        layer, inplanes = _make_layer(gen, inplanes, planes, blocks, stride, ibn, GROUPS)
        layers.append(layer)
    params['layers'] = layers
    out_planes = PLANES[-1] * EXPANSION
    # feat_bn: weight=1, bias=0, fresh running stats (mean 0 / var 1).
    params['feat_bn'] = _fold_bn(dict(weight=jnp.ones((out_planes,), jnp.float32),
                                      bias=jnp.zeros((out_planes,), jnp.float32),
                                      mean=jnp.zeros((out_planes,), jnp.float32),
                                      var=jnp.ones((out_planes,), jnp.float32)))
    return params


# ----------------------------------------------------------------------------
# full forward (ResNextIBN.forward, inference path)
# ----------------------------------------------------------------------------
def resnext_ibn_forward(x_nchw, params):
    x = jnp.transpose(x_nchw, (0, 2, 3, 1))             # NCHW -> NHWC
    x = stem_conv_bn_relu(x, params['w_stem'],
                          params['bn_stem']['scale'], params['bn_stem']['shift'])
    x = maxpool2d_pallas(x, kernel=3, stride=2, padding=1)
    for layer in params['layers']:
        for blk in layer:
            x = bottleneck_forward(x, blk)
    feat = global_avg_pool_pallas(x)                     # (N, C)
    fb = params['feat_bn']
    # training is False -> return F.normalize(feat_bn(x))
    # TODO(synk): training-mode branch (batch-stat BN update, dropout, classifier) not exercised.
    return featbn_l2norm_pallas(feat, fb['scale'], fb['shift'])


if __name__ == "__main__":
    key = jax.random.PRNGKey(0)
    pkey, xkey = jax.random.split(key)
    params = build_resnext_ibn_params(pkey)
    x = jax.random.normal(xkey, (2, 3, 32, 32), jnp.float32)   # NCHW, like PyTorch input
    fwd = jax.jit(lambda inp: resnext_ibn_forward(inp, params))
    out = jax.block_until_ready(fwd(x))
    assert out.shape == (2, PLANES[-1] * EXPANSION), out.shape
    assert bool(jnp.all(jnp.isfinite(out)))
    assert bool(jnp.allclose(jnp.linalg.norm(out, axis=1), 1.0, atol=1e-4))
    print("KERNEL_OK")
</pallas_src>

<mosaic_0001>
module attributes {stable_mosaic.version = 11 : i64} {
  func.func @_mm_1step_kernel(%arg0: i32, %arg1: memref<512x147xf32, #tpu.memory_space<vmem>>, %arg2: memref<147x8xf32, #tpu.memory_space<vmem>>, %arg3: memref<1x8xf32, #tpu.memory_space<vmem>>, %arg4: memref<1x8xf32, #tpu.memory_space<vmem>>, %arg5: memref<512x8xf32, #tpu.memory_space<vmem>>) attributes {dimension_semantics = [#tpu.dimension_semantics<parallel>], iteration_bounds = array<i64: 1>, scalar_prefetch = 0 : i64, scratch_operands = 0 : i64, tpu.core_type = #tpu.core_type<tc>, window_params = [{transform_indices = @transform_0, window_bounds = array<i64: 512, 147>}, {pipeline_mode = #tpu.pipeline_mode<synchronous>, transform_indices = @transform_1, window_bounds = array<i64: 147, 8>}, {pipeline_mode = #tpu.pipeline_mode<synchronous>, transform_indices = @transform_2, window_bounds = array<i64: 1, 8>}, {pipeline_mode = #tpu.pipeline_mode<synchronous>, transform_indices = @transform_3, window_bounds = array<i64: 1, 8>}, {transform_indices = @transform_4, window_bounds = array<i64: 512, 8>}]} {
    %c0 = arith.constant 0 : index
    %c0_0 = arith.constant 0 : index
    %0 = vector.load %arg1[%c0, %c0_0] : memref<512x147xf32, #tpu.memory_space<vmem>>, vector<512x147xf32>
    %c0_1 = arith.constant 0 : index
    %c0_2 = arith.constant 0 : index
    %1 = vector.load %arg2[%c0_1, %c0_2] : memref<147x8xf32, #tpu.memory_space<vmem>>, vector<147x8xf32>
    %cst = arith.constant dense<0.000000e+00> : vector<512x8xf32>
    %2 = tpu.matmul %0, %1, %cst {dimension_numbers = #tpu.dot_dimension_numbers<[1], [0], [0], [1], [0, 0, 1, 1], [], []>} : vector<512x147xf32>, vector<147x8xf32>, vector<512x8xf32> -> vector<512x8xf32>
    %c0_3 = arith.constant 0 : index
    %c0_4 = arith.constant 0 : index
    %3 = vector.load %arg3[%c0_3, %c0_4] : memref<1x8xf32, #tpu.memory_space<vmem>>, vector<1x8xf32>
    %4 = vector.broadcast %3 : vector<1x8xf32> to vector<512x8xf32>
    %5 = arith.mulf %2, %4 : vector<512x8xf32>
    %c0_5 = arith.constant 0 : index
    %c0_6 = arith.constant 0 : index
    %6 = vector.load %arg4[%c0_5, %c0_6] : memref<1x8xf32, #tpu.memory_space<vmem>>, vector<1x8xf32>
    %7 = vector.broadcast %6 : vector<1x8xf32> to vector<512x8xf32>
    %8 = arith.addf %5, %7 : vector<512x8xf32>
    %cst_7 = arith.constant 0.000000e+00 : f32
    %9 = vector.broadcast %cst_7 : f32 to vector<512x8xf32>
    %10 = arith.maximumf %8, %9 : vector<512x8xf32>
    %c0_8 = arith.constant 0 : index
    %c0_9 = arith.constant 0 : index
    %11 = vector.load %arg5[%c0_8, %c0_9] : memref<512x8xf32, #tpu.memory_space<vmem>>, vector<512x8xf32>
    tpu.vector_store %arg5[%c0_8, %c0_9], %10 {strides = array<i32>} : memref<512x8xf32, #tpu.memory_space<vmem>>, vector<512x8xf32>,
    return
  }
  func.func @transform_0(%arg0: i32) -> (i32, i32) {
    %c0_i32 = arith.constant 0 : i32
    %c0_i32_0 = arith.constant 0 : i32
    return %arg0, %c0_i32 : i32, i32
  }
  func.func @transform_1(%arg0: i32) -> (i32, i32) {
    %c0_i32 = arith.constant 0 : i32
    %c0_i32_0 = arith.constant 0 : i32
    %c0_i32_1 = arith.constant 0 : i32
    return %c0_i32, %c0_i32_0 : i32, i32
  }
  func.func @transform_2(%arg0: i32) -> (i32, i32) {
    %c0_i32 = arith.constant 0 : i32
    %c0_i32_0 = arith.constant 0 : i32
    %c0_i32_1 = arith.constant 0 : i32
    return %c0_i32, %c0_i32_0 : i32, i32
  }
  func.func @transform_3(%arg0: i32) -> (i32, i32) {
    %c0_i32 = arith.constant 0 : i32
    %c0_i32_0 = arith.constant 0 : i32
    %c0_i32_1 = arith.constant 0 : i32
    return %c0_i32, %c0_i32_0 : i32, i32
  }
  func.func @transform_4(%arg0: i32) -> (i32, i32) {
    %c0_i32 = arith.constant 0 : i32
    %c0_i32_0 = arith.constant 0 : i32
    return %arg0, %c0_i32 : i32, i32
  }
}

module attributes {stable_mosaic.version = 11 : i64} {
  func.func @_maxpool_kernel(%arg0: i32, %arg1: memref<9x128x8xf32, #tpu.memory_space<vmem>>, %arg2: memref<128x8xf32, #tpu.memory_space<vmem>>) attributes {dimension_semantics = [#tpu.dimension_semantics<parallel>], iteration_bounds = array<i64: 1>, scalar_prefetch = 0 : i64, scratch_operands = 0 : i64, tpu.core_type = #tpu.core_type<tc>, window_params = [{transform_indices = @transform_0, window_bounds = array<i64: 9, 128, 8>}, {transform_indices = @transform_1, window_bounds = array<i64: 128, 8>}]} {
    %c0 = arith.constant 0 : index
    %c0_0 = arith.constant 0 : index
    %c0_1 = arith.constant 0 : index
    %0 = vector.load %arg1[%c0, %c0_0, %c0_1] : memref<9x128x8xf32, #tpu.memory_space<vmem>>, vector<9x128x8xf32>
    %cst = arith.constant dense<0xFF800000> : vector<128x8xf32>
    %1 = vector.multi_reduction <maximumf>, %0, %cst [0] : vector<9x128x8xf32> to vector<128x8xf32>
    %c0_2 = arith.constant 0 : index
    %c0_3 = arith.constant 0 : index
    %2 = vector.load %arg2[%c0_2, %c0_3] : memref<128x8xf32, #tpu.memory_space<vmem>>, vector<128x8xf32>
    tpu.vector_store %arg2[%c0_2, %c0_3], %1 {strides = array<i32>} : memref<128x8xf32, #tpu.memory_space<vmem>>, vector<128x8xf32>,
    return
  }
  func.func @transform_0(%arg0: i32) -> (i32, i32, i32) {
    %c0_i32 = arith.constant 0 : i32
    %c0_i32_0 = arith.constant 0 : i32
    %c0_i32_1 = arith.constant 0 : i32
    return %c0_i32, %arg0, %c0_i32_0 : i32, i32, i32
  }
  func.func @transform_1(%arg0: i32) -> (i32, i32) {
    %c0_i32 = arith.constant 0 : i32
    %c0_i32_0 = arith.constant 0 : i32
    return %arg0, %c0_i32 : i32, i32
  }
}

module attributes {stable_mosaic.version = 11 : i64} {
  func.func @_mm_1step_kernel(%arg0: i32, %arg1: memref<128x8xf32, #tpu.memory_space<vmem>>, %arg2: memref<8x16xf32, #tpu.memory_space<vmem>>, %arg3: memref<128x16xf32, #tpu.memory_space<vmem>>) attributes {dimension_semantics = [#tpu.dimension_semantics<parallel>], iteration_bounds = array<i64: 1>, scalar_prefetch = 0 : i64, scratch_operands = 0 : i64, tpu.core_type = #tpu.core_type<tc>, window_params = [{transform_indices = @transform_0, window_bounds = array<i64: 128, 8>}, {pipeline_mode = #tpu.pipeline_mode<synchronous>, transform_indices = @transform_1, window_bounds = array<i64: 8, 16>}, {transform_indices = @transform_2, window_bounds = array<i64: 128, 16>}]} {
    %c0 = arith.constant 0 : index
    %c0_0 = arith.constant 0 : index
    %0 = vector.load %arg1[%c0, %c0_0] : memref<128x8xf32, #tpu.memory_space<vmem>>, vector<128x8xf32>
    %c0_1 = arith.constant 0 : index
    %c0_2 = arith.constant 0 : index
    %1 = vector.load %arg2[%c0_1, %c0_2] : memref<8x16xf32, #tpu.memory_space<vmem>>, vector<8x16xf32>
    %cst = arith.constant dense<0.000000e+00> : vector<128x16xf32>
    %2 = tpu.matmul %0, %1, %cst {dimension_numbers = #tpu.dot_dimension_numbers<[1], [0], [0], [1], [0, 0, 1, 1], [], []>} : vector<128x8xf32>, vector<8x16xf32>, vector<128x16xf32> -> vector<128x16xf32>
    %c0_3 = arith.constant 0 : index
    %c0_4 = arith.constant 0 : index
    %3 = vector.load %arg3[%c0_3, %c0_4] : memref<128x16xf32, #tpu.memory_space<vmem>>, vector<128x16xf32>
    tpu.vector_store %arg3[%c0_3, %c0_4], %2 {strides = array<i32>} : memref<128x16xf32, #tpu.memory_space<vmem>>, vector<128x16xf32>,
    return
  }
  func.func @transform_0(%arg0: i32) -> (i32, i32) {
    %c0_i32 = arith.constant 0 : i32
    %c0_i32_0 = arith.constant 0 : i32
    return %arg0, %c0_i32 : i32, i32
  }
  func.func @transform_1(%arg0: i32) -> (i32, i32) {
    %c0_i32 = arith.constant 0 : i32
    %c0_i32_0 = arith.constant 0 : i32
    %c0_i32_1 = arith.constant 0 : i32
    return %c0_i32, %c0_i32_0 : i32, i32
  }
  func.func @transform_2(%arg0: i32) -> (i32, i32) {
    %c0_i32 = arith.constant 0 : i32
    %c0_i32_0 = arith.constant 0 : i32
    return %arg0, %c0_i32 : i32, i32
  }
}

module attributes {stable_mosaic.version = 11 : i64} {
  func.func @_ibn_kernel(%arg0: i32, %arg1: memref<1x64x16xf32, #tpu.memory_space<vmem>>, %arg2: memref<1x16xf32, #tpu.memory_space<vmem>>, %arg3: memref<1x16xf32, #tpu.memory_space<vmem>>, %arg4: memref<1x16xf32, #tpu.memory_space<vmem>>, %arg5: memref<1x16xf32, #tpu.memory_space<vmem>>, %arg6: memref<1x16xf32, #tpu.memory_space<vmem>>, %arg7: memref<1x64x16xf32, #tpu.memory_space<vmem>>) attributes {dimension_semantics = [#tpu.dimension_semantics<parallel>], iteration_bounds = array<i64: 2>, scalar_prefetch = 0 : i64, scratch_operands = 0 : i64, tpu.core_type = #tpu.core_type<tc>, window_params = [{transform_indices = @transform_0, window_bounds = array<i64: 1, 64, 16>}, {pipeline_mode = #tpu.pipeline_mode<synchronous>, transform_indices = @transform_1, window_bounds = array<i64: 1, 16>}, {pipeline_mode = #tpu.pipeline_mode<synchronous>, transform_indices = @transform_2, window_bounds = array<i64: 1, 16>}, {pipeline_mode = #tpu.pipeline_mode<synchronous>, transform_indices = @transform_3, window_bounds = array<i64: 1, 16>}, {pipeline_mode = #tpu.pipeline_mode<synchronous>, transform_indices = @transform_4, window_bounds = array<i64: 1, 16>}, {pipeline_mode = #tpu.pipeline_mode<synchronous>, transform_indices = @transform_5, window_bounds = array<i64: 1, 16>}, {transform_indices = @transform_6, window_bounds = array<i64: 1, 64, 16>}]} {
    %c0 = arith.constant 0 : index
    %c0_0 = arith.constant 0 : index
    %c0_1 = arith.constant 0 : index
    %0 = vector.load %arg1[%c0, %c0_0, %c0_1] : memref<1x64x16xf32, #tpu.memory_space<vmem>>, vector<1x64x16xf32>
    %1 = vector.shape_cast %0 : vector<1x64x16xf32> to vector<64x16xf32>
    %cst = arith.constant dense<0.000000e+00> : vector<16xf32>
    %2 = vector.multi_reduction <add>, %1, %cst [0] : vector<64x16xf32> to vector<16xf32>
    %3 = vector.shape_cast %2 : vector<16xf32> to vector<1x16xf32>
    %cst_2 = arith.constant 6.400000e+01 : f32
    %4 = vector.broadcast %cst_2 : f32 to vector<1x16xf32>
    %5 = arith.divf %3, %4 : vector<1x16xf32>
    %6 = vector.broadcast %5 : vector<1x16xf32> to vector<64x16xf32>
    %7 = arith.subf %1, %6 : vector<64x16xf32>
    %8 = arith.mulf %7, %7 : vector<64x16xf32>
    %cst_3 = arith.constant dense<0.000000e+00> : vector<16xf32>
    %9 = vector.multi_reduction <add>, %8, %cst_3 [0] : vector<64x16xf32> to vector<16xf32>
    %10 = vector.shape_cast %9 : vector<16xf32> to vector<1x16xf32>
    %cst_4 = arith.constant 6.400000e+01 : f32
    %11 = vector.broadcast %cst_4 : f32 to vector<1x16xf32>
    %12 = arith.divf %10, %11 : vector<1x16xf32>
    %c0_5 = arith.constant 0 : index
    %c0_6 = arith.constant 0 : index
    %13 = vector.load %arg6[%c0_5, %c0_6] : memref<1x16xf32, #tpu.memory_space<vmem>>, vector<1x16xf32>
    %cst_7 = arith.constant 5.000000e-01 : f32
    %14 = vector.broadcast %cst_7 : f32 to vector<1x16xf32>
    %15 = arith.cmpf ogt, %13, %14 : vector<1x16xf32>
    %c0_8 = arith.constant 0 : index
    %c0_9 = arith.constant 0 : index
    %16 = vector.load %arg4[%c0_8, %c0_9] : memref<1x16xf32, #tpu.memory_space<vmem>>, vector<1x16xf32>
    %17 = arith.select %15, %5, %16 : vector<1x16xi1>, vector<1x16xf32>
    %c0_10 = arith.constant 0 : index
    %c0_11 = arith.constant 0 : index
    %18 = vector.load %arg5[%c0_10, %c0_11] : memref<1x16xf32, #tpu.memory_space<vmem>>, vector<1x16xf32>
    %19 = arith.select %15, %12, %18 : vector<1x16xi1>, vector<1x16xf32>
    %20 = vector.broadcast %17 : vector<1x16xf32> to vector<64x16xf32>
    %21 = arith.subf %1, %20 : vector<64x16xf32>
    %cst_12 = arith.constant 9.99999974E-6 : f32
    %22 = vector.broadcast %cst_12 : f32 to vector<1x16xf32>
    %23 = arith.addf %19, %22 : vector<1x16xf32>
    %24 = math.rsqrt %23 : vector<1x16xf32>
    %25 = vector.broadcast %24 : vector<1x16xf32> to vector<64x16xf32>
    %26 = arith.mulf %21, %25 : vector<64x16xf32>
    %c0_13 = arith.constant 0 : index
    %c0_14 = arith.constant 0 : index
    %27 = vector.load %arg2[%c0_13, %c0_14] : memref<1x16xf32, #tpu.memory_space<vmem>>, vector<1x16xf32>
    %28 = vector.broadcast %27 : vector<1x16xf32> to vector<64x16xf32>
    %29 = arith.mulf %26, %28 : vector<64x16xf32>
    %c0_15 = arith.constant 0 : index
    %c0_16 = arith.constant 0 : index
    %30 = vector.load %arg3[%c0_15, %c0_16] : memref<1x16xf32, #tpu.memory_space<vmem>>, vector<1x16xf32>
    %31 = vector.broadcast %30 : vector<1x16xf32> to vector<64x16xf32>
    %32 = arith.addf %29, %31 : vector<64x16xf32>
    %cst_17 = arith.constant 0.000000e+00 : f32
    %33 = vector.broadcast %cst_17 : f32 to vector<64x16xf32>
    %34 = arith.maximumf %32, %33 : vector<64x16xf32>
    %c0_18 = arith.constant 0 : index
    %c0_19 = arith.constant 0 : index
    %c0_20 = arith.constant 0 : index
    %35 = vector.load %arg7[%c0_18, %c0_19, %c0_20] : memref<1x64x16xf32, #tpu.memory_space<vmem>>, vector<1x64x16xf32>
    %36 = vector.shape_cast %35 : vector<1x64x16xf32> to vector<64x16xf32>
    %37 = vector.shape_cast %34 : vector<64x16xf32> to vector<1x64x16xf32>
    tpu.vector_store %arg7[%c0_18, %c0_19, %c0_20], %37 {strides = array<i32>} : memref<1x64x16xf32, #tpu.memory_space<vmem>>, vector<1x64x16xf32>,
    return
  }
  func.func @transform_0(%arg0: i32) -> (i32, i32, i32) {
    %c0_i32 = arith.constant 0 : i32
    %c0_i32_0 = arith.constant 0 : i32
    %c0_i32_1 = arith.constant 0 : i32
    return %arg0, %c0_i32, %c0_i32_0 : i32, i32, i32
  }
  func.func @transform_1(%arg0: i32) -> (i32, i32) {
    %c0_i32 = arith.constant 0 : i32
    %c0_i32_0 = arith.constant 0 : i32
    %c0_i32_1 = arith.constant 0 : i32
    return %c0_i32, %c0_i32_0 : i32, i32
  }
  func.func @transform_2(%arg0: i32) -> (i32, i32) {
    %c0_i32 = arith.constant 0 : i32
    %c0_i32_0 = arith.constant 0 : i32
    %c0_i32_1 = arith.constant 0 : i32
    return %c0_i32, %c0_i32_0 : i32, i32
  }
  func.func @transform_3(%arg0: i32) -> (i32, i32) {
    %c0_i32 = arith.constant 0 : i32
    %c0_i32_0 = arith.constant 0 : i32
    %c0_i32_1 = arith.constant 0 : i32
    return %c0_i32, %c0_i32_0 : i32, i32
  }
  func.func @transform_4(%arg0: i32) -> (i32, i32) {
    %c0_i32 = arith.constant 0 : i32
    %c0_i32_0 = arith.constant 0 : i32
    %c0_i32_1 = arith.constant 0 : i32
    return %c0_i32, %c0_i32_0 : i32, i32
  }
  func.func @transform_5(%arg0: i32) -> (i32, i32) {
    %c0_i32 = arith.constant 0 : i32
    %c0_i32_0 = arith.constant 0 : i32
    %c0_i32_1 = arith.constant 0 : i32
    return %c0_i32, %c0_i32_0 : i32, i32
  }
  func.func @transform_6(%arg0: i32) -> (i32, i32, i32) {
    %c0_i32 = arith.constant 0 : i32
    %c0_i32_0 = arith.constant 0 : i32
    %c0_i32_1 = arith.constant 0 : i32
    return %arg0, %c0_i32, %c0_i32_0 : i32, i32, i32
  }
}

module attributes {stable_mosaic.version = 11 : i64} {
  func.func @_grouped_mm_kernel(%arg0: i32, %arg1: i32, %arg2: memref<1x128x36xf32, #tpu.memory_space<vmem>>, %arg3: memref<1x36x4xf32, #tpu.memory_space<vmem>>, %arg4: memref<1x1x4xf32, #tpu.memory_space<vmem>>, %arg5: memref<1x1x4xf32, #tpu.memory_space<vmem>>, %arg6: memref<1x128x4xf32, #tpu.memory_space<vmem>>) attributes {dimension_semantics = [#tpu.dimension_semantics<parallel>, #tpu.dimension_semantics<parallel>], iteration_bounds = array<i64: 1, 4>, scalar_prefetch = 0 : i64, scratch_operands = 0 : i64, tpu.core_type = #tpu.core_type<tc>, window_params = [{transform_indices = @transform_0, window_bounds = array<i64: 1, 128, 36>}, {transform_indices = @transform_1, window_bounds = array<i64: 1, 36, 4>}, {transform_indices = @transform_2, window_bounds = array<i64: 1, 1, 4>}, {transform_indices = @transform_3, window_bounds = array<i64: 1, 1, 4>}, {transform_indices = @transform_4, window_bounds = array<i64: 1, 128, 4>}]} {
    %c0 = arith.constant 0 : index
    %c0_0 = arith.constant 0 : index
    %c0_1 = arith.constant 0 : index
    %0 = vector.load %arg2[%c0, %c0_0, %c0_1] : memref<1x128x36xf32, #tpu.memory_space<vmem>>, vector<1x128x36xf32>
    %1 = vector.shape_cast %0 : vector<1x128x36xf32> to vector<128x36xf32>
    %c0_2 = arith.constant 0 : index
    %c0_3 = arith.constant 0 : index
    %c0_4 = arith.constant 0 : index
    %2 = vector.load %arg3[%c0_2, %c0_3, %c0_4] : memref<1x36x4xf32, #tpu.memory_space<vmem>>, vector<1x36x4xf32>
    %3 = vector.shape_cast %2 : vector<1x36x4xf32> to vector<36x4xf32>
    %cst = arith.constant dense<0.000000e+00> : vector<128x4xf32>
    %4 = tpu.matmul %1, %3, %cst {dimension_numbers = #tpu.dot_dimension_numbers<[1], [0], [0], [1], [0, 0, 1, 1], [], []>} : vector<128x36xf32>, vector<36x4xf32>, vector<128x4xf32> -> vector<128x4xf32>
    %c0_5 = arith.constant 0 : index
    %c0_6 = arith.constant 0 : index
    %c0_7 = arith.constant 0 : index
    %5 = vector.load %arg4[%c0_5, %c0_6, %c0_7] : memref<1x1x4xf32, #tpu.memory_space<vmem>>, vector<1x1x4xf32>
    %6 = vector.shape_cast %5 : vector<1x1x4xf32> to vector<1x4xf32>
    %7 = vector.broadcast %6 : vector<1x4xf32> to vector<128x4xf32>
    %8 = arith.mulf %4, %7 : vector<128x4xf32>
    %c0_8 = arith.constant 0 : index
    %c0_9 = arith.constant 0 : index
    %c0_10 = arith.constant 0 : index
    %9 = vector.load %arg5[%c0_8, %c0_9, %c0_10] : memref<1x1x4xf32, #tpu.memory_space<vmem>>, vector<1x1x4xf32>
    %10 = vector.shape_cast %9 : vector<1x1x4xf32> to vector<1x4xf32>
    %11 = vector.broadcast %10 : vector<1x4xf32> to vector<128x4xf32>
    %12 = arith.addf %8, %11 : vector<128x4xf32>
    %cst_11 = arith.constant 0.000000e+00 : f32
    %13 = vector.broadcast %cst_11 : f32 to vector<128x4xf32>
    %14 = arith.maximumf %12, %13 : vector<128x4xf32>
    %c0_12 = arith.constant 0 : index
    %c0_13 = arith.constant 0 : index
    %c0_14 = arith.constant 0 : index
    %15 = vector.load %arg6[%c0_12, %c0_13, %c0_14] : memref<1x128x4xf32, #tpu.memory_space<vmem>>, vector<1x128x4xf32>
    %16 = vector.shape_cast %15 : vector<1x128x4xf32> to vector<128x4xf32>
    %17 = vector.shape_cast %14 : vector<128x4xf32> to vector<1x128x4xf32>
    tpu.vector_store %arg6[%c0_12, %c0_13, %c0_14], %17 {strides = array<i32>} : memref<1x128x4xf32, #tpu.memory_space<vmem>>, vector<1x128x4xf32>,
    return
  }
  func.func @transform_0(%arg0: i32, %arg1: i32) -> (i32, i32, i32) {
    %c0_i32 = arith.constant 0 : i32
    %c0_i32_0 = arith.constant 0 : i32
    return %arg1, %arg0, %c0_i32 : i32, i32, i32
  }
  func.func @transform_1(%arg0: i32, %arg1: i32) -> (i32, i32, i32) {
    %c0_i32 = arith.constant 0 : i32
    %c0_i32_0 = arith.constant 0 : i32
    %c0_i32_1 = arith.constant 0 : i32
    return %arg1, %c0_i32, %c0_i32_0 : i32, i32, i32
  }
  func.func @transform_2(%arg0: i32, %arg1: i32) -> (i32, i32, i32) {
    %c0_i32 = arith.constant 0 : i32
    %c0_i32_0 = arith.constant 0 : i32
    %c0_i32_1 = arith.constant 0 : i32
    return %arg1, %c0_i32, %c0_i32_0 : i32, i32, i32
  }
  func.func @transform_3(%arg0: i32, %arg1: i32) -> (i32, i32, i32) {
    %c0_i32 = arith.constant 0 : i32
    %c0_i32_0 = arith.constant 0 : i32
    %c0_i32_1 = arith.constant 0 : i32
    return %arg1, %c0_i32, %c0_i32_0 : i32, i32, i32
  }
  func.func @transform_4(%arg0: i32, %arg1: i32) -> (i32, i32, i32) {
    %c0_i32 = arith.constant 0 : i32
    %c0_i32_0 = arith.constant 0 : i32
    return %arg1, %arg0, %c0_i32 : i32, i32, i32
  }
}

module attributes {stable_mosaic.version = 11 : i64} {
  func.func @_mm_1step_kernel(%arg0: i32, %arg1: memref<128x8xf32, #tpu.memory_space<vmem>>, %arg2: memref<8x32xf32, #tpu.memory_space<vmem>>, %arg3: memref<1x32xf32, #tpu.memory_space<vmem>>, %arg4: memref<1x32xf32, #tpu.memory_space<vmem>>, %arg5: memref<128x32xf32, #tpu.memory_space<vmem>>) attributes {dimension_semantics = [#tpu.dimension_semantics<parallel>], iteration_bounds = array<i64: 1>, scalar_prefetch = 0 : i64, scratch_operands = 0 : i64, tpu.core_type = #tpu.core_type<tc>, window_params = [{transform_indices = @transform_0, window_bounds = array<i64: 128, 8>}, {pipeline_mode = #tpu.pipeline_mode<synchronous>, transform_indices = @transform_1, window_bounds = array<i64: 8, 32>}, {pipeline_mode = #tpu.pipeline_mode<synchronous>, transform_indices = @transform_2, window_bounds = array<i64: 1, 32>}, {pipeline_mode = #tpu.pipeline_mode<synchronous>, transform_indices = @transform_3, window_bounds = array<i64: 1, 32>}, {transform_indices = @transform_4, window_bounds = array<i64: 128, 32>}]} {
    %c0 = arith.constant 0 : index
    %c0_0 = arith.constant 0 : index
    %0 = vector.load %arg1[%c0, %c0_0] : memref<128x8xf32, #tpu.memory_space<vmem>>, vector<128x8xf32>
    %c0_1 = arith.constant 0 : index
    %c0_2 = arith.constant 0 : index
    %1 = vector.load %arg2[%c0_1, %c0_2] : memref<8x32xf32, #tpu.memory_space<vmem>>, vector<8x32xf32>
    %cst = arith.constant dense<0.000000e+00> : vector<128x32xf32>
    %2 = tpu.matmul %0, %1, %cst {dimension_numbers = #tpu.dot_dimension_numbers<[1], [0], [0], [1], [0, 0, 1, 1], [], []>} : vector<128x8xf32>, vector<8x32xf32>, vector<128x32xf32> -> vector<128x32xf32>
    %c0_3 = arith.constant 0 : index
    %c0_4 = arith.constant 0 : index
    %3 = vector.load %arg3[%c0_3, %c0_4] : memref<1x32xf32, #tpu.memory_space<vmem>>, vector<1x32xf32>
    %4 = vector.broadcast %3 : vector<1x32xf32> to vector<128x32xf32>
    %5 = arith.mulf %2, %4 : vector<128x32xf32>
    %c0_5 = arith.constant 0 : index
    %c0_6 = arith.constant 0 : index
    %6 = vector.load %arg4[%c0_5, %c0_6] : memref<1x32xf32, #tpu.memory_space<vmem>>, vector<1x32xf32>
    %7 = vector.broadcast %6 : vector<1x32xf32> to vector<128x32xf32>
    %8 = arith.addf %5, %7 : vector<128x32xf32>
    %c0_7 = arith.constant 0 : index
    %c0_8 = arith.constant 0 : index
    %9 = vector.load %arg5[%c0_7, %c0_8] : memref<128x32xf32, #tpu.memory_space<vmem>>, vector<128x32xf32>
    tpu.vector_store %arg5[%c0_7, %c0_8], %8 {strides = array<i32>} : memref<128x32xf32, #tpu.memory_space<vmem>>, vector<128x32xf32>,
    return
  }
  func.func @transform_0(%arg0: i32) -> (i32, i32) {
    %c0_i32 = arith.constant 0 : i32
    %c0_i32_0 = arith.constant 0 : i32
    return %arg0, %c0_i32 : i32, i32
  }
  func.func @transform_1(%arg0: i32) -> (i32, i32) {
    %c0_i32 = arith.constant 0 : i32
    %c0_i32_0 = arith.constant 0 : i32
    %c0_i32_1 = arith.constant 0 : i32
    return %c0_i32, %c0_i32_0 : i32, i32
  }
  func.func @transform_2(%arg0: i32) -> (i32, i32) {
    %c0_i32 = arith.constant 0 : i32
    %c0_i32_0 = arith.constant 0 : i32
    %c0_i32_1 = arith.constant 0 : i32
    return %c0_i32, %c0_i32_0 : i32, i32
  }
  func.func @transform_3(%arg0: i32) -> (i32, i32) {
    %c0_i32 = arith.constant 0 : i32
    %c0_i32_0 = arith.constant 0 : i32
    %c0_i32_1 = arith.constant 0 : i32
    return %c0_i32, %c0_i32_0 : i32, i32
  }
  func.func @transform_4(%arg0: i32) -> (i32, i32) {
    %c0_i32 = arith.constant 0 : i32
    %c0_i32_0 = arith.constant 0 : i32
    return %arg0, %c0_i32 : i32, i32
  }
}

module attributes {stable_mosaic.version = 11 : i64} {
  func.func @_reduce_mm_kernel(%arg0: i32, %arg1: i32, %arg2: memref<1x128x4xf32, #tpu.memory_space<vmem>>, %arg3: memref<1x4x32xf32, #tpu.memory_space<vmem>>, %arg4: memref<1x32xf32, #tpu.memory_space<vmem>>, %arg5: memref<1x32xf32, #tpu.memory_space<vmem>>, %arg6: memref<128x32xf32, #tpu.memory_space<vmem>>, %arg7: memref<128x32xf32, #tpu.memory_space<vmem>>, %arg8: memref<128x32xf32, #tpu.memory_space<vmem>>) attributes {dimension_semantics = [#tpu.dimension_semantics<parallel>, #tpu.dimension_semantics<arbitrary>], iteration_bounds = array<i64: 1, 4>, scalar_prefetch = 0 : i64, scratch_operands = 1 : i64, tpu.core_type = #tpu.core_type<tc>, window_params = [{transform_indices = @transform_0, window_bounds = array<i64: 1, 128, 4>}, {transform_indices = @transform_1, window_bounds = array<i64: 1, 4, 32>}, {pipeline_mode = #tpu.pipeline_mode<synchronous>, transform_indices = @transform_2, window_bounds = array<i64: 1, 32>}, {pipeline_mode = #tpu.pipeline_mode<synchronous>, transform_indices = @transform_3, window_bounds = array<i64: 1, 32>}, {transform_indices = @transform_4, window_bounds = array<i64: 128, 32>}, {transform_indices = @transform_5, window_bounds = array<i64: 128, 32>}]} {
    %c0_i32 = arith.constant 0 : i32
    %0 = arith.cmpi eq, %arg1, %c0_i32 : i32
    %1 = arith.extui %0 : i1 to i32
    %c0_i32_0 = arith.constant 0 : i32
    %2 = arith.cmpi ne, %1, %c0_i32_0 : i32
    scf.if %2 {
      %cst_11 = arith.constant 0.000000e+00 : f32
      %14 = vector.broadcast %cst_11 : f32 to vector<128x32xf32>
      %c0_12 = arith.constant 0 : index
      %c0_13 = arith.constant 0 : index
      %15 = vector.load %arg8[%c0_12, %c0_13] : memref<128x32xf32, #tpu.memory_space<vmem>>, vector<128x32xf32>
      tpu.vector_store %arg8[%c0_12, %c0_13], %14 {strides = array<i32>} : memref<128x32xf32, #tpu.memory_space<vmem>>, vector<128x32xf32>,
    } else {
    }
    %c0 = arith.constant 0 : index
    %c0_1 = arith.constant 0 : index
    %3 = vector.load %arg8[%c0, %c0_1] : memref<128x32xf32, #tpu.memory_space<vmem>>, vector<128x32xf32>
    %c0_2 = arith.constant 0 : index
    %c0_3 = arith.constant 0 : index
    %c0_4 = arith.constant 0 : index
    %4 = vector.load %arg2[%c0_2, %c0_3, %c0_4] : memref<1x128x4xf32, #tpu.memory_space<vmem>>, vector<1x128x4xf32>
    %5 = vector.shape_cast %4 : vector<1x128x4xf32> to vector<128x4xf32>
    %c0_5 = arith.constant 0 : index
    %c0_6 = arith.constant 0 : index
    %c0_7 = arith.constant 0 : index
    %6 = vector.load %arg3[%c0_5, %c0_6, %c0_7] : memref<1x4x32xf32, #tpu.memory_space<vmem>>, vector<1x4x32xf32>
    %7 = vector.shape_cast %6 : vector<1x4x32xf32> to vector<4x32xf32>
    %cst = arith.constant dense<0.000000e+00> : vector<128x32xf32>
    %8 = tpu.matmul %5, %7, %cst {dimension_numbers = #tpu.dot_dimension_numbers<[1], [0], [0], [1], [0, 0, 1, 1], [], []>} : vector<128x4xf32>, vector<4x32xf32>, vector<128x32xf32> -> vector<128x32xf32>
    %9 = arith.addf %3, %8 : vector<128x32xf32>
    %c0_8 = arith.constant 0 : index
    %c0_9 = arith.constant 0 : index
    %10 = vector.load %arg8[%c0_8, %c0_9] : memref<128x32xf32, #tpu.memory_space<vmem>>, vector<128x32xf32>
    tpu.vector_store %arg8[%c0_8, %c0_9], %9 {strides = array<i32>} : memref<128x32xf32, #tpu.memory_space<vmem>>, vector<128x32xf32>,
    %c3_i32 = arith.constant 3 : i32
    %11 = arith.cmpi eq, %arg1, %c3_i32 : i32
    %12 = arith.extui %11 : i1 to i32
    %c0_i32_10 = arith.constant 0 : i32
    %13 = arith.cmpi ne, %12, %c0_i32_10 : i32
    scf.if %13 {
      %c0_11 = arith.constant 0 : index
      %c0_12 = arith.constant 0 : index
      %14 = vector.load %arg8[%c0_11, %c0_12] : memref<128x32xf32, #tpu.memory_space<vmem>>, vector<128x32xf32>
      %c0_13 = arith.constant 0 : index
      %c0_14 = arith.constant 0 : index
      %15 = vector.load %arg4[%c0_13, %c0_14] : memref<1x32xf32, #tpu.memory_space<vmem>>, vector<1x32xf32>
      %16 = vector.broadcast %15 : vector<1x32xf32> to vector<128x32xf32>
      %17 = arith.mulf %14, %16 : vector<128x32xf32>
      %c0_15 = arith.constant 0 : index
      %c0_16 = arith.constant 0 : index
      %18 = vector.load %arg5[%c0_15, %c0_16] : memref<1x32xf32, #tpu.memory_space<vmem>>, vector<1x32xf32>
      %19 = vector.broadcast %18 : vector<1x32xf32> to vector<128x32xf32>
      %20 = arith.addf %17, %19 : vector<128x32xf32>
      %c0_17 = arith.constant 0 : index
      %c0_18 = arith.constant 0 : index
      %21 = vector.load %arg6[%c0_17, %c0_18] : memref<128x32xf32, #tpu.memory_space<vmem>>, vector<128x32xf32>
      %22 = arith.addf %20, %21 : vector<128x32xf32>
      %cst_19 = arith.constant 0.000000e+00 : f32
      %23 = vector.broadcast %cst_19 : f32 to vector<128x32xf32>
      %24 = arith.maximumf %22, %23 : vector<128x32xf32>
      %c0_20 = arith.constant 0 : index
      %c0_21 = arith.constant 0 : index
      %25 = vector.load %arg7[%c0_20, %c0_21] : memref<128x32xf32, #tpu.memory_space<vmem>>, vector<128x32xf32>
      tpu.vector_store %arg7[%c0_20, %c0_21], %24 {strides = array<i32>} : memref<128x32xf32, #tpu.memory_space<vmem>>, vector<128x32xf32>,
    } else {
    }
    return
  }
  func.func @transform_0(%arg0: i32, %arg1: i32) -> (i32, i32, i32) {
    %c0_i32 = arith.constant 0 : i32
    %c0_i32_0 = arith.constant 0 : i32
    return %arg1, %arg0, %c0_i32 : i32, i32, i32
  }
  func.func @transform_1(%arg0: i32, %arg1: i32) -> (i32, i32, i32) {
    %c0_i32 = arith.constant 0 : i32
    %c0_i32_0 = arith.constant 0 : i32
    %c0_i32_1 = arith.constant 0 : i32
    return %arg1, %c0_i32, %c0_i32_0 : i32, i32, i32
  }
  func.func @transform_2(%arg0: i32, %arg1: i32) -> (i32, i32) {
    %c0_i32 = arith.constant 0 : i32
    %c0_i32_0 = arith.constant 0 : i32
    %c0_i32_1 = arith.constant 0 : i32
    return %c0_i32, %c0_i32_0 : i32, i32
  }
  func.func @transform_3(%arg0: i32, %arg1: i32) -> (i32, i32) {
    %c0_i32 = arith.constant 0 : i32
    %c0_i32_0 = arith.constant 0 : i32
    %c0_i32_1 = arith.constant 0 : i32
    return %c0_i32, %c0_i32_0 : i32, i32
  }
  func.func @transform_4(%arg0: i32, %arg1: i32) -> (i32, i32) {
    %c0_i32 = arith.constant 0 : i32
    %c0_i32_0 = arith.constant 0 : i32
    return %arg0, %c0_i32 : i32, i32
  }
  func.func @transform_5(%arg0: i32, %arg1: i32) -> (i32, i32) {
    %c0_i32 = arith.constant 0 : i32
    %c0_i32_0 = arith.constant 0 : i32
    return %arg0, %c0_i32 : i32, i32
  }
}

module attributes {stable_mosaic.version = 11 : i64} {
  func.func @_mm_1step_kernel(%arg0: i32, %arg1: memref<128x32xf32, #tpu.memory_space<vmem>>, %arg2: memref<32x32xf32, #tpu.memory_space<vmem>>, %arg3: memref<128x32xf32, #tpu.memory_space<vmem>>) attributes {dimension_semantics = [#tpu.dimension_semantics<parallel>], iteration_bounds = array<i64: 1>, scalar_prefetch = 0 : i64, scratch_operands = 0 : i64, tpu.core_type = #tpu.core_type<tc>, window_params = [{transform_indices = @transform_0, window_bounds = array<i64: 128, 32>}, {pipeline_mode = #tpu.pipeline_mode<synchronous>, transform_indices = @transform_1, window_bounds = array<i64: 32, 32>}, {transform_indices = @transform_2, window_bounds = array<i64: 128, 32>}]} {
    %c0 = arith.constant 0 : index
    %c0_0 = arith.constant 0 : index
    %0 = vector.load %arg1[%c0, %c0_0] : memref<128x32xf32, #tpu.memory_space<vmem>>, vector<128x32xf32>
    %c0_1 = arith.constant 0 : index
    %c0_2 = arith.constant 0 : index
    %1 = vector.load %arg2[%c0_1, %c0_2] : memref<32x32xf32, #tpu.memory_space<vmem>>, vector<32x32xf32>
    %cst = arith.constant dense<0.000000e+00> : vector<128x32xf32>
    %2 = tpu.matmul %0, %1, %cst {dimension_numbers = #tpu.dot_dimension_numbers<[1], [0], [0], [1], [0, 0, 1, 1], [], []>} : vector<128x32xf32>, vector<32x32xf32>, vector<128x32xf32> -> vector<128x32xf32>
    %c0_3 = arith.constant 0 : index
    %c0_4 = arith.constant 0 : index
    %3 = vector.load %arg3[%c0_3, %c0_4] : memref<128x32xf32, #tpu.memory_space<vmem>>, vector<128x32xf32>
    tpu.vector_store %arg3[%c0_3, %c0_4], %2 {strides = array<i32>} : memref<128x32xf32, #tpu.memory_space<vmem>>, vector<128x32xf32>,
    return
  }
  func.func @transform_0(%arg0: i32) -> (i32, i32) {
    %c0_i32 = arith.constant 0 : i32
    %c0_i32_0 = arith.constant 0 : i32
    return %arg0, %c0_i32 : i32, i32
  }
  func.func @transform_1(%arg0: i32) -> (i32, i32) {
    %c0_i32 = arith.constant 0 : i32
    %c0_i32_0 = arith.constant 0 : i32
    %c0_i32_1 = arith.constant 0 : i32
    return %c0_i32, %c0_i32_0 : i32, i32
  }
  func.func @transform_2(%arg0: i32) -> (i32, i32) {
    %c0_i32 = arith.constant 0 : i32
    %c0_i32_0 = arith.constant 0 : i32
    return %arg0, %c0_i32 : i32, i32
  }
}

module attributes {stable_mosaic.version = 11 : i64} {
  func.func @_ibn_kernel(%arg0: i32, %arg1: memref<1x64x32xf32, #tpu.memory_space<vmem>>, %arg2: memref<1x32xf32, #tpu.memory_space<vmem>>, %arg3: memref<1x32xf32, #tpu.memory_space<vmem>>, %arg4: memref<1x32xf32, #tpu.memory_space<vmem>>, %arg5: memref<1x32xf32, #tpu.memory_space<vmem>>, %arg6: memref<1x32xf32, #tpu.memory_space<vmem>>, %arg7: memref<1x64x32xf32, #tpu.memory_space<vmem>>) attributes {dimension_semantics = [#tpu.dimension_semantics<parallel>], iteration_bounds = array<i64: 2>, scalar_prefetch = 0 : i64, scratch_operands = 0 : i64, tpu.core_type = #tpu.core_type<tc>, window_params = [{transform_indices = @transform_0, window_bounds = array<i64: 1, 64, 32>}, {pipeline_mode = #tpu.pipeline_mode<synchronous>, transform_indices = @transform_1, window_bounds = array<i64: 1, 32>}, {pipeline_mode = #tpu.pipeline_mode<synchronous>, transform_indices = @transform_2, window_bounds = array<i64: 1, 32>}, {pipeline_mode = #tpu.pipeline_mode<synchronous>, transform_indices = @transform_3, window_bounds = array<i64: 1, 32>}, {pipeline_mode = #tpu.pipeline_mode<synchronous>, transform_indices = @transform_4, window_bounds = array<i64: 1, 32>}, {pipeline_mode = #tpu.pipeline_mode<synchronous>, transform_indices = @transform_5, window_bounds = array<i64: 1, 32>}, {transform_indices = @transform_6, window_bounds = array<i64: 1, 64, 32>}]} {
    %c0 = arith.constant 0 : index
    %c0_0 = arith.constant 0 : index
    %c0_1 = arith.constant 0 : index
    %0 = vector.load %arg1[%c0, %c0_0, %c0_1] : memref<1x64x32xf32, #tpu.memory_space<vmem>>, vector<1x64x32xf32>
    %1 = vector.shape_cast %0 : vector<1x64x32xf32> to vector<64x32xf32>
    %cst = arith.constant dense<0.000000e+00> : vector<32xf32>
    %2 = vector.multi_reduction <add>, %1, %cst [0] : vector<64x32xf32> to vector<32xf32>
    %3 = vector.shape_cast %2 : vector<32xf32> to vector<1x32xf32>
    %cst_2 = arith.constant 6.400000e+01 : f32
    %4 = vector.broadcast %cst_2 : f32 to vector<1x32xf32>
    %5 = arith.divf %3, %4 : vector<1x32xf32>
    %6 = vector.broadcast %5 : vector<1x32xf32> to vector<64x32xf32>
    %7 = arith.subf %1, %6 : vector<64x32xf32>
    %8 = arith.mulf %7, %7 : vector<64x32xf32>
    %cst_3 = arith.constant dense<0.000000e+00> : vector<32xf32>
    %9 = vector.multi_reduction <add>, %8, %cst_3 [0] : vector<64x32xf32> to vector<32xf32>
    %10 = vector.shape_cast %9 : vector<32xf32> to vector<1x32xf32>
    %cst_4 = arith.constant 6.400000e+01 : f32
    %11 = vector.broadcast %cst_4 : f32 to vector<1x32xf32>
    %12 = arith.divf %10, %11 : vector<1x32xf32>
    %c0_5 = arith.constant 0 : index
    %c0_6 = arith.constant 0 : index
    %13 = vector.load %arg6[%c0_5, %c0_6] : memref<1x32xf32, #tpu.memory_space<vmem>>, vector<1x32xf32>
    %cst_7 = arith.constant 5.000000e-01 : f32
    %14 = vector.broadcast %cst_7 : f32 to vector<1x32xf32>
    %15 = arith.cmpf ogt, %13, %14 : vector<1x32xf32>
    %c0_8 = arith.constant 0 : index
    %c0_9 = arith.constant 0 : index
    %16 = vector.load %arg4[%c0_8, %c0_9] : memref<1x32xf32, #tpu.memory_space<vmem>>, vector<1x32xf32>
    %17 = arith.select %15, %5, %16 : vector<1x32xi1>, vector<1x32xf32>
    %c0_10 = arith.constant 0 : index
    %c0_11 = arith.constant 0 : index
    %18 = vector.load %arg5[%c0_10, %c0_11] : memref<1x32xf32, #tpu.memory_space<vmem>>, vector<1x32xf32>
    %19 = arith.select %15, %12, %18 : vector<1x32xi1>, vector<1x32xf32>
    %20 = vector.broadcast %17 : vector<1x32xf32> to vector<64x32xf32>
    %21 = arith.subf %1, %20 : vector<64x32xf32>
    %cst_12 = arith.constant 9.99999974E-6 : f32
    %22 = vector.broadcast %cst_12 : f32 to vector<1x32xf32>
    %23 = arith.addf %19, %22 : vector<1x32xf32>
    %24 = math.rsqrt %23 : vector<1x32xf32>
    %25 = vector.broadcast %24 : vector<1x32xf32> to vector<64x32xf32>
    %26 = arith.mulf %21, %25 : vector<64x32xf32>
    %c0_13 = arith.constant 0 : index
    %c0_14 = arith.constant 0 : index
    %27 = vector.load %arg2[%c0_13, %c0_14] : memref<1x32xf32, #tpu.memory_space<vmem>>, vector<1x32xf32>
    %28 = vector.broadcast %27 : vector<1x32xf32> to vector<64x32xf32>
    %29 = arith.mulf %26, %28 : vector<64x32xf32>
    %c0_15 = arith.constant 0 : index
    %c0_16 = arith.constant 0 : index
    %30 = vector.load %arg3[%c0_15, %c0_16] : memref<1x32xf32, #tpu.memory_space<vmem>>, vector<1x32xf32>
    %31 = vector.broadcast %30 : vector<1x32xf32> to vector<64x32xf32>
    %32 = arith.addf %29, %31 : vector<64x32xf32>
    %cst_17 = arith.constant 0.000000e+00 : f32
    %33 = vector.broadcast %cst_17 : f32 to vector<64x32xf32>
    %34 = arith.maximumf %32, %33 : vector<64x32xf32>
    %c0_18 = arith.constant 0 : index
    %c0_19 = arith.constant 0 : index
    %c0_20 = arith.constant 0 : index
    %35 = vector.load %arg7[%c0_18, %c0_19, %c0_20] : memref<1x64x32xf32, #tpu.memory_space<vmem>>, vector<1x64x32xf32>
    %36 = vector.shape_cast %35 : vector<1x64x32xf32> to vector<64x32xf32>
    %37 = vector.shape_cast %34 : vector<64x32xf32> to vector<1x64x32xf32>
    tpu.vector_store %arg7[%c0_18, %c0_19, %c0_20], %37 {strides = array<i32>} : memref<1x64x32xf32, #tpu.memory_space<vmem>>, vector<1x64x32xf32>,
    return
  }
  func.func @transform_0(%arg0: i32) -> (i32, i32, i32) {
    %c0_i32 = arith.constant 0 : i32
    %c0_i32_0 = arith.constant 0 : i32
    %c0_i32_1 = arith.constant 0 : i32
    return %arg0, %c0_i32, %c0_i32_0 : i32, i32, i32
  }
  func.func @transform_1(%arg0: i32) -> (i32, i32) {
    %c0_i32 = arith.constant 0 : i32
    %c0_i32_0 = arith.constant 0 : i32
    %c0_i32_1 = arith.constant 0 : i32
    return %c0_i32, %c0_i32_0 : i32, i32
  }
  func.func @transform_2(%arg0: i32) -> (i32, i32) {
    %c0_i32 = arith.constant 0 : i32
    %c0_i32_0 = arith.constant 0 : i32
    %c0_i32_1 = arith.constant 0 : i32
    return %c0_i32, %c0_i32_0 : i32, i32
  }
  func.func @transform_3(%arg0: i32) -> (i32, i32) {
    %c0_i32 = arith.constant 0 : i32
    %c0_i32_0 = arith.constant 0 : i32
    %c0_i32_1 = arith.constant 0 : i32
    return %c0_i32, %c0_i32_0 : i32, i32
  }
  func.func @transform_4(%arg0: i32) -> (i32, i32) {
    %c0_i32 = arith.constant 0 : i32
    %c0_i32_0 = arith.constant 0 : i32
    %c0_i32_1 = arith.constant 0 : i32
    return %c0_i32, %c0_i32_0 : i32, i32
  }
  func.func @transform_5(%arg0: i32) -> (i32, i32) {
    %c0_i32 = arith.constant 0 : i32
    %c0_i32_0 = arith.constant 0 : i32
    %c0_i32_1 = arith.constant 0 : i32
    return %c0_i32, %c0_i32_0 : i32, i32
  }
  func.func @transform_6(%arg0: i32) -> (i32, i32, i32) {
    %c0_i32 = arith.constant 0 : i32
    %c0_i32_0 = arith.constant 0 : i32
    %c0_i32_1 = arith.constant 0 : i32
    return %arg0, %c0_i32, %c0_i32_0 : i32, i32, i32
  }
}

module attributes {stable_mosaic.version = 11 : i64} {
  func.func @_grouped_mm_kernel(%arg0: i32, %arg1: i32, %arg2: memref<1x32x72xf32, #tpu.memory_space<vmem>>, %arg3: memref<1x72x8xf32, #tpu.memory_space<vmem>>, %arg4: memref<1x1x8xf32, #tpu.memory_space<vmem>>, %arg5: memref<1x1x8xf32, #tpu.memory_space<vmem>>, %arg6: memref<1x32x8xf32, #tpu.memory_space<vmem>>) attributes {dimension_semantics = [#tpu.dimension_semantics<parallel>, #tpu.dimension_semantics<parallel>], iteration_bounds = array<i64: 1, 4>, scalar_prefetch = 0 : i64, scratch_operands = 0 : i64, tpu.core_type = #tpu.core_type<tc>, window_params = [{transform_indices = @transform_0, window_bounds = array<i64: 1, 32, 72>}, {transform_indices = @transform_1, window_bounds = array<i64: 1, 72, 8>}, {transform_indices = @transform_2, window_bounds = array<i64: 1, 1, 8>}, {transform_indices = @transform_3, window_bounds = array<i64: 1, 1, 8>}, {transform_indices = @transform_4, window_bounds = array<i64: 1, 32, 8>}]} {
    %c0 = arith.constant 0 : index
    %c0_0 = arith.constant 0 : index
    %c0_1 = arith.constant 0 : index
    %0 = vector.load %arg2[%c0, %c0_0, %c0_1] : memref<1x32x72xf32, #tpu.memory_space<vmem>>, vector<1x32x72xf32>
    %1 = vector.shape_cast %0 : vector<1x32x72xf32> to vector<32x72xf32>
    %c0_2 = arith.constant 0 : index
    %c0_3 = arith.constant 0 : index
    %c0_4 = arith.constant 0 : index
    %2 = vector.load %arg3[%c0_2, %c0_3, %c0_4] : memref<1x72x8xf32, #tpu.memory_space<vmem>>, vector<1x72x8xf32>
    %3 = vector.shape_cast %2 : vector<1x72x8xf32> to vector<72x8xf32>
    %cst = arith.constant dense<0.000000e+00> : vector<32x8xf32>
    %4 = tpu.matmul %1, %3, %cst {dimension_numbers = #tpu.dot_dimension_numbers<[1], [0], [0], [1], [0, 0, 1, 1], [], []>} : vector<32x72xf32>, vector<72x8xf32>, vector<32x8xf32> -> vector<32x8xf32>
    %c0_5 = arith.constant 0 : index
    %c0_6 = arith.constant 0 : index
    %c0_7 = arith.constant 0 : index
    %5 = vector.load %arg4[%c0_5, %c0_6, %c0_7] : memref<1x1x8xf32, #tpu.memory_space<vmem>>, vector<1x1x8xf32>
    %6 = vector.shape_cast %5 : vector<1x1x8xf32> to vector<1x8xf32>
    %7 = vector.broadcast %6 : vector<1x8xf32> to vector<32x8xf32>
    %8 = arith.mulf %4, %7 : vector<32x8xf32>
    %c0_8 = arith.constant 0 : index
    %c0_9 = arith.constant 0 : index
    %c0_10 = arith.constant 0 : index
    %9 = vector.load %arg5[%c0_8, %c0_9, %c0_10] : memref<1x1x8xf32, #tpu.memory_space<vmem>>, vector<1x1x8xf32>
    %10 = vector.shape_cast %9 : vector<1x1x8xf32> to vector<1x8xf32>
    %11 = vector.broadcast %10 : vector<1x8xf32> to vector<32x8xf32>
    %12 = arith.addf %8, %11 : vector<32x8xf32>
    %cst_11 = arith.constant 0.000000e+00 : f32
    %13 = vector.broadcast %cst_11 : f32 to vector<32x8xf32>
    %14 = arith.maximumf %12, %13 : vector<32x8xf32>
    %c0_12 = arith.constant 0 : index
    %c0_13 = arith.constant 0 : index
    %c0_14 = arith.constant 0 : index
    %15 = vector.load %arg6[%c0_12, %c0_13, %c0_14] : memref<1x32x8xf32, #tpu.memory_space<vmem>>, vector<1x32x8xf32>
    %16 = vector.shape_cast %15 : vector<1x32x8xf32> to vector<32x8xf32>
    %17 = vector.shape_cast %14 : vector<32x8xf32> to vector<1x32x8xf32>
    tpu.vector_store %arg6[%c0_12, %c0_13, %c0_14], %17 {strides = array<i32>} : memref<1x32x8xf32, #tpu.memory_space<vmem>>, vector<1x32x8xf32>,
    return
  }
  func.func @transform_0(%arg0: i32, %arg1: i32) -> (i32, i32, i32) {
    %c0_i32 = arith.constant 0 : i32
    %c0_i32_0 = arith.constant 0 : i32
    return %arg1, %arg0, %c0_i32 : i32, i32, i32
  }
  func.func @transform_1(%arg0: i32, %arg1: i32) -> (i32, i32, i32) {
    %c0_i32 = arith.constant 0 : i32
    %c0_i32_0 = arith.constant 0 : i32
    %c0_i32_1 = arith.constant 0 : i32
    return %arg1, %c0_i32, %c0_i32_0 : i32, i32, i32
  }
  func.func @transform_2(%arg0: i32, %arg1: i32) -> (i32, i32, i32) {
    %c0_i32 = arith.constant 0 : i32
    %c0_i32_0 = arith.constant 0 : i32
    %c0_i32_1 = arith.constant 0 : i32
    return %arg1, %c0_i32, %c0_i32_0 : i32, i32, i32
  }
  func.func @transform_3(%arg0: i32, %arg1: i32) -> (i32, i32, i32) {
    %c0_i32 = arith.constant 0 : i32
    %c0_i32_0 = arith.constant 0 : i32
    %c0_i32_1 = arith.constant 0 : i32
    return %arg1, %c0_i32, %c0_i32_0 : i32, i32, i32
  }
  func.func @transform_4(%arg0: i32, %arg1: i32) -> (i32, i32, i32) {
    %c0_i32 = arith.constant 0 : i32
    %c0_i32_0 = arith.constant 0 : i32
    return %arg1, %arg0, %c0_i32 : i32, i32, i32
  }
}

module attributes {stable_mosaic.version = 11 : i64} {
  func.func @_mm_1step_kernel(%arg0: i32, %arg1: memref<32x32xf32, #tpu.memory_space<vmem>>, %arg2: memref<32x64xf32, #tpu.memory_space<vmem>>, %arg3: memref<1x64xf32, #tpu.memory_space<vmem>>, %arg4: memref<1x64xf32, #tpu.memory_space<vmem>>, %arg5: memref<32x64xf32, #tpu.memory_space<vmem>>) attributes {dimension_semantics = [#tpu.dimension_semantics<parallel>], iteration_bounds = array<i64: 1>, scalar_prefetch = 0 : i64, scratch_operands = 0 : i64, tpu.core_type = #tpu.core_type<tc>, window_params = [{transform_indices = @transform_0, window_bounds = array<i64: 32, 32>}, {pipeline_mode = #tpu.pipeline_mode<synchronous>, transform_indices = @transform_1, window_bounds = array<i64: 32, 64>}, {pipeline_mode = #tpu.pipeline_mode<synchronous>, transform_indices = @transform_2, window_bounds = array<i64: 1, 64>}, {pipeline_mode = #tpu.pipeline_mode<synchronous>, transform_indices = @transform_3, window_bounds = array<i64: 1, 64>}, {transform_indices = @transform_4, window_bounds = array<i64: 32, 64>}]} {
    %c0 = arith.constant 0 : index
    %c0_0 = arith.constant 0 : index
    %0 = vector.load %arg1[%c0, %c0_0] : memref<32x32xf32, #tpu.memory_space<vmem>>, vector<32x32xf32>
    %c0_1 = arith.constant 0 : index
    %c0_2 = arith.constant 0 : index
    %1 = vector.load %arg2[%c0_1, %c0_2] : memref<32x64xf32, #tpu.memory_space<vmem>>, vector<32x64xf32>
    %cst = arith.constant dense<0.000000e+00> : vector<32x64xf32>
    %2 = tpu.matmul %0, %1, %cst {dimension_numbers = #tpu.dot_dimension_numbers<[1], [0], [0], [1], [0, 0, 1, 1], [], []>} : vector<32x32xf32>, vector<32x64xf32>, vector<32x64xf32> -> vector<32x64xf32>
    %c0_3 = arith.constant 0 : index
    %c0_4 = arith.constant 0 : index
    %3 = vector.load %arg3[%c0_3, %c0_4] : memref<1x64xf32, #tpu.memory_space<vmem>>, vector<1x64xf32>
    %4 = vector.broadcast %3 : vector<1x64xf32> to vector<32x64xf32>
    %5 = arith.mulf %2, %4 : vector<32x64xf32>
    %c0_5 = arith.constant 0 : index
    %c0_6 = arith.constant 0 : index
    %6 = vector.load %arg4[%c0_5, %c0_6] : memref<1x64xf32, #tpu.memory_space<vmem>>, vector<1x64xf32>
    %7 = vector.broadcast %6 : vector<1x64xf32> to vector<32x64xf32>
    %8 = arith.addf %5, %7 : vector<32x64xf32>
    %c0_7 = arith.constant 0 : index
    %c0_8 = arith.constant 0 : index
    %9 = vector.load %arg5[%c0_7, %c0_8] : memref<32x64xf32, #tpu.memory_space<vmem>>, vector<32x64xf32>
    tpu.vector_store %arg5[%c0_7, %c0_8], %8 {strides = array<i32>} : memref<32x64xf32, #tpu.memory_space<vmem>>, vector<32x64xf32>,
    return
  }
  func.func @transform_0(%arg0: i32) -> (i32, i32) {
    %c0_i32 = arith.constant 0 : i32
    %c0_i32_0 = arith.constant 0 : i32
    return %arg0, %c0_i32 : i32, i32
  }
  func.func @transform_1(%arg0: i32) -> (i32, i32) {
    %c0_i32 = arith.constant 0 : i32
    %c0_i32_0 = arith.constant 0 : i32
    %c0_i32_1 = arith.constant 0 : i32
    return %c0_i32, %c0_i32_0 : i32, i32
  }
  func.func @transform_2(%arg0: i32) -> (i32, i32) {
    %c0_i32 = arith.constant 0 : i32
    %c0_i32_0 = arith.constant 0 : i32
    %c0_i32_1 = arith.constant 0 : i32
    return %c0_i32, %c0_i32_0 : i32, i32
  }
  func.func @transform_3(%arg0: i32) -> (i32, i32) {
    %c0_i32 = arith.constant 0 : i32
    %c0_i32_0 = arith.constant 0 : i32
    %c0_i32_1 = arith.constant 0 : i32
    return %c0_i32, %c0_i32_0 : i32, i32
  }
  func.func @transform_4(%arg0: i32) -> (i32, i32) {
    %c0_i32 = arith.constant 0 : i32
    %c0_i32_0 = arith.constant 0 : i32
    return %arg0, %c0_i32 : i32, i32
  }
}

module attributes {stable_mosaic.version = 11 : i64} {
  func.func @_reduce_mm_kernel(%arg0: i32, %arg1: i32, %arg2: memref<1x32x8xf32, #tpu.memory_space<vmem>>, %arg3: memref<1x8x64xf32, #tpu.memory_space<vmem>>, %arg4: memref<1x64xf32, #tpu.memory_space<vmem>>, %arg5: memref<1x64xf32, #tpu.memory_space<vmem>>, %arg6: memref<32x64xf32, #tpu.memory_space<vmem>>, %arg7: memref<32x64xf32, #tpu.memory_space<vmem>>, %arg8: memref<32x64xf32, #tpu.memory_space<vmem>>) attributes {dimension_semantics = [#tpu.dimension_semantics<parallel>, #tpu.dimension_semantics<arbitrary>], iteration_bounds = array<i64: 1, 4>, scalar_prefetch = 0 : i64, scratch_operands = 1 : i64, tpu.core_type = #tpu.core_type<tc>, window_params = [{transform_indices = @transform_0, window_bounds = array<i64: 1, 32, 8>}, {transform_indices = @transform_1, window_bounds = array<i64: 1, 8, 64>}, {pipeline_mode = #tpu.pipeline_mode<synchronous>, transform_indices = @transform_2, window_bounds = array<i64: 1, 64>}, {pipeline_mode = #tpu.pipeline_mode<synchronous>, transform_indices = @transform_3, window_bounds = array<i64: 1, 64>}, {transform_indices = @transform_4, window_bounds = array<i64: 32, 64>}, {transform_indices = @transform_5, window_bounds = array<i64: 32, 64>}]} {
    %c0_i32 = arith.constant 0 : i32
    %0 = arith.cmpi eq, %arg1, %c0_i32 : i32
    %1 = arith.extui %0 : i1 to i32
    %c0_i32_0 = arith.constant 0 : i32
    %2 = arith.cmpi ne, %1, %c0_i32_0 : i32
    scf.if %2 {
      %cst_11 = arith.constant 0.000000e+00 : f32
      %14 = vector.broadcast %cst_11 : f32 to vector<32x64xf32>
      %c0_12 = arith.constant 0 : index
      %c0_13 = arith.constant 0 : index
      %15 = vector.load %arg8[%c0_12, %c0_13] : memref<32x64xf32, #tpu.memory_space<vmem>>, vector<32x64xf32>
      tpu.vector_store %arg8[%c0_12, %c0_13], %14 {strides = array<i32>} : memref<32x64xf32, #tpu.memory_space<vmem>>, vector<32x64xf32>,
    } else {
    }
    %c0 = arith.constant 0 : index
    %c0_1 = arith.constant 0 : index
    %3 = vector.load %arg8[%c0, %c0_1] : memref<32x64xf32, #tpu.memory_space<vmem>>, vector<32x64xf32>
    %c0_2 = arith.constant 0 : index
    %c0_3 = arith.constant 0 : index
    %c0_4 = arith.constant 0 : index
    %4 = vector.load %arg2[%c0_2, %c0_3, %c0_4] : memref<1x32x8xf32, #tpu.memory_space<vmem>>, vector<1x32x8xf32>
    %5 = vector.shape_cast %4 : vector<1x32x8xf32> to vector<32x8xf32>
    %c0_5 = arith.constant 0 : index
    %c0_6 = arith.constant 0 : index
    %c0_7 = arith.constant 0 : index
    %6 = vector.load %arg3[%c0_5, %c0_6, %c0_7] : memref<1x8x64xf32, #tpu.memory_space<vmem>>, vector<1x8x64xf32>
    %7 = vector.shape_cast %6 : vector<1x8x64xf32> to vector<8x64xf32>
    %cst = arith.constant dense<0.000000e+00> : vector<32x64xf32>
    %8 = tpu.matmul %5, %7, %cst {dimension_numbers = #tpu.dot_dimension_numbers<[1], [0], [0], [1], [0, 0, 1, 1], [], []>} : vector<32x8xf32>, vector<8x64xf32>, vector<32x64xf32> -> vector<32x64xf32>
    %9 = arith.addf %3, %8 : vector<32x64xf32>
    %c0_8 = arith.constant 0 : index
    %c0_9 = arith.constant 0 : index
    %10 = vector.load %arg8[%c0_8, %c0_9] : memref<32x64xf32, #tpu.memory_space<vmem>>, vector<32x64xf32>
    tpu.vector_store %arg8[%c0_8, %c0_9], %9 {strides = array<i32>} : memref<32x64xf32, #tpu.memory_space<vmem>>, vector<32x64xf32>,
    %c3_i32 = arith.constant 3 : i32
    %11 = arith.cmpi eq, %arg1, %c3_i32 : i32
    %12 = arith.extui %11 : i1 to i32
    %c0_i32_10 = arith.constant 0 : i32
    %13 = arith.cmpi ne, %12, %c0_i32_10 : i32
    scf.if %13 {
      %c0_11 = arith.constant 0 : index
      %c0_12 = arith.constant 0 : index
      %14 = vector.load %arg8[%c0_11, %c0_12] : memref<32x64xf32, #tpu.memory_space<vmem>>, vector<32x64xf32>
      %c0_13 = arith.constant 0 : index
      %c0_14 = arith.constant 0 : index
      %15 = vector.load %arg4[%c0_13, %c0_14] : memref<1x64xf32, #tpu.memory_space<vmem>>, vector<1x64xf32>
      %16 = vector.broadcast %15 : vector<1x64xf32> to vector<32x64xf32>
      %17 = arith.mulf %14, %16 : vector<32x64xf32>
      %c0_15 = arith.constant 0 : index
      %c0_16 = arith.constant 0 : index
      %18 = vector.load %arg5[%c0_15, %c0_16] : memref<1x64xf32, #tpu.memory_space<vmem>>, vector<1x64xf32>
      %19 = vector.broadcast %18 : vector<1x64xf32> to vector<32x64xf32>
      %20 = arith.addf %17, %19 : vector<32x64xf32>
      %c0_17 = arith.constant 0 : index
      %c0_18 = arith.constant 0 : index
      %21 = vector.load %arg6[%c0_17, %c0_18] : memref<32x64xf32, #tpu.memory_space<vmem>>, vector<32x64xf32>
      %22 = arith.addf %20, %21 : vector<32x64xf32>
      %cst_19 = arith.constant 0.000000e+00 : f32
      %23 = vector.broadcast %cst_19 : f32 to vector<32x64xf32>
      %24 = arith.maximumf %22, %23 : vector<32x64xf32>
      %c0_20 = arith.constant 0 : index
      %c0_21 = arith.constant 0 : index
      %25 = vector.load %arg7[%c0_20, %c0_21] : memref<32x64xf32, #tpu.memory_space<vmem>>, vector<32x64xf32>
      tpu.vector_store %arg7[%c0_20, %c0_21], %24 {strides = array<i32>} : memref<32x64xf32, #tpu.memory_space<vmem>>, vector<32x64xf32>,
    } else {
    }
    return
  }
  func.func @transform_0(%arg0: i32, %arg1: i32) -> (i32, i32, i32) {
    %c0_i32 = arith.constant 0 : i32
    %c0_i32_0 = arith.constant 0 : i32
    return %arg1, %arg0, %c0_i32 : i32, i32, i32
  }
  func.func @transform_1(%arg0: i32, %arg1: i32) -> (i32, i32, i32) {
    %c0_i32 = arith.constant 0 : i32
    %c0_i32_0 = arith.constant 0 : i32
    %c0_i32_1 = arith.constant 0 : i32
    return %arg1, %c0_i32, %c0_i32_0 : i32, i32, i32
  }
  func.func @transform_2(%arg0: i32, %arg1: i32) -> (i32, i32) {
    %c0_i32 = arith.constant 0 : i32
    %c0_i32_0 = arith.constant 0 : i32
    %c0_i32_1 = arith.constant 0 : i32
    return %c0_i32, %c0_i32_0 : i32, i32
  }
  func.func @transform_3(%arg0: i32, %arg1: i32) -> (i32, i32) {
    %c0_i32 = arith.constant 0 : i32
    %c0_i32_0 = arith.constant 0 : i32
    %c0_i32_1 = arith.constant 0 : i32
    return %c0_i32, %c0_i32_0 : i32, i32
  }
  func.func @transform_4(%arg0: i32, %arg1: i32) -> (i32, i32) {
    %c0_i32 = arith.constant 0 : i32
    %c0_i32_0 = arith.constant 0 : i32
    return %arg0, %c0_i32 : i32, i32
  }
  func.func @transform_5(%arg0: i32, %arg1: i32) -> (i32, i32) {
    %c0_i32 = arith.constant 0 : i32
    %c0_i32_0 = arith.constant 0 : i32
    return %arg0, %c0_i32 : i32, i32
  }
}

module attributes {stable_mosaic.version = 11 : i64} {
  func.func @_mm_1step_kernel(%arg0: i32, %arg1: memref<32x64xf32, #tpu.memory_space<vmem>>, %arg2: memref<64x64xf32, #tpu.memory_space<vmem>>, %arg3: memref<32x64xf32, #tpu.memory_space<vmem>>) attributes {dimension_semantics = [#tpu.dimension_semantics<parallel>], iteration_bounds = array<i64: 1>, scalar_prefetch = 0 : i64, scratch_operands = 0 : i64, tpu.core_type = #tpu.core_type<tc>, window_params = [{transform_indices = @transform_0, window_bounds = array<i64: 32, 64>}, {pipeline_mode = #tpu.pipeline_mode<synchronous>, transform_indices = @transform_1, window_bounds = array<i64: 64, 64>}, {transform_indices = @transform_2, window_bounds = array<i64: 32, 64>}]} {
    %c0 = arith.constant 0 : index
    %c0_0 = arith.constant 0 : index
    %0 = vector.load %arg1[%c0, %c0_0] : memref<32x64xf32, #tpu.memory_space<vmem>>, vector<32x64xf32>
    %c0_1 = arith.constant 0 : index
    %c0_2 = arith.constant 0 : index
    %1 = vector.load %arg2[%c0_1, %c0_2] : memref<64x64xf32, #tpu.memory_space<vmem>>, vector<64x64xf32>
    %cst = arith.constant dense<0.000000e+00> : vector<32x64xf32>
    %2 = tpu.matmul %0, %1, %cst {dimension_numbers = #tpu.dot_dimension_numbers<[1], [0], [0], [1], [0, 0, 1, 1], [], []>} : vector<32x64xf32>, vector<64x64xf32>, vector<32x64xf32> -> vector<32x64xf32>
    %c0_3 = arith.constant 0 : index
    %c0_4 = arith.constant 0 : index
    %3 = vector.load %arg3[%c0_3, %c0_4] : memref<32x64xf32, #tpu.memory_space<vmem>>, vector<32x64xf32>
    tpu.vector_store %arg3[%c0_3, %c0_4], %2 {strides = array<i32>} : memref<32x64xf32, #tpu.memory_space<vmem>>, vector<32x64xf32>,
    return
  }
  func.func @transform_0(%arg0: i32) -> (i32, i32) {
    %c0_i32 = arith.constant 0 : i32
    %c0_i32_0 = arith.constant 0 : i32
    return %arg0, %c0_i32 : i32, i32
  }
  func.func @transform_1(%arg0: i32) -> (i32, i32) {
    %c0_i32 = arith.constant 0 : i32
    %c0_i32_0 = arith.constant 0 : i32
    %c0_i32_1 = arith.constant 0 : i32
    return %c0_i32, %c0_i32_0 : i32, i32
  }
  func.func @transform_2(%arg0: i32) -> (i32, i32) {
    %c0_i32 = arith.constant 0 : i32
    %c0_i32_0 = arith.constant 0 : i32
    return %arg0, %c0_i32 : i32, i32
  }
}

module attributes {stable_mosaic.version = 11 : i64} {
  func.func @_ibn_kernel(%arg0: i32, %arg1: memref<1x16x64xf32, #tpu.memory_space<vmem>>, %arg2: memref<1x64xf32, #tpu.memory_space<vmem>>, %arg3: memref<1x64xf32, #tpu.memory_space<vmem>>, %arg4: memref<1x64xf32, #tpu.memory_space<vmem>>, %arg5: memref<1x64xf32, #tpu.memory_space<vmem>>, %arg6: memref<1x64xf32, #tpu.memory_space<vmem>>, %arg7: memref<1x16x64xf32, #tpu.memory_space<vmem>>) attributes {dimension_semantics = [#tpu.dimension_semantics<parallel>], iteration_bounds = array<i64: 2>, scalar_prefetch = 0 : i64, scratch_operands = 0 : i64, tpu.core_type = #tpu.core_type<tc>, window_params = [{transform_indices = @transform_0, window_bounds = array<i64: 1, 16, 64>}, {pipeline_mode = #tpu.pipeline_mode<synchronous>, transform_indices = @transform_1, window_bounds = array<i64: 1, 64>}, {pipeline_mode = #tpu.pipeline_mode<synchronous>, transform_indices = @transform_2, window_bounds = array<i64: 1, 64>}, {pipeline_mode = #tpu.pipeline_mode<synchronous>, transform_indices = @transform_3, window_bounds = array<i64: 1, 64>}, {pipeline_mode = #tpu.pipeline_mode<synchronous>, transform_indices = @transform_4, window_bounds = array<i64: 1, 64>}, {pipeline_mode = #tpu.pipeline_mode<synchronous>, transform_indices = @transform_5, window_bounds = array<i64: 1, 64>}, {transform_indices = @transform_6, window_bounds = array<i64: 1, 16, 64>}]} {
    %c0 = arith.constant 0 : index
    %c0_0 = arith.constant 0 : index
    %c0_1 = arith.constant 0 : index
    %0 = vector.load %arg1[%c0, %c0_0, %c0_1] : memref<1x16x64xf32, #tpu.memory_space<vmem>>, vector<1x16x64xf32>
    %1 = vector.shape_cast %0 : vector<1x16x64xf32> to vector<16x64xf32>
    %cst = arith.constant dense<0.000000e+00> : vector<64xf32>
    %2 = vector.multi_reduction <add>, %1, %cst [0] : vector<16x64xf32> to vector<64xf32>
    %3 = vector.shape_cast %2 : vector<64xf32> to vector<1x64xf32>
    %cst_2 = arith.constant 1.600000e+01 : f32
    %4 = vector.broadcast %cst_2 : f32 to vector<1x64xf32>
    %5 = arith.divf %3, %4 : vector<1x64xf32>
    %6 = vector.broadcast %5 : vector<1x64xf32> to vector<16x64xf32>
    %7 = arith.subf %1, %6 : vector<16x64xf32>
    %8 = arith.mulf %7, %7 : vector<16x64xf32>
    %cst_3 = arith.constant dense<0.000000e+00> : vector<64xf32>
    %9 = vector.multi_reduction <add>, %8, %cst_3 [0] : vector<16x64xf32> to vector<64xf32>
    %10 = vector.shape_cast %9 : vector<64xf32> to vector<1x64xf32>
    %cst_4 = arith.constant 1.600000e+01 : f32
    %11 = vector.broadcast %cst_4 : f32 to vector<1x64xf32>
    %12 = arith.divf %10, %11 : vector<1x64xf32>
    %c0_5 = arith.constant 0 : index
    %c0_6 = arith.constant 0 : index
    %13 = vector.load %arg6[%c0_5, %c0_6] : memref<1x64xf32, #tpu.memory_space<vmem>>, vector<1x64xf32>
    %cst_7 = arith.constant 5.000000e-01 : f32
    %14 = vector.broadcast %cst_7 : f32 to vector<1x64xf32>
    %15 = arith.cmpf ogt, %13, %14 : vector<1x64xf32>
    %c0_8 = arith.constant 0 : index
    %c0_9 = arith.constant 0 : index
    %16 = vector.load %arg4[%c0_8, %c0_9] : memref<1x64xf32, #tpu.memory_space<vmem>>, vector<1x64xf32>
    %17 = arith.select %15, %5, %16 : vector<1x64xi1>, vector<1x64xf32>
    %c0_10 = arith.constant 0 : index
    %c0_11 = arith.constant 0 : index
    %18 = vector.load %arg5[%c0_10, %c0_11] : memref<1x64xf32, #tpu.memory_space<vmem>>, vector<1x64xf32>
    %19 = arith.select %15, %12, %18 : vector<1x64xi1>, vector<1x64xf32>
    %20 = vector.broadcast %17 : vector<1x64xf32> to vector<16x64xf32>
    %21 = arith.subf %1, %20 : vector<16x64xf32>
    %cst_12 = arith.constant 9.99999974E-6 : f32
    %22 = vector.broadcast %cst_12 : f32 to vector<1x64xf32>
    %23 = arith.addf %19, %22 : vector<1x64xf32>
    %24 = math.rsqrt %23 : vector<1x64xf32>
    %25 = vector.broadcast %24 : vector<1x64xf32> to vector<16x64xf32>
    %26 = arith.mulf %21, %25 : vector<16x64xf32>
    %c0_13 = arith.constant 0 : index
    %c0_14 = arith.constant 0 : index
    %27 = vector.load %arg2[%c0_13, %c0_14] : memref<1x64xf32, #tpu.memory_space<vmem>>, vector<1x64xf32>
    %28 = vector.broadcast %27 : vector<1x64xf32> to vector<16x64xf32>
    %29 = arith.mulf %26, %28 : vector<16x64xf32>
    %c0_15 = arith.constant 0 : index
    %c0_16 = arith.constant 0 : index
    %30 = vector.load %arg3[%c0_15, %c0_16] : memref<1x64xf32, #tpu.memory_space<vmem>>, vector<1x64xf32>
    %31 = vector.broadcast %30 : vector<1x64xf32> to vector<16x64xf32>
    %32 = arith.addf %29, %31 : vector<16x64xf32>
    %cst_17 = arith.constant 0.000000e+00 : f32
    %33 = vector.broadcast %cst_17 : f32 to vector<16x64xf32>
    %34 = arith.maximumf %32, %33 : vector<16x64xf32>
    %c0_18 = arith.constant 0 : index
    %c0_19 = arith.constant 0 : index
    %c0_20 = arith.constant 0 : index
    %35 = vector.load %arg7[%c0_18, %c0_19, %c0_20] : memref<1x16x64xf32, #tpu.memory_space<vmem>>, vector<1x16x64xf32>
    %36 = vector.shape_cast %35 : vector<1x16x64xf32> to vector<16x64xf32>
    %37 = vector.shape_cast %34 : vector<16x64xf32> to vector<1x16x64xf32>
    tpu.vector_store %arg7[%c0_18, %c0_19, %c0_20], %37 {strides = array<i32>} : memref<1x16x64xf32, #tpu.memory_space<vmem>>, vector<1x16x64xf32>,
    return
  }
  func.func @transform_0(%arg0: i32) -> (i32, i32, i32) {
    %c0_i32 = arith.constant 0 : i32
    %c0_i32_0 = arith.constant 0 : i32
    %c0_i32_1 = arith.constant 0 : i32
    return %arg0, %c0_i32, %c0_i32_0 : i32, i32, i32
  }
  func.func @transform_1(%arg0: i32) -> (i32, i32) {
    %c0_i32 = arith.constant 0 : i32
    %c0_i32_0 = arith.constant 0 : i32
    %c0_i32_1 = arith.constant 0 : i32
    return %c0_i32, %c0_i32_0 : i32, i32
  }
  func.func @transform_2(%arg0: i32) -> (i32, i32) {
    %c0_i32 = arith.constant 0 : i32
    %c0_i32_0 = arith.constant 0 : i32
    %c0_i32_1 = arith.constant 0 : i32
    return %c0_i32, %c0_i32_0 : i32, i32
  }
  func.func @transform_3(%arg0: i32) -> (i32, i32) {
    %c0_i32 = arith.constant 0 : i32
    %c0_i32_0 = arith.constant 0 : i32
    %c0_i32_1 = arith.constant 0 : i32
    return %c0_i32, %c0_i32_0 : i32, i32
  }
  func.func @transform_4(%arg0: i32) -> (i32, i32) {
    %c0_i32 = arith.constant 0 : i32
    %c0_i32_0 = arith.constant 0 : i32
    %c0_i32_1 = arith.constant 0 : i32
    return %c0_i32, %c0_i32_0 : i32, i32
  }
  func.func @transform_5(%arg0: i32) -> (i32, i32) {
    %c0_i32 = arith.constant 0 : i32
    %c0_i32_0 = arith.constant 0 : i32
    %c0_i32_1 = arith.constant 0 : i32
    return %c0_i32, %c0_i32_0 : i32, i32
  }
  func.func @transform_6(%arg0: i32) -> (i32, i32, i32) {
    %c0_i32 = arith.constant 0 : i32
    %c0_i32_0 = arith.constant 0 : i32
    %c0_i32_1 = arith.constant 0 : i32
    return %arg0, %c0_i32, %c0_i32_0 : i32, i32, i32
  }
}

module attributes {stable_mosaic.version = 11 : i64} {
  func.func @_grouped_mm_kernel(%arg0: i32, %arg1: i32, %arg2: memref<1x8x144xf32, #tpu.memory_space<vmem>>, %arg3: memref<1x144x16xf32, #tpu.memory_space<vmem>>, %arg4: memref<1x1x16xf32, #tpu.memory_space<vmem>>, %arg5: memref<1x1x16xf32, #tpu.memory_space<vmem>>, %arg6: memref<1x8x16xf32, #tpu.memory_space<vmem>>) attributes {dimension_semantics = [#tpu.dimension_semantics<parallel>, #tpu.dimension_semantics<parallel>], iteration_bounds = array<i64: 1, 4>, scalar_prefetch = 0 : i64, scratch_operands = 0 : i64, tpu.core_type = #tpu.core_type<tc>, window_params = [{transform_indices = @transform_0, window_bounds = array<i64: 1, 8, 144>}, {transform_indices = @transform_1, window_bounds = array<i64: 1, 144, 16>}, {transform_indices = @transform_2, window_bounds = array<i64: 1, 1, 16>}, {transform_indices = @transform_3, window_bounds = array<i64: 1, 1, 16>}, {transform_indices = @transform_4, window_bounds = array<i64: 1, 8, 16>}]} {
    %c0 = arith.constant 0 : index
    %c0_0 = arith.constant 0 : index
    %c0_1 = arith.constant 0 : index
    %0 = vector.load %arg2[%c0, %c0_0, %c0_1] : memref<1x8x144xf32, #tpu.memory_space<vmem>>, vector<1x8x144xf32>
    %1 = vector.shape_cast %0 : vector<1x8x144xf32> to vector<8x144xf32>
    %c0_2 = arith.constant 0 : index
    %c0_3 = arith.constant 0 : index
    %c0_4 = arith.constant 0 : index
    %2 = vector.load %arg3[%c0_2, %c0_3, %c0_4] : memref<1x144x16xf32, #tpu.memory_space<vmem>>, vector<1x144x16xf32>
    %3 = vector.shape_cast %2 : vector<1x144x16xf32> to vector<144x16xf32>
    %cst = arith.constant dense<0.000000e+00> : vector<8x16xf32>
    %4 = tpu.matmul %1, %3, %cst {dimension_numbers = #tpu.dot_dimension_numbers<[1], [0], [0], [1], [0, 0, 1, 1], [], []>} : vector<8x144xf32>, vector<144x16xf32>, vector<8x16xf32> -> vector<8x16xf32>
    %c0_5 = arith.constant 0 : index
    %c0_6 = arith.constant 0 : index
    %c0_7 = arith.constant 0 : index
    %5 = vector.load %arg4[%c0_5, %c0_6, %c0_7] : memref<1x1x16xf32, #tpu.memory_space<vmem>>, vector<1x1x16xf32>
    %6 = vector.shape_cast %5 : vector<1x1x16xf32> to vector<1x16xf32>
    %7 = vector.broadcast %6 : vector<1x16xf32> to vector<8x16xf32>
    %8 = arith.mulf %4, %7 : vector<8x16xf32>
    %c0_8 = arith.constant 0 : index
    %c0_9 = arith.constant 0 : index
    %c0_10 = arith.constant 0 : index
    %9 = vector.load %arg5[%c0_8, %c0_9, %c0_10] : memref<1x1x16xf32, #tpu.memory_space<vmem>>, vector<1x1x16xf32>
    %10 = vector.shape_cast %9 : vector<1x1x16xf32> to vector<1x16xf32>
    %11 = vector.broadcast %10 : vector<1x16xf32> to vector<8x16xf32>
    %12 = arith.addf %8, %11 : vector<8x16xf32>
    %cst_11 = arith.constant 0.000000e+00 : f32
    %13 = vector.broadcast %cst_11 : f32 to vector<8x16xf32>
    %14 = arith.maximumf %12, %13 : vector<8x16xf32>
    %c0_12 = arith.constant 0 : index
    %c0_13 = arith.constant 0 : index
    %c0_14 = arith.constant 0 : index
    %15 = vector.load %arg6[%c0_12, %c0_13, %c0_14] : memref<1x8x16xf32, #tpu.memory_space<vmem>>, vector<1x8x16xf32>
    %16 = vector.shape_cast %15 : vector<1x8x16xf32> to vector<8x16xf32>
    %17 = vector.shape_cast %14 : vector<8x16xf32> to vector<1x8x16xf32>
    tpu.vector_store %arg6[%c0_12, %c0_13, %c0_14], %17 {strides = array<i32>} : memref<1x8x16xf32, #tpu.memory_space<vmem>>, vector<1x8x16xf32>,
    return
  }
  func.func @transform_0(%arg0: i32, %arg1: i32) -> (i32, i32, i32) {
    %c0_i32 = arith.constant 0 : i32
    %c0_i32_0 = arith.constant 0 : i32
    return %arg1, %arg0, %c0_i32 : i32, i32, i32
  }
  func.func @transform_1(%arg0: i32, %arg1: i32) -> (i32, i32, i32) {
    %c0_i32 = arith.constant 0 : i32
    %c0_i32_0 = arith.constant 0 : i32
    %c0_i32_1 = arith.constant 0 : i32
    return %arg1, %c0_i32, %c0_i32_0 : i32, i32, i32
  }
  func.func @transform_2(%arg0: i32, %arg1: i32) -> (i32, i32, i32) {
    %c0_i32 = arith.constant 0 : i32
    %c0_i32_0 = arith.constant 0 : i32
    %c0_i32_1 = arith.constant 0 : i32
    return %arg1, %c0_i32, %c0_i32_0 : i32, i32, i32
  }
  func.func @transform_3(%arg0: i32, %arg1: i32) -> (i32, i32, i32) {
    %c0_i32 = arith.constant 0 : i32
    %c0_i32_0 = arith.constant 0 : i32
    %c0_i32_1 = arith.constant 0 : i32
    return %arg1, %c0_i32, %c0_i32_0 : i32, i32, i32
  }
  func.func @transform_4(%arg0: i32, %arg1: i32) -> (i32, i32, i32) {
    %c0_i32 = arith.constant 0 : i32
    %c0_i32_0 = arith.constant 0 : i32
    return %arg1, %arg0, %c0_i32 : i32, i32, i32
  }
}

module attributes {stable_mosaic.version = 11 : i64} {
  func.func @_mm_1step_kernel(%arg0: i32, %arg1: memref<8x64xf32, #tpu.memory_space<vmem>>, %arg2: memref<64x128xf32, #tpu.memory_space<vmem>>, %arg3: memref<1x128xf32, #tpu.memory_space<vmem>>, %arg4: memref<1x128xf32, #tpu.memory_space<vmem>>, %arg5: memref<8x128xf32, #tpu.memory_space<vmem>>) attributes {dimension_semantics = [#tpu.dimension_semantics<parallel>], iteration_bounds = array<i64: 1>, scalar_prefetch = 0 : i64, scratch_operands = 0 : i64, tpu.core_type = #tpu.core_type<tc>, window_params = [{transform_indices = @transform_0, window_bounds = array<i64: 8, 64>}, {pipeline_mode = #tpu.pipeline_mode<synchronous>, transform_indices = @transform_1, window_bounds = array<i64: 64, 128>}, {pipeline_mode = #tpu.pipeline_mode<synchronous>, transform_indices = @transform_2, window_bounds = array<i64: 1, 128>}, {pipeline_mode = #tpu.pipeline_mode<synchronous>, transform_indices = @transform_3, window_bounds = array<i64: 1, 128>}, {transform_indices = @transform_4, window_bounds = array<i64: 8, 128>}]} {
    %c0 = arith.constant 0 : index
    %c0_0 = arith.constant 0 : index
    %0 = vector.load %arg1[%c0, %c0_0] : memref<8x64xf32, #tpu.memory_space<vmem>>, vector<8x64xf32>
    %c0_1 = arith.constant 0 : index
    %c0_2 = arith.constant 0 : index
    %1 = vector.load %arg2[%c0_1, %c0_2] : memref<64x128xf32, #tpu.memory_space<vmem>>, vector<64x128xf32>
    %cst = arith.constant dense<0.000000e+00> : vector<8x128xf32>
    %2 = tpu.matmul %0, %1, %cst {dimension_numbers = #tpu.dot_dimension_numbers<[1], [0], [0], [1], [0, 0, 1, 1], [], []>} : vector<8x64xf32>, vector<64x128xf32>, vector<8x128xf32> -> vector<8x128xf32>
    %c0_3 = arith.constant 0 : index
    %c0_4 = arith.constant 0 : index
    %3 = vector.load %arg3[%c0_3, %c0_4] : memref<1x128xf32, #tpu.memory_space<vmem>>, vector<1x128xf32>
    %4 = vector.broadcast %3 : vector<1x128xf32> to vector<8x128xf32>
    %5 = arith.mulf %2, %4 : vector<8x128xf32>
    %c0_5 = arith.constant 0 : index
    %c0_6 = arith.constant 0 : index
    %6 = vector.load %arg4[%c0_5, %c0_6] : memref<1x128xf32, #tpu.memory_space<vmem>>, vector<1x128xf32>
    %7 = vector.broadcast %6 : vector<1x128xf32> to vector<8x128xf32>
    %8 = arith.addf %5, %7 : vector<8x128xf32>
    %c0_7 = arith.constant 0 : index
    %c0_8 = arith.constant 0 : index
    %9 = vector.load %arg5[%c0_7, %c0_8] : memref<8x128xf32, #tpu.memory_space<vmem>>, vector<8x128xf32>
    tpu.vector_store %arg5[%c0_7, %c0_8], %8 {strides = array<i32>} : memref<8x128xf32, #tpu.memory_space<vmem>>, vector<8x128xf32>,
    return
  }
  func.func @transform_0(%arg0: i32) -> (i32, i32) {
    %c0_i32 = arith.constant 0 : i32
    %c0_i32_0 = arith.constant 0 : i32
    return %arg0, %c0_i32 : i32, i32
  }
  func.func @transform_1(%arg0: i32) -> (i32, i32) {
    %c0_i32 = arith.constant 0 : i32
    %c0_i32_0 = arith.constant 0 : i32
    %c0_i32_1 = arith.constant 0 : i32
    return %c0_i32, %c0_i32_0 : i32, i32
  }
  func.func @transform_2(%arg0: i32) -> (i32, i32) {
    %c0_i32 = arith.constant 0 : i32
    %c0_i32_0 = arith.constant 0 : i32
    %c0_i32_1 = arith.constant 0 : i32
    return %c0_i32, %c0_i32_0 : i32, i32
  }
  func.func @transform_3(%arg0: i32) -> (i32, i32) {
    %c0_i32 = arith.constant 0 : i32
    %c0_i32_0 = arith.constant 0 : i32
    %c0_i32_1 = arith.constant 0 : i32
    return %c0_i32, %c0_i32_0 : i32, i32
  }
  func.func @transform_4(%arg0: i32) -> (i32, i32) {
    %c0_i32 = arith.constant 0 : i32
    %c0_i32_0 = arith.constant 0 : i32
    return %arg0, %c0_i32 : i32, i32
  }
}

module attributes {stable_mosaic.version = 11 : i64} {
  func.func @_reduce_mm_kernel(%arg0: i32, %arg1: i32, %arg2: memref<1x8x16xf32, #tpu.memory_space<vmem>>, %arg3: memref<1x16x128xf32, #tpu.memory_space<vmem>>, %arg4: memref<1x128xf32, #tpu.memory_space<vmem>>, %arg5: memref<1x128xf32, #tpu.memory_space<vmem>>, %arg6: memref<8x128xf32, #tpu.memory_space<vmem>>, %arg7: memref<8x128xf32, #tpu.memory_space<vmem>>, %arg8: memref<8x128xf32, #tpu.memory_space<vmem>>) attributes {dimension_semantics = [#tpu.dimension_semantics<parallel>, #tpu.dimension_semantics<arbitrary>], iteration_bounds = array<i64: 1, 4>, scalar_prefetch = 0 : i64, scratch_operands = 1 : i64, tpu.core_type = #tpu.core_type<tc>, window_params = [{transform_indices = @transform_0, window_bounds = array<i64: 1, 8, 16>}, {transform_indices = @transform_1, window_bounds = array<i64: 1, 16, 128>}, {pipeline_mode = #tpu.pipeline_mode<synchronous>, transform_indices = @transform_2, window_bounds = array<i64: 1, 128>}, {pipeline_mode = #tpu.pipeline_mode<synchronous>, transform_indices = @transform_3, window_bounds = array<i64: 1, 128>}, {transform_indices = @transform_4, window_bounds = array<i64: 8, 128>}, {transform_indices = @transform_5, window_bounds = array<i64: 8, 128>}]} {
    %c0_i32 = arith.constant 0 : i32
    %0 = arith.cmpi eq, %arg1, %c0_i32 : i32
    %1 = arith.extui %0 : i1 to i32
    %c0_i32_0 = arith.constant 0 : i32
    %2 = arith.cmpi ne, %1, %c0_i32_0 : i32
    scf.if %2 {
      %cst_11 = arith.constant 0.000000e+00 : f32
      %14 = vector.broadcast %cst_11 : f32 to vector<8x128xf32>
      %c0_12 = arith.constant 0 : index
      %c0_13 = arith.constant 0 : index
      %15 = vector.load %arg8[%c0_12, %c0_13] : memref<8x128xf32, #tpu.memory_space<vmem>>, vector<8x128xf32>
      tpu.vector_store %arg8[%c0_12, %c0_13], %14 {strides = array<i32>} : memref<8x128xf32, #tpu.memory_space<vmem>>, vector<8x128xf32>,
    } else {
    }
    %c0 = arith.constant 0 : index
    %c0_1 = arith.constant 0 : index
    %3 = vector.load %arg8[%c0, %c0_1] : memref<8x128xf32, #tpu.memory_space<vmem>>, vector<8x128xf32>
    %c0_2 = arith.constant 0 : index
    %c0_3 = arith.constant 0 : index
    %c0_4 = arith.constant 0 : index
    %4 = vector.load %arg2[%c0_2, %c0_3, %c0_4] : memref<1x8x16xf32, #tpu.memory_space<vmem>>, vector<1x8x16xf32>
    %5 = vector.shape_cast %4 : vector<1x8x16xf32> to vector<8x16xf32>
    %c0_5 = arith.constant 0 : index
    %c0_6 = arith.constant 0 : index
    %c0_7 = arith.constant 0 : index
    %6 = vector.load %arg3[%c0_5, %c0_6, %c0_7] : memref<1x16x128xf32, #tpu.memory_space<vmem>>, vector<1x16x128xf32>
    %7 = vector.shape_cast %6 : vector<1x16x128xf32> to vector<16x128xf32>
    %cst = arith.constant dense<0.000000e+00> : vector<8x128xf32>
    %8 = tpu.matmul %5, %7, %cst {dimension_numbers = #tpu.dot_dimension_numbers<[1], [0], [0], [1], [0, 0, 1, 1], [], []>} : vector<8x16xf32>, vector<16x128xf32>, vector<8x128xf32> -> vector<8x128xf32>
    %9 = arith.addf %3, %8 : vector<8x128xf32>
    %c0_8 = arith.constant 0 : index
    %c0_9 = arith.constant 0 : index
    %10 = vector.load %arg8[%c0_8, %c0_9] : memref<8x128xf32, #tpu.memory_space<vmem>>, vector<8x128xf32>
    tpu.vector_store %arg8[%c0_8, %c0_9], %9 {strides = array<i32>} : memref<8x128xf32, #tpu.memory_space<vmem>>, vector<8x128xf32>,
    %c3_i32 = arith.constant 3 : i32
    %11 = arith.cmpi eq, %arg1, %c3_i32 : i32
    %12 = arith.extui %11 : i1 to i32
    %c0_i32_10 = arith.constant 0 : i32
    %13 = arith.cmpi ne, %12, %c0_i32_10 : i32
    scf.if %13 {
      %c0_11 = arith.constant 0 : index
      %c0_12 = arith.constant 0 : index
      %14 = vector.load %arg8[%c0_11, %c0_12] : memref<8x128xf32, #tpu.memory_space<vmem>>, vector<8x128xf32>
      %c0_13 = arith.constant 0 : index
      %c0_14 = arith.constant 0 : index
      %15 = vector.load %arg4[%c0_13, %c0_14] : memref<1x128xf32, #tpu.memory_space<vmem>>, vector<1x128xf32>
      %16 = vector.broadcast %15 : vector<1x128xf32> to vector<8x128xf32>
      %17 = arith.mulf %14, %16 : vector<8x128xf32>
      %c0_15 = arith.constant 0 : index
      %c0_16 = arith.constant 0 : index
      %18 = vector.load %arg5[%c0_15, %c0_16] : memref<1x128xf32, #tpu.memory_space<vmem>>, vector<1x128xf32>
      %19 = vector.broadcast %18 : vector<1x128xf32> to vector<8x128xf32>
      %20 = arith.addf %17, %19 : vector<8x128xf32>
      %c0_17 = arith.constant 0 : index
      %c0_18 = arith.constant 0 : index
      %21 = vector.load %arg6[%c0_17, %c0_18] : memref<8x128xf32, #tpu.memory_space<vmem>>, vector<8x128xf32>
      %22 = arith.addf %20, %21 : vector<8x128xf32>
      %cst_19 = arith.constant 0.000000e+00 : f32
      %23 = vector.broadcast %cst_19 : f32 to vector<8x128xf32>
      %24 = arith.maximumf %22, %23 : vector<8x128xf32>
      %c0_20 = arith.constant 0 : index
      %c0_21 = arith.constant 0 : index
      %25 = vector.load %arg7[%c0_20, %c0_21] : memref<8x128xf32, #tpu.memory_space<vmem>>, vector<8x128xf32>
      tpu.vector_store %arg7[%c0_20, %c0_21], %24 {strides = array<i32>} : memref<8x128xf32, #tpu.memory_space<vmem>>, vector<8x128xf32>,
    } else {
    }
    return
  }
  func.func @transform_0(%arg0: i32, %arg1: i32) -> (i32, i32, i32) {
    %c0_i32 = arith.constant 0 : i32
    %c0_i32_0 = arith.constant 0 : i32
    return %arg1, %arg0, %c0_i32 : i32, i32, i32
  }
  func.func @transform_1(%arg0: i32, %arg1: i32) -> (i32, i32, i32) {
    %c0_i32 = arith.constant 0 : i32
    %c0_i32_0 = arith.constant 0 : i32
    %c0_i32_1 = arith.constant 0 : i32
    return %arg1, %c0_i32, %c0_i32_0 : i32, i32, i32
  }
  func.func @transform_2(%arg0: i32, %arg1: i32) -> (i32, i32) {
    %c0_i32 = arith.constant 0 : i32
    %c0_i32_0 = arith.constant 0 : i32
    %c0_i32_1 = arith.constant 0 : i32
    return %c0_i32, %c0_i32_0 : i32, i32
  }
  func.func @transform_3(%arg0: i32, %arg1: i32) -> (i32, i32) {
    %c0_i32 = arith.constant 0 : i32
    %c0_i32_0 = arith.constant 0 : i32
    %c0_i32_1 = arith.constant 0 : i32
    return %c0_i32, %c0_i32_0 : i32, i32
  }
  func.func @transform_4(%arg0: i32, %arg1: i32) -> (i32, i32) {
    %c0_i32 = arith.constant 0 : i32
    %c0_i32_0 = arith.constant 0 : i32
    return %arg0, %c0_i32 : i32, i32
  }
  func.func @transform_5(%arg0: i32, %arg1: i32) -> (i32, i32) {
    %c0_i32 = arith.constant 0 : i32
    %c0_i32_0 = arith.constant 0 : i32
    return %arg0, %c0_i32 : i32, i32
  }
}

module attributes {stable_mosaic.version = 11 : i64} {
  func.func @_mm_1step_kernel(%arg0: i32, %arg1: memref<8x128xf32, #tpu.memory_space<vmem>>, %arg2: memref<128x128xf32, #tpu.memory_space<vmem>>, %arg3: memref<1x128xf32, #tpu.memory_space<vmem>>, %arg4: memref<1x128xf32, #tpu.memory_space<vmem>>, %arg5: memref<8x128xf32, #tpu.memory_space<vmem>>) attributes {dimension_semantics = [#tpu.dimension_semantics<parallel>], iteration_bounds = array<i64: 1>, scalar_prefetch = 0 : i64, scratch_operands = 0 : i64, tpu.core_type = #tpu.core_type<tc>, window_params = [{transform_indices = @transform_0, window_bounds = array<i64: 8, 128>}, {pipeline_mode = #tpu.pipeline_mode<synchronous>, transform_indices = @transform_1, window_bounds = array<i64: 128, 128>}, {pipeline_mode = #tpu.pipeline_mode<synchronous>, transform_indices = @transform_2, window_bounds = array<i64: 1, 128>}, {pipeline_mode = #tpu.pipeline_mode<synchronous>, transform_indices = @transform_3, window_bounds = array<i64: 1, 128>}, {transform_indices = @transform_4, window_bounds = array<i64: 8, 128>}]} {
    %c0 = arith.constant 0 : index
    %c0_0 = arith.constant 0 : index
    %0 = vector.load %arg1[%c0, %c0_0] : memref<8x128xf32, #tpu.memory_space<vmem>>, vector<8x128xf32>
    %c0_1 = arith.constant 0 : index
    %c0_2 = arith.constant 0 : index
    %1 = vector.load %arg2[%c0_1, %c0_2] : memref<128x128xf32, #tpu.memory_space<vmem>>, vector<128x128xf32>
    %cst = arith.constant dense<0.000000e+00> : vector<8x128xf32>
    %2 = tpu.matmul %0, %1, %cst {dimension_numbers = #tpu.dot_dimension_numbers<[1], [0], [0], [1], [0, 0, 1, 1], [], []>} : vector<8x128xf32>, vector<128x128xf32>, vector<8x128xf32> -> vector<8x128xf32>
    %c0_3 = arith.constant 0 : index
    %c0_4 = arith.constant 0 : index
    %3 = vector.load %arg3[%c0_3, %c0_4] : memref<1x128xf32, #tpu.memory_space<vmem>>, vector<1x128xf32>
    %4 = vector.broadcast %3 : vector<1x128xf32> to vector<8x128xf32>
    %5 = arith.mulf %2, %4 : vector<8x128xf32>
    %c0_5 = arith.constant 0 : index
    %c0_6 = arith.constant 0 : index
    %6 = vector.load %arg4[%c0_5, %c0_6] : memref<1x128xf32, #tpu.memory_space<vmem>>, vector<1x128xf32>
    %7 = vector.broadcast %6 : vector<1x128xf32> to vector<8x128xf32>
    %8 = arith.addf %5, %7 : vector<8x128xf32>
    %cst_7 = arith.constant 0.000000e+00 : f32
    %9 = vector.broadcast %cst_7 : f32 to vector<8x128xf32>
    %10 = arith.maximumf %8, %9 : vector<8x128xf32>
    %c0_8 = arith.constant 0 : index
    %c0_9 = arith.constant 0 : index
    %11 = vector.load %arg5[%c0_8, %c0_9] : memref<8x128xf32, #tpu.memory_space<vmem>>, vector<8x128xf32>
    tpu.vector_store %arg5[%c0_8, %c0_9], %10 {strides = array<i32>} : memref<8x128xf32, #tpu.memory_space<vmem>>, vector<8x128xf32>,
    return
  }
  func.func @transform_0(%arg0: i32) -> (i32, i32) {
    %c0_i32 = arith.constant 0 : i32
    %c0_i32_0 = arith.constant 0 : i32
    return %arg0, %c0_i32 : i32, i32
  }
  func.func @transform_1(%arg0: i32) -> (i32, i32) {
    %c0_i32 = arith.constant 0 : i32
    %c0_i32_0 = arith.constant 0 : i32
    %c0_i32_1 = arith.constant 0 : i32
    return %c0_i32, %c0_i32_0 : i32, i32
  }
  func.func @transform_2(%arg0: i32) -> (i32, i32) {
    %c0_i32 = arith.constant 0 : i32
    %c0_i32_0 = arith.constant 0 : i32
    %c0_i32_1 = arith.constant 0 : i32
    return %c0_i32, %c0_i32_0 : i32, i32
  }
  func.func @transform_3(%arg0: i32) -> (i32, i32) {
    %c0_i32 = arith.constant 0 : i32
    %c0_i32_0 = arith.constant 0 : i32
    %c0_i32_1 = arith.constant 0 : i32
    return %c0_i32, %c0_i32_0 : i32, i32
  }
  func.func @transform_4(%arg0: i32) -> (i32, i32) {
    %c0_i32 = arith.constant 0 : i32
    %c0_i32_0 = arith.constant 0 : i32
    return %arg0, %c0_i32 : i32, i32
  }
}

module attributes {stable_mosaic.version = 11 : i64} {
  func.func @_grouped_mm_kernel(%arg0: i32, %arg1: i32, %arg2: memref<1x8x288xf32, #tpu.memory_space<vmem>>, %arg3: memref<1x288x32xf32, #tpu.memory_space<vmem>>, %arg4: memref<1x1x32xf32, #tpu.memory_space<vmem>>, %arg5: memref<1x1x32xf32, #tpu.memory_space<vmem>>, %arg6: memref<1x8x32xf32, #tpu.memory_space<vmem>>) attributes {dimension_semantics = [#tpu.dimension_semantics<parallel>, #tpu.dimension_semantics<parallel>], iteration_bounds = array<i64: 1, 4>, scalar_prefetch = 0 : i64, scratch_operands = 0 : i64, tpu.core_type = #tpu.core_type<tc>, window_params = [{transform_indices = @transform_0, window_bounds = array<i64: 1, 8, 288>}, {transform_indices = @transform_1, window_bounds = array<i64: 1, 288, 32>}, {transform_indices = @transform_2, window_bounds = array<i64: 1, 1, 32>}, {transform_indices = @transform_3, window_bounds = array<i64: 1, 1, 32>}, {transform_indices = @transform_4, window_bounds = array<i64: 1, 8, 32>}]} {
    %c0 = arith.constant 0 : index
    %c0_0 = arith.constant 0 : index
    %c0_1 = arith.constant 0 : index
    %0 = vector.load %arg2[%c0, %c0_0, %c0_1] : memref<1x8x288xf32, #tpu.memory_space<vmem>>, vector<1x8x288xf32>
    %1 = vector.shape_cast %0 : vector<1x8x288xf32> to vector<8x288xf32>
    %c0_2 = arith.constant 0 : index
    %c0_3 = arith.constant 0 : index
    %c0_4 = arith.constant 0 : index
    %2 = vector.load %arg3[%c0_2, %c0_3, %c0_4] : memref<1x288x32xf32, #tpu.memory_space<vmem>>, vector<1x288x32xf32>
    %3 = vector.shape_cast %2 : vector<1x288x32xf32> to vector<288x32xf32>
    %cst = arith.constant dense<0.000000e+00> : vector<8x32xf32>
    %4 = tpu.matmul %1, %3, %cst {dimension_numbers = #tpu.dot_dimension_numbers<[1], [0], [0], [1], [0, 0, 1, 1], [], []>} : vector<8x288xf32>, vector<288x32xf32>, vector<8x32xf32> -> vector<8x32xf32>
    %c0_5 = arith.constant 0 : index
    %c0_6 = arith.constant 0 : index
    %c0_7 = arith.constant 0 : index
    %5 = vector.load %arg4[%c0_5, %c0_6, %c0_7] : memref<1x1x32xf32, #tpu.memory_space<vmem>>, vector<1x1x32xf32>
    %6 = vector.shape_cast %5 : vector<1x1x32xf32> to vector<1x32xf32>
    %7 = vector.broadcast %6 : vector<1x32xf32> to vector<8x32xf32>
    %8 = arith.mulf %4, %7 : vector<8x32xf32>
    %c0_8 = arith.constant 0 : index
    %c0_9 = arith.constant 0 : index
    %c0_10 = arith.constant 0 : index
    %9 = vector.load %arg5[%c0_8, %c0_9, %c0_10] : memref<1x1x32xf32, #tpu.memory_space<vmem>>, vector<1x1x32xf32>
    %10 = vector.shape_cast %9 : vector<1x1x32xf32> to vector<1x32xf32>
    %11 = vector.broadcast %10 : vector<1x32xf32> to vector<8x32xf32>
    %12 = arith.addf %8, %11 : vector<8x32xf32>
    %cst_11 = arith.constant 0.000000e+00 : f32
    %13 = vector.broadcast %cst_11 : f32 to vector<8x32xf32>
    %14 = arith.maximumf %12, %13 : vector<8x32xf32>
    %c0_12 = arith.constant 0 : index
    %c0_13 = arith.constant 0 : index
    %c0_14 = arith.constant 0 : index
    %15 = vector.load %arg6[%c0_12, %c0_13, %c0_14] : memref<1x8x32xf32, #tpu.memory_space<vmem>>, vector<1x8x32xf32>
    %16 = vector.shape_cast %15 : vector<1x8x32xf32> to vector<8x32xf32>
    %17 = vector.shape_cast %14 : vector<8x32xf32> to vector<1x8x32xf32>
    tpu.vector_store %arg6[%c0_12, %c0_13, %c0_14], %17 {strides = array<i32>} : memref<1x8x32xf32, #tpu.memory_space<vmem>>, vector<1x8x32xf32>,
    return
  }
  func.func @transform_0(%arg0: i32, %arg1: i32) -> (i32, i32, i32) {
    %c0_i32 = arith.constant 0 : i32
    %c0_i32_0 = arith.constant 0 : i32
    return %arg1, %arg0, %c0_i32 : i32, i32, i32
  }
  func.func @transform_1(%arg0: i32, %arg1: i32) -> (i32, i32, i32) {
    %c0_i32 = arith.constant 0 : i32
    %c0_i32_0 = arith.constant 0 : i32
    %c0_i32_1 = arith.constant 0 : i32
    return %arg1, %c0_i32, %c0_i32_0 : i32, i32, i32
  }
  func.func @transform_2(%arg0: i32, %arg1: i32) -> (i32, i32, i32) {
    %c0_i32 = arith.constant 0 : i32
    %c0_i32_0 = arith.constant 0 : i32
    %c0_i32_1 = arith.constant 0 : i32
    return %arg1, %c0_i32, %c0_i32_0 : i32, i32, i32
  }
  func.func @transform_3(%arg0: i32, %arg1: i32) -> (i32, i32, i32) {
    %c0_i32 = arith.constant 0 : i32
    %c0_i32_0 = arith.constant 0 : i32
    %c0_i32_1 = arith.constant 0 : i32
    return %arg1, %c0_i32, %c0_i32_0 : i32, i32, i32
  }
  func.func @transform_4(%arg0: i32, %arg1: i32) -> (i32, i32, i32) {
    %c0_i32 = arith.constant 0 : i32
    %c0_i32_0 = arith.constant 0 : i32
    return %arg1, %arg0, %c0_i32 : i32, i32, i32
  }
}

module attributes {stable_mosaic.version = 11 : i64} {
  func.func @_mm_1step_kernel(%arg0: i32, %arg1: memref<8x128xf32, #tpu.memory_space<vmem>>, %arg2: memref<128x256xf32, #tpu.memory_space<vmem>>, %arg3: memref<1x256xf32, #tpu.memory_space<vmem>>, %arg4: memref<1x256xf32, #tpu.memory_space<vmem>>, %arg5: memref<8x256xf32, #tpu.memory_space<vmem>>) attributes {dimension_semantics = [#tpu.dimension_semantics<parallel>], iteration_bounds = array<i64: 1>, scalar_prefetch = 0 : i64, scratch_operands = 0 : i64, tpu.core_type = #tpu.core_type<tc>, window_params = [{transform_indices = @transform_0, window_bounds = array<i64: 8, 128>}, {pipeline_mode = #tpu.pipeline_mode<synchronous>, transform_indices = @transform_1, window_bounds = array<i64: 128, 256>}, {pipeline_mode = #tpu.pipeline_mode<synchronous>, transform_indices = @transform_2, window_bounds = array<i64: 1, 256>}, {pipeline_mode = #tpu.pipeline_mode<synchronous>, transform_indices = @transform_3, window_bounds = array<i64: 1, 256>}, {transform_indices = @transform_4, window_bounds = array<i64: 8, 256>}]} {
    %c0 = arith.constant 0 : index
    %c0_0 = arith.constant 0 : index
    %0 = vector.load %arg1[%c0, %c0_0] : memref<8x128xf32, #tpu.memory_space<vmem>>, vector<8x128xf32>
    %c0_1 = arith.constant 0 : index
    %c0_2 = arith.constant 0 : index
    %1 = vector.load %arg2[%c0_1, %c0_2] : memref<128x256xf32, #tpu.memory_space<vmem>>, vector<128x256xf32>
    %cst = arith.constant dense<0.000000e+00> : vector<8x256xf32>
    %2 = tpu.matmul %0, %1, %cst {dimension_numbers = #tpu.dot_dimension_numbers<[1], [0], [0], [1], [0, 0, 1, 1], [], []>} : vector<8x128xf32>, vector<128x256xf32>, vector<8x256xf32> -> vector<8x256xf32>
    %c0_3 = arith.constant 0 : index
    %c0_4 = arith.constant 0 : index
    %3 = vector.load %arg3[%c0_3, %c0_4] : memref<1x256xf32, #tpu.memory_space<vmem>>, vector<1x256xf32>
    %4 = vector.broadcast %3 : vector<1x256xf32> to vector<8x256xf32>
    %5 = arith.mulf %2, %4 : vector<8x256xf32>
    %c0_5 = arith.constant 0 : index
    %c0_6 = arith.constant 0 : index
    %6 = vector.load %arg4[%c0_5, %c0_6] : memref<1x256xf32, #tpu.memory_space<vmem>>, vector<1x256xf32>
    %7 = vector.broadcast %6 : vector<1x256xf32> to vector<8x256xf32>
    %8 = arith.addf %5, %7 : vector<8x256xf32>
    %c0_7 = arith.constant 0 : index
    %c0_8 = arith.constant 0 : index
    %9 = vector.load %arg5[%c0_7, %c0_8] : memref<8x256xf32, #tpu.memory_space<vmem>>, vector<8x256xf32>
    tpu.vector_store %arg5[%c0_7, %c0_8], %8 {strides = array<i32>} : memref<8x256xf32, #tpu.memory_space<vmem>>, vector<8x256xf32>,
    return
  }
  func.func @transform_0(%arg0: i32) -> (i32, i32) {
    %c0_i32 = arith.constant 0 : i32
    %c0_i32_0 = arith.constant 0 : i32
    return %arg0, %c0_i32 : i32, i32
  }
  func.func @transform_1(%arg0: i32) -> (i32, i32) {
    %c0_i32 = arith.constant 0 : i32
    %c0_i32_0 = arith.constant 0 : i32
    %c0_i32_1 = arith.constant 0 : i32
    return %c0_i32, %c0_i32_0 : i32, i32
  }
  func.func @transform_2(%arg0: i32) -> (i32, i32) {
    %c0_i32 = arith.constant 0 : i32
    %c0_i32_0 = arith.constant 0 : i32
    %c0_i32_1 = arith.constant 0 : i32
    return %c0_i32, %c0_i32_0 : i32, i32
  }
  func.func @transform_3(%arg0: i32) -> (i32, i32) {
    %c0_i32 = arith.constant 0 : i32
    %c0_i32_0 = arith.constant 0 : i32
    %c0_i32_1 = arith.constant 0 : i32
    return %c0_i32, %c0_i32_0 : i32, i32
  }
  func.func @transform_4(%arg0: i32) -> (i32, i32) {
    %c0_i32 = arith.constant 0 : i32
    %c0_i32_0 = arith.constant 0 : i32
    return %arg0, %c0_i32 : i32, i32
  }
}

module attributes {stable_mosaic.version = 11 : i64} {
  func.func @_reduce_mm_kernel(%arg0: i32, %arg1: i32, %arg2: memref<1x8x32xf32, #tpu.memory_space<vmem>>, %arg3: memref<1x32x256xf32, #tpu.memory_space<vmem>>, %arg4: memref<1x256xf32, #tpu.memory_space<vmem>>, %arg5: memref<1x256xf32, #tpu.memory_space<vmem>>, %arg6: memref<8x256xf32, #tpu.memory_space<vmem>>, %arg7: memref<8x256xf32, #tpu.memory_space<vmem>>, %arg8: memref<8x256xf32, #tpu.memory_space<vmem>>) attributes {dimension_semantics = [#tpu.dimension_semantics<parallel>, #tpu.dimension_semantics<arbitrary>], iteration_bounds = array<i64: 1, 4>, scalar_prefetch = 0 : i64, scratch_operands = 1 : i64, tpu.core_type = #tpu.core_type<tc>, window_params = [{transform_indices = @transform_0, window_bounds = array<i64: 1, 8, 32>}, {transform_indices = @transform_1, window_bounds = array<i64: 1, 32, 256>}, {pipeline_mode = #tpu.pipeline_mode<synchronous>, transform_indices = @transform_2, window_bounds = array<i64: 1, 256>}, {pipeline_mode = #tpu.pipeline_mode<synchronous>, transform_indices = @transform_3, window_bounds = array<i64: 1, 256>}, {transform_indices = @transform_4, window_bounds = array<i64: 8, 256>}, {transform_indices = @transform_5, window_bounds = array<i64: 8, 256>}]} {
    %c0_i32 = arith.constant 0 : i32
    %0 = arith.cmpi eq, %arg1, %c0_i32 : i32
    %1 = arith.extui %0 : i1 to i32
    %c0_i32_0 = arith.constant 0 : i32
    %2 = arith.cmpi ne, %1, %c0_i32_0 : i32
    scf.if %2 {
      %cst_11 = arith.constant 0.000000e+00 : f32
      %14 = vector.broadcast %cst_11 : f32 to vector<8x256xf32>
      %c0_12 = arith.constant 0 : index
      %c0_13 = arith.constant 0 : index
      %15 = vector.load %arg8[%c0_12, %c0_13] : memref<8x256xf32, #tpu.memory_space<vmem>>, vector<8x256xf32>
      tpu.vector_store %arg8[%c0_12, %c0_13], %14 {strides = array<i32>} : memref<8x256xf32, #tpu.memory_space<vmem>>, vector<8x256xf32>,
    } else {
    }
    %c0 = arith.constant 0 : index
    %c0_1 = arith.constant 0 : index
    %3 = vector.load %arg8[%c0, %c0_1] : memref<8x256xf32, #tpu.memory_space<vmem>>, vector<8x256xf32>
    %c0_2 = arith.constant 0 : index
    %c0_3 = arith.constant 0 : index
    %c0_4 = arith.constant 0 : index
    %4 = vector.load %arg2[%c0_2, %c0_3, %c0_4] : memref<1x8x32xf32, #tpu.memory_space<vmem>>, vector<1x8x32xf32>
    %5 = vector.shape_cast %4 : vector<1x8x32xf32> to vector<8x32xf32>
    %c0_5 = arith.constant 0 : index
    %c0_6 = arith.constant 0 : index
    %c0_7 = arith.constant 0 : index
    %6 = vector.load %arg3[%c0_5, %c0_6, %c0_7] : memref<1x32x256xf32, #tpu.memory_space<vmem>>, vector<1x32x256xf32>
    %7 = vector.shape_cast %6 : vector<1x32x256xf32> to vector<32x256xf32>
    %cst = arith.constant dense<0.000000e+00> : vector<8x256xf32>
    %8 = tpu.matmul %5, %7, %cst {dimension_numbers = #tpu.dot_dimension_numbers<[1], [0], [0], [1], [0, 0, 1, 1], [], []>} : vector<8x32xf32>, vector<32x256xf32>, vector<8x256xf32> -> vector<8x256xf32>
    %9 = arith.addf %3, %8 : vector<8x256xf32>
    %c0_8 = arith.constant 0 : index
    %c0_9 = arith.constant 0 : index
    %10 = vector.load %arg8[%c0_8, %c0_9] : memref<8x256xf32, #tpu.memory_space<vmem>>, vector<8x256xf32>
    tpu.vector_store %arg8[%c0_8, %c0_9], %9 {strides = array<i32>} : memref<8x256xf32, #tpu.memory_space<vmem>>, vector<8x256xf32>,
    %c3_i32 = arith.constant 3 : i32
    %11 = arith.cmpi eq, %arg1, %c3_i32 : i32
    %12 = arith.extui %11 : i1 to i32
    %c0_i32_10 = arith.constant 0 : i32
    %13 = arith.cmpi ne, %12, %c0_i32_10 : i32
    scf.if %13 {
      %c0_11 = arith.constant 0 : index
      %c0_12 = arith.constant 0 : index
      %14 = vector.load %arg8[%c0_11, %c0_12] : memref<8x256xf32, #tpu.memory_space<vmem>>, vector<8x256xf32>
      %c0_13 = arith.constant 0 : index
      %c0_14 = arith.constant 0 : index
      %15 = vector.load %arg4[%c0_13, %c0_14] : memref<1x256xf32, #tpu.memory_space<vmem>>, vector<1x256xf32>
      %16 = vector.broadcast %15 : vector<1x256xf32> to vector<8x256xf32>
      %17 = arith.mulf %14, %16 : vector<8x256xf32>
      %c0_15 = arith.constant 0 : index
      %c0_16 = arith.constant 0 : index
      %18 = vector.load %arg5[%c0_15, %c0_16] : memref<1x256xf32, #tpu.memory_space<vmem>>, vector<1x256xf32>
      %19 = vector.broadcast %18 : vector<1x256xf32> to vector<8x256xf32>
      %20 = arith.addf %17, %19 : vector<8x256xf32>
      %c0_17 = arith.constant 0 : index
      %c0_18 = arith.constant 0 : index
      %21 = vector.load %arg6[%c0_17, %c0_18] : memref<8x256xf32, #tpu.memory_space<vmem>>, vector<8x256xf32>
      %22 = arith.addf %20, %21 : vector<8x256xf32>
      %cst_19 = arith.constant 0.000000e+00 : f32
      %23 = vector.broadcast %cst_19 : f32 to vector<8x256xf32>
      %24 = arith.maximumf %22, %23 : vector<8x256xf32>
      %c0_20 = arith.constant 0 : index
      %c0_21 = arith.constant 0 : index
      %25 = vector.load %arg7[%c0_20, %c0_21] : memref<8x256xf32, #tpu.memory_space<vmem>>, vector<8x256xf32>
      tpu.vector_store %arg7[%c0_20, %c0_21], %24 {strides = array<i32>} : memref<8x256xf32, #tpu.memory_space<vmem>>, vector<8x256xf32>,
    } else {
    }
    return
  }
  func.func @transform_0(%arg0: i32, %arg1: i32) -> (i32, i32, i32) {
    %c0_i32 = arith.constant 0 : i32
    %c0_i32_0 = arith.constant 0 : i32
    return %arg1, %arg0, %c0_i32 : i32, i32, i32
  }
  func.func @transform_1(%arg0: i32, %arg1: i32) -> (i32, i32, i32) {
    %c0_i32 = arith.constant 0 : i32
    %c0_i32_0 = arith.constant 0 : i32
    %c0_i32_1 = arith.constant 0 : i32
    return %arg1, %c0_i32, %c0_i32_0 : i32, i32, i32
  }
  func.func @transform_2(%arg0: i32, %arg1: i32) -> (i32, i32) {
    %c0_i32 = arith.constant 0 : i32
    %c0_i32_0 = arith.constant 0 : i32
    %c0_i32_1 = arith.constant 0 : i32
    return %c0_i32, %c0_i32_0 : i32, i32
  }
  func.func @transform_3(%arg0: i32, %arg1: i32) -> (i32, i32) {
    %c0_i32 = arith.constant 0 : i32
    %c0_i32_0 = arith.constant 0 : i32
    %c0_i32_1 = arith.constant 0 : i32
    return %c0_i32, %c0_i32_0 : i32, i32
  }
  func.func @transform_4(%arg0: i32, %arg1: i32) -> (i32, i32) {
    %c0_i32 = arith.constant 0 : i32
    %c0_i32_0 = arith.constant 0 : i32
    return %arg0, %c0_i32 : i32, i32
  }
  func.func @transform_5(%arg0: i32, %arg1: i32) -> (i32, i32) {
    %c0_i32 = arith.constant 0 : i32
    %c0_i32_0 = arith.constant 0 : i32
    return %arg0, %c0_i32 : i32, i32
  }
}

module attributes {stable_mosaic.version = 11 : i64} {
  func.func @_gap_kernel(%arg0: i32, %arg1: memref<1x4x256xf32, #tpu.memory_space<vmem>>, %arg2: memref<1x1x256xf32, #tpu.memory_space<vmem>>) attributes {dimension_semantics = [#tpu.dimension_semantics<parallel>], iteration_bounds = array<i64: 2>, scalar_prefetch = 0 : i64, scratch_operands = 0 : i64, tpu.core_type = #tpu.core_type<tc>, window_params = [{transform_indices = @transform_0, window_bounds = array<i64: 1, 4, 256>}, {transform_indices = @transform_1, window_bounds = array<i64: 1, 1, 256>}]} {
    %c0 = arith.constant 0 : index
    %c0_0 = arith.constant 0 : index
    %c0_1 = arith.constant 0 : index
    %0 = vector.load %arg1[%c0, %c0_0, %c0_1] : memref<1x4x256xf32, #tpu.memory_space<vmem>>, vector<1x4x256xf32>
    %cst = arith.constant dense<0.000000e+00> : vector<1x256xf32>
    %1 = vector.multi_reduction <add>, %0, %cst [1] : vector<1x4x256xf32> to vector<1x256xf32>
    %2 = vector.shape_cast %1 : vector<1x256xf32> to vector<1x1x256xf32>
    %cst_2 = arith.constant 4.000000e+00 : f32
    %3 = vector.broadcast %cst_2 : f32 to vector<1x1x256xf32>
    %4 = arith.divf %2, %3 : vector<1x1x256xf32>
    %c0_3 = arith.constant 0 : index
    %c0_4 = arith.constant 0 : index
    %c0_5 = arith.constant 0 : index
    %5 = vector.load %arg2[%c0_3, %c0_4, %c0_5] : memref<1x1x256xf32, #tpu.memory_space<vmem>>, vector<1x1x256xf32>
    tpu.vector_store %arg2[%c0_3, %c0_4, %c0_5], %4 {strides = array<i32>} : memref<1x1x256xf32, #tpu.memory_space<vmem>>, vector<1x1x256xf32>,
    return
  }
  func.func @transform_0(%arg0: i32) -> (i32, i32, i32) {
    %c0_i32 = arith.constant 0 : i32
    %c0_i32_0 = arith.constant 0 : i32
    %c0_i32_1 = arith.constant 0 : i32
    return %arg0, %c0_i32, %c0_i32_0 : i32, i32, i32
  }
  func.func @transform_1(%arg0: i32) -> (i32, i32, i32) {
    %c0_i32 = arith.constant 0 : i32
    %c0_i32_0 = arith.constant 0 : i32
    %c0_i32_1 = arith.constant 0 : i32
    return %arg0, %c0_i32, %c0_i32_0 : i32, i32, i32
  }
}

module attributes {stable_mosaic.version = 11 : i64} {
  func.func @_featbn_l2_kernel(%arg0: i32, %arg1: memref<2x256xf32, #tpu.memory_space<vmem>>, %arg2: memref<1x256xf32, #tpu.memory_space<vmem>>, %arg3: memref<1x256xf32, #tpu.memory_space<vmem>>, %arg4: memref<2x256xf32, #tpu.memory_space<vmem>>) attributes {dimension_semantics = [#tpu.dimension_semantics<arbitrary>], iteration_bounds = array<i64: 1>, scalar_prefetch = 0 : i64, scratch_operands = 0 : i64, tpu.core_type = #tpu.core_type<tc>, window_params = [{pipeline_mode = #tpu.pipeline_mode<synchronous>, transform_indices = @transform_0, window_bounds = array<i64: 2, 256>}, {pipeline_mode = #tpu.pipeline_mode<synchronous>, transform_indices = @transform_1, window_bounds = array<i64: 1, 256>}, {pipeline_mode = #tpu.pipeline_mode<synchronous>, transform_indices = @transform_2, window_bounds = array<i64: 1, 256>}, {pipeline_mode = #tpu.pipeline_mode<synchronous>, transform_indices = @transform_3, window_bounds = array<i64: 2, 256>}]} {
    %c0 = arith.constant 0 : index
    %c0_0 = arith.constant 0 : index
    %0 = vector.load %arg1[%c0, %c0_0] : memref<2x256xf32, #tpu.memory_space<vmem>>, vector<2x256xf32>
    %c0_1 = arith.constant 0 : index
    %c0_2 = arith.constant 0 : index
    %1 = vector.load %arg2[%c0_1, %c0_2] : memref<1x256xf32, #tpu.memory_space<vmem>>, vector<1x256xf32>
    %2 = vector.broadcast %1 : vector<1x256xf32> to vector<2x256xf32>
    %3 = arith.mulf %0, %2 : vector<2x256xf32>
    %c0_3 = arith.constant 0 : index
    %c0_4 = arith.constant 0 : index
    %4 = vector.load %arg3[%c0_3, %c0_4] : memref<1x256xf32, #tpu.memory_space<vmem>>, vector<1x256xf32>
    %5 = vector.broadcast %4 : vector<1x256xf32> to vector<2x256xf32>
    %6 = arith.addf %3, %5 : vector<2x256xf32>
    %7 = arith.mulf %6, %6 : vector<2x256xf32>
    %cst = arith.constant dense<0.000000e+00> : vector<2xf32>
    %8 = vector.multi_reduction <add>, %7, %cst [1] : vector<2x256xf32> to vector<2xf32>
    %9 = vector.shape_cast %8 : vector<2xf32> to vector<2x1xf32>
    %10 = math.sqrt %9 : vector<2x1xf32>
    %cst_5 = arith.constant 9.99999996E-13 : f32
    %11 = vector.broadcast %cst_5 : f32 to vector<2x1xf32>
    %12 = arith.maximumf %10, %11 : vector<2x1xf32>
    %13 = vector.broadcast %12 : vector<2x1xf32> to vector<2x256xf32>
    %14 = arith.divf %6, %13 : vector<2x256xf32>
    %c0_6 = arith.constant 0 : index
    %c0_7 = arith.constant 0 : index
    %15 = vector.load %arg4[%c0_6, %c0_7] : memref<2x256xf32, #tpu.memory_space<vmem>>, vector<2x256xf32>
    tpu.vector_store %arg4[%c0_6, %c0_7], %14 {strides = array<i32>} : memref<2x256xf32, #tpu.memory_space<vmem>>, vector<2x256xf32>,
    return
  }
  func.func @transform_0(%arg0: i32) -> (i32, i32) {
    %c0_i32 = arith.constant 0 : i32
    %c0_i32_0 = arith.constant 0 : i32
    %c0_i32_1 = arith.constant 0 : i32
    return %c0_i32, %c0_i32_0 : i32, i32
  }
  func.func @transform_1(%arg0: i32) -> (i32, i32) {
    %c0_i32 = arith.constant 0 : i32
    %c0_i32_0 = arith.constant 0 : i32
    %c0_i32_1 = arith.constant 0 : i32
    return %c0_i32, %c0_i32_0 : i32, i32
  }
  func.func @transform_2(%arg0: i32) -> (i32, i32) {
    %c0_i32 = arith.constant 0 : i32
    %c0_i32_0 = arith.constant 0 : i32
    %c0_i32_1 = arith.constant 0 : i32
    return %c0_i32, %c0_i32_0 : i32, i32
  }
  func.func @transform_3(%arg0: i32) -> (i32, i32) {
    %c0_i32 = arith.constant 0 : i32
    %c0_i32_0 = arith.constant 0 : i32
    %c0_i32_1 = arith.constant 0 : i32
    return %c0_i32, %c0_i32_0 : i32, i32
  }
}

</mosaic_0001>

<bundles_post_ra>
// kernel: _lambda_.23
= control target key start
LH: loop header
LB: loop body
LE: loop exit
PB: predicated region body
PF: predicated region fallthrough
CT: control target
= control target key end

     0   :  { %v1137_v0 = vmov 0.0|0.0   ;;  %vm164_vm0 = vcmask 154624   ;;  %v1138_v30 = vmov 0.0   ;;  %vm357_vm1 = vcmask 1042432   ;;  %s2081_s1 = inlined_call_operand.vmem [shape: f32[147,8], index: 1, kind: input, shape index: {}]   ;;  %s2082_s0 = inlined_call_operand.vmem [shape: f32[512,147], index: 0, kind: input, shape index: {}]   ;;  %s2083_s2 = inlined_call_operand.vmem [shape: f32[1,8], index: 2, kind: input, shape index: {}]   ;;  %s2084_s3 = inlined_call_operand.vmem [shape: f32[1,8], index: 3, kind: input, shape index: {}]   ;;  %s2085_s4 = inlined_call_operand.vmem [shape: f32[512,8], index: 4, kind: output, shape index: {}]  }
   0x1   :  { %1088 = vmatprep.subr.bf16.mxu0 %v1137_v0  ;;  %1115 = vmatprep.subr.bf16.mxu1 %v1137_v0  ;;  %v145_v1 = vld [vmem:[%s2081_s1] sm:$0xff]  ;;  %v146_v2 = vld [vmem:[%s2081_s1 + $0x8] sm:$0xff]  ;;  %v147_v3 = vld [vmem:[%s2081_s1 + $0x10] sm:$0xff]  ;;  %vm952_vm2 = vcmask 64512  }
   0x2   :  { %v1089_v4 = vpack.c.bf16 %v146_v2, %v145_v1  ;;  %v148_v5 = vld [vmem:[%s2081_s1 + $0x18] sm:$0xff]  ;;  %v149_v7 = vld [vmem:[%s2081_s1 + $0x20] sm:$0xff]  ;;  %v150_v8 = vld [vmem:[%s2081_s1 + $0x28] sm:$0xff] }
   0x3   :  { %v1092_v6 = vpack.c.bf16 %v148_v5, %v147_v3  ;;  %v18_v9 = vld [vmem:[%s2082_s0 + $0x8] sm:$0xff]  ;;  %v1095_v11 = vpack.c.bf16 %v150_v8, %v149_v7  ;;  %v151_v12 = vld [vmem:[%s2081_s1 + $0x30] sm:$0xff]  ;;  %v152_v13 = vld [vmem:[%s2081_s1 + $0x38] sm:$0xff] }
   0x4   :  { %1090 = vmatpush1.bf16.msra.mxu0 %v1089_v4  ;;  %1125 = vmatpush1.bf16.msra.mxu1 %v1089_v4  ;;  %v82_v10 = vld [vmem:[%s2082_s0 + $0x208] sm:$0xff]  ;;  %v1098_v14 = vpack.c.bf16 %v152_v13, %v151_v12  ;;  %v153_v15 = vld [vmem:[%s2081_s1 + $0x40] sm:$0xff]  ;;  %v155_v18 = vld [vmem:[%s2081_s1 + $0x50] sm:$0xff] }
   0x5   :  { %1091 = vmatprep.subr.bf16.mxu0 %v1137_v0  ;;  %1116 = vmatprep.subr.bf16.mxu1 %v1137_v0  ;;  %v154_v16 = vld [vmem:[%s2081_s1 + $0x48] sm:$0xff]  ;;  %v156_v19 = vld [vmem:[%s2081_s1 + $0x58] sm:$0xff]  ;;  %v157_v21 = vld [vmem:[%s2081_s1 + $0x60] sm:$0xff] }
   0x6   :  { %1022 = vmatprep.mubr.msk.f32.mxu0 %vm164_vm0, %v18_v9  ;;  %1054 = vmatprep.mubr.msk.f32.mxu1 %vm164_vm0, %v82_v10  ;;  %v1101_v17 = vpack.c.bf16 %v154_v16, %v153_v15  ;;  %v1104_v20 = vpack.c.bf16 %v156_v19, %v155_v18  ;;  %v158_v22 = vld [vmem:[%s2081_s1 + $0x68] sm:$0xff]  ;;  %v159_v24 = vld [vmem:[%s2081_s1 + $0x70] sm:$0xff]  ;;  %v160_v25 = vld [vmem:[%s2081_s1 + $0x78] sm:$0xff] }
   0x7   :  { %v1107_v23 = vpack.c.bf16 %v158_v22, %v157_v21  ;;  %v1110_v26 = vpack.c.bf16 %v160_v25, %v159_v24  ;;  %v161_v27 = vld [vmem:[%s2081_s1 + $0x80] sm:$0xff]  ;;  %v162_v28 = vld [vmem:[%s2081_s1 + $0x88] sm:$0xff]  ;;  %v163_v31 = vld [vmem:[%s2081_s1 + $0x90] sm:$0x7] }
   0x8   :  { %1093 = vmatpush1.bf16.msra.mxu0 %v1092_v6  ;;  %1126 = vmatpush1.bf16.msra.mxu1 %v1092_v6  ;;  %v1113_v29 = vpack.c.bf16 %v162_v28, %v161_v27  ;;  %v17_v32 = vld [vmem:[%s2082_s0] sm:$0xff]  ;;  %v20_v34 = vld [vmem:[%s2082_s0 + $0x18] sm:$0xff]  ;;  %v19_v36 = vld [vmem:[%s2082_s0 + $0x10] sm:$0xff] }
   0x9   :  { %1094 = vmatprep.subr.bf16.mxu0 %v1137_v0  ;;  %1117 = vmatprep.subr.bf16.mxu1 %v1137_v0  ;;  %v81_v33 = vld [vmem:[%s2082_s0 + $0x200] sm:$0xff]  ;;  %v84_v35 = vld [vmem:[%s2082_s0 + $0x218] sm:$0xff]  ;;  %v83_v37 = vld [vmem:[%s2082_s0 + $0x210] sm:$0xff] }
   0xa   :  { %v22_v38 = vld [vmem:[%s2082_s0 + $0x28] sm:$0xff]  ;;  %v21_v40 = vld [vmem:[%s2082_s0 + $0x20] sm:$0xff]  ;;  %v24_v42 = vld [vmem:[%s2082_s0 + $0x38] sm:$0xff] }
   0xb   :  { %v86_v39 = vld [vmem:[%s2082_s0 + $0x228] sm:$0xff]  ;;  %v85_v41 = vld [vmem:[%s2082_s0 + $0x220] sm:$0xff]  ;;  %v88_v43 = vld [vmem:[%s2082_s0 + $0x238] sm:$0xff] }
   0xc   :  { %1096 = vmatpush1.bf16.msra.mxu0 %v1095_v11  ;;  %1127 = vmatpush1.bf16.msra.mxu1 %v1095_v11  ;;  %v23_v44 = vld [vmem:[%s2082_s0 + $0x30] sm:$0xff]  ;;  %v26_v46 = vld [vmem:[%s2082_s0 + $0x48] sm:$0xff]  ;;  %v25_v48 = vld [vmem:[%s2082_s0 + $0x40] sm:$0xff] }
   0xd   :  { %1097 = vmatprep.subr.bf16.mxu0 %v1137_v0  ;;  %1118 = vmatprep.subr.bf16.mxu1 %v1137_v0  ;;  %v87_v45 = vld [vmem:[%s2082_s0 + $0x230] sm:$0xff]  ;;  %v90_v47 = vld [vmem:[%s2082_s0 + $0x248] sm:$0xff]  ;;  %v89_v49 = vld [vmem:[%s2082_s0 + $0x240] sm:$0xff] }
   0xe   :  { %v28_v50 = vld [vmem:[%s2082_s0 + $0x58] sm:$0xff]  ;;  %v27_v52 = vld [vmem:[%s2082_s0 + $0x50] sm:$0xff]  ;;  %v30_v54 = vld [vmem:[%s2082_s0 + $0x68] sm:$0xff] }
   0xf   :  { %v92_v51 = vld [vmem:[%s2082_s0 + $0x258] sm:$0xff]  ;;  %v91_v53 = vld [vmem:[%s2082_s0 + $0x250] sm:$0xff]  ;;  %v94_v55 = vld [vmem:[%s2082_s0 + $0x268] sm:$0xff] }
  0x10   :  { %1099 = vmatpush1.bf16.msra.mxu0 %v1098_v14  ;;  %1128 = vmatpush1.bf16.msra.mxu1 %v1098_v14  ;;  %v29_v56 = vld [vmem:[%s2082_s0 + $0x60] sm:$0xff]  ;;  %v32_v58 = vld [vmem:[%s2082_s0 + $0x78] sm:$0xff]  ;;  %v31_v60 = vld [vmem:[%s2082_s0 + $0x70] sm:$0xff] }
  0x11   :  { %1100 = vmatprep.subr.bf16.mxu0 %v1137_v0  ;;  %1119 = vmatprep.subr.bf16.mxu1 %v1137_v0  ;;  %v93_v57 = vld [vmem:[%s2082_s0 + $0x260] sm:$0xff]  ;;  %v96_v59 = vld [vmem:[%s2082_s0 + $0x278] sm:$0xff]  ;;  %v95_v61 = vld [vmem:[%s2082_s0 + $0x270] sm:$0xff] }
  0x12   :  { %v34_v62 = vld [vmem:[%s2082_s0 + $0x88] sm:$0xff]  ;;  %v97_v1 = vld [vmem:[%s2082_s0 + $0x280] sm:$0xff]  ;;  %v36_v2 = vld [vmem:[%s2082_s0 + $0x98] sm:$0xff] }
  0x13   :  { %v98_v63 = vld [vmem:[%s2082_s0 + $0x288] sm:$0xff]  ;;  %v100_v3 = vld [vmem:[%s2082_s0 + $0x298] sm:$0xff]  ;;  %v35_v4 = vld [vmem:[%s2082_s0 + $0x90] sm:$0xff] }
  0x14   :  { %1102 = vmatpush1.bf16.msra.mxu0 %v1101_v17  ;;  %1129 = vmatpush1.bf16.msra.mxu1 %v1101_v17  ;;  %v99_v5 = vld [vmem:[%s2082_s0 + $0x290] sm:$0xff]  ;;  %v38_v6 = vld [vmem:[%s2082_s0 + $0xa8] sm:$0xff]  ;;  %v37_v8 = vld [vmem:[%s2082_s0 + $0xa0] sm:$0xff] }
  0x15   :  { %1103 = vmatprep.subr.bf16.mxu0 %v1137_v0  ;;  %1120 = vmatprep.subr.bf16.mxu1 %v1137_v0  ;;  %v102_v7 = vld [vmem:[%s2082_s0 + $0x2a8] sm:$0xff]  ;;  %v101_v9 = vld [vmem:[%s2082_s0 + $0x2a0] sm:$0xff]  ;;  %v40_v10 = vld [vmem:[%s2082_s0 + $0xb8] sm:$0xff] }
  0x16   :  { %v104_v11 = vld [vmem:[%s2082_s0 + $0x2b8] sm:$0xff]  ;;  %v39_v12 = vld [vmem:[%s2082_s0 + $0xb0] sm:$0xff]  ;;  %v42_v14 = vld [vmem:[%s2082_s0 + $0xc8] sm:$0xff] }
  0x17   :  { %v103_v13 = vld [vmem:[%s2082_s0 + $0x2b0] sm:$0xff]  ;;  %v106_v15 = vld [vmem:[%s2082_s0 + $0x2c8] sm:$0xff]  ;;  %v41_v16 = vld [vmem:[%s2082_s0 + $0xc0] sm:$0xff] }
  0x18   :  { %1105 = vmatpush1.bf16.msra.mxu0 %v1104_v20  ;;  %1130 = vmatpush1.bf16.msra.mxu1 %v1104_v20  ;;  %v105_v17 = vld [vmem:[%s2082_s0 + $0x2c0] sm:$0xff]  ;;  %v44_v18 = vld [vmem:[%s2082_s0 + $0xd8] sm:$0xff]  ;;  %v43_v20 = vld [vmem:[%s2082_s0 + $0xd0] sm:$0xff] }
  0x19   :  { %1106 = vmatprep.subr.bf16.mxu0 %v1137_v0  ;;  %1121 = vmatprep.subr.bf16.mxu1 %v1137_v0  ;;  %v108_v19 = vld [vmem:[%s2082_s0 + $0x2d8] sm:$0xff]  ;;  %v107_v21 = vld [vmem:[%s2082_s0 + $0x2d0] sm:$0xff]  ;;  %v46_v22 = vld [vmem:[%s2082_s0 + $0xe8] sm:$0xff] }
  0x1a   :  { %v45_v24 = vld [vmem:[%s2082_s0 + $0xe0] sm:$0xff]  ;;  %v112_v27 = vld [vmem:[%s2082_s0 + $0x2f8] sm:$0xff]  ;;  %v47_v28 = vld [vmem:[%s2082_s0 + $0xf0] sm:$0xff] }
  0x1b   :  { %v109_v25 = vld [vmem:[%s2082_s0 + $0x2e0] sm:$0xff] }
  0x1c   :  { %1108 = vmatpush1.bf16.msra.mxu0 %v1107_v23  ;;  %1131 = vmatpush1.bf16.msra.mxu1 %v1107_v23  ;;  %v110_v23 = vld [vmem:[%s2082_s0 + $0x2e8] sm:$0xff] }
  0x1d   :  { %1109 = vmatprep.subr.bf16.mxu0 %v1137_v0  ;;  %1122 = vmatprep.subr.bf16.mxu1 %v1137_v0 }
  0x20   :  { %1111 = vmatpush1.bf16.msra.mxu0 %v1110_v26  ;;  %1132 = vmatpush1.bf16.msra.mxu1 %v1110_v26  ;;  %v48_v26 = vld [vmem:[%s2082_s0 + $0xf8] sm:$0xff] }
  0x21   :  { %1112 = vmatprep.subr.bf16.mxu0 %v1137_v0  ;;  %1123 = vmatprep.subr.bf16.mxu1 %v1137_v0  ;;  %v33_v0 = vld [vmem:[%s2082_s0 + $0x80] sm:$0xff] }
  0x24   :  { %1114 = vmatpush1.bf16.msra.mxu0 %v1113_v29  ;;  %1133 = vmatpush1.bf16.msra.mxu1 %v1113_v29  ;;  %v111_v29 = vld [vmem:[%s2082_s0 + $0x2f0] sm:$0xff] }
  0x25   :  { %397 = vmatprep.subr.mxu0 %v1138_v30  ;;  %1124 = vmatprep.subr.mxu1 %v1138_v30  ;;  %v50_v30 = vld [vmem:[%s2082_s0 + $0x108] sm:$0xff] }
  0x28   :  { %1021 = vmatpush1.msk.msra.mxu0 %vm357_vm1, %v163_v31  ;;  %1134 = vmatpush1.msk.msra.mxu1 %vm357_vm1, %v163_v31  ;;  %v114_v31 = vld [vmem:[%s2082_s0 + $0x308] sm:$0xff] }
  0x29   :  { %426 = vmatmul.mubr.f32.vlgmr.msra.gmra.mrb[0].mxu0 %v17_v32  ;;  %586 = vmatmul.mubr.f32.vlgmr.msra.gmra.mrb[0].mxu1 %v81_v33  ;;  %v49_v32 = vld [vmem:[%s2082_s0 + $0x100] sm:$0xff] }
  0x2a   :  { %1023 = vmatprep.mubr.msk.f32.mxu0 %vm164_vm0, %v20_v34  ;;  %1055 = vmatprep.mubr.msk.f32.mxu1 %vm164_vm0, %v84_v35  ;;  %v113_v33 = vld [vmem:[%s2082_s0 + $0x300] sm:$0xff]  ;;  %v52_v34 = vld [vmem:[%s2082_s0 + $0x118] sm:$0xff] }
  0x2b   :  { %v116_v35 = vld [vmem:[%s2082_s0 + $0x318] sm:$0xff] }
  0x2d   :  { %431 = vmatmul.mubr.f32.gmra.mrb[2].mxu0 %v19_v36  ;;  %591 = vmatmul.mubr.f32.gmra.mrb[2].mxu1 %v83_v37  ;;  %v51_v36 = vld [vmem:[%s2082_s0 + $0x110] sm:$0xff] }
  0x2e   :  { %1024 = vmatprep.mubr.msk.f32.mxu0 %vm164_vm0, %v22_v38  ;;  %1056 = vmatprep.mubr.msk.f32.mxu1 %vm164_vm0, %v86_v39  ;;  %v115_v37 = vld [vmem:[%s2082_s0 + $0x310] sm:$0xff]  ;;  %v54_v38 = vld [vmem:[%s2082_s0 + $0x128] sm:$0xff] }
  0x2f   :  { %v118_v39 = vld [vmem:[%s2082_s0 + $0x328] sm:$0xff] }
  0x31   :  { %436 = vmatmul.mubr.f32.gmra.mrb[4].mxu0 %v21_v40  ;;  %596 = vmatmul.mubr.f32.gmra.mrb[4].mxu1 %v85_v41  ;;  %v53_v40 = vld [vmem:[%s2082_s0 + $0x120] sm:$0xff] }
  0x32   :  { %1025 = vmatprep.mubr.msk.f32.mxu0 %vm164_vm0, %v24_v42  ;;  %1057 = vmatprep.mubr.msk.f32.mxu1 %vm164_vm0, %v88_v43  ;;  %v117_v41 = vld [vmem:[%s2082_s0 + $0x320] sm:$0xff]  ;;  %v56_v42 = vld [vmem:[%s2082_s0 + $0x138] sm:$0xff] }
  0x33   :  { %v120_v43 = vld [vmem:[%s2082_s0 + $0x338] sm:$0xff] }
  0x35   :  { %441 = vmatmul.mubr.f32.gmra.mrb[6].mxu0 %v23_v44  ;;  %601 = vmatmul.mubr.f32.gmra.mrb[6].mxu1 %v87_v45  ;;  %v55_v44 = vld [vmem:[%s2082_s0 + $0x130] sm:$0xff] }
  0x36   :  { %1026 = vmatprep.mubr.msk.f32.mxu0 %vm164_vm0, %v26_v46  ;;  %1058 = vmatprep.mubr.msk.f32.mxu1 %vm164_vm0, %v90_v47  ;;  %v119_v45 = vld [vmem:[%s2082_s0 + $0x330] sm:$0xff]  ;;  %v58_v46 = vld [vmem:[%s2082_s0 + $0x148] sm:$0xff] }
  0x37   :  { %v122_v47 = vld [vmem:[%s2082_s0 + $0x348] sm:$0xff] }
  0x39   :  { %446 = vmatmul.mubr.f32.gmra.mrb[8].mxu0 %v25_v48  ;;  %606 = vmatmul.mubr.f32.gmra.mrb[8].mxu1 %v89_v49  ;;  %v57_v48 = vld [vmem:[%s2082_s0 + $0x140] sm:$0xff] }
  0x3a   :  { %1027 = vmatprep.mubr.msk.f32.mxu0 %vm164_vm0, %v28_v50  ;;  %1059 = vmatprep.mubr.msk.f32.mxu1 %vm164_vm0, %v92_v51  ;;  %v121_v49 = vld [vmem:[%s2082_s0 + $0x340] sm:$0xff]  ;;  %v60_v50 = vld [vmem:[%s2082_s0 + $0x158] sm:$0xff] }
  0x3b   :  { %v124_v51 = vld [vmem:[%s2082_s0 + $0x358] sm:$0xff] }
  0x3d   :  { %451 = vmatmul.mubr.f32.gmra.mrb[10].mxu0 %v27_v52  ;;  %611 = vmatmul.mubr.f32.gmra.mrb[10].mxu1 %v91_v53  ;;  %v59_v52 = vld [vmem:[%s2082_s0 + $0x150] sm:$0xff] }
  0x3e   :  { %1028 = vmatprep.mubr.msk.f32.mxu0 %vm164_vm0, %v30_v54  ;;  %1060 = vmatprep.mubr.msk.f32.mxu1 %vm164_vm0, %v94_v55  ;;  %v123_v53 = vld [vmem:[%s2082_s0 + $0x350] sm:$0xff]  ;;  %v62_v54 = vld [vmem:[%s2082_s0 + $0x168] sm:$0xff] }
  0x3f   :  { %v126_v55 = vld [vmem:[%s2082_s0 + $0x368] sm:$0xff] }
  0x41   :  { %456 = vmatmul.mubr.f32.gmra.mrb[12].mxu0 %v29_v56  ;;  %616 = vmatmul.mubr.f32.gmra.mrb[12].mxu1 %v93_v57  ;;  %v61_v56 = vld [vmem:[%s2082_s0 + $0x160] sm:$0xff] }
  0x42   :  { %1029 = vmatprep.mubr.msk.f32.mxu0 %vm164_vm0, %v32_v58  ;;  %1061 = vmatprep.mubr.msk.f32.mxu1 %vm164_vm0, %v96_v59  ;;  %v125_v57 = vld [vmem:[%s2082_s0 + $0x360] sm:$0xff]  ;;  %v64_v58 = vld [vmem:[%s2082_s0 + $0x178] sm:$0xff] }
  0x43   :  { %v128_v59 = vld [vmem:[%s2082_s0 + $0x378] sm:$0xff] }
  0x45   :  { %461 = vmatmul.mubr.f32.gmra.mrb[14].mxu0 %v31_v60  ;;  %621 = vmatmul.mubr.f32.gmra.mrb[14].mxu1 %v95_v61  ;;  %v63_v60 = vld [vmem:[%s2082_s0 + $0x170] sm:$0xff] }
  0x46   :  { %1030 = vmatprep.mubr.msk.f32.mxu0 %vm164_vm0, %v34_v62  ;;  %1062 = vmatprep.mubr.msk.f32.mxu1 %vm164_vm0, %v98_v63  ;;  %v127_v61 = vld [vmem:[%s2082_s0 + $0x370] sm:$0xff]  ;;  %v66_v62 = vld [vmem:[%s2082_s0 + $0x188] sm:$0xff] }
  0x47   :  { %v130_v63 = vld [vmem:[%s2082_s0 + $0x388] sm:$0xff] }
  0x49   :  { %466 = vmatmul.mubr.f32.gmra.mrb[16].mxu0 %v33_v0  ;;  %626 = vmatmul.mubr.f32.gmra.mrb[16].mxu1 %v97_v1  ;;  %v65_v0 = vld [vmem:[%s2082_s0 + $0x180] sm:$0xff] }
  0x4a   :  { %1031 = vmatprep.mubr.msk.f32.mxu0 %vm164_vm0, %v36_v2  ;;  %1063 = vmatprep.mubr.msk.f32.mxu1 %vm164_vm0, %v100_v3  ;;  %v129_v1 = vld [vmem:[%s2082_s0 + $0x380] sm:$0xff]  ;;  %v68_v2 = vld [vmem:[%s2082_s0 + $0x198] sm:$0xff] }
  0x4b   :  { %v132_v3 = vld [vmem:[%s2082_s0 + $0x398] sm:$0xff] }
  0x4d   :  { %471 = vmatmul.mubr.f32.gmra.mrb[18].mxu0 %v35_v4  ;;  %631 = vmatmul.mubr.f32.gmra.mrb[18].mxu1 %v99_v5  ;;  %v67_v4 = vld [vmem:[%s2082_s0 + $0x190] sm:$0xff] }
  0x4e   :  { %1032 = vmatprep.mubr.msk.f32.mxu0 %vm164_vm0, %v38_v6  ;;  %1064 = vmatprep.mubr.msk.f32.mxu1 %vm164_vm0, %v102_v7  ;;  %v131_v5 = vld [vmem:[%s2082_s0 + $0x390] sm:$0xff]  ;;  %v70_v6 = vld [vmem:[%s2082_s0 + $0x1a8] sm:$0xff] }
  0x4f   :  { %v134_v7 = vld [vmem:[%s2082_s0 + $0x3a8] sm:$0xff] }
  0x51   :  { %476 = vmatmul.mubr.f32.gmra.mrb[20].mxu0 %v37_v8  ;;  %636 = vmatmul.mubr.f32.gmra.mrb[20].mxu1 %v101_v9  ;;  %v69_v8 = vld [vmem:[%s2082_s0 + $0x1a0] sm:$0xff] }
  0x52   :  { %1033 = vmatprep.mubr.msk.f32.mxu0 %vm164_vm0, %v40_v10  ;;  %1065 = vmatprep.mubr.msk.f32.mxu1 %vm164_vm0, %v104_v11  ;;  %v133_v9 = vld [vmem:[%s2082_s0 + $0x3a0] sm:$0xff]  ;;  %v72_v10 = vld [vmem:[%s2082_s0 + $0x1b8] sm:$0xff] }
  0x53   :  { %v136_v11 = vld [vmem:[%s2082_s0 + $0x3b8] sm:$0xff] }
  0x55   :  { %481 = vmatmul.mubr.f32.gmra.mrb[22].mxu0 %v39_v12  ;;  %641 = vmatmul.mubr.f32.gmra.mrb[22].mxu1 %v103_v13  ;;  %v71_v12 = vld [vmem:[%s2082_s0 + $0x1b0] sm:$0xff] }
  0x56   :  { %1034 = vmatprep.mubr.msk.f32.mxu0 %vm164_vm0, %v42_v14  ;;  %1066 = vmatprep.mubr.msk.f32.mxu1 %vm164_vm0, %v106_v15  ;;  %v135_v13 = vld [vmem:[%s2082_s0 + $0x3b0] sm:$0xff]  ;;  %v74_v14 = vld [vmem:[%s2082_s0 + $0x1c8] sm:$0xff] }
  0x57   :  { %v138_v15 = vld [vmem:[%s2082_s0 + $0x3c8] sm:$0xff] }
  0x59   :  { %486 = vmatmul.mubr.f32.gmra.mrb[24].mxu0 %v41_v16  ;;  %646 = vmatmul.mubr.f32.gmra.mrb[24].mxu1 %v105_v17  ;;  %v73_v16 = vld [vmem:[%s2082_s0 + $0x1c0] sm:$0xff] }
  0x5a   :  { %1035 = vmatprep.mubr.msk.f32.mxu0 %vm164_vm0, %v44_v18  ;;  %1067 = vmatprep.mubr.msk.f32.mxu1 %vm164_vm0, %v108_v19  ;;  %v137_v17 = vld [vmem:[%s2082_s0 + $0x3c0] sm:$0xff]  ;;  %v76_v18 = vld [vmem:[%s2082_s0 + $0x1d8] sm:$0xff] }
  0x5b   :  { %v140_v19 = vld [vmem:[%s2082_s0 + $0x3d8] sm:$0xff] }
  0x5d   :  { %491 = vmatmul.mubr.f32.gmra.mrb[26].mxu0 %v43_v20  ;;  %651 = vmatmul.mubr.f32.gmra.mrb[26].mxu1 %v107_v21  ;;  %v75_v20 = vld [vmem:[%s2082_s0 + $0x1d0] sm:$0xff] }
  0x5e   :  { %1036 = vmatprep.mubr.msk.f32.mxu0 %vm164_vm0, %v46_v22  ;;  %1068 = vmatprep.mubr.msk.f32.mxu1 %vm164_vm0, %v110_v23  ;;  %v139_v21 = vld [vmem:[%s2082_s0 + $0x3d0] sm:$0xff]  ;;  %v78_v22 = vld [vmem:[%s2082_s0 + $0x1e8] sm:$0xff] }
  0x5f   :  { %v142_v23 = vld [vmem:[%s2082_s0 + $0x3e8] sm:$0xff] }
  0x61   :  { %496 = vmatmul.mubr.f32.gmra.mrb[28].mxu0 %v45_v24  ;;  %656 = vmatmul.mubr.f32.gmra.mrb[28].mxu1 %v109_v25  ;;  %v77_v24 = vld [vmem:[%s2082_s0 + $0x1e0] sm:$0xff] }
  0x62   :  { %1037 = vmatprep.mubr.msk.f32.mxu0 %vm164_vm0, %v48_v26  ;;  %1069 = vmatprep.mubr.msk.f32.mxu1 %vm164_vm0, %v112_v27  ;;  %v141_v25 = vld [vmem:[%s2082_s0 + $0x3e0] sm:$0xff]  ;;  %v80_v26 = vld [vmem:[%s2082_s0 + $0x1f8] sm:$0xff] }
  0x63   :  { %v144_v27 = vld [vmem:[%s2082_s0 + $0x3f8] sm:$0xff] }
  0x65   :  { %501 = vmatmul.mubr.f32.gmra.mrb[30].mxu0 %v47_v28  ;;  %661 = vmatmul.mubr.f32.gmra.mrb[30].mxu1 %v111_v29  ;;  %v79_v28 = vld [vmem:[%s2082_s0 + $0x1f0] sm:$0xff] }
  0x66   :  { %1038 = vmatprep.mubr.msk.f32.mxu0 %vm164_vm0, %v50_v30  ;;  %1070 = vmatprep.mubr.msk.f32.mxu1 %vm164_vm0, %v114_v31  ;;  %v143_v29 = vld [vmem:[%s2082_s0 + $0x3f0] sm:$0xff]  ;;  %v1690_v30 = vld [vmem:[%s2083_s2] ss:$0 sm:$0xff] }
  0x69   :  { %506 = vmatmul.mubr.f32.gmra.mrb[32].mxu0 %v49_v32  ;;  %666 = vmatmul.mubr.f32.gmra.mrb[32].mxu1 %v113_v33  ;;  %v1695_v32 = vld [vmem:[%s2084_s3] ss:$0 sm:$0xff] }
  0x6a   :  { %1039 = vmatprep.mubr.msk.f32.mxu0 %vm164_vm0, %v52_v34  ;;  %1071 = vmatprep.mubr.msk.f32.mxu1 %vm164_vm0, %v116_v35 }
  0x6d   :  { %511 = vmatmul.mubr.f32.gmra.mrb[34].mxu0 %v51_v36  ;;  %671 = vmatmul.mubr.f32.gmra.mrb[34].mxu1 %v115_v37 }
  0x6e   :  { %1040 = vmatprep.mubr.msk.f32.mxu0 %vm164_vm0, %v54_v38  ;;  %1072 = vmatprep.mubr.msk.f32.mxu1 %vm164_vm0, %v118_v39 }
  0x71   :  { %516 = vmatmul.mubr.f32.gmra.mrb[36].mxu0 %v53_v40  ;;  %676 = vmatmul.mubr.f32.gmra.mrb[36].mxu1 %v117_v41 }
  0x72   :  { %1041 = vmatprep.mubr.msk.f32.mxu0 %vm164_vm0, %v56_v42  ;;  %1073 = vmatprep.mubr.msk.f32.mxu1 %vm164_vm0, %v120_v43 }
  0x75   :  { %521 = vmatmul.mubr.f32.gmra.mrb[38].mxu0 %v55_v44  ;;  %681 = vmatmul.mubr.f32.gmra.mrb[38].mxu1 %v119_v45 }
  0x76   :  { %1042 = vmatprep.mubr.msk.f32.mxu0 %vm164_vm0, %v58_v46  ;;  %1074 = vmatprep.mubr.msk.f32.mxu1 %vm164_vm0, %v122_v47 }
  0x79   :  { %526 = vmatmul.mubr.f32.gmra.mrb[40].mxu0 %v57_v48  ;;  %686 = vmatmul.mubr.f32.gmra.mrb[40].mxu1 %v121_v49 }
  0x7a   :  { %1043 = vmatprep.mubr.msk.f32.mxu0 %vm164_vm0, %v60_v50  ;;  %1075 = vmatprep.mubr.msk.f32.mxu1 %vm164_vm0, %v124_v51 }
  0x7d   :  { %531 = vmatmul.mubr.f32.gmra.mrb[42].mxu0 %v59_v52  ;;  %691 = vmatmul.mubr.f32.gmra.mrb[42].mxu1 %v123_v53 }
  0x7e   :  { %1044 = vmatprep.mubr.msk.f32.mxu0 %vm164_vm0, %v62_v54  ;;  %1076 = vmatprep.mubr.msk.f32.mxu1 %vm164_vm0, %v126_v55 }
  0x81   :  { %536 = vmatmul.mubr.f32.gmra.mrb[44].mxu0 %v61_v56  ;;  %696 = vmatmul.mubr.f32.gmra.mrb[44].mxu1 %v125_v57 }
  0x82   :  { %1045 = vmatprep.mubr.msk.f32.mxu0 %vm164_vm0, %v64_v58  ;;  %1077 = vmatprep.mubr.msk.f32.mxu1 %vm164_vm0, %v128_v59 }
  0x85   :  { %541 = vmatmul.mubr.f32.gmra.mrb[46].mxu0 %v63_v60  ;;  %701 = vmatmul.mubr.f32.gmra.mrb[46].mxu1 %v127_v61 }
  0x86   :  { %1046 = vmatprep.mubr.msk.f32.mxu0 %vm164_vm0, %v66_v62  ;;  %1078 = vmatprep.mubr.msk.f32.mxu1 %vm164_vm0, %v130_v63 }
  0x89   :  { %546 = vmatmul.mubr.f32.gmra.mrb[48].mxu0 %v65_v0  ;;  %706 = vmatmul.mubr.f32.gmra.mrb[48].mxu1 %v129_v1 }
  0x8a   :  { %1047 = vmatprep.mubr.msk.f32.mxu0 %vm164_vm0, %v68_v2  ;;  %1079 = vmatprep.mubr.msk.f32.mxu1 %vm164_vm0, %v132_v3 }
  0x8d   :  { %551 = vmatmul.mubr.f32.gmra.mrb[50].mxu0 %v67_v4  ;;  %711 = vmatmul.mubr.f32.gmra.mrb[50].mxu1 %v131_v5 }
  0x8e   :  { %1048 = vmatprep.mubr.msk.f32.mxu0 %vm164_vm0, %v70_v6  ;;  %1080 = vmatprep.mubr.msk.f32.mxu1 %vm164_vm0, %v134_v7 }
  0x91   :  { %556 = vmatmul.mubr.f32.gmra.mrb[52].mxu0 %v69_v8  ;;  %716 = vmatmul.mubr.f32.gmra.mrb[52].mxu1 %v133_v9 }
  0x92   :  { %1049 = vmatprep.mubr.msk.f32.mxu0 %vm164_vm0, %v72_v10  ;;  %1081 = vmatprep.mubr.msk.f32.mxu1 %vm164_vm0, %v136_v11 }
  0x95   :  { %561 = vmatmul.mubr.f32.gmra.mrb[54].mxu0 %v71_v12  ;;  %721 = vmatmul.mubr.f32.gmra.mrb[54].mxu1 %v135_v13 }
  0x96   :  { %1050 = vmatprep.mubr.msk.f32.mxu0 %vm164_vm0, %v74_v14  ;;  %1082 = vmatprep.mubr.msk.f32.mxu1 %vm164_vm0, %v138_v15 }
  0x99   :  { %566 = vmatmul.mubr.f32.gmra.mrb[56].mxu0 %v73_v16  ;;  %726 = vmatmul.mubr.f32.gmra.mrb[56].mxu1 %v137_v17 }
  0x9a   :  { %1051 = vmatprep.mubr.msk.f32.mxu0 %vm164_vm0, %v76_v18  ;;  %1083 = vmatprep.mubr.msk.f32.mxu1 %vm164_vm0, %v140_v19 }
  0x9d   :  { %571 = vmatmul.mubr.f32.gmra.mrb[58].mxu0 %v75_v20  ;;  %731 = vmatmul.mubr.f32.gmra.mrb[58].mxu1 %v139_v21 }
  0x9e   :  { %1052 = vmatprep.mubr.msk.f32.mxu0 %vm164_vm0, %v78_v22  ;;  %1084 = vmatprep.mubr.msk.f32.mxu1 %vm164_vm0, %v142_v23 }
  0xa1   :  { %576 = vmatmul.mubr.f32.gmra.mrb[60].mxu0 %v77_v24  ;;  %736 = vmatmul.mubr.f32.gmra.mrb[60].mxu1 %v141_v25 }
  0xa2   :  { %1053 = vmatprep.mubr.msk.f32.mxu0 %vm164_vm0, %v80_v26  ;;  %1085 = vmatprep.mubr.msk.f32.mxu1 %vm164_vm0, %v144_v27 }
  0xa5   :  { %581 = vmatmul.mubr.f32.gmra.mrb[62].mxu0 %v79_v28  ;;  %741 = vmatmul.mubr.f32.gmra.mrb[62].mxu1 %v143_v29 }
  0xfc   :  { %v427_v31 = vpop.f32.mrb[0].mxu0  ;;  %v587_v33 = vpop.f32.mrb[0].mxu1 }
  0xfd   :  { %v753_v34 = vmul.f32 %v1690_v30, %v427_v31  ;;  %v785_v35 = vmul.f32 %v1690_v30, %v587_v33  ;;  %v429_v36 = vpop.f32.mrb[1].mxu0  ;;  %v589_v37 = vpop.f32.mrb[1].mxu1 }
  0xff   :  { %v824_v38 = vadd.f32 %v1695_v32, %v753_v34  ;;  %v856_v39 = vadd.f32 %v1695_v32, %v785_v35 }
 0x100   :  { %v432_v40 = vpop.f32.mrb[2].mxu0  ;;  %v592_v41 = vpop.f32.mrb[2].mxu1 }
 0x101   :  { %v888_v42 = vmax.f32 %v824_v38, 0.0  ;;  %v920_v43 = vmax.f32 %v856_v39, 0.0  ;;  %v754_v44 = vmul.f32 %v1690_v30, %v432_v40  ;;  %v786_v45 = vmul.f32 %v1690_v30, %v592_v41  ;;  %v434_v46 = vpop.f32.mrb[3].mxu0  ;;  %v594_v47 = vpop.f32.mrb[3].mxu1 }
 0x103   :  { %953 = vst.msk [vmem:[%s2085_s4] sm:$0xff] %vm952_vm2, %v888_v42  ;;  %985 = vst.msk [vmem:[%s2085_s4 + $0x100] sm:$0xff] %vm952_vm2, %v920_v43  ;;  %v825_v48 = vadd.f32 %v1695_v32, %v754_v44  ;;  %v857_v49 = vadd.f32 %v1695_v32, %v786_v45 }
 0x104   :  { %v437_v50 = vpop.f32.mrb[4].mxu0  ;;  %v597_v51 = vpop.f32.mrb[4].mxu1 }
 0x105   :  { %v889_v52 = vmax.f32 %v825_v48, 0.0  ;;  %v921_v53 = vmax.f32 %v857_v49, 0.0  ;;  %v755_v54 = vmul.f32 %v1690_v30, %v437_v50  ;;  %v787_v55 = vmul.f32 %v1690_v30, %v597_v51  ;;  %v439_v56 = vpop.f32.mrb[5].mxu0  ;;  %v599_v57 = vpop.f32.mrb[5].mxu1 }
 0x107   :  { %954 = vst.msk [vmem:[%s2085_s4 + $0x8] sm:$0xff] %vm952_vm2, %v889_v52  ;;  %986 = vst.msk [vmem:[%s2085_s4 + $0x108] sm:$0xff] %vm952_vm2, %v921_v53  ;;  %v826_v58 = vadd.f32 %v1695_v32, %v755_v54  ;;  %v858_v59 = vadd.f32 %v1695_v32, %v787_v55 }
 0x108   :  { %v442_v60 = vpop.f32.mrb[6].mxu0  ;;  %v602_v61 = vpop.f32.mrb[6].mxu1 }
 0x109   :  { %v890_v62 = vmax.f32 %v826_v58, 0.0  ;;  %v922_v63 = vmax.f32 %v858_v59, 0.0  ;;  %v756_v0 = vmul.f32 %v1690_v30, %v442_v60  ;;  %v788_v1 = vmul.f32 %v1690_v30, %v602_v61  ;;  %v444_v2 = vpop.f32.mrb[7].mxu0  ;;  %v604_v3 = vpop.f32.mrb[7].mxu1 }
 0x10b   :  { %955 = vst.msk [vmem:[%s2085_s4 + $0x10] sm:$0xff] %vm952_vm2, %v890_v62  ;;  %987 = vst.msk [vmem:[%s2085_s4 + $0x110] sm:$0xff] %vm952_vm2, %v922_v63  ;;  %v827_v4 = vadd.f32 %v1695_v32, %v756_v0  ;;  %v859_v5 = vadd.f32 %v1695_v32, %v788_v1 }
 0x10c   :  { %v447_v6 = vpop.f32.mrb[8].mxu0  ;;  %v607_v7 = vpop.f32.mrb[8].mxu1 }
 0x10d   :  { %v891_v8 = vmax.f32 %v827_v4, 0.0  ;;  %v923_v9 = vmax.f32 %v859_v5, 0.0  ;;  %v757_v10 = vmul.f32 %v1690_v30, %v447_v6  ;;  %v789_v11 = vmul.f32 %v1690_v30, %v607_v7  ;;  %v449_v12 = vpop.f32.mrb[9].mxu0  ;;  %v609_v13 = vpop.f32.mrb[9].mxu1 }
 0x10f   :  { %956 = vst.msk [vmem:[%s2085_s4 + $0x18] sm:$0xff] %vm952_vm2, %v891_v8  ;;  %988 = vst.msk [vmem:[%s2085_s4 + $0x118] sm:$0xff] %vm952_vm2, %v923_v9  ;;  %v828_v14 = vadd.f32 %v1695_v32, %v757_v10  ;;  %v860_v15 = vadd.f32 %v1695_v32, %v789_v11 }
 0x110   :  { %v452_v16 = vpop.f32.mrb[10].mxu0  ;;  %v612_v17 = vpop.f32.mrb[10].mxu1 }
 0x111   :  { %v892_v18 = vmax.f32 %v828_v14, 0.0  ;;  %v924_v19 = vmax.f32 %v860_v15, 0.0  ;;  %v758_v20 = vmul.f32 %v1690_v30, %v452_v16  ;;  %v790_v21 = vmul.f32 %v1690_v30, %v612_v17  ;;  %v454_v22 = vpop.f32.mrb[11].mxu0  ;;  %v614_v23 = vpop.f32.mrb[11].mxu1 }
 0x113   :  { %957 = vst.msk [vmem:[%s2085_s4 + $0x20] sm:$0xff] %vm952_vm2, %v892_v18  ;;  %989 = vst.msk [vmem:[%s2085_s4 + $0x120] sm:$0xff] %vm952_vm2, %v924_v19  ;;  %v829_v24 = vadd.f32 %v1695_v32, %v758_v20  ;;  %v861_v25 = vadd.f32 %v1695_v32, %v790_v21 }
 0x114   :  { %v457_v26 = vpop.f32.mrb[12].mxu0  ;;  %v617_v27 = vpop.f32.mrb[12].mxu1 }
 0x115   :  { %v893_v28 = vmax.f32 %v829_v24, 0.0  ;;  %v925_v29 = vmax.f32 %v861_v25, 0.0  ;;  %v759_v31 = vmul.f32 %v1690_v30, %v457_v26  ;;  %v791_v33 = vmul.f32 %v1690_v30, %v617_v27  ;;  %v459_v34 = vpop.f32.mrb[13].mxu0  ;;  %v619_v35 = vpop.f32.mrb[13].mxu1 }
 0x117   :  { %958 = vst.msk [vmem:[%s2085_s4 + $0x28] sm:$0xff] %vm952_vm2, %v893_v28  ;;  %990 = vst.msk [vmem:[%s2085_s4 + $0x128] sm:$0xff] %vm952_vm2, %v925_v29  ;;  %v830_v36 = vadd.f32 %v1695_v32, %v759_v31  ;;  %v862_v37 = vadd.f32 %v1695_v32, %v791_v33 }
 0x118   :  { %v462_v38 = vpop.f32.mrb[14].mxu0  ;;  %v622_v39 = vpop.f32.mrb[14].mxu1 }
 0x119   :  { %v894_v40 = vmax.f32 %v830_v36, 0.0  ;;  %v926_v41 = vmax.f32 %v862_v37, 0.0  ;;  %v760_v42 = vmul.f32 %v1690_v30, %v462_v38  ;;  %v792_v43 = vmul.f32 %v1690_v30, %v622_v39  ;;  %v464_v44 = vpop.f32.mrb[15].mxu0  ;;  %v624_v45 = vpop.f32.mrb[15].mxu1 }
 0x11b   :  { %959 = vst.msk [vmem:[%s2085_s4 + $0x30] sm:$0xff] %vm952_vm2, %v894_v40  ;;  %991 = vst.msk [vmem:[%s2085_s4 + $0x130] sm:$0xff] %vm952_vm2, %v926_v41  ;;  %v831_v46 = vadd.f32 %v1695_v32, %v760_v42  ;;  %v863_v47 = vadd.f32 %v1695_v32, %v792_v43 }
 0x11c   :  { %v467_v48 = vpop.f32.mrb[16].mxu0  ;;  %v627_v49 = vpop.f32.mrb[16].mxu1 }
 0x11d   :  { %v895_v50 = vmax.f32 %v831_v46, 0.0  ;;  %v927_v51 = vmax.f32 %v863_v47, 0.0  ;;  %v761_v52 = vmul.f32 %v1690_v30, %v467_v48  ;;  %v793_v53 = vmul.f32 %v1690_v30, %v627_v49  ;;  %v469_v54 = vpop.f32.mrb[17].mxu0  ;;  %v629_v55 = vpop.f32.mrb[17].mxu1 }
 0x11f   :  { %960 = vst.msk [vmem:[%s2085_s4 + $0x38] sm:$0xff] %vm952_vm2, %v895_v50  ;;  %992 = vst.msk [vmem:[%s2085_s4 + $0x138] sm:$0xff] %vm952_vm2, %v927_v51  ;;  %v832_v56 = vadd.f32 %v1695_v32, %v761_v52  ;;  %v864_v57 = vadd.f32 %v1695_v32, %v793_v53 }
 0x120   :  { %v472_v58 = vpop.f32.mrb[18].mxu0  ;;  %v632_v59 = vpop.f32.mrb[18].mxu1 }
 0x121   :  { %v896_v60 = vmax.f32 %v832_v56, 0.0  ;;  %v928_v61 = vmax.f32 %v864_v57, 0.0  ;;  %v762_v62 = vmul.f32 %v1690_v30, %v472_v58  ;;  %v794_v63 = vmul.f32 %v1690_v30, %v632_v59  ;;  %v474_v0 = vpop.f32.mrb[19].mxu0  ;;  %v634_v1 = vpop.f32.mrb[19].mxu1 }
 0x123   :  { %961 = vst.msk [vmem:[%s2085_s4 + $0x40] sm:$0xff] %vm952_vm2, %v896_v60  ;;  %993 = vst.msk [vmem:[%s2085_s4 + $0x140] sm:$0xff] %vm952_vm2, %v928_v61  ;;  %v833_v2 = vadd.f32 %v1695_v32, %v762_v62  ;;  %v865_v3 = vadd.f32 %v1695_v32, %v794_v63 }
 0x124   :  { %v477_v4 = vpop.f32.mrb[20].mxu0  ;;  %v637_v5 = vpop.f32.mrb[20].mxu1 }
 0x125   :  { %v897_v6 = vmax.f32 %v833_v2, 0.0  ;;  %v929_v7 = vmax.f32 %v865_v3, 0.0  ;;  %v763_v8 = vmul.f32 %v1690_v30, %v477_v4  ;;  %v795_v9 = vmul.f32 %v1690_v30, %v637_v5  ;;  %v479_v10 = vpop.f32.mrb[21].mxu0  ;;  %v639_v11 = vpop.f32.mrb[21].mxu1 }
 0x127   :  { %962 = vst.msk [vmem:[%s2085_s4 + $0x48] sm:$0xff] %vm952_vm2, %v897_v6  ;;  %994 = vst.msk [vmem:[%s2085_s4 + $0x148] sm:$0xff] %vm952_vm2, %v929_v7  ;;  %v834_v12 = vadd.f32 %v1695_v32, %v763_v8  ;;  %v866_v13 = vadd.f32 %v1695_v32, %v795_v9 }
 0x128   :  { %v482_v14 = vpop.f32.mrb[22].mxu0  ;;  %v642_v15 = vpop.f32.mrb[22].mxu1 }
 0x129   :  { %v898_v16 = vmax.f32 %v834_v12, 0.0  ;;  %v930_v17 = vmax.f32 %v866_v13, 0.0  ;;  %v764_v18 = vmul.f32 %v1690_v30, %v482_v14  ;;  %v796_v19 = vmul.f32 %v1690_v30, %v642_v15  ;;  %v484_v20 = vpop.f32.mrb[23].mxu0  ;;  %v644_v21 = vpop.f32.mrb[23].mxu1 }
 0x12b   :  { %963 = vst.msk [vmem:[%s2085_s4 + $0x50] sm:$0xff] %vm952_vm2, %v898_v16  ;;  %995 = vst.msk [vmem:[%s2085_s4 + $0x150] sm:$0xff] %vm952_vm2, %v930_v17  ;;  %v835_v22 = vadd.f32 %v1695_v32, %v764_v18  ;;  %v867_v23 = vadd.f32 %v1695_v32, %v796_v19 }
 0x12c   :  { %v487_v24 = vpop.f32.mrb[24].mxu0  ;;  %v647_v25 = vpop.f32.mrb[24].mxu1 }
 0x12d   :  { %v899_v26 = vmax.f32 %v835_v22, 0.0  ;;  %v931_v27 = vmax.f32 %v867_v23, 0.0  ;;  %v765_v28 = vmul.f32 %v1690_v30, %v487_v24  ;;  %v797_v29 = vmul.f32 %v1690_v30, %v647_v25  ;;  %v489_v31 = vpop.f32.mrb[25].mxu0  ;;  %v649_v33 = vpop.f32.mrb[25].mxu1 }
 0x12f   :  { %964 = vst.msk [vmem:[%s2085_s4 + $0x58] sm:$0xff] %vm952_vm2, %v899_v26  ;;  %996 = vst.msk [vmem:[%s2085_s4 + $0x158] sm:$0xff] %vm952_vm2, %v931_v27  ;;  %v836_v34 = vadd.f32 %v1695_v32, %v765_v28  ;;  %v868_v35 = vadd.f32 %v1695_v32, %v797_v29 }
 0x130   :  { %v492_v36 = vpop.f32.mrb[26].mxu0  ;;  %v652_v37 = vpop.f32.mrb[26].mxu1 }
 0x131   :  { %v900_v38 = vmax.f32 %v836_v34, 0.0  ;;  %v932_v39 = vmax.f32 %v868_v35, 0.0  ;;  %v766_v40 = vmul.f32 %v1690_v30, %v492_v36  ;;  %v798_v41 = vmul.f32 %v1690_v30, %v652_v37  ;;  %v494_v42 = vpop.f32.mrb[27].mxu0  ;;  %v654_v43 = vpop.f32.mrb[27].mxu1 }
 0x133   :  { %965 = vst.msk [vmem:[%s2085_s4 + $0x60] sm:$0xff] %vm952_vm2, %v900_v38  ;;  %997 = vst.msk [vmem:[%s2085_s4 + $0x160] sm:$0xff] %vm952_vm2, %v932_v39  ;;  %v837_v44 = vadd.f32 %v1695_v32, %v766_v40  ;;  %v869_v45 = vadd.f32 %v1695_v32, %v798_v41 }
 0x134   :  { %v497_v46 = vpop.f32.mrb[28].mxu0  ;;  %v657_v47 = vpop.f32.mrb[28].mxu1 }
 0x135   :  { %v901_v48 = vmax.f32 %v837_v44, 0.0  ;;  %v933_v49 = vmax.f32 %v869_v45, 0.0  ;;  %v767_v50 = vmul.f32 %v1690_v30, %v497_v46  ;;  %v799_v51 = vmul.f32 %v1690_v30, %v657_v47  ;;  %v499_v52 = vpop.f32.mrb[29].mxu0  ;;  %v659_v53 = vpop.f32.mrb[29].mxu1 }
 0x137   :  { %966 = vst.msk [vmem:[%s2085_s4 + $0x68] sm:$0xff] %vm952_vm2, %v901_v48  ;;  %998 = vst.msk [vmem:[%s2085_s4 + $0x168] sm:$0xff] %vm952_vm2, %v933_v49  ;;  %v838_v54 = vadd.f32 %v1695_v32, %v767_v50  ;;  %v870_v55 = vadd.f32 %v1695_v32, %v799_v51 }
 0x138   :  { %v502_v56 = vpop.f32.mrb[30].mxu0  ;;  %v662_v57 = vpop.f32.mrb[30].mxu1 }
 0x139   :  { %v902_v58 = vmax.f32 %v838_v54, 0.0  ;;  %v934_v59 = vmax.f32 %v870_v55, 0.0  ;;  %v768_v60 = vmul.f32 %v1690_v30, %v502_v56  ;;  %v800_v61 = vmul.f32 %v1690_v30, %v662_v57  ;;  %v504_v62 = vpop.f32.mrb[31].mxu0  ;;  %v664_v63 = vpop.f32.mrb[31].mxu1 }
 0x13b   :  { %967 = vst.msk [vmem:[%s2085_s4 + $0x70] sm:$0xff] %vm952_vm2, %v902_v58  ;;  %999 = vst.msk [vmem:[%s2085_s4 + $0x170] sm:$0xff] %vm952_vm2, %v934_v59  ;;  %v839_v0 = vadd.f32 %v1695_v32, %v768_v60  ;;  %v871_v1 = vadd.f32 %v1695_v32, %v800_v61 }
 0x13c   :  { %v507_v2 = vpop.f32.mrb[32].mxu0  ;;  %v667_v3 = vpop.f32.mrb[32].mxu1 }
 0x13d   :  { %v903_v4 = vmax.f32 %v839_v0, 0.0  ;;  %v935_v5 = vmax.f32 %v871_v1, 0.0  ;;  %v769_v6 = vmul.f32 %v1690_v30, %v507_v2  ;;  %v801_v7 = vmul.f32 %v1690_v30, %v667_v3  ;;  %v509_v8 = vpop.f32.mrb[33].mxu0  ;;  %v669_v9 = vpop.f32.mrb[33].mxu1 }
 0x13f   :  { %968 = vst.msk [vmem:[%s2085_s4 + $0x78] sm:$0xff] %vm952_vm2, %v903_v4  ;;  %1000 = vst.msk [vmem:[%s2085_s4 + $0x178] sm:$0xff] %vm952_vm2, %v935_v5  ;;  %v840_v10 = vadd.f32 %v1695_v32, %v769_v6  ;;  %v872_v11 = vadd.f32 %v1695_v32, %v801_v7 }
 0x140   :  { %v512_v12 = vpop.f32.mrb[34].mxu0  ;;  %v672_v13 = vpop.f32.mrb[34].mxu1 }
 0x141   :  { %v904_v14 = vmax.f32 %v840_v10, 0.0  ;;  %v936_v15 = vmax.f32 %v872_v11, 0.0  ;;  %v770_v16 = vmul.f32 %v1690_v30, %v512_v12  ;;  %v802_v17 = vmul.f32 %v1690_v30, %v672_v13  ;;  %v514_v18 = vpop.f32.mrb[35].mxu0  ;;  %v674_v19 = vpop.f32.mrb[35].mxu1 }
 0x143   :  { %969 = vst.msk [vmem:[%s2085_s4 + $0x80] sm:$0xff] %vm952_vm2, %v904_v14  ;;  %1001 = vst.msk [vmem:[%s2085_s4 + $0x180] sm:$0xff] %vm952_vm2, %v936_v15  ;;  %v841_v20 = vadd.f32 %v1695_v32, %v770_v16  ;;  %v873_v21 = vadd.f32 %v1695_v32, %v802_v17 }
 0x144   :  { %v517_v22 = vpop.f32.mrb[36].mxu0  ;;  %v677_v23 = vpop.f32.mrb[36].mxu1 }
 0x145   :  { %v905_v24 = vmax.f32 %v841_v20, 0.0  ;;  %v937_v25 = vmax.f32 %v873_v21, 0.0  ;;  %v771_v26 = vmul.f32 %v1690_v30, %v517_v22  ;;  %v803_v27 = vmul.f32 %v1690_v30, %v677_v23  ;;  %v519_v28 = vpop.f32.mrb[37].mxu0  ;;  %v679_v29 = vpop.f32.mrb[37].mxu1 }
 0x147   :  { %970 = vst.msk [vmem:[%s2085_s4 + $0x88] sm:$0xff] %vm952_vm2, %v905_v24  ;;  %1002 = vst.msk [vmem:[%s2085_s4 + $0x188] sm:$0xff] %vm952_vm2, %v937_v25  ;;  %v842_v31 = vadd.f32 %v1695_v32, %v771_v26  ;;  %v874_v33 = vadd.f32 %v1695_v32, %v803_v27 }
 0x148   :  { %v522_v34 = vpop.f32.mrb[38].mxu0  ;;  %v682_v35 = vpop.f32.mrb[38].mxu1 }
 0x149   :  { %v906_v36 = vmax.f32 %v842_v31, 0.0  ;;  %v938_v37 = vmax.f32 %v874_v33, 0.0  ;;  %v772_v38 = vmul.f32 %v1690_v30, %v522_v34  ;;  %v804_v39 = vmul.f32 %v1690_v30, %v682_v35  ;;  %v524_v40 = vpop.f32.mrb[39].mxu0  ;;  %v684_v41 = vpop.f32.mrb[39].mxu1 }
 0x14b   :  { %971 = vst.msk [vmem:[%s2085_s4 + $0x90] sm:$0xff] %vm952_vm2, %v906_v36  ;;  %1003 = vst.msk [vmem:[%s2085_s4 + $0x190] sm:$0xff] %vm952_vm2, %v938_v37  ;;  %v843_v42 = vadd.f32 %v1695_v32, %v772_v38  ;;  %v875_v43 = vadd.f32 %v1695_v32, %v804_v39 }
 0x14c   :  { %v527_v44 = vpop.f32.mrb[40].mxu0  ;;  %v687_v45 = vpop.f32.mrb[40].mxu1 }
 0x14d   :  { %v907_v46 = vmax.f32 %v843_v42, 0.0  ;;  %v939_v47 = vmax.f32 %v875_v43, 0.0  ;;  %v773_v48 = vmul.f32 %v1690_v30, %v527_v44  ;;  %v805_v49 = vmul.f32 %v1690_v30, %v687_v45  ;;  %v529_v50 = vpop.f32.mrb[41].mxu0  ;;  %v689_v51 = vpop.f32.mrb[41].mxu1 }
 0x14f   :  { %972 = vst.msk [vmem:[%s2085_s4 + $0x98] sm:$0xff] %vm952_vm2, %v907_v46  ;;  %1004 = vst.msk [vmem:[%s2085_s4 + $0x198] sm:$0xff] %vm952_vm2, %v939_v47  ;;  %v844_v52 = vadd.f32 %v1695_v32, %v773_v48  ;;  %v876_v53 = vadd.f32 %v1695_v32, %v805_v49 }
 0x150   :  { %v532_v54 = vpop.f32.mrb[42].mxu0  ;;  %v692_v55 = vpop.f32.mrb[42].mxu1 }
 0x151   :  { %v908_v56 = vmax.f32 %v844_v52, 0.0  ;;  %v940_v57 = vmax.f32 %v876_v53, 0.0  ;;  %v774_v58 = vmul.f32 %v1690_v30, %v532_v54  ;;  %v806_v59 = vmul.f32 %v1690_v30, %v692_v55  ;;  %v534_v60 = vpop.f32.mrb[43].mxu0  ;;  %v694_v61 = vpop.f32.mrb[43].mxu1 }
 0x153   :  { %973 = vst.msk [vmem:[%s2085_s4 + $0xa0] sm:$0xff] %vm952_vm2, %v908_v56  ;;  %1005 = vst.msk [vmem:[%s2085_s4 + $0x1a0] sm:$0xff] %vm952_vm2, %v940_v57  ;;  %v845_v62 = vadd.f32 %v1695_v32, %v774_v58  ;;  %v877_v63 = vadd.f32 %v1695_v32, %v806_v59 }
 0x154   :  { %v537_v0 = vpop.f32.mrb[44].mxu0  ;;  %v697_v1 = vpop.f32.mrb[44].mxu1 }
 0x155   :  { %v909_v2 = vmax.f32 %v845_v62, 0.0  ;;  %v941_v3 = vmax.f32 %v877_v63, 0.0  ;;  %v775_v4 = vmul.f32 %v1690_v30, %v537_v0  ;;  %v807_v5 = vmul.f32 %v1690_v30, %v697_v1  ;;  %v539_v6 = vpop.f32.mrb[45].mxu0  ;;  %v699_v7 = vpop.f32.mrb[45].mxu1 }
 0x157   :  { %974 = vst.msk [vmem:[%s2085_s4 + $0xa8] sm:$0xff] %vm952_vm2, %v909_v2  ;;  %1006 = vst.msk [vmem:[%s2085_s4 + $0x1a8] sm:$0xff] %vm952_vm2, %v941_v3  ;;  %v846_v8 = vadd.f32 %v1695_v32, %v775_v4  ;;  %v878_v9 = vadd.f32 %v1695_v32, %v807_v5 }
 0x158   :  { %v542_v10 = vpop.f32.mrb[46].mxu0  ;;  %v702_v11 = vpop.f32.mrb[46].mxu1 }
 0x159   :  { %v910_v12 = vmax.f32 %v846_v8, 0.0  ;;  %v942_v13 = vmax.f32 %v878_v9, 0.0  ;;  %v776_v14 = vmul.f32 %v1690_v30, %v542_v10  ;;  %v808_v15 = vmul.f32 %v1690_v30, %v702_v11  ;;  %v544_v16 = vpop.f32.mrb[47].mxu0  ;;  %v704_v17 = vpop.f32.mrb[47].mxu1 }
 0x15b   :  { %975 = vst.msk [vmem:[%s2085_s4 + $0xb0] sm:$0xff] %vm952_vm2, %v910_v12  ;;  %1007 = vst.msk [vmem:[%s2085_s4 + $0x1b0] sm:$0xff] %vm952_vm2, %v942_v13  ;;  %v847_v18 = vadd.f32 %v1695_v32, %v776_v14  ;;  %v879_v19 = vadd.f32 %v1695_v32, %v808_v15 }
 0x15c   :  { %v547_v20 = vpop.f32.mrb[48].mxu0  ;;  %v707_v21 = vpop.f32.mrb[48].mxu1 }
 0x15d   :  { %v911_v22 = vmax.f32 %v847_v18, 0.0  ;;  %v943_v23 = vmax.f32 %v879_v19, 0.0  ;;  %v777_v24 = vmul.f32 %v1690_v30, %v547_v20  ;;  %v809_v25 = vmul.f32 %v1690_v30, %v707_v21  ;;  %v549_v26 = vpop.f32.mrb[49].mxu0  ;;  %v709_v27 = vpop.f32.mrb[49].mxu1 }
 0x15f   :  { %976 = vst.msk [vmem:[%s2085_s4 + $0xb8] sm:$0xff] %vm952_vm2, %v911_v22  ;;  %1008 = vst.msk [vmem:[%s2085_s4 + $0x1b8] sm:$0xff] %vm952_vm2, %v943_v23  ;;  %v848_v28 = vadd.f32 %v1695_v32, %v777_v24  ;;  %v880_v29 = vadd.f32 %v1695_v32, %v809_v25 }
 0x160   :  { %v552_v31 = vpop.f32.mrb[50].mxu0  ;;  %v712_v33 = vpop.f32.mrb[50].mxu1 }
 0x161   :  { %v912_v34 = vmax.f32 %v848_v28, 0.0  ;;  %v944_v35 = vmax.f32 %v880_v29, 0.0  ;;  %v778_v36 = vmul.f32 %v1690_v30, %v552_v31  ;;  %v810_v37 = vmul.f32 %v1690_v30, %v712_v33  ;;  %v554_v38 = vpop.f32.mrb[51].mxu0  ;;  %v714_v39 = vpop.f32.mrb[51].mxu1 }
 0x163   :  { %977 = vst.msk [vmem:[%s2085_s4 + $0xc0] sm:$0xff] %vm952_vm2, %v912_v34  ;;  %1009 = vst.msk [vmem:[%s2085_s4 + $0x1c0] sm:$0xff] %vm952_vm2, %v944_v35  ;;  %v849_v40 = vadd.f32 %v1695_v32, %v778_v36  ;;  %v881_v41 = vadd.f32 %v1695_v32, %v810_v37 }
 0x164   :  { %v557_v42 = vpop.f32.mrb[52].mxu0  ;;  %v717_v43 = vpop.f32.mrb[52].mxu1 }
 0x165   :  { %v913_v44 = vmax.f32 %v849_v40, 0.0  ;;  %v945_v45 = vmax.f32 %v881_v41, 0.0  ;;  %v779_v46 = vmul.f32 %v1690_v30, %v557_v42  ;;  %v811_v47 = vmul.f32 %v1690_v30, %v717_v43  ;;  %v559_v48 = vpop.f32.mrb[53].mxu0  ;;  %v719_v49 = vpop.f32.mrb[53].mxu1 }
 0x167   :  { %978 = vst.msk [vmem:[%s2085_s4 + $0xc8] sm:$0xff] %vm952_vm2, %v913_v44  ;;  %1010 = vst.msk [vmem:[%s2085_s4 + $0x1c8] sm:$0xff] %vm952_vm2, %v945_v45  ;;  %v850_v50 = vadd.f32 %v1695_v32, %v779_v46  ;;  %v882_v51 = vadd.f32 %v1695_v32, %v811_v47 }
 0x168   :  { %v562_v52 = vpop.f32.mrb[54].mxu0  ;;  %v722_v53 = vpop.f32.mrb[54].mxu1 }
 0x169   :  { %v914_v54 = vmax.f32 %v850_v50, 0.0  ;;  %v946_v55 = vmax.f32 %v882_v51, 0.0  ;;  %v780_v56 = vmul.f32 %v1690_v30, %v562_v52  ;;  %v812_v57 = vmul.f32 %v1690_v30, %v722_v53  ;;  %v564_v58 = vpop.f32.mrb[55].mxu0  ;;  %v724_v59 = vpop.f32.mrb[55].mxu1 }
 0x16b   :  { %979 = vst.msk [vmem:[%s2085_s4 + $0xd0] sm:$0xff] %vm952_vm2, %v914_v54  ;;  %1011 = vst.msk [vmem:[%s2085_s4 + $0x1d0] sm:$0xff] %vm952_vm2, %v946_v55  ;;  %v851_v60 = vadd.f32 %v1695_v32, %v780_v56  ;;  %v883_v61 = vadd.f32 %v1695_v32, %v812_v57 }
 0x16c   :  { %v567_v62 = vpop.f32.mrb[56].mxu0  ;;  %v727_v63 = vpop.f32.mrb[56].mxu1 }
 0x16d   :  { %v915_v0 = vmax.f32 %v851_v60, 0.0  ;;  %v947_v1 = vmax.f32 %v883_v61, 0.0  ;;  %v781_v2 = vmul.f32 %v1690_v30, %v567_v62  ;;  %v813_v3 = vmul.f32 %v1690_v30, %v727_v63  ;;  %v569_v4 = vpop.f32.mrb[57].mxu0  ;;  %v729_v5 = vpop.f32.mrb[57].mxu1 }
 0x16f   :  { %980 = vst.msk [vmem:[%s2085_s4 + $0xd8] sm:$0xff] %vm952_vm2, %v915_v0  ;;  %1012 = vst.msk [vmem:[%s2085_s4 + $0x1d8] sm:$0xff] %vm952_vm2, %v947_v1  ;;  %v852_v6 = vadd.f32 %v1695_v32, %v781_v2  ;;  %v884_v7 = vadd.f32 %v1695_v32, %v813_v3 }
 0x170   :  { %v572_v8 = vpop.f32.mrb[58].mxu0  ;;  %v732_v9 = vpop.f32.mrb[58].mxu1 }
 0x171   :  { %v916_v10 = vmax.f32 %v852_v6, 0.0  ;;  %v948_v11 = vmax.f32 %v884_v7, 0.0  ;;  %v782_v12 = vmul.f32 %v1690_v30, %v572_v8  ;;  %v814_v13 = vmul.f32 %v1690_v30, %v732_v9  ;;  %v574_v14 = vpop.f32.mrb[59].mxu0  ;;  %v734_v15 = vpop.f32.mrb[59].mxu1 }
 0x173   :  { %981 = vst.msk [vmem:[%s2085_s4 + $0xe0] sm:$0xff] %vm952_vm2, %v916_v10  ;;  %1013 = vst.msk [vmem:[%s2085_s4 + $0x1e0] sm:$0xff] %vm952_vm2, %v948_v11  ;;  %v853_v16 = vadd.f32 %v1695_v32, %v782_v12  ;;  %v885_v17 = vadd.f32 %v1695_v32, %v814_v13 }
 0x174   :  { %v577_v18 = vpop.f32.mrb[60].mxu0  ;;  %v737_v19 = vpop.f32.mrb[60].mxu1 }
 0x175   :  { %v917_v20 = vmax.f32 %v853_v16, 0.0  ;;  %v949_v21 = vmax.f32 %v885_v17, 0.0  ;;  %v783_v22 = vmul.f32 %v1690_v30, %v577_v18  ;;  %v815_v23 = vmul.f32 %v1690_v30, %v737_v19  ;;  %v579_v24 = vpop.f32.mrb[61].mxu0  ;;  %v739_v25 = vpop.f32.mrb[61].mxu1 }
 0x177   :  { %982 = vst.msk [vmem:[%s2085_s4 + $0xe8] sm:$0xff] %vm952_vm2, %v917_v20  ;;  %1014 = vst.msk [vmem:[%s2085_s4 + $0x1e8] sm:$0xff] %vm952_vm2, %v949_v21  ;;  %v854_v26 = vadd.f32 %v1695_v32, %v783_v22  ;;  %v886_v27 = vadd.f32 %v1695_v32, %v815_v23 }
 0x178   :  { %v582_v28 = vpop.f32.mrb[62].mxu0  ;;  %v742_v29 = vpop.f32.mrb[62].mxu1 }
 0x179   :  { %v918_v31 = vmax.f32 %v854_v26, 0.0  ;;  %v950_v33 = vmax.f32 %v886_v27, 0.0  ;;  %v784_v34 = vmul.f32 %v1690_v30, %v582_v28  ;;  %v816_v35 = vmul.f32 %v1690_v30, %v742_v29  ;;  %v584_v36 = vpop.f32.mrb[63].mxu0  ;;  %v744_v37 = vpop.f32.mrb[63].mxu1 }
 0x17b   :  { %983 = vst.msk [vmem:[%s2085_s4 + $0xf0] sm:$0xff] %vm952_vm2, %v918_v31  ;;  %1015 = vst.msk [vmem:[%s2085_s4 + $0x1f0] sm:$0xff] %vm952_vm2, %v950_v33  ;;  %v855_v38 = vadd.f32 %v1695_v32, %v784_v34  ;;  %v887_v39 = vadd.f32 %v1695_v32, %v816_v35 }
 0x17d   :  { %v919_v40 = vmax.f32 %v855_v38, 0.0  ;;  %v951_v41 = vmax.f32 %v887_v39, 0.0 }
 0x17f   :  { %984 = vst.msk [vmem:[%s2085_s4 + $0xf8] sm:$0xff] %vm952_vm2, %v919_v40  ;;  %1016 = vst.msk [vmem:[%s2085_s4 + $0x1f8] sm:$0xff] %vm952_vm2, %v951_v41 }

// kernel: _lambda_.24
= control target key start
LH: loop header
LB: loop body
LE: loop exit
PB: predicated region body
PF: predicated region fallthrough
CT: control target
= control target key end

     0   :  { %vm152_vm0 = vcmask 64512   ;;  %s1095_s0 = inlined_call_operand.vmem [shape: f32[9,128,8], index: 0, kind: input, shape index: {}]   ;;  %s1096_s1 = inlined_call_operand.vmem [shape: f32[128,8], index: 1, kind: output, shape index: {}]  }
   0x1   :  { %v8_v0 = vld [vmem:[%s1095_s0] sm:$0xff]  ;;  %v9_v13 = vld [vmem:[%s1095_s0 + $0x8] sm:$0xff]  ;;  %v10_v32 = vld [vmem:[%s1095_s0 + $0x10] sm:$0xff] }
   0x2   :  { %v24_v1 = vld [vmem:[%s1095_s0 + $0x80] sm:$0xff]  ;;  %v153_v5 = vsel %vm152_vm0, %v8_v0, -inf  ;;  %v25_v14 = vld [vmem:[%s1095_s0 + $0x88] sm:$0xff]  ;;  %v170_v19 = vsel %vm152_vm0, %v9_v13, -inf  ;;  %v26_v33 = vld [vmem:[%s1095_s0 + $0x90] sm:$0xff]  ;;  %v187_v38 = vsel %vm152_vm0, %v10_v32, -inf }
   0x3   :  { %v40_v2 = vld [vmem:[%s1095_s0 + $0x100] sm:$0xff]  ;;  %v154_v6 = vsel %vm152_vm0, %v24_v1, -inf  ;;  %v41_v15 = vld [vmem:[%s1095_s0 + $0x108] sm:$0xff]  ;;  %v171_v20 = vsel %vm152_vm0, %v25_v14, -inf  ;;  %v42_v34 = vld [vmem:[%s1095_s0 + $0x110] sm:$0xff]  ;;  %v188_v39 = vsel %vm152_vm0, %v26_v33, -inf }
   0x4   :  { %v56_v3 = vld [vmem:[%s1095_s0 + $0x180] sm:$0xff]  ;;  %v156_v7 = vsel %vm152_vm0, %v40_v2, -inf  ;;  %v155_v11 = vmax.f32 %v153_v5, %v154_v6  ;;  %v57_v18 = vld [vmem:[%s1095_s0 + $0x188] sm:$0xff]  ;;  %v173_v21 = vsel %vm152_vm0, %v41_v15, -inf  ;;  %v172_v27 = vmax.f32 %v170_v19, %v171_v20  ;;  %v58_v37 = vld [vmem:[%s1095_s0 + $0x190] sm:$0xff] }
   0x5   :  { %v72_v4 = vld [vmem:[%s1095_s0 + $0x200] sm:$0xff]  ;;  %v158_v12 = vsel %vm152_vm0, %v56_v3, -inf  ;;  %v73_v24 = vld [vmem:[%s1095_s0 + $0x208] sm:$0xff]  ;;  %v175_v31 = vsel %vm152_vm0, %v57_v18, -inf  ;;  %v190_v40 = vsel %vm152_vm0, %v42_v34, -inf  ;;  %v74_v45 = vld [vmem:[%s1095_s0 + $0x210] sm:$0xff]  ;;  %v189_v46 = vmax.f32 %v187_v38, %v188_v39 }
   0x6   :  { %v88_v8 = vld [vmem:[%s1095_s0 + $0x280] sm:$0xff]  ;;  %v157_v17 = vmax.f32 %v155_v11, %v156_v7  ;;  %v160_v22 = vsel %vm152_vm0, %v72_v4, -inf  ;;  %v89_v25 = vld [vmem:[%s1095_s0 + $0x288] sm:$0xff]  ;;  %v174_v36 = vmax.f32 %v172_v27, %v173_v21  ;;  %v177_v44 = vsel %vm152_vm0, %v73_v24, -inf  ;;  %v11_v51 = vld [vmem:[%s1095_s0 + $0x18] sm:$0xff] }
   0x7   :  { %v104_v9 = vld [vmem:[%s1095_s0 + $0x300] sm:$0xff]  ;;  %v162_v23 = vsel %vm152_vm0, %v88_v8, -inf  ;;  %v105_v26 = vld [vmem:[%s1095_s0 + $0x308] sm:$0xff]  ;;  %v179_v48 = vsel %vm152_vm0, %v89_v25, -inf  ;;  %v192_v50 = vsel %vm152_vm0, %v58_v37, -inf  ;;  %v27_v52 = vld [vmem:[%s1095_s0 + $0x98] sm:$0xff]  ;;  %v191_v58 = vmax.f32 %v189_v46, %v190_v40 }
   0x8   :  { %v120_v10 = vld [vmem:[%s1095_s0 + $0x380] sm:$0xff]  ;;  %v159_v28 = vmax.f32 %v157_v17, %v158_v12  ;;  %v164_v29 = vsel %vm152_vm0, %v104_v9, -inf  ;;  %v121_v35 = vld [vmem:[%s1095_s0 + $0x388] sm:$0xff]  ;;  %v176_v47 = vmax.f32 %v174_v36, %v175_v31  ;;  %v181_v49 = vsel %vm152_vm0, %v105_v26, -inf  ;;  %v43_v53 = vld [vmem:[%s1095_s0 + $0x118] sm:$0xff] }
   0x9   :  { %v136_v16 = vld [vmem:[%s1095_s0 + $0x400] sm:$0xff]  ;;  %v166_v30 = vsel %vm152_vm0, %v120_v10, -inf  ;;  %v137_v43 = vld [vmem:[%s1095_s0 + $0x408] sm:$0xff]  ;;  %v183_v55 = vsel %vm152_vm0, %v121_v35, -inf  ;;  %v90_v56 = vld [vmem:[%s1095_s0 + $0x290] sm:$0xff]  ;;  %v204_v60 = vsel %vm152_vm0, %v11_v51, -inf  ;;  %v193_v4 = vmax.f32 %v191_v58, %v192_v50 }
   0xa   :  { %v161_v41 = vmax.f32 %v159_v28, %v160_v22  ;;  %v168_v42 = vsel %vm152_vm0, %v136_v16, -inf  ;;  %v106_v57 = vld [vmem:[%s1095_s0 + $0x310] sm:$0xff]  ;;  %v59_v59 = vld [vmem:[%s1095_s0 + $0x198] sm:$0xff]  ;;  %v178_v61 = vmax.f32 %v176_v47, %v177_v44  ;;  %v194_v62 = vsel %vm152_vm0, %v74_v45, -inf  ;;  %v12_v6 = vld [vmem:[%s1095_s0 + $0x20] sm:$0xff] }
   0xb   :  { %v75_v63 = vld [vmem:[%s1095_s0 + $0x218] sm:$0xff]  ;;  %v205_v0 = vsel %vm152_vm0, %v27_v52, -inf  ;;  %v207_v1 = vsel %vm152_vm0, %v43_v53, -inf  ;;  %v185_v3 = vsel %vm152_vm0, %v137_v43, -inf  ;;  %v28_v7 = vld [vmem:[%s1095_s0 + $0xa0] sm:$0xff]  ;;  %v196_v10 = vsel %vm152_vm0, %v90_v56, -inf }
   0xc   :  { %v163_v54 = vmax.f32 %v161_v41, %v162_v23  ;;  %v206_v5 = vmax.f32 %v204_v60, %v205_v0  ;;  %v44_v8 = vld [vmem:[%s1095_s0 + $0x120] sm:$0xff]  ;;  %v180_v9 = vmax.f32 %v178_v61, %v179_v48  ;;  %v198_v11 = vsel %vm152_vm0, %v106_v57, -inf  ;;  %v122_v14 = vld [vmem:[%s1095_s0 + $0x390] sm:$0xff]  ;;  %v91_v16 = vld [vmem:[%s1095_s0 + $0x298] sm:$0xff] }
   0xd   :  { %v209_v12 = vsel %vm152_vm0, %v59_v59, -inf  ;;  %v195_v15 = vmax.f32 %v193_v4, %v194_v62  ;;  %v211_v18 = vsel %vm152_vm0, %v75_v63, -inf  ;;  %v60_v19 = vld [vmem:[%s1095_s0 + $0x1a0] sm:$0xff]  ;;  %v138_v21 = vld [vmem:[%s1095_s0 + $0x410] sm:$0xff]  ;;  %v221_v22 = vsel %vm152_vm0, %v12_v6, -inf  ;;  %v107_v27 = vld [vmem:[%s1095_s0 + $0x318] sm:$0xff] }
   0xe   :  { %v165_v2 = vmax.f32 %v163_v54, %v164_v29  ;;  %v208_v17 = vmax.f32 %v206_v5, %v207_v1  ;;  %v182_v20 = vmax.f32 %v180_v9, %v181_v49  ;;  %v222_v23 = vsel %vm152_vm0, %v28_v7, -inf  ;;  %v76_v29 = vld [vmem:[%s1095_s0 + $0x220] sm:$0xff]  ;;  %v13_v31 = vld [vmem:[%s1095_s0 + $0x28] sm:$0xff]  ;;  %v123_v39 = vld [vmem:[%s1095_s0 + $0x398] sm:$0xff] }
   0xf   :  { %v224_v24 = vsel %vm152_vm0, %v44_v8, -inf  ;;  %v197_v26 = vmax.f32 %v195_v15, %v196_v10  ;;  %v200_v33 = vsel %vm152_vm0, %v122_v14, -inf  ;;  %v213_v34 = vsel %vm152_vm0, %v91_v16, -inf  ;;  %v29_v36 = vld [vmem:[%s1095_s0 + $0xa8] sm:$0xff]  ;;  %v92_v41 = vld [vmem:[%s1095_s0 + $0x2a0] sm:$0xff]  ;;  %v139_v50 = vld [vmem:[%s1095_s0 + $0x418] sm:$0xff] }
  0x10   :  { %v167_v13 = vmax.f32 %v165_v2, %v166_v30  ;;  %v210_v28 = vmax.f32 %v208_v17, %v209_v12  ;;  %v223_v30 = vmax.f32 %v221_v22, %v222_v23  ;;  %v184_v32 = vmax.f32 %v182_v20, %v183_v55  ;;  %v45_v43 = vld [vmem:[%s1095_s0 + $0x128] sm:$0xff]  ;;  %v108_v52 = vld [vmem:[%s1095_s0 + $0x320] sm:$0xff]  ;;  %v14_v60 = vld [vmem:[%s1095_s0 + $0x30] sm:$0xff] }
  0x11   :  { %v226_v35 = vsel %vm152_vm0, %v60_v19, -inf  ;;  %v199_v37 = vmax.f32 %v197_v26, %v198_v11  ;;  %v202_v38 = vsel %vm152_vm0, %v138_v21, -inf  ;;  %v215_v45 = vsel %vm152_vm0, %v107_v27, -inf  ;;  %v61_v47 = vld [vmem:[%s1095_s0 + $0x1a8] sm:$0xff]  ;;  %v30_v61 = vld [vmem:[%s1095_s0 + $0xb0] sm:$0xff]  ;;  %v124_v0 = vld [vmem:[%s1095_s0 + $0x3a0] sm:$0xff] }
  0x12   :  { %v169_v25 = vmax.f32 %v167_v13, %v168_v42  ;;  %v212_v40 = vmax.f32 %v210_v28, %v211_v18  ;;  %v225_v42 = vmax.f32 %v223_v30, %v224_v24  ;;  %v186_v44 = vmax.f32 %v184_v32, %v185_v3  ;;  %v77_v54 = vld [vmem:[%s1095_s0 + $0x228] sm:$0xff]  ;;  %v46_v3 = vld [vmem:[%s1095_s0 + $0x130] sm:$0xff]  ;;  %v140_v11 = vld [vmem:[%s1095_s0 + $0x420] sm:$0xff] }
  0x13   :  { %v228_v46 = vsel %vm152_vm0, %v76_v29, -inf  ;;  %v238_v48 = vsel %vm152_vm0, %v13_v31, -inf  ;;  %v201_v49 = vmax.f32 %v199_v37, %v200_v33  ;;  %v239_v55 = vsel %vm152_vm0, %v29_v36, -inf  ;;  %v93_v6 = vld [vmem:[%s1095_s0 + $0x2a8] sm:$0xff]  ;;  %v62_v9 = vld [vmem:[%s1095_s0 + $0x1b0] sm:$0xff]  ;;  %v15_v21 = vld [vmem:[%s1095_s0 + $0x38] sm:$0xff] }
  0x14   :  { %425 = vst.msk [vmem:[%s1096_s1] sm:$0xff] %vm152_vm0, %v169_v25  ;;  %v214_v51 = vmax.f32 %v212_v40, %v213_v34  ;;  %v227_v53 = vmax.f32 %v225_v42, %v226_v35  ;;  %426 = vst.msk [vmem:[%s1096_s1 + $0x8] sm:$0xff] %vm152_vm0, %v186_v44  ;;  %v217_v56 = vsel %vm152_vm0, %v123_v39, -inf  ;;  %v230_v57 = vsel %vm152_vm0, %v92_v41, -inf  ;;  %v109_v13 = vld [vmem:[%s1095_s0 + $0x328] sm:$0xff]  ;;  %v78_v18 = vld [vmem:[%s1095_s0 + $0x230] sm:$0xff] }
  0x15   :  { %v240_v58 = vmax.f32 %v238_v48, %v239_v55  ;;  %v241_v59 = vsel %vm152_vm0, %v45_v43, -inf  ;;  %v203_v62 = vmax.f32 %v201_v49, %v202_v38  ;;  %v243_v2 = vsel %vm152_vm0, %v61_v47, -inf  ;;  %v31_v22 = vld [vmem:[%s1095_s0 + $0xb8] sm:$0xff]  ;;  %v125_v29 = vld [vmem:[%s1095_s0 + $0x3a8] sm:$0xff]  ;;  %v94_v32 = vld [vmem:[%s1095_s0 + $0x2b0] sm:$0xff] }
  0x16   :  { %v216_v63 = vmax.f32 %v214_v51, %v215_v45  ;;  %v229_v1 = vmax.f32 %v227_v53, %v228_v46  ;;  %v219_v4 = vsel %vm152_vm0, %v139_v50, -inf  ;;  %v232_v5 = vsel %vm152_vm0, %v108_v52, -inf  ;;  %v47_v27 = vld [vmem:[%s1095_s0 + $0x138] sm:$0xff]  ;;  %v141_v36 = vld [vmem:[%s1095_s0 + $0x428] sm:$0xff]  ;;  %v110_v37 = vld [vmem:[%s1095_s0 + $0x330] sm:$0xff] }
  0x17   :  { %v242_v7 = vmax.f32 %v240_v58, %v241_v59  ;;  %v245_v8 = vsel %vm152_vm0, %v77_v54, -inf  ;;  %427 = vst.msk [vmem:[%s1096_s1 + $0x10] sm:$0xff] %vm152_vm0, %v203_v62  ;;  %v255_v14 = vsel %vm152_vm0, %v14_v60, -inf  ;;  %v256_v15 = vsel %vm152_vm0, %v30_v61, -inf  ;;  %v63_v34 = vld [vmem:[%s1095_s0 + $0x1b8] sm:$0xff]  ;;  %v16_v46 = vld [vmem:[%s1095_s0 + $0x40] sm:$0xff] }
  0x18   :  { %v218_v10 = vmax.f32 %v216_v63, %v217_v56  ;;  %v231_v12 = vmax.f32 %v229_v1, %v230_v57  ;;  %v234_v16 = vsel %vm152_vm0, %v124_v0, -inf  ;;  %v257_v19 = vmax.f32 %v255_v14, %v256_v15  ;;  %v79_v43 = vld [vmem:[%s1095_s0 + $0x238] sm:$0xff]  ;;  %v32_v47 = vld [vmem:[%s1095_s0 + $0xc0] sm:$0xff]  ;;  %v126_v50 = vld [vmem:[%s1095_s0 + $0x3b0] sm:$0xff] }
  0x19   :  { %v244_v17 = vmax.f32 %v242_v7, %v243_v2  ;;  %v258_v20 = vsel %vm152_vm0, %v46_v3, -inf  ;;  %v247_v25 = vsel %vm152_vm0, %v93_v6, -inf  ;;  %v260_v26 = vsel %vm152_vm0, %v62_v9, -inf  ;;  %v95_v56 = vld [vmem:[%s1095_s0 + $0x2b8] sm:$0xff]  ;;  %v48_v58 = vld [vmem:[%s1095_s0 + $0x140] sm:$0xff]  ;;  %v142_v60 = vld [vmem:[%s1095_s0 + $0x430] sm:$0xff] }
  0x1a   :  { %v220_v23 = vmax.f32 %v218_v10, %v219_v4  ;;  %v233_v24 = vmax.f32 %v231_v12, %v232_v5  ;;  %v236_v28 = vsel %vm152_vm0, %v140_v11, -inf  ;;  %v249_v31 = vsel %vm152_vm0, %v109_v13, -inf  ;;  %v64_v59 = vld [vmem:[%s1095_s0 + $0x1c0] sm:$0xff]  ;;  %v111_v3 = vld [vmem:[%s1095_s0 + $0x338] sm:$0xff]  ;;  %v17_v7 = vld [vmem:[%s1095_s0 + $0x48] sm:$0xff] }
  0x1b   :  { %v246_v30 = vmax.f32 %v244_v17, %v245_v8  ;;  %v259_v33 = vmax.f32 %v257_v19, %v258_v20  ;;  %v262_v38 = vsel %vm152_vm0, %v78_v18, -inf  ;;  %v272_v39 = vsel %vm152_vm0, %v15_v21, -inf  ;;  %v80_v5 = vld [vmem:[%s1095_s0 + $0x240] sm:$0xff]  ;;  %v33_v12 = vld [vmem:[%s1095_s0 + $0xc8] sm:$0xff]  ;;  %v127_v15 = vld [vmem:[%s1095_s0 + $0x3b8] sm:$0xff] }
  0x1c   :  { %428 = vst.msk [vmem:[%s1096_s1 + $0x18] sm:$0xff] %vm152_vm0, %v220_v23  ;;  %v235_v35 = vmax.f32 %v233_v24, %v234_v16  ;;  %v273_v40 = vsel %vm152_vm0, %v31_v22, -inf  ;;  %v275_v45 = vsel %vm152_vm0, %v47_v27, -inf  ;;  %v251_v49 = vsel %vm152_vm0, %v125_v29, -inf  ;;  %v96_v17 = vld [vmem:[%s1095_s0 + $0x2c0] sm:$0xff]  ;;  %v49_v19 = vld [vmem:[%s1095_s0 + $0x148] sm:$0xff] }
  0x1d   :  { %v248_v41 = vmax.f32 %v246_v30, %v247_v25  ;;  %v261_v42 = vmax.f32 %v259_v33, %v260_v26  ;;  %v274_v44 = vmax.f32 %v272_v39, %v273_v40  ;;  %v264_v51 = vsel %vm152_vm0, %v94_v32, -inf  ;;  %v65_v23 = vld [vmem:[%s1095_s0 + $0x1c8] sm:$0xff]  ;;  %v143_v26 = vld [vmem:[%s1095_s0 + $0x438] sm:$0xff]  ;;  %v128_v40 = vld [vmem:[%s1095_s0 + $0x3c0] sm:$0xff] }
  0x1e   :  { %v237_v48 = vmax.f32 %v235_v35, %v236_v28  ;;  %v277_v52 = vsel %vm152_vm0, %v63_v34, -inf  ;;  %v253_v54 = vsel %vm152_vm0, %v141_v36, -inf  ;;  %v266_v61 = vsel %vm152_vm0, %v110_v37, -inf  ;;  %v112_v28 = vld [vmem:[%s1095_s0 + $0x340] sm:$0xff]  ;;  %v81_v30 = vld [vmem:[%s1095_s0 + $0x248] sm:$0xff]  ;;  %v18_v36 = vld [vmem:[%s1095_s0 + $0x50] sm:$0xff] }
  0x1f   :  { %v250_v53 = vmax.f32 %v248_v41, %v249_v31  ;;  %v263_v55 = vmax.f32 %v261_v42, %v262_v38  ;;  %v276_v57 = vmax.f32 %v274_v44, %v275_v45  ;;  %v279_v62 = vsel %vm152_vm0, %v79_v43, -inf  ;;  %v34_v37 = vld [vmem:[%s1095_s0 + $0xd0] sm:$0xff] }
  0x20   :  { %429 = vst.msk [vmem:[%s1096_s1 + $0x20] sm:$0xff] %vm152_vm0, %v237_v48  ;;  %v289_v63 = vsel %vm152_vm0, %v16_v46, -inf  ;;  %v290_v0 = vsel %vm152_vm0, %v32_v47, -inf  ;;  %v268_v8 = vsel %vm152_vm0, %v126_v50, -inf  ;;  %v281_v9 = vsel %vm152_vm0, %v95_v56, -inf  ;;  %v50_v43 = vld [vmem:[%s1095_s0 + $0x150] sm:$0xff] }
  0x21   :  { %v252_v1 = vmax.f32 %v250_v53, %v251_v49  ;;  %v265_v2 = vmax.f32 %v263_v55, %v264_v51  ;;  %v278_v4 = vmax.f32 %v276_v57, %v277_v52  ;;  %v291_v6 = vmax.f32 %v289_v63, %v290_v0  ;;  %v97_v46 = vld [vmem:[%s1095_s0 + $0x2c8] sm:$0xff]  ;;  %v66_v49 = vld [vmem:[%s1095_s0 + $0x1d0] sm:$0xff]  ;;  %v144_v51 = vld [vmem:[%s1095_s0 + $0x440] sm:$0xff] }
  0x22   :  { %v292_v10 = vsel %vm152_vm0, %v48_v58, -inf  ;;  %v294_v11 = vsel %vm152_vm0, %v64_v59, -inf  ;;  %v270_v20 = vsel %vm152_vm0, %v142_v60, -inf  ;;  %v283_v21 = vsel %vm152_vm0, %v111_v3, -inf  ;;  %v113_v53 = vld [vmem:[%s1095_s0 + $0x348] sm:$0xff]  ;;  %v82_v58 = vld [vmem:[%s1095_s0 + $0x250] sm:$0xff] }
  0x23   :  { %v254_v13 = vmax.f32 %v252_v1, %v253_v54  ;;  %v267_v14 = vmax.f32 %v265_v2, %v266_v61  ;;  %v280_v16 = vmax.f32 %v278_v4, %v279_v62  ;;  %v293_v18 = vmax.f32 %v291_v6, %v292_v10  ;;  %v19_v61 = vld [vmem:[%s1095_s0 + $0x58] sm:$0xff] }
  0x24   :  { %v296_v22 = vsel %vm152_vm0, %v80_v5, -inf  ;;  %v306_v24 = vsel %vm152_vm0, %v17_v7, -inf  ;;  %v307_v31 = vsel %vm152_vm0, %v33_v12, -inf  ;;  %v285_v32 = vsel %vm152_vm0, %v127_v15, -inf  ;;  %v35_v62 = vld [vmem:[%s1095_s0 + $0xd8] sm:$0xff]  ;;  %v129_v5 = vld [vmem:[%s1095_s0 + $0x3c8] sm:$0xff] }
  0x25   :  { %430 = vst.msk [vmem:[%s1096_s1 + $0x28] sm:$0xff] %vm152_vm0, %v254_v13  ;;  %v269_v25 = vmax.f32 %v267_v14, %v268_v8  ;;  %v282_v27 = vmax.f32 %v280_v16, %v281_v9  ;;  %v295_v29 = vmax.f32 %v293_v18, %v294_v11  ;;  %v298_v33 = vsel %vm152_vm0, %v96_v17, -inf  ;;  %v51_v3 = vld [vmem:[%s1095_s0 + $0x158] sm:$0xff]  ;;  %v98_v8 = vld [vmem:[%s1095_s0 + $0x2d0] sm:$0xff]  ;;  %v145_v12 = vld [vmem:[%s1095_s0 + $0x448] sm:$0xff] }
  0x26   :  { %v308_v34 = vmax.f32 %v306_v24, %v307_v31  ;;  %v309_v35 = vsel %vm152_vm0, %v49_v19, -inf  ;;  %v311_v42 = vsel %vm152_vm0, %v65_v23, -inf  ;;  %v287_v44 = vsel %vm152_vm0, %v143_v26, -inf  ;;  %v67_v10 = vld [vmem:[%s1095_s0 + $0x1d8] sm:$0xff]  ;;  %v114_v13 = vld [vmem:[%s1095_s0 + $0x350] sm:$0xff]  ;;  %v36_v23 = vld [vmem:[%s1095_s0 + $0xe0] sm:$0xff] }
  0x27   :  { %v271_v38 = vmax.f32 %v269_v25, %v270_v20  ;;  %v284_v39 = vmax.f32 %v282_v27, %v283_v21  ;;  %v297_v41 = vmax.f32 %v295_v29, %v296_v22  ;;  %v300_v45 = vsel %vm152_vm0, %v112_v28, -inf  ;;  %v83_v19 = vld [vmem:[%s1095_s0 + $0x258] sm:$0xff]  ;;  %v20_v22 = vld [vmem:[%s1095_s0 + $0x60] sm:$0xff]  ;;  %v130_v26 = vld [vmem:[%s1095_s0 + $0x3d0] sm:$0xff] }
  0x28   :  { %v310_v47 = vmax.f32 %v308_v34, %v309_v35  ;;  %v313_v48 = vsel %vm152_vm0, %v81_v30, -inf  ;;  %v323_v54 = vsel %vm152_vm0, %v18_v36, -inf  ;;  %v324_v55 = vsel %vm152_vm0, %v34_v37, -inf  ;;  %v52_v34 = vld [vmem:[%s1095_s0 + $0x160] sm:$0xff]  ;;  %v146_v36 = vld [vmem:[%s1095_s0 + $0x450] sm:$0xff] }
  0x29   :  { %431 = vst.msk [vmem:[%s1096_s1 + $0x30] sm:$0xff] %vm152_vm0, %v271_v38  ;;  %v286_v50 = vmax.f32 %v284_v39, %v285_v32  ;;  %v299_v52 = vmax.f32 %v297_v41, %v298_v33  ;;  %v302_v56 = vsel %vm152_vm0, %v128_v40, -inf  ;;  %v325_v59 = vmax.f32 %v323_v54, %v324_v55  ;;  %v99_v32 = vld [vmem:[%s1095_s0 + $0x2d8] sm:$0xff]  ;;  %v68_v35 = vld [vmem:[%s1095_s0 + $0x1e0] sm:$0xff] }
  0x2a   :  { %v312_v57 = vmax.f32 %v310_v47, %v311_v42  ;;  %v326_v60 = vsel %vm152_vm0, %v50_v43, -inf  ;;  %v315_v1 = vsel %vm152_vm0, %v97_v46, -inf  ;;  %v328_v2 = vsel %vm152_vm0, %v66_v49, -inf  ;;  %v115_v43 = vld [vmem:[%s1095_s0 + $0x358] sm:$0xff]  ;;  %v21_v47 = vld [vmem:[%s1095_s0 + $0x68] sm:$0xff] }
  0x2b   :  { %v288_v63 = vmax.f32 %v286_v50, %v287_v44  ;;  %v301_v0 = vmax.f32 %v299_v52, %v300_v45  ;;  %v304_v4 = vsel %vm152_vm0, %v144_v51, -inf  ;;  %v317_v7 = vsel %vm152_vm0, %v113_v53, -inf  ;;  %v84_v45 = vld [vmem:[%s1095_s0 + $0x260] sm:$0xff]  ;;  %v37_v52 = vld [vmem:[%s1095_s0 + $0xe8] sm:$0xff]  ;;  %v131_v55 = vld [vmem:[%s1095_s0 + $0x3d8] sm:$0xff] }
  0x2c   :  { %v314_v6 = vmax.f32 %v312_v57, %v313_v48  ;;  %v327_v9 = vmax.f32 %v325_v59, %v326_v60  ;;  %v330_v14 = vsel %vm152_vm0, %v82_v58, -inf  ;;  %v340_v15 = vsel %vm152_vm0, %v19_v61, -inf  ;;  %v100_v57 = vld [vmem:[%s1095_s0 + $0x2e0] sm:$0xff]  ;;  %v53_v59 = vld [vmem:[%s1095_s0 + $0x168] sm:$0xff] }
  0x2d   :  { %432 = vst.msk [vmem:[%s1096_s1 + $0x38] sm:$0xff] %vm152_vm0, %v288_v63  ;;  %v303_v11 = vmax.f32 %v301_v0, %v302_v56  ;;  %v341_v16 = vsel %vm152_vm0, %v35_v62, -inf  ;;  %v343_v21 = vsel %vm152_vm0, %v51_v3, -inf  ;;  %v319_v25 = vsel %vm152_vm0, %v129_v5, -inf  ;;  %v69_v63 = vld [vmem:[%s1095_s0 + $0x1e8] sm:$0xff] }
  0x2e   :  { %v316_v17 = vmax.f32 %v314_v6, %v315_v1  ;;  %v329_v18 = vmax.f32 %v327_v9, %v328_v2  ;;  %v342_v20 = vmax.f32 %v340_v15, %v341_v16  ;;  %v332_v27 = vsel %vm152_vm0, %v98_v8, -inf  ;;  %v147_v2 = vld [vmem:[%s1095_s0 + $0x458] sm:$0xff]  ;;  %v85_v6 = vld [vmem:[%s1095_s0 + $0x268] sm:$0xff]  ;;  %v132_v16 = vld [vmem:[%s1095_s0 + $0x3e0] sm:$0xff] }
  0x2f   :  { %v305_v24 = vmax.f32 %v303_v11, %v304_v4  ;;  %v345_v28 = vsel %vm152_vm0, %v67_v10, -inf  ;;  %v321_v30 = vsel %vm152_vm0, %v145_v12, -inf  ;;  %v334_v37 = vsel %vm152_vm0, %v114_v13, -inf  ;;  %v116_v4 = vld [vmem:[%s1095_s0 + $0x360] sm:$0xff]  ;;  %v22_v12 = vld [vmem:[%s1095_s0 + $0x70] sm:$0xff] }
  0x30   :  { %v318_v29 = vmax.f32 %v316_v17, %v317_v7  ;;  %v331_v31 = vmax.f32 %v329_v18, %v330_v14  ;;  %v344_v33 = vmax.f32 %v342_v20, %v343_v21  ;;  %v347_v38 = vsel %vm152_vm0, %v83_v19, -inf  ;;  %v38_v13 = vld [vmem:[%s1095_s0 + $0xf0] sm:$0xff] }
  0x31   :  { %433 = vst.msk [vmem:[%s1096_s1 + $0x40] sm:$0xff] %vm152_vm0, %v305_v24  ;;  %v357_v39 = vsel %vm152_vm0, %v20_v22, -inf  ;;  %v358_v40 = vsel %vm152_vm0, %v36_v23, -inf  ;;  %v336_v48 = vsel %vm152_vm0, %v130_v26, -inf  ;;  %v349_v49 = vsel %vm152_vm0, %v99_v32, -inf  ;;  %v54_v19 = vld [vmem:[%s1095_s0 + $0x170] sm:$0xff] }
  0x32   :  { %v320_v41 = vmax.f32 %v318_v29, %v319_v25  ;;  %v333_v42 = vmax.f32 %v331_v31, %v332_v27  ;;  %v346_v44 = vmax.f32 %v344_v33, %v345_v28  ;;  %v359_v46 = vmax.f32 %v357_v39, %v358_v40  ;;  %v101_v22 = vld [vmem:[%s1095_s0 + $0x2e8] sm:$0xff]  ;;  %v70_v25 = vld [vmem:[%s1095_s0 + $0x1f0] sm:$0xff]  ;;  %v148_v27 = vld [vmem:[%s1095_s0 + $0x460] sm:$0xff] }
  0x33   :  { %v360_v50 = vsel %vm152_vm0, %v52_v34, -inf  ;;  %v362_v51 = vsel %vm152_vm0, %v68_v35, -inf  ;;  %v338_v60 = vsel %vm152_vm0, %v146_v36, -inf  ;;  %v351_v61 = vsel %vm152_vm0, %v115_v43, -inf  ;;  %v117_v29 = vld [vmem:[%s1095_s0 + $0x368] sm:$0xff]  ;;  %v86_v34 = vld [vmem:[%s1095_s0 + $0x270] sm:$0xff] }
  0x34   :  { %v322_v53 = vmax.f32 %v320_v41, %v321_v30  ;;  %v335_v54 = vmax.f32 %v333_v42, %v334_v37  ;;  %v348_v56 = vmax.f32 %v346_v44, %v347_v38  ;;  %v361_v58 = vmax.f32 %v359_v46, %v360_v50  ;;  %v23_v37 = vld [vmem:[%s1095_s0 + $0x78] sm:$0xff] }
  0x35   :  { %v364_v62 = vsel %vm152_vm0, %v84_v45, -inf  ;;  %v374_v0 = vsel %vm152_vm0, %v21_v47, -inf  ;;  %v375_v7 = vsel %vm152_vm0, %v37_v52, -inf  ;;  %v353_v8 = vsel %vm152_vm0, %v131_v55, -inf  ;;  %v39_v38 = vld [vmem:[%s1095_s0 + $0xf8] sm:$0xff]  ;;  %v133_v45 = vld [vmem:[%s1095_s0 + $0x3e8] sm:$0xff] }
  0x36   :  { %434 = vst.msk [vmem:[%s1096_s1 + $0x48] sm:$0xff] %vm152_vm0, %v322_v53  ;;  %v337_v1 = vmax.f32 %v335_v54, %v336_v48  ;;  %v350_v3 = vmax.f32 %v348_v56, %v349_v49  ;;  %v363_v5 = vmax.f32 %v361_v58, %v362_v51  ;;  %v366_v9 = vsel %vm152_vm0, %v100_v57, -inf  ;;  %v55_v43 = vld [vmem:[%s1095_s0 + $0x178] sm:$0xff]  ;;  %v102_v48 = vld [vmem:[%s1095_s0 + $0x2f0] sm:$0xff]  ;;  %v149_v55 = vld [vmem:[%s1095_s0 + $0x468] sm:$0xff] }
  0x37   :  { %v376_v10 = vmax.f32 %v374_v0, %v375_v7  ;;  %v377_v11 = vsel %vm152_vm0, %v53_v59, -inf  ;;  %v379_v18 = vsel %vm152_vm0, %v69_v63, -inf  ;;  %v355_v20 = vsel %vm152_vm0, %v147_v2, -inf  ;;  %v71_v50 = vld [vmem:[%s1095_s0 + $0x1f8] sm:$0xff]  ;;  %v118_v57 = vld [vmem:[%s1095_s0 + $0x370] sm:$0xff] }
  0x38   :  { %v339_v14 = vmax.f32 %v337_v1, %v338_v60  ;;  %v352_v15 = vmax.f32 %v350_v3, %v351_v61  ;;  %v365_v17 = vmax.f32 %v363_v5, %v364_v62  ;;  %v368_v21 = vsel %vm152_vm0, %v116_v4, -inf  ;;  %v87_v59 = vld [vmem:[%s1095_s0 + $0x278] sm:$0xff]  ;;  %v134_v3 = vld [vmem:[%s1095_s0 + $0x3f0] sm:$0xff] }
  0x39   :  { %v378_v23 = vmax.f32 %v376_v10, %v377_v11  ;;  %v381_v24 = vsel %vm152_vm0, %v85_v6, -inf  ;;  %v391_v30 = vsel %vm152_vm0, %v22_v12, -inf  ;;  %v392_v31 = vsel %vm152_vm0, %v38_v13, -inf  ;;  %v103_v5 = vld [vmem:[%s1095_s0 + $0x2f8] sm:$0xff]  ;;  %v150_v11 = vld [vmem:[%s1095_s0 + $0x470] sm:$0xff] }
  0x3a   :  { %435 = vst.msk [vmem:[%s1096_s1 + $0x50] sm:$0xff] %vm152_vm0, %v339_v14  ;;  %v354_v26 = vmax.f32 %v352_v15, %v353_v8  ;;  %v367_v28 = vmax.f32 %v365_v17, %v366_v9  ;;  %v370_v32 = vsel %vm152_vm0, %v132_v16, -inf  ;;  %v393_v35 = vmax.f32 %v391_v30, %v392_v31  ;;  %v119_v13 = vld [vmem:[%s1095_s0 + $0x378] sm:$0xff] }
  0x3b   :  { %v380_v33 = vmax.f32 %v378_v23, %v379_v18  ;;  %v394_v36 = vsel %vm152_vm0, %v54_v19, -inf  ;;  %v383_v41 = vsel %vm152_vm0, %v101_v22, -inf  ;;  %v396_v42 = vsel %vm152_vm0, %v70_v25, -inf  ;;  %v135_v19 = vld [vmem:[%s1095_s0 + $0x3f8] sm:$0xff] }
  0x3c   :  { %v356_v39 = vmax.f32 %v354_v26, %v355_v20  ;;  %v369_v40 = vmax.f32 %v367_v28, %v368_v21  ;;  %v372_v44 = vsel %vm152_vm0, %v148_v27, -inf  ;;  %v385_v47 = vsel %vm152_vm0, %v117_v29, -inf }
  0x3d   :  { %v382_v46 = vmax.f32 %v380_v33, %v381_v24  ;;  %v395_v49 = vmax.f32 %v393_v35, %v394_v36  ;;  %v398_v52 = vsel %vm152_vm0, %v86_v34, -inf  ;;  %v408_v53 = vsel %vm152_vm0, %v23_v37, -inf  ;;  %v151_v24 = vld [vmem:[%s1095_s0 + $0x478] sm:$0xff] }
  0x3e   :  { %436 = vst.msk [vmem:[%s1096_s1 + $0x58] sm:$0xff] %vm152_vm0, %v356_v39  ;;  %v371_v51 = vmax.f32 %v369_v40, %v370_v32  ;;  %v409_v54 = vsel %vm152_vm0, %v39_v38, -inf  ;;  %v411_v61 = vsel %vm152_vm0, %v55_v43, -inf  ;;  %v387_v63 = vsel %vm152_vm0, %v133_v45, -inf }
  0x3f   :  { %v384_v56 = vmax.f32 %v382_v46, %v383_v41  ;;  %v397_v58 = vmax.f32 %v395_v49, %v396_v42  ;;  %v410_v60 = vmax.f32 %v408_v53, %v409_v54  ;;  %v400_v0 = vsel %vm152_vm0, %v102_v48, -inf }
  0x40   :  { %v373_v62 = vmax.f32 %v371_v51, %v372_v44  ;;  %v413_v1 = vsel %vm152_vm0, %v71_v50, -inf  ;;  %v389_v7 = vsel %vm152_vm0, %v149_v55, -inf  ;;  %v402_v8 = vsel %vm152_vm0, %v118_v57, -inf }
  0x41   :  { %v386_v2 = vmax.f32 %v384_v56, %v385_v47  ;;  %v399_v4 = vmax.f32 %v397_v58, %v398_v52  ;;  %v412_v6 = vmax.f32 %v410_v60, %v411_v61  ;;  %v415_v9 = vsel %vm152_vm0, %v87_v59, -inf }
  0x42   :  { %437 = vst.msk [vmem:[%s1096_s1 + $0x60] sm:$0xff] %vm152_vm0, %v373_v62  ;;  %v404_v15 = vsel %vm152_vm0, %v134_v3, -inf  ;;  %v417_v16 = vsel %vm152_vm0, %v103_v5, -inf  ;;  %v406_v21 = vsel %vm152_vm0, %v150_v11, -inf  ;;  %v419_v22 = vsel %vm152_vm0, %v119_v13, -inf }
  0x43   :  { %v388_v10 = vmax.f32 %v386_v2, %v387_v63  ;;  %v401_v12 = vmax.f32 %v399_v4, %v400_v0  ;;  %v414_v14 = vmax.f32 %v412_v6, %v413_v1  ;;  %v421_v26 = vsel %vm152_vm0, %v135_v19, -inf }
  0x44   :  { %v423_v29 = vsel %vm152_vm0, %v151_v24, -inf }
  0x45   :  { %v390_v17 = vmax.f32 %v388_v10, %v389_v7  ;;  %v403_v18 = vmax.f32 %v401_v12, %v402_v8  ;;  %v416_v20 = vmax.f32 %v414_v14, %v415_v9 }
  0x47   :  { %438 = vst.msk [vmem:[%s1096_s1 + $0x68] sm:$0xff] %vm152_vm0, %v390_v17  ;;  %v405_v23 = vmax.f32 %v403_v18, %v404_v15  ;;  %v418_v25 = vmax.f32 %v416_v20, %v417_v16 }
  0x49   :  { %v407_v27 = vmax.f32 %v405_v23, %v406_v21  ;;  %v420_v28 = vmax.f32 %v418_v25, %v419_v22 }
  0x4b   :  { %439 = vst.msk [vmem:[%s1096_s1 + $0x70] sm:$0xff] %vm152_vm0, %v407_v27  ;;  %v422_v30 = vmax.f32 %v420_v28, %v421_v26 }
  0x4d   :  { %v424_v31 = vmax.f32 %v422_v30, %v423_v29 }
  0x4f   :  { %440 = vst.msk [vmem:[%s1096_s1 + $0x78] sm:$0xff] %vm152_vm0, %v424_v31 }

// kernel: _lambda_.25
= control target key start
LH: loop header
LB: loop body
LE: loop exit
PB: predicated region body
PF: predicated region fallthrough
CT: control target
= control target key end

     0   :  { %vm28_vm0 = vcmask 64512   ;;  %vm222_vm1 = vcmask 130048   ;;  %s450_s1 = inlined_call_operand.vmem [shape: f32[8,16], index: 1, kind: input, shape index: {}]   ;;  %s451_s0 = inlined_call_operand.vmem [shape: f32[128,8], index: 0, kind: input, shape index: {}]   ;;  %s452_s2 = inlined_call_operand.vmem [shape: f32[128,16], index: 2, kind: output, shape index: {}]  }
   0x1   :  { %v27_v0 = vld [vmem:[%s450_s1] sm:$0xff]  ;;  %v12_v3 = vld [vmem:[%s451_s0 + $0x8] sm:$0xff]  ;;  %v13_v5 = vld [vmem:[%s451_s0 + $0x10] sm:$0xff] }
   0x2   :  { %v11_v1 = vld [vmem:[%s451_s0] sm:$0xff]  ;;  %276 = vmatprep.subr.mxu0 %v27_v0  ;;  %302 = vmatprep.subr.mxu1 %v27_v0  ;;  %v20_v4 = vld [vmem:[%s451_s0 + $0x48] sm:$0xff]  ;;  %v21_v6 = vld [vmem:[%s451_s0 + $0x50] sm:$0xff] }
   0x3   :  { %v19_v2 = vld [vmem:[%s451_s0 + $0x40] sm:$0xff]  ;;  %277 = vmatpush3.msra.mxu0 %v27_v0  ;;  %303 = vmatpush3.msra.mxu1 %v27_v0  ;;  %v14_v7 = vld [vmem:[%s451_s0 + $0x18] sm:$0xff]  ;;  %v16_v11 = vld [vmem:[%s451_s0 + $0x28] sm:$0xff] }
   0x4   :  { %278 = vmatprep.mubr.msk.f32.mxu0 %vm28_vm0, %v11_v1  ;;  %290 = vmatprep.mubr.msk.f32.mxu1 %vm28_vm0, %v19_v2  ;;  %v22_v8 = vld [vmem:[%s451_s0 + $0x58] sm:$0xff]  ;;  %v15_v9 = vld [vmem:[%s451_s0 + $0x20] sm:$0xff]  ;;  %v24_v12 = vld [vmem:[%s451_s0 + $0x68] sm:$0xff] }
   0x5   :  { %279 = vmatmul.mubr.msk.f32.vlgmr.msra.gmra.mrb[0].mxu0 %vm28_vm0, %v12_v3  ;;  %291 = vmatmul.mubr.msk.f32.vlgmr.msra.gmra.mrb[0].mxu1 %vm28_vm0, %v20_v4  ;;  %v23_v10 = vld [vmem:[%s451_s0 + $0x60] sm:$0xff]  ;;  %v17_v13 = vld [vmem:[%s451_s0 + $0x30] sm:$0xff]  ;;  %v18_v15 = vld [vmem:[%s451_s0 + $0x38] sm:$0xff] }
   0x6   :  { %281 = vmatprep.mubr.msk.f32.mxu0 %vm28_vm0, %v13_v5  ;;  %293 = vmatprep.mubr.msk.f32.mxu1 %vm28_vm0, %v21_v6  ;;  %v25_v14 = vld [vmem:[%s451_s0 + $0x70] sm:$0xff]  ;;  %v26_v16 = vld [vmem:[%s451_s0 + $0x78] sm:$0xff] }
   0x9   :  { %282 = vmatmul.mubr.msk.f32.gmra.mrb[2].mxu0 %vm28_vm0, %v14_v7  ;;  %294 = vmatmul.mubr.msk.f32.gmra.mrb[2].mxu1 %vm28_vm0, %v22_v8 }
   0xa   :  { %284 = vmatprep.mubr.msk.f32.mxu0 %vm28_vm0, %v15_v9  ;;  %296 = vmatprep.mubr.msk.f32.mxu1 %vm28_vm0, %v23_v10 }
   0xd   :  { %285 = vmatmul.mubr.msk.f32.gmra.mrb[4].mxu0 %vm28_vm0, %v16_v11  ;;  %297 = vmatmul.mubr.msk.f32.gmra.mrb[4].mxu1 %vm28_vm0, %v24_v12 }
   0xe   :  { %287 = vmatprep.mubr.msk.f32.mxu0 %vm28_vm0, %v17_v13  ;;  %299 = vmatprep.mubr.msk.f32.mxu1 %vm28_vm0, %v25_v14 }
  0x11   :  { %288 = vmatmul.mubr.msk.f32.gmra.mrb[6].mxu0 %vm28_vm0, %v18_v15  ;;  %300 = vmatmul.mubr.msk.f32.gmra.mrb[6].mxu1 %vm28_vm0, %v26_v16 }
  0xd8   :  { %v280_v17 = vpop.f32.mrb[0].mxu0  ;;  %v292_v18 = vpop.f32.mrb[0].mxu1 }
  0xd9   :  { %224 = vst.msk [vmem:[%s452_s2 + $0x8] sm:$0xff] %vm222_vm1, %v280_v17  ;;  %232 = vst.msk [vmem:[%s452_s2 + $0x48] sm:$0xff] %vm222_vm1, %v292_v18  ;;  %v143_v19 = vpop.f32.mrb[1].mxu0  ;;  %v183_v20 = vpop.f32.mrb[1].mxu1 }
  0xda   :  { %223 = vst.msk [vmem:[%s452_s2] sm:$0xff] %vm222_vm1, %v143_v19  ;;  %231 = vst.msk [vmem:[%s452_s2 + $0x40] sm:$0xff] %vm222_vm1, %v183_v20 }
  0xdc   :  { %v283_v21 = vpop.f32.mrb[2].mxu0  ;;  %v295_v22 = vpop.f32.mrb[2].mxu1 }
  0xdd   :  { %226 = vst.msk [vmem:[%s452_s2 + $0x18] sm:$0xff] %vm222_vm1, %v283_v21  ;;  %234 = vst.msk [vmem:[%s452_s2 + $0x58] sm:$0xff] %vm222_vm1, %v295_v22  ;;  %v153_v23 = vpop.f32.mrb[3].mxu0  ;;  %v193_v24 = vpop.f32.mrb[3].mxu1 }
  0xde   :  { %225 = vst.msk [vmem:[%s452_s2 + $0x10] sm:$0xff] %vm222_vm1, %v153_v23  ;;  %233 = vst.msk [vmem:[%s452_s2 + $0x50] sm:$0xff] %vm222_vm1, %v193_v24 }
  0xe0   :  { %v286_v25 = vpop.f32.mrb[4].mxu0  ;;  %v298_v26 = vpop.f32.mrb[4].mxu1 }
  0xe1   :  { %228 = vst.msk [vmem:[%s452_s2 + $0x28] sm:$0xff] %vm222_vm1, %v286_v25  ;;  %236 = vst.msk [vmem:[%s452_s2 + $0x68] sm:$0xff] %vm222_vm1, %v298_v26  ;;  %v163_v27 = vpop.f32.mrb[5].mxu0  ;;  %v203_v28 = vpop.f32.mrb[5].mxu1 }
  0xe2   :  { %227 = vst.msk [vmem:[%s452_s2 + $0x20] sm:$0xff] %vm222_vm1, %v163_v27  ;;  %235 = vst.msk [vmem:[%s452_s2 + $0x60] sm:$0xff] %vm222_vm1, %v203_v28 }
  0xe4   :  { %v289_v29 = vpop.f32.mrb[6].mxu0  ;;  %v301_v30 = vpop.f32.mrb[6].mxu1 }
  0xe5   :  { %230 = vst.msk [vmem:[%s452_s2 + $0x38] sm:$0xff] %vm222_vm1, %v289_v29  ;;  %238 = vst.msk [vmem:[%s452_s2 + $0x78] sm:$0xff] %vm222_vm1, %v301_v30  ;;  %v173_v31 = vpop.f32.mrb[7].mxu0  ;;  %v213_v32 = vpop.f32.mrb[7].mxu1 }
  0xe6   :  { %229 = vst.msk [vmem:[%s452_s2 + $0x30] sm:$0xff] %vm222_vm1, %v173_v31  ;;  %237 = vst.msk [vmem:[%s452_s2 + $0x70] sm:$0xff] %vm222_vm1, %v213_v32 }

// kernel: _lambda_.26
= control target key start
LH: loop header
LB: loop body
LE: loop exit
PB: predicated region body
PF: predicated region fallthrough
CT: control target
= control target key end

     0   :  { %s527_s21 = smov 0   ;;  %s630_s0 = inlined_call_operand.vmem [shape: f32[2,64,16], index: 0, kind: input, shape index: {}]   ;;  %s631_s1 = inlined_call_operand.vmem [shape: f32[1,16], index: 1, kind: input, shape index: {}]   ;;  %s632_s2 = inlined_call_operand.vmem [shape: f32[1,16], index: 2, kind: input, shape index: {}]   ;;  %s633_s3 = inlined_call_operand.vmem [shape: f32[1,16], index: 3, kind: input, shape index: {}]   ;;  %s634_s4 = inlined_call_operand.vmem [shape: f32[1,16], index: 4, kind: input, shape index: {}]   ;;  %s635_s5 = inlined_call_operand.vmem [shape: f32[1,16], index: 5, kind: input, shape index: {}]   ;;  %s636_s6 = inlined_call_operand.vmem [shape: f32[2,64,16], index: 6, kind: output, shape index: {}]  }
   0x1 LB: > { %s459_s22 = sadd.s32 4294967295, %s490_s21   ;;  %p463_p0 = scmp.ge.s32.totalorder %s490_s21, 1  ;;  %s490_s21 = sphi %s527_s21, %s16_s21  }
   0x2   : > { %p212_p1 = scmp.lt.s32.totalorder %s490_s21, 3 }
   0x4   : > { %p213_p2 = pnand %p463_p0, %p212_p1 }
   0x5   : > { %p242_p3 = scmp.lt.s32.totalorder (!%p213_p2), %s459_s22, 1  ;;  %vm260_vm0 = vcmask (!%p213_p2), 130048  }
   0x6   : > { %216 = sbr.rel (%p213_p2) target bundleno = 107 (0x6b), region = 44 }
   0xd   : > { %s638_s22 = smov (!%p242_p3, %s459_s22), 1 }
   0xe   : > { %s472_s23 = sshll.u32 %s638_s22, 6 }
   0xf   : > { %s246_s26 = scalar_lea.vmem %s630_s0, %s472_s23  ;;  %s251_s15 = scalar_lea.vmem %s636_s6, %s472_s23 }
  0x10   : > { %v543_v0 = vld [vmem:[%s246_s26] sm:$0xff]  ;;  %v545_v1 = vld [vmem:[%s246_s26 + $0x8] sm:$0xff]  ;;  %v547_v2 = vld [vmem:[%s246_s26 + $0x10] sm:$0xff] }
  0x11   : > { %v549_v3 = vld [vmem:[%s246_s26 + $0x18] sm:$0xff]  ;;  %v261_v4 = vsel %vm260_vm0, %v543_v0, 0.0  ;;  %v262_v5 = vsel %vm260_vm0, %v545_v1, 0.0  ;;  %v264_v6 = vsel %vm260_vm0, %v547_v2, 0.0  ;;  %v557_v7 = vld [vmem:[%s246_s26 + $0x20] sm:$0xff]  ;;  %v561_v10 = vld [vmem:[%s246_s26 + $0x28] sm:$0xff] }
  0x12   : > { %v263_v8 = vadd.f32 %v262_v5, %v261_v4  ;;  %v266_v9 = vsel %vm260_vm0, %v549_v3, 0.0  ;;  %v268_v12 = vsel %vm260_vm0, %v557_v7, 0.0  ;;  %v565_v13 = vld [vmem:[%s246_s26 + $0x30] sm:$0xff]  ;;  %v270_v15 = vsel %vm260_vm0, %v561_v10, 0.0  ;;  %v569_v16 = vld [vmem:[%s246_s26 + $0x38] sm:$0xff] }
  0x13   : > { %v272_v18 = vsel %vm260_vm0, %v565_v13, 0.0  ;;  %v274_v20 = vsel %vm260_vm0, %v569_v16, 0.0 }
  0x14   : > { %v265_v11 = vadd.f32 %v264_v6, %v263_v8  ;;  %v322_v6 = vld [vmem:[%s635_s5] sm:$0x1] }
  0x15   : > { %vm323_vm1 = vcmp.gt.f32.partialorder %v322_v6, 0.5 }
  0x16   : > { %v267_v14 = vadd.f32 %v266_v9, %v265_v11  ;;  %v329_v9 = vlaneseq  ;;  %v326_v11 = vld [vmem:[%s634_s4] sm:$0x1] }
  0x18   : > { %v269_v17 = vadd.f32 %v268_v12, %v267_v14 }
  0x1a   : > { %v271_v19 = vadd.f32 %v270_v15, %v269_v17  ;;  %v330_v15 = vshrl.u32 %v329_v9, 7 }
  0x1c   : > { %v273_v21 = vadd.f32 %v272_v18, %v271_v19  ;;  %v324_v18 = vld [vmem:[%s633_s3] sm:$0x1]  ;;  %v331_v19 = vsub.s32 0, %v330_v15 }
  0x1e   : > { %v275_v22 = vadd.f32 %v274_v20, %v273_v21 }
  0x20   : > { %v276_v23 = vrot.slane %v275_v22, 4 }
  0x22   : > { %v277_v24 = vadd.f32 %v276_v23, %v275_v22 }
  0x24   : > { %v278_v25 = vrot.slane %v277_v24, 2 }
  0x26   : > { %v279_v26 = vadd.f32 %v278_v25, %v277_v24 }
  0x28   : > { %v280_v27 = vrot.slane %v279_v26, 1 }
  0x2a   : > { %v281_v28 = vadd.f32 %v280_v27, %v279_v26 }
  0x2c   : > { %v283_v29 = vmul.f32 0.015625, %v281_v28 }
  0x2e   : > { %v284_v30 = vsub.f32 %v543_v0, %v283_v29  ;;  %v285_v31 = vsub.f32 %v545_v1, %v283_v29  ;;  %v286_v32 = vsub.f32 %v547_v2, %v283_v29  ;;  %v287_v33 = vsub.f32 %v549_v3, %v283_v29 }
  0x2f   : > { %v288_v34 = vsub.f32 %v557_v7, %v283_v29  ;;  %v289_v35 = vsub.f32 %v561_v10, %v283_v29  ;;  %v290_v40 = vsub.f32 %v565_v13, %v283_v29  ;;  %v291_v46 = vsub.f32 %v569_v16, %v283_v29 }
  0x30   : > { %v292_v36 = vmul.f32 %v284_v30, %v284_v30  ;;  %v293_v37 = vmul.f32 %v285_v31, %v285_v31  ;;  %v294_v38 = vmul.f32 %v286_v32, %v286_v32  ;;  %v295_v39 = vmul.f32 %v287_v33, %v287_v33 }
  0x31   : > { %v296_v41 = vmul.f32 %v288_v34, %v288_v34  ;;  %v297_v47 = vmul.f32 %v289_v35, %v289_v35  ;;  %v298_v50 = vmul.f32 %v290_v40, %v290_v40  ;;  %v299_v53 = vmul.f32 %v291_v46, %v291_v46 }
  0x32   : > { %v300_v42 = vsel %vm260_vm0, %v292_v36, 0.0  ;;  %v301_v43 = vsel %vm260_vm0, %v293_v37, 0.0  ;;  %v303_v44 = vsel %vm260_vm0, %v294_v38, 0.0  ;;  %v305_v48 = vsel %vm260_vm0, %v295_v39, 0.0 }
  0x33   : > { %v302_v45 = vadd.f32 %v301_v43, %v300_v42  ;;  %v307_v51 = vsel %vm260_vm0, %v296_v41, 0.0  ;;  %v309_v54 = vsel %vm260_vm0, %v297_v47, 0.0  ;;  %v311_v56 = vsel %vm260_vm0, %v298_v50, 0.0 }
  0x34   : > { %v313_v58 = vsel %vm260_vm0, %v299_v53, 0.0  ;;  %v325_v20 = vsel %vm323_vm1, %v283_v29, %v324_v18 }
  0x35   : > { %v304_v49 = vadd.f32 %v303_v44, %v302_v45  ;;  %v332_v21 = vrot.slane %v325_v20, %v331_v19 }
  0x37   : > { %v306_v52 = vadd.f32 %v305_v48, %v304_v49  ;;  %v334_v22 = vsub.f32 %v543_v0, %v332_v21  ;;  %v335_v23 = vsub.f32 %v545_v1, %v332_v21  ;;  %v336_v24 = vsub.f32 %v547_v2, %v332_v21  ;;  %v468_v0 = vld [vmem:[%s631_s1] ss:$0 sm:$0xff] }
  0x38   : > { %v337_v25 = vsub.f32 %v549_v3, %v332_v21  ;;  %v338_v27 = vsub.f32 %v557_v7, %v332_v21  ;;  %v339_v28 = vsub.f32 %v561_v10, %v332_v21  ;;  %v340_v30 = vsub.f32 %v565_v13, %v332_v21  ;;  %v469_v3 = vld [vmem:[%s632_s2] ss:$0 sm:$0xff] }
  0x39   : > { %v308_v55 = vadd.f32 %v307_v51, %v306_v52  ;;  %v341_v31 = vsub.f32 %v569_v16, %v332_v21 }
  0x3b   : > { %v310_v57 = vadd.f32 %v309_v54, %v308_v55 }
  0x3d   : > { %v312_v59 = vadd.f32 %v311_v56, %v310_v57 }
  0x3f   : > { %v314_v60 = vadd.f32 %v313_v58, %v312_v59 }
  0x41   : > { %v315_v61 = vrot.slane %v314_v60, 4 }
  0x43   : > { %v316_v62 = vadd.f32 %v315_v61, %v314_v60 }
  0x45   : > { %v317_v63 = vrot.slane %v316_v62, 2 }
  0x47   : > { %v318_v4 = vadd.f32 %v317_v63, %v316_v62 }
  0x49   : > { %v319_v5 = vrot.slane %v318_v4, 1 }
  0x4b   : > { %v320_v8 = vadd.f32 %v319_v5, %v318_v4 }
  0x4d   : > { %v321_v12 = vmul.f32 0.015625, %v320_v8 }
  0x4f   : > { %v327_v14 = vsel %vm323_vm1, %v321_v12, %v326_v11 }
  0x50   : > { %v342_v17 = vadd.f32 1e-05, %v327_v14 }
  0x52   : > { %482 = vrsqrt.f32 %v342_v17 }
  0x5c   : > { %v483_v26 = vpop.eup %482 }
  0x5d   : > { %v348_v32 = vrot.slane %v483_v26, %v331_v19 }
  0x5f   : > { %v350_v29 = vmul.f32 %v348_v32, %v334_v22  ;;  %v351_v1 = vmul.f32 %v348_v32, %v335_v23  ;;  %v352_v33 = vmul.f32 %v348_v32, %v336_v24  ;;  %v353_v2 = vmul.f32 %v348_v32, %v337_v25 }
  0x60   : > { %v354_v7 = vmul.f32 %v348_v32, %v338_v27  ;;  %v355_v10 = vmul.f32 %v348_v32, %v339_v28  ;;  %v356_v34 = vmul.f32 %v348_v32, %v340_v30  ;;  %v357_v13 = vmul.f32 %v348_v32, %v341_v31 }
  0x61   : > { %v365_v35 = vmul.f32 %v468_v0, %v350_v29  ;;  %v366_v16 = vmul.f32 %v468_v0, %v351_v1  ;;  %v367_v36 = vmul.f32 %v468_v0, %v352_v33  ;;  %v368_v37 = vmul.f32 %v468_v0, %v353_v2 }
  0x62   : > { %v369_v38 = vmul.f32 %v468_v0, %v354_v7  ;;  %v370_v39 = vmul.f32 %v468_v0, %v355_v10  ;;  %v371_v40 = vmul.f32 %v468_v0, %v356_v34  ;;  %v372_v41 = vmul.f32 %v468_v0, %v357_v13 }
  0x63   : > { %v380_v42 = vadd.f32 %v469_v3, %v365_v35  ;;  %v381_v43 = vadd.f32 %v469_v3, %v366_v16  ;;  %v382_v44 = vadd.f32 %v469_v3, %v367_v36  ;;  %v383_v45 = vadd.f32 %v469_v3, %v368_v37 }
  0x64   : > { %v384_v46 = vadd.f32 %v469_v3, %v369_v38  ;;  %v385_v47 = vadd.f32 %v469_v3, %v370_v39  ;;  %v386_v48 = vadd.f32 %v469_v3, %v371_v40  ;;  %v387_v49 = vadd.f32 %v469_v3, %v372_v41 }
  0x65   : > { %v388_v50 = vmax.f32 %v380_v42, 0.0  ;;  %v389_v51 = vmax.f32 %v381_v43, 0.0  ;;  %v390_v52 = vmax.f32 %v382_v44, 0.0  ;;  %v391_v53 = vmax.f32 %v383_v45, 0.0 }
  0x66   : > { %v392_v54 = vmax.f32 %v384_v46, 0.0  ;;  %v393_v55 = vmax.f32 %v385_v47, 0.0  ;;  %v394_v56 = vmax.f32 %v386_v48, 0.0  ;;  %v395_v57 = vmax.f32 %v387_v49, 0.0 }
  0x67   : > { %396 = vst.msk [vmem:[%s251_s15] sm:$0xff] %vm260_vm0, %v388_v50  ;;  %397 = vst.msk [vmem:[%s251_s15 + $0x8] sm:$0xff] %vm260_vm0, %v389_v51 }
  0x68   : > { %398 = vst.msk [vmem:[%s251_s15 + $0x10] sm:$0xff] %vm260_vm0, %v390_v52  ;;  %399 = vst.msk [vmem:[%s251_s15 + $0x18] sm:$0xff] %vm260_vm0, %v391_v53 }
  0x69   : > { %400 = vst.msk [vmem:[%s251_s15 + $0x20] sm:$0xff] %vm260_vm0, %v392_v54  ;;  %401 = vst.msk [vmem:[%s251_s15 + $0x28] sm:$0xff] %vm260_vm0, %v393_v55 }
  0x6a   : > { %402 = vst.msk [vmem:[%s251_s15 + $0x30] sm:$0xff] %vm260_vm0, %v394_v56  ;;  %403 = vst.msk [vmem:[%s251_s15 + $0x38] sm:$0xff] %vm260_vm0, %v395_v57 }
  0x6b PF: > { %s16_s21 = sadd.s32 1, %s490_s21  }
  0x6c   : > { %p13_p4 = scmp.ge.s32.totalorder %s16_s21, 4  }
  0x6e   :  { %15 = sbr.rel (!%p13_p4) target bundleno = 1 (0x1), region = 74 }

// kernel: _lambda_.27
= control target key start
LH: loop header
LB: loop body
LE: loop exit
PB: predicated region body
PF: predicated region fallthrough
CT: control target
= control target key end

     0   :  { %s876_s15 = smov 0   ;;  %s878_s16 = smov 0   ;;  %s1032_s0 = inlined_call_operand.vmem [shape: f32[4,128,36], index: 0, kind: input, shape index: {}]   ;;  %s1033_s1 = inlined_call_operand.vmem [shape: f32[4,36,4], index: 1, kind: input, shape index: {}]   ;;  %s1034_s2 = inlined_call_operand.vmem [shape: f32[4,1,4], index: 2, kind: input, shape index: {}]   ;;  %s1035_s3 = inlined_call_operand.vmem [shape: f32[4,1,4], index: 3, kind: input, shape index: {}]   ;;  %s1036_s4 = inlined_call_operand.vmem [shape: f32[4,128,4], index: 4, kind: output, shape index: {}]  }
   0x1   :  { %s880_s17 = smov 0  }
   0x2 LB: > { %s23_s18 = sadd.s32 1, %s845_s16  ;;  %p704_p0 = scmp.ge.s32.totalorder %s849_s17, 1  ;;  %s849_s17 = sphi %s880_s17, %s14_s17   ;;  %s845_s16 = sphi %s878_s16, %s1038_s16   ;;  %s841_s15 = sphi %s876_s15, %s1037_s15  }
   0x3   : > { %p24_p1 = scmp.ge.s32.totalorder %s23_s18, 4  ;;  %p209_p2 = scmp.lt.s32.totalorder %s849_s17, 5 }
   0x5   : > { %s1040_s18 = smov (%p24_p1, %s23_s18), 0  ;;  %p210_p3 = pnand %p704_p0, %p209_p2 }
   0x6   : > { %p255_p4 = scmp.lt.s32.totalorder (!%p210_p3), %s841_s15, 3  ;;  %vm306_vm0 = vcmask (!%p210_p3), 293888   ;;  %vm355_vm1 = vcmask (!%p210_p3), 1043456   ;;  %vm566_vm2 = vcmask (!%p210_p3), 31744  }
   0x7   : > { %213 = sbr.rel (%p210_p3) target bundleno = 264 (0x108), region = 36 }
   0xe   : > { %s1042_s15 = smov (!%p255_p4, %s841_s15), 3 }
   0xf   : > { %s731_s19 = sshll.u32 %s1042_s15, 7  ;;  %s802_s20 = smul.u32 40, %s1042_s15 }
  0x10   : > { %s903_s23 = scalar_lea.vmem %s1032_s0, %s731_s19  ;;  %s271_s29 = scalar_lea.vmem %s1034_s2, %s1042_s15 }
  0x11   : > { %s268_s26 = scalar_lea.vmem %s1033_s1, %s802_s20  ;;  %v285_v0 = vld [vmem:[%s903_s23] sm:$0xff]  ;;  %v286_v9 = vld [vmem:[%s903_s23 + $0x8] sm:$0xff]  ;;  %v287_v11 = vld [vmem:[%s903_s23 + $0x10] sm:$0xff]  ;;  %s274_s6 = scalar_lea.vmem %s1035_s3, %s1042_s15 }
  0x12   : > { %v293_v1 = vld [vmem:[%s903_s23 + $0x40] sm:$0xff]  ;;  %v302_v3 = vld [vmem:[%s268_s26 + $0x8] sm:$0xff]  ;;  %764 = vmatprep.mubr.msk.f32.mxu0 %vm306_vm0, %v285_v0  ;;  %v303_v5 = vld [vmem:[%s268_s26 + $0x10] sm:$0xff]  ;;  %s963_s9 = scalar_lea.vmem %s1036_s4, %s731_s19 }
  0x13   : > { %v301_v2 = vld [vmem:[%s268_s26] sm:$0xff]  ;;  %776 = vmatprep.mubr.msk.f32.mxu1 %vm306_vm0, %v293_v1  ;;  %v304_v6 = vld [vmem:[%s268_s26 + $0x18] sm:$0xff]  ;;  %v294_v10 = vld [vmem:[%s903_s23 + $0x48] sm:$0xff] }
  0x14   : > { %v788_v4 = vpack.c.bf16 %v302_v3, %v301_v2  ;;  %v792_v7 = vpack.c.bf16 %v304_v6, %v303_v5  ;;  %v305_v8 = vld [vmem:[%s268_s26 + $0x20] sm:$0xf]  ;;  %v295_v12 = vld [vmem:[%s903_s23 + $0x50] sm:$0xff]  ;;  %v288_v13 = vld [vmem:[%s903_s23 + $0x18] sm:$0xff] }
  0x15   : > { %v296_v14 = vld [vmem:[%s903_s23 + $0x58] sm:$0xff]  ;;  %v289_v15 = vld [vmem:[%s903_s23 + $0x20] sm:$0xff]  ;;  %v290_v17 = vld [vmem:[%s903_s23 + $0x28] sm:$0xff] }
  0x16   : > { %789 = vmatprep.subr.bf16.mxu0 %v788_v4  ;;  %796 = vmatprep.subr.bf16.mxu1 %v788_v4  ;;  %v297_v16 = vld [vmem:[%s903_s23 + $0x60] sm:$0xff]  ;;  %v298_v18 = vld [vmem:[%s903_s23 + $0x68] sm:$0xff]  ;;  %v291_v19 = vld [vmem:[%s903_s23 + $0x30] sm:$0xff] }
  0x17   : > { %791 = vmatpush3.bf16.msra.mxu0 %v788_v4  ;;  %799 = vmatpush3.bf16.msra.mxu1 %v788_v4  ;;  %v299_v20 = vld [vmem:[%s903_s23 + $0x70] sm:$0xff]  ;;  %v292_v21 = vld [vmem:[%s903_s23 + $0x38] sm:$0xff]  ;;  %v948_v23 = vld [vmem:[%s271_s29] ss:$0 sm:$0xff] }
  0x18   : > { %793 = vmatprep.subr.bf16.mxu0 %v792_v7  ;;  %797 = vmatprep.subr.bf16.mxu1 %v792_v7  ;;  %v300_v22 = vld [vmem:[%s903_s23 + $0x78] sm:$0xff]  ;;  %v950_v24 = vld [vmem:[%s274_s6] ss:$0 sm:$0xff] }
  0x1b   : > { %795 = vmatpush3.bf16.msra.mxu0 %v792_v7  ;;  %800 = vmatpush3.bf16.msra.mxu1 %v792_v7 }
  0x1c   : > { %762 = vmatprep.subr.msk.mxu0 %vm355_vm1, %v305_v8  ;;  %798 = vmatprep.subr.msk.mxu1 %vm355_vm1, %v305_v8 }
  0x1f   : > { %763 = vmatpush3.msk.msra.mxu0 %vm355_vm1, %v305_v8  ;;  %801 = vmatpush3.msk.msra.mxu1 %vm355_vm1, %v305_v8 }
  0x20   : > { %765 = vmatmul.mubr.msk.f32.vlgmr.msra.gmra.mrb[0].mxu0 %vm306_vm0, %v286_v9  ;;  %777 = vmatmul.mubr.msk.f32.vlgmr.msra.gmra.mrb[0].mxu1 %vm306_vm0, %v294_v10 }
  0x21   : > { %767 = vmatprep.mubr.msk.f32.mxu0 %vm306_vm0, %v287_v11  ;;  %779 = vmatprep.mubr.msk.f32.mxu1 %vm306_vm0, %v295_v12 }
  0x24   : > { %768 = vmatmul.mubr.msk.f32.gmra.mrb[2].mxu0 %vm306_vm0, %v288_v13  ;;  %780 = vmatmul.mubr.msk.f32.gmra.mrb[2].mxu1 %vm306_vm0, %v296_v14 }
  0x25   : > { %770 = vmatprep.mubr.msk.f32.mxu0 %vm306_vm0, %v289_v15  ;;  %782 = vmatprep.mubr.msk.f32.mxu1 %vm306_vm0, %v297_v16 }
  0x28   : > { %771 = vmatmul.mubr.msk.f32.gmra.mrb[4].mxu0 %vm306_vm0, %v290_v17  ;;  %783 = vmatmul.mubr.msk.f32.gmra.mrb[4].mxu1 %vm306_vm0, %v298_v18 }
  0x29   : > { %773 = vmatprep.mubr.msk.f32.mxu0 %vm306_vm0, %v291_v19  ;;  %785 = vmatprep.mubr.msk.f32.mxu1 %vm306_vm0, %v299_v20 }
  0x2c   : > { %774 = vmatmul.mubr.msk.f32.gmra.mrb[6].mxu0 %vm306_vm0, %v292_v21  ;;  %786 = vmatmul.mubr.msk.f32.gmra.mrb[6].mxu1 %vm306_vm0, %v300_v22 }
  0xf3   : > { %v766_v25 = vpop.f32.mrb[0].mxu0  ;;  %v778_v26 = vpop.f32.mrb[0].mxu1 }
  0xf4   : > { %v512_v27 = vmul.f32 %v766_v25, %v948_v23  ;;  %v520_v28 = vmul.f32 %v778_v26, %v948_v23  ;;  %v425_v29 = vpop.f32.mrb[1].mxu0  ;;  %v465_v30 = vpop.f32.mrb[1].mxu1 }
  0xf5   : > { %v511_v31 = vmul.f32 %v948_v23, %v425_v29  ;;  %v519_v32 = vmul.f32 %v948_v23, %v465_v30 }
  0xf6   : > { %v535_v33 = vadd.f32 %v950_v24, %v512_v27  ;;  %v543_v34 = vadd.f32 %v950_v24, %v520_v28 }
  0xf7   : > { %v534_v35 = vadd.f32 %v950_v24, %v511_v31  ;;  %v542_v36 = vadd.f32 %v950_v24, %v519_v32  ;;  %v769_v37 = vpop.f32.mrb[2].mxu0  ;;  %v781_v38 = vpop.f32.mrb[2].mxu1 }
  0xf8   : > { %v551_v39 = vmax.f32 %v535_v33, 0.0  ;;  %v559_v40 = vmax.f32 %v543_v34, 0.0  ;;  %v514_v41 = vmul.f32 %v769_v37, %v948_v23  ;;  %v522_v42 = vmul.f32 %v781_v38, %v948_v23  ;;  %v435_v43 = vpop.f32.mrb[3].mxu0  ;;  %v475_v44 = vpop.f32.mrb[3].mxu1 }
  0xf9   : > { %v550_v45 = vmax.f32 %v534_v35, 0.0  ;;  %v558_v46 = vmax.f32 %v542_v36, 0.0  ;;  %v513_v47 = vmul.f32 %v948_v23, %v435_v43  ;;  %v521_v48 = vmul.f32 %v948_v23, %v475_v44 }
  0xfa   : > { %568 = vst.msk [vmem:[%s963_s9 + $0x8] sm:$0xff] %vm566_vm2, %v551_v39  ;;  %576 = vst.msk [vmem:[%s963_s9 + $0x48] sm:$0xff] %vm566_vm2, %v559_v40  ;;  %v537_v49 = vadd.f32 %v950_v24, %v514_v41  ;;  %v545_v50 = vadd.f32 %v950_v24, %v522_v42 }
  0xfb   : > { %567 = vst.msk [vmem:[%s963_s9] sm:$0xff] %vm566_vm2, %v550_v45  ;;  %575 = vst.msk [vmem:[%s963_s9 + $0x40] sm:$0xff] %vm566_vm2, %v558_v46  ;;  %v536_v51 = vadd.f32 %v950_v24, %v513_v47  ;;  %v544_v52 = vadd.f32 %v950_v24, %v521_v48  ;;  %v772_v53 = vpop.f32.mrb[4].mxu0  ;;  %v784_v54 = vpop.f32.mrb[4].mxu1 }
  0xfc   : > { %v553_v55 = vmax.f32 %v537_v49, 0.0  ;;  %v561_v56 = vmax.f32 %v545_v50, 0.0  ;;  %v516_v57 = vmul.f32 %v772_v53, %v948_v23  ;;  %v524_v58 = vmul.f32 %v784_v54, %v948_v23  ;;  %v445_v59 = vpop.f32.mrb[5].mxu0  ;;  %v485_v60 = vpop.f32.mrb[5].mxu1 }
  0xfd   : > { %v552_v61 = vmax.f32 %v536_v51, 0.0  ;;  %v560_v62 = vmax.f32 %v544_v52, 0.0  ;;  %v515_v63 = vmul.f32 %v948_v23, %v445_v59  ;;  %v523_v0 = vmul.f32 %v948_v23, %v485_v60 }
  0xfe   : > { %570 = vst.msk [vmem:[%s963_s9 + $0x18] sm:$0xff] %vm566_vm2, %v553_v55  ;;  %578 = vst.msk [vmem:[%s963_s9 + $0x58] sm:$0xff] %vm566_vm2, %v561_v56  ;;  %v539_v1 = vadd.f32 %v950_v24, %v516_v57  ;;  %v547_v2 = vadd.f32 %v950_v24, %v524_v58 }
  0xff   : > { %569 = vst.msk [vmem:[%s963_s9 + $0x10] sm:$0xff] %vm566_vm2, %v552_v61  ;;  %577 = vst.msk [vmem:[%s963_s9 + $0x50] sm:$0xff] %vm566_vm2, %v560_v62  ;;  %v538_v3 = vadd.f32 %v950_v24, %v515_v63  ;;  %v546_v4 = vadd.f32 %v950_v24, %v523_v0  ;;  %v775_v5 = vpop.f32.mrb[6].mxu0  ;;  %v787_v6 = vpop.f32.mrb[6].mxu1 }
 0x100   : > { %v555_v7 = vmax.f32 %v539_v1, 0.0  ;;  %v563_v8 = vmax.f32 %v547_v2, 0.0  ;;  %v518_v9 = vmul.f32 %v775_v5, %v948_v23  ;;  %v526_v10 = vmul.f32 %v787_v6, %v948_v23  ;;  %v455_v11 = vpop.f32.mrb[7].mxu0  ;;  %v495_v12 = vpop.f32.mrb[7].mxu1 }
 0x101   : > { %v554_v13 = vmax.f32 %v538_v3, 0.0  ;;  %v562_v14 = vmax.f32 %v546_v4, 0.0  ;;  %v517_v15 = vmul.f32 %v948_v23, %v455_v11  ;;  %v525_v16 = vmul.f32 %v948_v23, %v495_v12 }
 0x102   : > { %572 = vst.msk [vmem:[%s963_s9 + $0x28] sm:$0xff] %vm566_vm2, %v555_v7  ;;  %580 = vst.msk [vmem:[%s963_s9 + $0x68] sm:$0xff] %vm566_vm2, %v563_v8  ;;  %v541_v17 = vadd.f32 %v950_v24, %v518_v9  ;;  %v549_v18 = vadd.f32 %v950_v24, %v526_v10 }
 0x103   : > { %571 = vst.msk [vmem:[%s963_s9 + $0x20] sm:$0xff] %vm566_vm2, %v554_v13  ;;  %579 = vst.msk [vmem:[%s963_s9 + $0x60] sm:$0xff] %vm566_vm2, %v562_v14  ;;  %v540_v19 = vadd.f32 %v950_v24, %v517_v15  ;;  %v548_v20 = vadd.f32 %v950_v24, %v525_v16 }
 0x104   : > { %v557_v21 = vmax.f32 %v541_v17, 0.0  ;;  %v565_v22 = vmax.f32 %v549_v18, 0.0 }
 0x105   : > { %v556_v23 = vmax.f32 %v540_v19, 0.0  ;;  %v564_v25 = vmax.f32 %v548_v20, 0.0 }
 0x106   : > { %574 = vst.msk [vmem:[%s963_s9 + $0x38] sm:$0xff] %vm566_vm2, %v557_v21  ;;  %582 = vst.msk [vmem:[%s963_s9 + $0x78] sm:$0xff] %vm566_vm2, %v565_v22 }
 0x107   : > { %573 = vst.msk [vmem:[%s963_s9 + $0x30] sm:$0xff] %vm566_vm2, %v556_v23  ;;  %581 = vst.msk [vmem:[%s963_s9 + $0x70] sm:$0xff] %vm566_vm2, %v564_v25 }
 0x108 PF: > { %s14_s17 = sadd.s32 1, %s849_s17   ;;  %s1037_s15 = smov %s845_s16 }
 0x109   : > { %p11_p5 = scmp.ge.s32.totalorder %s14_s17, 6   ;;  %s1038_s16 = smov %s1040_s18 }
 0x10b   :  { %13 = sbr.rel (!%p11_p5) target bundleno = 2 (0x2), region = 75 }

// kernel: _lambda_.28
= control target key start
LH: loop header
LB: loop body
LE: loop exit
PB: predicated region body
PF: predicated region fallthrough
CT: control target
= control target key end

     0   :  { %vm34_vm0 = vcmask 64512   ;;  %vm274_vm1 = vcmask 261120   ;;  %s520_s1 = inlined_call_operand.vmem [shape: f32[8,32], index: 1, kind: input, shape index: {}]   ;;  %s521_s0 = inlined_call_operand.vmem [shape: f32[128,8], index: 0, kind: input, shape index: {}]   ;;  %s522_s2 = inlined_call_operand.vmem [shape: f32[1,32], index: 2, kind: input, shape index: {}]   ;;  %s523_s3 = inlined_call_operand.vmem [shape: f32[1,32], index: 3, kind: input, shape index: {}]   ;;  %s524_s4 = inlined_call_operand.vmem [shape: f32[128,32], index: 4, kind: output, shape index: {}]  }
   0x1   :  { %v33_v0 = vld [vmem:[%s520_s1] sm:$0xff]  ;;  %v18_v3 = vld [vmem:[%s521_s0 + $0x8] sm:$0xff]  ;;  %v19_v5 = vld [vmem:[%s521_s0 + $0x10] sm:$0xff] }
   0x2   :  { %v17_v1 = vld [vmem:[%s521_s0] sm:$0xff]  ;;  %330 = vmatprep.subr.mxu0 %v33_v0  ;;  %356 = vmatprep.subr.mxu1 %v33_v0  ;;  %v26_v4 = vld [vmem:[%s521_s0 + $0x48] sm:$0xff]  ;;  %v27_v6 = vld [vmem:[%s521_s0 + $0x50] sm:$0xff] }
   0x3   :  { %v25_v2 = vld [vmem:[%s521_s0 + $0x40] sm:$0xff]  ;;  %331 = vmatpush3.msra.mxu0 %v33_v0  ;;  %357 = vmatpush3.msra.mxu1 %v33_v0  ;;  %v20_v7 = vld [vmem:[%s521_s0 + $0x18] sm:$0xff]  ;;  %v22_v11 = vld [vmem:[%s521_s0 + $0x28] sm:$0xff] }
   0x4   :  { %332 = vmatprep.mubr.msk.f32.mxu0 %vm34_vm0, %v17_v1  ;;  %344 = vmatprep.mubr.msk.f32.mxu1 %vm34_vm0, %v25_v2  ;;  %v28_v8 = vld [vmem:[%s521_s0 + $0x58] sm:$0xff]  ;;  %v21_v9 = vld [vmem:[%s521_s0 + $0x20] sm:$0xff]  ;;  %v30_v12 = vld [vmem:[%s521_s0 + $0x68] sm:$0xff] }
   0x5   :  { %333 = vmatmul.mubr.msk.f32.vlgmr.msra.gmra.mrb[0].mxu0 %vm34_vm0, %v18_v3  ;;  %345 = vmatmul.mubr.msk.f32.vlgmr.msra.gmra.mrb[0].mxu1 %vm34_vm0, %v26_v4  ;;  %v29_v10 = vld [vmem:[%s521_s0 + $0x60] sm:$0xff]  ;;  %v23_v13 = vld [vmem:[%s521_s0 + $0x30] sm:$0xff]  ;;  %v24_v15 = vld [vmem:[%s521_s0 + $0x38] sm:$0xff] }
   0x6   :  { %335 = vmatprep.mubr.msk.f32.mxu0 %vm34_vm0, %v19_v5  ;;  %347 = vmatprep.mubr.msk.f32.mxu1 %vm34_vm0, %v27_v6  ;;  %v31_v14 = vld [vmem:[%s521_s0 + $0x70] sm:$0xff]  ;;  %v32_v16 = vld [vmem:[%s521_s0 + $0x78] sm:$0xff]  ;;  %v311_v17 = vld [vmem:[%s522_s2] ss:$0 sm:$0xff] }
   0x7   :  { %v312_v19 = vld [vmem:[%s523_s3] ss:$0 sm:$0xff] }
   0x9   :  { %336 = vmatmul.mubr.msk.f32.gmra.mrb[2].mxu0 %vm34_vm0, %v20_v7  ;;  %348 = vmatmul.mubr.msk.f32.gmra.mrb[2].mxu1 %vm34_vm0, %v28_v8 }
   0xa   :  { %338 = vmatprep.mubr.msk.f32.mxu0 %vm34_vm0, %v21_v9  ;;  %350 = vmatprep.mubr.msk.f32.mxu1 %vm34_vm0, %v29_v10 }
   0xd   :  { %339 = vmatmul.mubr.msk.f32.gmra.mrb[4].mxu0 %vm34_vm0, %v22_v11  ;;  %351 = vmatmul.mubr.msk.f32.gmra.mrb[4].mxu1 %vm34_vm0, %v30_v12 }
   0xe   :  { %341 = vmatprep.mubr.msk.f32.mxu0 %vm34_vm0, %v23_v13  ;;  %353 = vmatprep.mubr.msk.f32.mxu1 %vm34_vm0, %v31_v14 }
  0x11   :  { %342 = vmatmul.mubr.msk.f32.gmra.mrb[6].mxu0 %vm34_vm0, %v24_v15  ;;  %354 = vmatmul.mubr.msk.f32.gmra.mrb[6].mxu1 %vm34_vm0, %v32_v16 }
  0xd8   :  { %v334_v18 = vpop.f32.mrb[0].mxu0  ;;  %v346_v20 = vpop.f32.mrb[0].mxu1 }
  0xd9   :  { %v236_v21 = vmul.f32 %v334_v18, %v311_v17  ;;  %v244_v22 = vmul.f32 %v346_v20, %v311_v17  ;;  %v149_v23 = vpop.f32.mrb[1].mxu0  ;;  %v189_v24 = vpop.f32.mrb[1].mxu1 }
  0xda   :  { %v235_v25 = vmul.f32 %v311_v17, %v149_v23  ;;  %v243_v26 = vmul.f32 %v311_v17, %v189_v24 }
  0xdb   :  { %v259_v27 = vadd.f32 %v312_v19, %v236_v21  ;;  %v267_v28 = vadd.f32 %v312_v19, %v244_v22 }
  0xdc   :  { %v258_v29 = vadd.f32 %v312_v19, %v235_v25  ;;  %v266_v30 = vadd.f32 %v312_v19, %v243_v26  ;;  %v337_v31 = vpop.f32.mrb[2].mxu0  ;;  %v349_v32 = vpop.f32.mrb[2].mxu1 }
  0xdd   :  { %276 = vst.msk [vmem:[%s524_s4 + $0x8] sm:$0xff] %vm274_vm1, %v259_v27  ;;  %284 = vst.msk [vmem:[%s524_s4 + $0x48] sm:$0xff] %vm274_vm1, %v267_v28  ;;  %v238_v33 = vmul.f32 %v337_v31, %v311_v17  ;;  %v246_v34 = vmul.f32 %v349_v32, %v311_v17  ;;  %v159_v35 = vpop.f32.mrb[3].mxu0  ;;  %v199_v36 = vpop.f32.mrb[3].mxu1 }
  0xde   :  { %275 = vst.msk [vmem:[%s524_s4] sm:$0xff] %vm274_vm1, %v258_v29  ;;  %283 = vst.msk [vmem:[%s524_s4 + $0x40] sm:$0xff] %vm274_vm1, %v266_v30  ;;  %v237_v37 = vmul.f32 %v311_v17, %v159_v35  ;;  %v245_v38 = vmul.f32 %v311_v17, %v199_v36 }
  0xdf   :  { %v261_v39 = vadd.f32 %v312_v19, %v238_v33  ;;  %v269_v40 = vadd.f32 %v312_v19, %v246_v34 }
  0xe0   :  { %v260_v41 = vadd.f32 %v312_v19, %v237_v37  ;;  %v268_v42 = vadd.f32 %v312_v19, %v245_v38  ;;  %v340_v43 = vpop.f32.mrb[4].mxu0  ;;  %v352_v44 = vpop.f32.mrb[4].mxu1 }
  0xe1   :  { %278 = vst.msk [vmem:[%s524_s4 + $0x18] sm:$0xff] %vm274_vm1, %v261_v39  ;;  %286 = vst.msk [vmem:[%s524_s4 + $0x58] sm:$0xff] %vm274_vm1, %v269_v40  ;;  %v240_v45 = vmul.f32 %v340_v43, %v311_v17  ;;  %v248_v46 = vmul.f32 %v352_v44, %v311_v17  ;;  %v169_v47 = vpop.f32.mrb[5].mxu0  ;;  %v209_v48 = vpop.f32.mrb[5].mxu1 }
  0xe2   :  { %277 = vst.msk [vmem:[%s524_s4 + $0x10] sm:$0xff] %vm274_vm1, %v260_v41  ;;  %285 = vst.msk [vmem:[%s524_s4 + $0x50] sm:$0xff] %vm274_vm1, %v268_v42  ;;  %v239_v49 = vmul.f32 %v311_v17, %v169_v47  ;;  %v247_v50 = vmul.f32 %v311_v17, %v209_v48 }
  0xe3   :  { %v263_v51 = vadd.f32 %v312_v19, %v240_v45  ;;  %v271_v52 = vadd.f32 %v312_v19, %v248_v46 }
  0xe4   :  { %v262_v53 = vadd.f32 %v312_v19, %v239_v49  ;;  %v270_v54 = vadd.f32 %v312_v19, %v247_v50  ;;  %v343_v55 = vpop.f32.mrb[6].mxu0  ;;  %v355_v56 = vpop.f32.mrb[6].mxu1 }
  0xe5   :  { %280 = vst.msk [vmem:[%s524_s4 + $0x28] sm:$0xff] %vm274_vm1, %v263_v51  ;;  %288 = vst.msk [vmem:[%s524_s4 + $0x68] sm:$0xff] %vm274_vm1, %v271_v52  ;;  %v242_v57 = vmul.f32 %v343_v55, %v311_v17  ;;  %v250_v58 = vmul.f32 %v355_v56, %v311_v17  ;;  %v179_v59 = vpop.f32.mrb[7].mxu0  ;;  %v219_v60 = vpop.f32.mrb[7].mxu1 }
  0xe6   :  { %279 = vst.msk [vmem:[%s524_s4 + $0x20] sm:$0xff] %vm274_vm1, %v262_v53  ;;  %287 = vst.msk [vmem:[%s524_s4 + $0x60] sm:$0xff] %vm274_vm1, %v270_v54  ;;  %v241_v61 = vmul.f32 %v311_v17, %v179_v59  ;;  %v249_v62 = vmul.f32 %v311_v17, %v219_v60 }
  0xe7   :  { %v265_v63 = vadd.f32 %v312_v19, %v242_v57  ;;  %v273_v0 = vadd.f32 %v312_v19, %v250_v58 }
  0xe8   :  { %v264_v1 = vadd.f32 %v312_v19, %v241_v61  ;;  %v272_v2 = vadd.f32 %v312_v19, %v249_v62 }
  0xe9   :  { %282 = vst.msk [vmem:[%s524_s4 + $0x38] sm:$0xff] %vm274_vm1, %v265_v63  ;;  %290 = vst.msk [vmem:[%s524_s4 + $0x78] sm:$0xff] %vm274_vm1, %v273_v0 }
  0xea   :  { %281 = vst.msk [vmem:[%s524_s4 + $0x30] sm:$0xff] %vm274_vm1, %v264_v1  ;;  %289 = vst.msk [vmem:[%s524_s4 + $0x70] sm:$0xff] %vm274_vm1, %v272_v2 }

// kernel: _lambda_.29
= control target key start
LH: loop header
LB: loop body
LE: loop exit
PB: predicated region body
PF: predicated region fallthrough
CT: control target
= control target key end

     0   :  { %s962_s18 = smov 0   ;;  %s964_s19 = smov 0   ;;  %s1221_s0 = inlined_call_operand.vmem [shape: f32[4,128,4], index: 0, kind: input, shape index: {}]   ;;  %s1222_s1 = inlined_call_operand.vmem [shape: f32[4,4,32], index: 1, kind: input, shape index: {}]   ;;  %s1223_s2 = inlined_call_operand.vmem [shape: f32[1,32], index: 2, kind: input, shape index: {}]   ;;  %s1224_s3 = inlined_call_operand.vmem [shape: f32[1,32], index: 3, kind: input, shape index: {}]   ;;  %s1225_s4 = inlined_call_operand.vmem [shape: f32[128,32], index: 4, kind: input, shape index: {}]   ;;  %s1226_s5 = inlined_call_operand.vmem [shape: f32[128,32], index: 5, kind: output, shape index: {}]  }
   0x1   :  { %s966_s20 = smov 0  }
   0x2 LB: > { %s24_s21 = sadd.s32 1, %s925_s19  ;;  %p807_p0 = scmp.ge.s32.totalorder %s929_s20, 1  ;;  %s929_s20 = sphi %s966_s20, %s15_s20   ;;  %s925_s19 = sphi %s964_s19, %s1228_s19   ;;  %s921_s18 = sphi %s962_s18, %s1227_s18  }
   0x3   : > { %p25_p1 = scmp.ge.s32.totalorder %s24_s21, 4  ;;  %p226_p2 = scmp.lt.s32.totalorder %s929_s20, 5 }
   0x5   : > { %s1230_s21 = smov (%p25_p1, %s24_s21), 0  ;;  %p227_p3 = pnand %p807_p0, %p226_p2 }
   0x6   : > { %p268_p4 = scmp.lt.s32.totalorder (!%p227_p3), %s921_s18, 3  ;;  %p811_p5 = scmp.ne.s32.totalorder (!%p227_p3), %s921_s18, 0 }
   0x7   : > { %230 = sbr.rel (%p227_p3) target bundleno = 273 (0x111), region = 40 }
   0xe   : > { %s269_s22 = scalar_select %p268_p4, %s921_s18, 3 }
   0xf   : > { %296 = sbr.rel (%p811_p5) target bundleno = 24 (0x18), region = 44  ;;  %vm297_vm0 = vcmask (!%p811_p5), 261120   ;;  %v931_v0 = vmov (!%p811_p5), 0.0  }
  0x10   : > { %s836_s23 = sshll.u32 %s269_s22, 7  ;;  %s810_s24 = sshll.u32 %s269_s22, 2  ;;  %298 = vst.msk [vmem:[#allocation2] sm:$0xff] (!%p811_p5), %vm297_vm0, %v931_v0  ;;  %299 = vst.msk [vmem:[#allocation2 + $0x8] sm:$0xff] (!%p811_p5), %vm297_vm0, %v931_v0 }
  0x11   : > { %s987_s27 = scalar_lea.vmem %s1221_s0, %s836_s23  ;;  %s280_s30 = scalar_lea.vmem %s1222_s1, %s810_s24  ;;  %300 = vst.msk [vmem:[#allocation2 + $0x10] sm:$0xff] (!%p811_p5), %vm297_vm0, %v931_v0  ;;  %301 = vst.msk [vmem:[#allocation2 + $0x18] sm:$0xff] (!%p811_p5), %vm297_vm0, %v931_v0 }
  0x12   : > { %302 = vst.msk [vmem:[#allocation2 + $0x20] sm:$0xff] (!%p811_p5), %vm297_vm0, %v931_v0  ;;  %303 = vst.msk [vmem:[#allocation2 + $0x28] sm:$0xff] (!%p811_p5), %vm297_vm0, %v931_v0 }
  0x13   : > { %304 = vst.msk [vmem:[#allocation2 + $0x30] sm:$0xff] (!%p811_p5), %vm297_vm0, %v931_v0  ;;  %305 = vst.msk [vmem:[#allocation2 + $0x38] sm:$0xff] (!%p811_p5), %vm297_vm0, %v931_v0 }
  0x14   : > { %306 = vst.msk [vmem:[#allocation2 + $0x40] sm:$0xff] (!%p811_p5), %vm297_vm0, %v931_v0  ;;  %307 = vst.msk [vmem:[#allocation2 + $0x48] sm:$0xff] (!%p811_p5), %vm297_vm0, %v931_v0 }
  0x15   : > { %308 = vst.msk [vmem:[#allocation2 + $0x50] sm:$0xff] (!%p811_p5), %vm297_vm0, %v931_v0  ;;  %309 = vst.msk [vmem:[#allocation2 + $0x58] sm:$0xff] (!%p811_p5), %vm297_vm0, %v931_v0 }
  0x16   : > { %310 = vst.msk [vmem:[#allocation2 + $0x60] sm:$0xff] %vm297_vm0, %v931_v0  ;;  %311 = vst.msk [vmem:[#allocation2 + $0x68] sm:$0xff] %vm297_vm0, %v931_v0 }
  0x17   : > { %312 = vst.msk [vmem:[#allocation2 + $0x70] sm:$0xff] %vm297_vm0, %v931_v0  ;;  %313 = vst.msk [vmem:[#allocation2 + $0x78] sm:$0xff] %vm297_vm0, %v931_v0 }
  0x18 PF: > { %v346_v1 = vld [vmem:[%s280_s30] sm:$0xf]  ;;  %vm396_vm1 = vcmask 1043456   ;;  %vm347_vm2 = vcmask 31744   ;;  %v331_v4 = vld [vmem:[%s987_s27 + $0x8] sm:$0xff]  ;;  %v332_v6 = vld [vmem:[%s987_s27 + $0x10] sm:$0xff] }
  0x19   : > { %v330_v2 = vld [vmem:[%s987_s27] sm:$0xff]  ;;  %854 = vmatprep.subr.msk.mxu0 %vm396_vm1, %v346_v1  ;;  %880 = vmatprep.subr.msk.mxu1 %vm396_vm1, %v346_v1  ;;  %v339_v5 = vld [vmem:[%s987_s27 + $0x48] sm:$0xff]  ;;  %v340_v7 = vld [vmem:[%s987_s27 + $0x50] sm:$0xff]  ;;  %vm561_vm3 = vcmask 261120   ;;  %p829_p6 = scmp.ne.s32.totalorder %s921_s18, 3 }
  0x1a   : > { %v338_v3 = vld [vmem:[%s987_s27 + $0x40] sm:$0xff]  ;;  %855 = vmatpush3.msk.msra.mxu0 %vm396_vm1, %v346_v1  ;;  %881 = vmatpush3.msk.msra.mxu1 %vm396_vm1, %v346_v1  ;;  %v333_v8 = vld [vmem:[%s987_s27 + $0x18] sm:$0xff]  ;;  %v335_v12 = vld [vmem:[%s987_s27 + $0x28] sm:$0xff] }
  0x1b   : > { %856 = vmatprep.mubr.msk.f32.mxu0 %vm347_vm2, %v330_v2  ;;  %868 = vmatprep.mubr.msk.f32.mxu1 %vm347_vm2, %v338_v3  ;;  %v341_v9 = vld [vmem:[%s987_s27 + $0x58] sm:$0xff]  ;;  %v334_v10 = vld [vmem:[%s987_s27 + $0x20] sm:$0xff]  ;;  %v343_v13 = vld [vmem:[%s987_s27 + $0x68] sm:$0xff] }
  0x1c   : > { %857 = vmatmul.mubr.msk.f32.vlgmr.msra.gmra.mrb[0].mxu0 %vm347_vm2, %v331_v4  ;;  %869 = vmatmul.mubr.msk.f32.vlgmr.msra.gmra.mrb[0].mxu1 %vm347_vm2, %v339_v5  ;;  %v342_v11 = vld [vmem:[%s987_s27 + $0x60] sm:$0xff]  ;;  %v336_v14 = vld [vmem:[%s987_s27 + $0x30] sm:$0xff]  ;;  %v337_v16 = vld [vmem:[%s987_s27 + $0x38] sm:$0xff] }
  0x1d   : > { %859 = vmatprep.mubr.msk.f32.mxu0 %vm347_vm2, %v332_v6  ;;  %871 = vmatprep.mubr.msk.f32.mxu1 %vm347_vm2, %v340_v7  ;;  %v344_v15 = vld [vmem:[%s987_s27 + $0x70] sm:$0xff]  ;;  %v345_v17 = vld [vmem:[%s987_s27 + $0x78] sm:$0xff]  ;;  %v315_v18 = vld [vmem:[#allocation2 + $0x8] sm:$0xff] }
  0x1e   : > { %v323_v19 = vld [vmem:[#allocation2 + $0x48] sm:$0xff]  ;;  %v314_v20 = vld [vmem:[#allocation2] sm:$0xff]  ;;  %v317_v30 = vld [vmem:[#allocation2 + $0x18] sm:$0xff] }
  0x1f   : > { %v322_v21 = vld [vmem:[#allocation2 + $0x40] sm:$0xff]  ;;  %v325_v31 = vld [vmem:[#allocation2 + $0x58] sm:$0xff]  ;;  %v316_v32 = vld [vmem:[#allocation2 + $0x10] sm:$0xff] }
  0x20   : > { %860 = vmatmul.mubr.msk.f32.gmra.mrb[2].mxu0 %vm347_vm2, %v333_v8  ;;  %872 = vmatmul.mubr.msk.f32.gmra.mrb[2].mxu1 %vm347_vm2, %v341_v9  ;;  %v324_v33 = vld [vmem:[#allocation2 + $0x50] sm:$0xff]  ;;  %v319_v42 = vld [vmem:[#allocation2 + $0x28] sm:$0xff]  ;;  %v318_v44 = vld [vmem:[#allocation2 + $0x20] sm:$0xff] }
  0x21   : > { %862 = vmatprep.mubr.msk.f32.mxu0 %vm347_vm2, %v334_v10  ;;  %874 = vmatprep.mubr.msk.f32.mxu1 %vm347_vm2, %v342_v11  ;;  %v327_v43 = vld [vmem:[#allocation2 + $0x68] sm:$0xff]  ;;  %v326_v45 = vld [vmem:[#allocation2 + $0x60] sm:$0xff]  ;;  %v321_v54 = vld [vmem:[#allocation2 + $0x38] sm:$0xff] }
  0x22   : > { %v329_v55 = vld [vmem:[#allocation2 + $0x78] sm:$0xff]  ;;  %v320_v56 = vld [vmem:[#allocation2 + $0x30] sm:$0xff]  ;;  %v1061_v3 = vld [vmem:[%s1223_s2] ss:$0 sm:$0xff] (!%p829_p6) }
  0x23   : > { %v328_v57 = vld [vmem:[#allocation2 + $0x70] sm:$0xff]  ;;  %v1066_v4 = vld [vmem:[%s1224_s3] ss:$0 sm:$0xff] (!%p829_p6) }
  0x24   : > { %863 = vmatmul.mubr.msk.f32.gmra.mrb[4].mxu0 %vm347_vm2, %v335_v12  ;;  %875 = vmatmul.mubr.msk.f32.gmra.mrb[4].mxu1 %vm347_vm2, %v343_v13  ;;  %v644_v7 = vld [vmem:[%s1225_s4] sm:$0xff] (!%p829_p6)  ;;  %v645_v12 = vld [vmem:[%s1225_s4 + $0x8] sm:$0xff] (!%p829_p6) }
  0x25   : > { %865 = vmatprep.mubr.msk.f32.mxu0 %vm347_vm2, %v336_v14  ;;  %877 = vmatprep.mubr.msk.f32.mxu1 %vm347_vm2, %v344_v15  ;;  %v646_v14 = vld [vmem:[%s1225_s4 + $0x10] sm:$0xff] (!%p829_p6) }
  0x28   : > { %866 = vmatmul.mubr.msk.f32.gmra.mrb[6].mxu0 %vm347_vm2, %v337_v16  ;;  %878 = vmatmul.mubr.msk.f32.gmra.mrb[6].mxu1 %vm347_vm2, %v345_v17 }
  0xef   : > { %v858_v22 = vpop.f32.mrb[0].mxu0  ;;  %v870_v23 = vpop.f32.mrb[0].mxu1 }
  0xf0   : > { %v546_v24 = vadd.f32 %v858_v22, %v315_v18  ;;  %v554_v25 = vadd.f32 %v870_v23, %v323_v19  ;;  %v466_v26 = vpop.f32.mrb[1].mxu0  ;;  %v506_v27 = vpop.f32.mrb[1].mxu1  ;;  %v647_v18 = vld [vmem:[%s1225_s4 + $0x18] sm:$0xff] (!%p829_p6) }
  0xf1   : > { %v545_v28 = vadd.f32 %v466_v26, %v314_v20  ;;  %v553_v29 = vadd.f32 %v506_v27, %v322_v21 }
  0xf2   : > { %563 = vst.msk [vmem:[#allocation2 + $0x8] sm:$0xff] %vm561_vm3, %v546_v24  ;;  %571 = vst.msk [vmem:[#allocation2 + $0x48] sm:$0xff] %vm561_vm3, %v554_v25  ;;  %v648_v25 = vld [vmem:[%s1225_s4 + $0x20] sm:$0xff] (!%p829_p6) }
  0xf3   : > { %562 = vst.msk [vmem:[#allocation2] sm:$0xff] %vm561_vm3, %v545_v28  ;;  %570 = vst.msk [vmem:[#allocation2 + $0x40] sm:$0xff] %vm561_vm3, %v553_v29  ;;  %v861_v34 = vpop.f32.mrb[2].mxu0  ;;  %v873_v35 = vpop.f32.mrb[2].mxu1 }
  0xf4   : > { %v548_v36 = vadd.f32 %v861_v34, %v317_v30  ;;  %v556_v37 = vadd.f32 %v873_v35, %v325_v31  ;;  %v476_v38 = vpop.f32.mrb[3].mxu0  ;;  %v516_v39 = vpop.f32.mrb[3].mxu1  ;;  %v649_v30 = vld [vmem:[%s1225_s4 + $0x28] sm:$0xff] (!%p829_p6) }
  0xf5   : > { %v547_v40 = vadd.f32 %v476_v38, %v316_v32  ;;  %v555_v41 = vadd.f32 %v516_v39, %v324_v33  ;;  %v650_v38 = vld [vmem:[%s1225_s4 + $0x30] sm:$0xff] (!%p829_p6)  ;;  %v651_v39 = vld [vmem:[%s1225_s4 + $0x38] sm:$0xff] (!%p829_p6) }
  0xf6   : > { %565 = vst.msk [vmem:[#allocation2 + $0x18] sm:$0xff] %vm561_vm3, %v548_v36  ;;  %573 = vst.msk [vmem:[#allocation2 + $0x58] sm:$0xff] %vm561_vm3, %v556_v37 }
  0xf7   : > { %564 = vst.msk [vmem:[#allocation2 + $0x10] sm:$0xff] %vm561_vm3, %v547_v40  ;;  %572 = vst.msk [vmem:[#allocation2 + $0x50] sm:$0xff] %vm561_vm3, %v555_v41  ;;  %v864_v46 = vpop.f32.mrb[4].mxu0  ;;  %v876_v47 = vpop.f32.mrb[4].mxu1 }
  0xf8   : > { %v550_v48 = vadd.f32 %v864_v46, %v319_v42  ;;  %v558_v49 = vadd.f32 %v876_v47, %v327_v43  ;;  %v486_v50 = vpop.f32.mrb[5].mxu0  ;;  %v526_v51 = vpop.f32.mrb[5].mxu1 }
  0xf9   : > { %v549_v52 = vadd.f32 %v486_v50, %v318_v44  ;;  %v557_v53 = vadd.f32 %v526_v51, %v326_v45  ;;  %581 = sbr.rel (%p829_p6) target bundleno = 273 (0x111), region = 48  ;;  %v583_v6 = vld [vmem:[#allocation2 + $0x8] sm:$0xff] (!%p829_p6) }
  0xfa   : > { %567 = vst.msk [vmem:[#allocation2 + $0x28] sm:$0xff] %vm561_vm3, %v550_v48  ;;  %575 = vst.msk [vmem:[#allocation2 + $0x68] sm:$0xff] %vm561_vm3, %v558_v49  ;;  %v582_v2 = vld [vmem:[#allocation2] sm:$0xff] (!%p829_p6)  ;;  %v606_v8 = vmul.f32 (!%p829_p6), %v1061_v3, %v583_v6  ;;  %v591_v40 = vld [vmem:[#allocation2 + $0x48] sm:$0xff] (!%p829_p6) }
  0xfb   : > { %566 = vst.msk [vmem:[#allocation2 + $0x20] sm:$0xff] %vm561_vm3, %v549_v52  ;;  %574 = vst.msk [vmem:[#allocation2 + $0x60] sm:$0xff] %vm561_vm3, %v557_v53  ;;  %v867_v58 = vpop.f32.mrb[6].mxu0  ;;  %v879_v59 = vpop.f32.mrb[6].mxu1  ;;  %v605_v5 = vmul.f32 (!%p829_p6), %v1061_v3, %v582_v2  ;;  %v590_v33 = vld [vmem:[#allocation2 + $0x40] sm:$0xff] (!%p829_p6)  ;;  %v654_v6 = vld [vmem:[%s1225_s4 + $0x50] sm:$0xff] (!%p829_p6) }
  0xfc   : > { %v552_v60 = vadd.f32 %v867_v58, %v321_v54  ;;  %v560_v61 = vadd.f32 %v879_v59, %v329_v55  ;;  %v496_v62 = vpop.f32.mrb[7].mxu0  ;;  %v536_v63 = vpop.f32.mrb[7].mxu1  ;;  %v629_v17 = vadd.f32 (!%p829_p6), %v1066_v4, %v606_v8  ;;  %v613_v50 = vmul.f32 (!%p829_p6), %v1061_v3, %v590_v33  ;;  %v652_v55 = vld [vmem:[%s1225_s4 + $0x40] sm:$0xff] (!%p829_p6) }
  0xfd   : > { %v551_v0 = vadd.f32 %v496_v62, %v320_v56  ;;  %v559_v1 = vadd.f32 %v536_v63, %v328_v57  ;;  %v585_v10 = vld [vmem:[#allocation2 + $0x18] sm:$0xff] (!%p829_p6)  ;;  %v628_v11 = vadd.f32 (!%p829_p6), %v1066_v4, %v605_v5  ;;  %v614_v56 = vmul.f32 (!%p829_p6), %v1061_v3, %v591_v40 }
  0xfe   : > { %569 = vst.msk [vmem:[#allocation2 + $0x38] sm:$0xff] %vm561_vm3, %v552_v60  ;;  %577 = vst.msk [vmem:[#allocation2 + $0x78] sm:$0xff] %vm561_vm3, %v560_v61  ;;  %v584_v9 = vld [vmem:[#allocation2 + $0x10] sm:$0xff] (!%p829_p6)  ;;  %v608_v15 = vmul.f32 (!%p829_p6), %v1061_v3, %v585_v10  ;;  %v661_v28 = vadd.f32 (!%p829_p6), %v645_v12, %v629_v17  ;;  %v593_v46 = vld [vmem:[#allocation2 + $0x58] sm:$0xff] (!%p829_p6)  ;;  %v636_v59 = vadd.f32 (!%p829_p6), %v1066_v4, %v613_v50 }
  0xff   : > { %568 = vst.msk [vmem:[#allocation2 + $0x30] sm:$0xff] %vm561_vm3, %v551_v0  ;;  %576 = vst.msk [vmem:[#allocation2 + $0x70] sm:$0xff] %vm561_vm3, %v559_v1  ;;  %v607_v13 = vmul.f32 (!%p829_p6), %v1061_v3, %v584_v9  ;;  %v660_v22 = vadd.f32 (!%p829_p6), %v644_v7, %v628_v11  ;;  %v592_v45 = vld [vmem:[#allocation2 + $0x50] sm:$0xff] (!%p829_p6)  ;;  %v653_v60 = vld [vmem:[%s1225_s4 + $0x48] sm:$0xff] (!%p829_p6)  ;;  %v616_v62 = vmul.f32 (!%p829_p6), %v1061_v3, %v593_v46 }
 0x100   : > { %v631_v24 = vadd.f32 %v1066_v4, %v608_v15  ;;  %v677_v41 = vmax.f32 %v661_v28, 0.0  ;;  %v615_v61 = vmul.f32 %v1061_v3, %v592_v45  ;;  %v637_v5 = vadd.f32 %v1066_v4, %v614_v56  ;;  %v655_v7 = vld [vmem:[%s1225_s4 + $0x58] sm:$0xff]  ;;  %v656_v12 = vld [vmem:[%s1225_s4 + $0x60] sm:$0xff] }
 0x101   : > { %v587_v20 = vld [vmem:[#allocation2 + $0x28] sm:$0xff]  ;;  %v630_v23 = vadd.f32 %v1066_v4, %v607_v13  ;;  %v676_v34 = vmax.f32 %v660_v22, 0.0  ;;  %v668_v9 = vadd.f32 %v652_v55, %v636_v59  ;;  %v639_v11 = vadd.f32 %v1066_v4, %v616_v62 }
 0x102   : > { %v586_v16 = vld [vmem:[#allocation2 + $0x20] sm:$0xff]  ;;  %v610_v26 = vmul.f32 %v1061_v3, %v587_v20  ;;  %v663_v36 = vadd.f32 %v647_v18, %v631_v24  ;;  %693 = vst.msk [vmem:[%s1226_s5 + $0x8] sm:$0xff] %vm561_vm3, %v677_v41  ;;  %v595_v57 = vld [vmem:[#allocation2 + $0x68] sm:$0xff]  ;;  %v638_v10 = vadd.f32 %v1066_v4, %v615_v61  ;;  %v659_v24 = vld [vmem:[%s1225_s4 + $0x78] sm:$0xff] }
 0x103   : > { %v609_v19 = vmul.f32 %v1061_v3, %v586_v16  ;;  %v662_v35 = vadd.f32 %v646_v14, %v630_v23  ;;  %692 = vst.msk [vmem:[%s1226_s5] sm:$0xff] %vm561_vm3, %v676_v34  ;;  %v594_v51 = vld [vmem:[#allocation2 + $0x60] sm:$0xff]  ;;  %v618_v13 = vmul.f32 %v1061_v3, %v595_v57  ;;  %v669_v14 = vadd.f32 %v653_v60, %v637_v5  ;;  %v657_v16 = vld [vmem:[%s1225_s4 + $0x68] sm:$0xff]  ;;  %v658_v23 = vld [vmem:[%s1225_s4 + $0x70] sm:$0xff] }
 0x104   : > { %v633_v37 = vadd.f32 %v1066_v4, %v610_v26  ;;  %v679_v48 = vmax.f32 %v663_v36, 0.0  ;;  %v617_v8 = vmul.f32 %v1061_v3, %v594_v51  ;;  %v670_v20 = vadd.f32 %v654_v6, %v638_v10 }
 0x105   : > { %v589_v27 = vld [vmem:[#allocation2 + $0x38] sm:$0xff]  ;;  %v632_v29 = vadd.f32 %v1066_v4, %v609_v19  ;;  %v678_v47 = vmax.f32 %v662_v35, 0.0  ;;  %v684_v19 = vmax.f32 %v668_v9, 0.0  ;;  %v641_v22 = vadd.f32 %v1066_v4, %v618_v13 }
 0x106   : > { %v588_v21 = vld [vmem:[#allocation2 + $0x30] sm:$0xff]  ;;  %v612_v32 = vmul.f32 %v1061_v3, %v589_v27  ;;  %v665_v49 = vadd.f32 %v649_v30, %v633_v37  ;;  %695 = vst.msk [vmem:[%s1226_s5 + $0x18] sm:$0xff] %vm561_vm3, %v679_v48  ;;  %v597_v0 = vld [vmem:[#allocation2 + $0x78] sm:$0xff]  ;;  %v640_v15 = vadd.f32 %v1066_v4, %v617_v8 }
 0x107   : > { %v611_v31 = vmul.f32 %v1061_v3, %v588_v21  ;;  %v664_v42 = vadd.f32 %v648_v25, %v632_v29  ;;  %694 = vst.msk [vmem:[%s1226_s5 + $0x10] sm:$0xff] %vm561_vm3, %v678_v47  ;;  %v596_v63 = vld [vmem:[#allocation2 + $0x70] sm:$0xff]  ;;  %v620_v18 = vmul.f32 %v1061_v3, %v597_v0  ;;  %v671_v21 = vadd.f32 %v655_v7, %v639_v11 }
 0x108   : > { %v635_v44 = vadd.f32 %v1066_v4, %v612_v32  ;;  %v681_v58 = vmax.f32 %v665_v49, 0.0  ;;  %v619_v17 = vmul.f32 %v1061_v3, %v596_v63  ;;  %v685_v25 = vmax.f32 %v669_v14, 0.0  ;;  %700 = vst.msk [vmem:[%s1226_s5 + $0x40] sm:$0xff] %vm561_vm3, %v684_v19 }
 0x109   : > { %v634_v43 = vadd.f32 %v1066_v4, %v611_v31  ;;  %v680_v52 = vmax.f32 %v664_v42, 0.0  ;;  %v672_v26 = vadd.f32 %v656_v12, %v640_v15  ;;  %v643_v28 = vadd.f32 %v1066_v4, %v620_v18 }
 0x10a   : > { %v667_v54 = vadd.f32 %v651_v39, %v635_v44  ;;  %697 = vst.msk [vmem:[%s1226_s5 + $0x28] sm:$0xff] %vm561_vm3, %v681_v58  ;;  %v642_v27 = vadd.f32 %v1066_v4, %v619_v17  ;;  %v686_v3 = vmax.f32 %v670_v20, 0.0  ;;  %v687_v29 = vmax.f32 %v671_v21, 0.0  ;;  %701 = vst.msk [vmem:[%s1226_s5 + $0x48] sm:$0xff] %vm561_vm3, %v685_v25 }
 0x10b   : > { %v666_v53 = vadd.f32 %v650_v38, %v634_v43  ;;  %696 = vst.msk [vmem:[%s1226_s5 + $0x20] sm:$0xff] %vm561_vm3, %v680_v52  ;;  %v673_v30 = vadd.f32 %v657_v16, %v641_v22  ;;  %v688_v31 = vmax.f32 %v672_v26, 0.0  ;;  %v675_v33 = vadd.f32 %v659_v24, %v643_v28 }
 0x10c   : > { %v683_v2 = vmax.f32 %v667_v54, 0.0  ;;  %v674_v32 = vadd.f32 %v658_v23, %v642_v27  ;;  %702 = vst.msk [vmem:[%s1226_s5 + $0x50] sm:$0xff] %vm561_vm3, %v686_v3  ;;  %703 = vst.msk [vmem:[%s1226_s5 + $0x58] sm:$0xff] %vm561_vm3, %v687_v29 }
 0x10d   : > { %v682_v1 = vmax.f32 %v666_v53, 0.0  ;;  %v689_v4 = vmax.f32 %v673_v30, 0.0  ;;  %704 = vst.msk [vmem:[%s1226_s5 + $0x60] sm:$0xff] %vm561_vm3, %v688_v31  ;;  %v691_v35 = vmax.f32 %v675_v33, 0.0 }
 0x10e   : > { %699 = vst.msk [vmem:[%s1226_s5 + $0x38] sm:$0xff] %vm561_vm3, %v683_v2  ;;  %v690_v34 = vmax.f32 %v674_v32, 0.0 }
 0x10f   : > { %698 = vst.msk [vmem:[%s1226_s5 + $0x30] sm:$0xff] %vm561_vm3, %v682_v1  ;;  %705 = vst.msk [vmem:[%s1226_s5 + $0x68] sm:$0xff] %vm561_vm3, %v689_v4 }
 0x110   : > { %706 = vst.msk [vmem:[%s1226_s5 + $0x70] sm:$0xff] %vm561_vm3, %v690_v34  ;;  %707 = vst.msk [vmem:[%s1226_s5 + $0x78] sm:$0xff] %vm561_vm3, %v691_v35 }
 0x111 PF: > { %s15_s20 = sadd.s32 1, %s929_s20   ;;  %s1227_s18 = smov %s925_s19 }
 0x112   : > { %p12_p7 = scmp.ge.s32.totalorder %s15_s20, 6   ;;  %s1228_s19 = smov %s1230_s21 }
 0x114   :  { %14 = sbr.rel (!%p12_p7) target bundleno = 2 (0x2), region = 84 }

// kernel: _lambda_.30
= control target key start
LH: loop header
LB: loop body
LE: loop exit
PB: predicated region body
PF: predicated region fallthrough
CT: control target
= control target key end

     0   :  { %vm31_vm0 = vcmask 261120   ;;  %s480_s1 = inlined_call_operand.vmem [shape: f32[32,32], index: 1, kind: input, shape index: {}]   ;;  %s481_s0 = inlined_call_operand.vmem [shape: f32[128,32], index: 0, kind: input, shape index: {}]   ;;  %s482_s2 = inlined_call_operand.vmem [shape: f32[128,32], index: 2, kind: output, shape index: {}]  }
   0x1   :  { %v27_v0 = vld [vmem:[%s480_s1] sm:$0xff]  ;;  %v28_v1 = vld [vmem:[%s480_s1 + $0x8] sm:$0xff]  ;;  %v29_v2 = vld [vmem:[%s480_s1 + $0x10] sm:$0xff] }
   0x2   :  { %v313_v3 = vpack.c.bf16 %v28_v1, %v27_v0  ;;  %v30_v4 = vld [vmem:[%s480_s1 + $0x18] sm:$0xff]  ;;  %v11_v5 = vld [vmem:[%s481_s0] sm:$0xff]  ;;  %v12_v8 = vld [vmem:[%s481_s0 + $0x8] sm:$0xff] }
   0x3   :  { %v19_v6 = vld [vmem:[%s481_s0 + $0x40] sm:$0xff]  ;;  %v317_v7 = vpack.c.bf16 %v30_v4, %v29_v2  ;;  %289 = vmatprep.mubr.msk.f32.mxu0 %vm31_vm0, %v11_v5  ;;  %v20_v9 = vld [vmem:[%s481_s0 + $0x48] sm:$0xff]  ;;  %v13_v10 = vld [vmem:[%s481_s0 + $0x10] sm:$0xff] }
   0x4   :  { %301 = vmatprep.mubr.msk.f32.mxu1 %vm31_vm0, %v19_v6  ;;  %314 = vmatprep.subr.bf16.mxu0 %v313_v3  ;;  %v21_v11 = vld [vmem:[%s481_s0 + $0x50] sm:$0xff]  ;;  %v14_v12 = vld [vmem:[%s481_s0 + $0x18] sm:$0xff]  ;;  %v15_v14 = vld [vmem:[%s481_s0 + $0x20] sm:$0xff] }
   0x5   :  { %321 = vmatprep.subr.bf16.mxu1 %v313_v3  ;;  %316 = vmatpush3.bf16.msra.mxu0 %v313_v3  ;;  %v22_v13 = vld [vmem:[%s481_s0 + $0x58] sm:$0xff]  ;;  %v23_v15 = vld [vmem:[%s481_s0 + $0x60] sm:$0xff]  ;;  %v16_v16 = vld [vmem:[%s481_s0 + $0x28] sm:$0xff] }
   0x6   :  { %323 = vmatpush3.bf16.msra.mxu1 %v313_v3  ;;  %318 = vmatprep.subr.bf16.mxu0 %v317_v7  ;;  %v24_v17 = vld [vmem:[%s481_s0 + $0x68] sm:$0xff]  ;;  %v17_v18 = vld [vmem:[%s481_s0 + $0x30] sm:$0xff]  ;;  %v18_v20 = vld [vmem:[%s481_s0 + $0x38] sm:$0xff] }
   0x7   :  { %322 = vmatprep.subr.bf16.mxu1 %v317_v7  ;;  %v25_v19 = vld [vmem:[%s481_s0 + $0x70] sm:$0xff]  ;;  %v26_v21 = vld [vmem:[%s481_s0 + $0x78] sm:$0xff] }
   0x9   :  { %320 = vmatpush3.bf16.msra.mxu0 %v317_v7 }
   0xa   :  { %324 = vmatpush3.bf16.msra.mxu1 %v317_v7 }
   0xc   :  { %290 = vmatmul.mubr.msk.f32.vlgmr.msra.gmra.mrb[0].mxu0 %vm31_vm0, %v12_v8 }
   0xd   :  { %302 = vmatmul.mubr.msk.f32.vlgmr.msra.gmra.mrb[0].mxu1 %vm31_vm0, %v20_v9  ;;  %292 = vmatprep.mubr.msk.f32.mxu0 %vm31_vm0, %v13_v10 }
   0xe   :  { %304 = vmatprep.mubr.msk.f32.mxu1 %vm31_vm0, %v21_v11 }
  0x10   :  { %293 = vmatmul.mubr.msk.f32.gmra.mrb[2].mxu0 %vm31_vm0, %v14_v12 }
  0x11   :  { %305 = vmatmul.mubr.msk.f32.gmra.mrb[2].mxu1 %vm31_vm0, %v22_v13  ;;  %295 = vmatprep.mubr.msk.f32.mxu0 %vm31_vm0, %v15_v14 }
  0x12   :  { %307 = vmatprep.mubr.msk.f32.mxu1 %vm31_vm0, %v23_v15 }
  0x14   :  { %296 = vmatmul.mubr.msk.f32.gmra.mrb[4].mxu0 %vm31_vm0, %v16_v16 }
  0x15   :  { %308 = vmatmul.mubr.msk.f32.gmra.mrb[4].mxu1 %vm31_vm0, %v24_v17  ;;  %298 = vmatprep.mubr.msk.f32.mxu0 %vm31_vm0, %v17_v18 }
  0x16   :  { %310 = vmatprep.mubr.msk.f32.mxu1 %vm31_vm0, %v25_v19 }
  0x18   :  { %299 = vmatmul.mubr.msk.f32.gmra.mrb[6].mxu0 %vm31_vm0, %v18_v20 }
  0x19   :  { %311 = vmatmul.mubr.msk.f32.gmra.mrb[6].mxu1 %vm31_vm0, %v26_v21 }
  0xdf   :  { %v291_v22 = vpop.f32.mrb[0].mxu0 }
  0xe0   :  { %v303_v23 = vpop.f32.mrb[0].mxu1  ;;  %226 = vst.msk [vmem:[%s482_s2 + $0x8] sm:$0xff] %vm31_vm0, %v291_v22  ;;  %v146_v24 = vpop.f32.mrb[1].mxu0 }
  0xe1   :  { %234 = vst.msk [vmem:[%s482_s2 + $0x48] sm:$0xff] %vm31_vm0, %v303_v23  ;;  %v186_v25 = vpop.f32.mrb[1].mxu1  ;;  %225 = vst.msk [vmem:[%s482_s2] sm:$0xff] %vm31_vm0, %v146_v24 }
  0xe2   :  { %233 = vst.msk [vmem:[%s482_s2 + $0x40] sm:$0xff] %vm31_vm0, %v186_v25 }
  0xe3   :  { %v294_v26 = vpop.f32.mrb[2].mxu0 }
  0xe4   :  { %v306_v27 = vpop.f32.mrb[2].mxu1  ;;  %228 = vst.msk [vmem:[%s482_s2 + $0x18] sm:$0xff] %vm31_vm0, %v294_v26  ;;  %v156_v28 = vpop.f32.mrb[3].mxu0 }
  0xe5   :  { %236 = vst.msk [vmem:[%s482_s2 + $0x58] sm:$0xff] %vm31_vm0, %v306_v27  ;;  %v196_v29 = vpop.f32.mrb[3].mxu1  ;;  %227 = vst.msk [vmem:[%s482_s2 + $0x10] sm:$0xff] %vm31_vm0, %v156_v28 }
  0xe6   :  { %235 = vst.msk [vmem:[%s482_s2 + $0x50] sm:$0xff] %vm31_vm0, %v196_v29 }
  0xe7   :  { %v297_v30 = vpop.f32.mrb[4].mxu0 }
  0xe8   :  { %v309_v31 = vpop.f32.mrb[4].mxu1  ;;  %230 = vst.msk [vmem:[%s482_s2 + $0x28] sm:$0xff] %vm31_vm0, %v297_v30  ;;  %v166_v32 = vpop.f32.mrb[5].mxu0 }
  0xe9   :  { %238 = vst.msk [vmem:[%s482_s2 + $0x68] sm:$0xff] %vm31_vm0, %v309_v31  ;;  %v206_v33 = vpop.f32.mrb[5].mxu1  ;;  %229 = vst.msk [vmem:[%s482_s2 + $0x20] sm:$0xff] %vm31_vm0, %v166_v32 }
  0xea   :  { %237 = vst.msk [vmem:[%s482_s2 + $0x60] sm:$0xff] %vm31_vm0, %v206_v33 }
  0xeb   :  { %v300_v34 = vpop.f32.mrb[6].mxu0 }
  0xec   :  { %v312_v35 = vpop.f32.mrb[6].mxu1  ;;  %232 = vst.msk [vmem:[%s482_s2 + $0x38] sm:$0xff] %vm31_vm0, %v300_v34  ;;  %v176_v36 = vpop.f32.mrb[7].mxu0 }
  0xed   :  { %240 = vst.msk [vmem:[%s482_s2 + $0x78] sm:$0xff] %vm31_vm0, %v312_v35  ;;  %v216_v37 = vpop.f32.mrb[7].mxu1  ;;  %231 = vst.msk [vmem:[%s482_s2 + $0x30] sm:$0xff] %vm31_vm0, %v176_v36 }
  0xee   :  { %239 = vst.msk [vmem:[%s482_s2 + $0x70] sm:$0xff] %vm31_vm0, %v216_v37 }

// kernel: _lambda_.31
= control target key start
LH: loop header
LB: loop body
LE: loop exit
PB: predicated region body
PF: predicated region fallthrough
CT: control target
= control target key end

     0   :  { %s527_s21 = smov 0   ;;  %s630_s0 = inlined_call_operand.vmem [shape: f32[2,64,32], index: 0, kind: input, shape index: {}]   ;;  %s631_s1 = inlined_call_operand.vmem [shape: f32[1,32], index: 1, kind: input, shape index: {}]   ;;  %s632_s2 = inlined_call_operand.vmem [shape: f32[1,32], index: 2, kind: input, shape index: {}]   ;;  %s633_s3 = inlined_call_operand.vmem [shape: f32[1,32], index: 3, kind: input, shape index: {}]   ;;  %s634_s4 = inlined_call_operand.vmem [shape: f32[1,32], index: 4, kind: input, shape index: {}]   ;;  %s635_s5 = inlined_call_operand.vmem [shape: f32[1,32], index: 5, kind: input, shape index: {}]   ;;  %s636_s6 = inlined_call_operand.vmem [shape: f32[2,64,32], index: 6, kind: output, shape index: {}]  }
   0x1 LB: > { %s459_s22 = sadd.s32 4294967295, %s490_s21   ;;  %p463_p0 = scmp.ge.s32.totalorder %s490_s21, 1  ;;  %s490_s21 = sphi %s527_s21, %s16_s21  }
   0x2   : > { %p212_p1 = scmp.lt.s32.totalorder %s490_s21, 3 }
   0x4   : > { %p213_p2 = pnand %p463_p0, %p212_p1 }
   0x5   : > { %p242_p3 = scmp.lt.s32.totalorder (!%p213_p2), %s459_s22, 1  ;;  %vm260_vm0 = vcmask (!%p213_p2), 261120  }
   0x6   : > { %216 = sbr.rel (%p213_p2) target bundleno = 107 (0x6b), region = 44 }
   0xd   : > { %s638_s22 = smov (!%p242_p3, %s459_s22), 1 }
   0xe   : > { %s472_s23 = sshll.u32 %s638_s22, 6 }
   0xf   : > { %s246_s26 = scalar_lea.vmem %s630_s0, %s472_s23  ;;  %s251_s15 = scalar_lea.vmem %s636_s6, %s472_s23 }
  0x10   : > { %v543_v0 = vld [vmem:[%s246_s26] sm:$0xff]  ;;  %v545_v1 = vld [vmem:[%s246_s26 + $0x8] sm:$0xff]  ;;  %v547_v2 = vld [vmem:[%s246_s26 + $0x10] sm:$0xff] }
  0x11   : > { %v549_v3 = vld [vmem:[%s246_s26 + $0x18] sm:$0xff]  ;;  %v261_v4 = vsel %vm260_vm0, %v543_v0, 0.0  ;;  %v262_v5 = vsel %vm260_vm0, %v545_v1, 0.0  ;;  %v264_v6 = vsel %vm260_vm0, %v547_v2, 0.0  ;;  %v557_v7 = vld [vmem:[%s246_s26 + $0x20] sm:$0xff]  ;;  %v561_v10 = vld [vmem:[%s246_s26 + $0x28] sm:$0xff] }
  0x12   : > { %v263_v8 = vadd.f32 %v262_v5, %v261_v4  ;;  %v266_v9 = vsel %vm260_vm0, %v549_v3, 0.0  ;;  %v268_v12 = vsel %vm260_vm0, %v557_v7, 0.0  ;;  %v565_v13 = vld [vmem:[%s246_s26 + $0x30] sm:$0xff]  ;;  %v270_v15 = vsel %vm260_vm0, %v561_v10, 0.0  ;;  %v569_v16 = vld [vmem:[%s246_s26 + $0x38] sm:$0xff] }
  0x13   : > { %v272_v18 = vsel %vm260_vm0, %v565_v13, 0.0  ;;  %v274_v20 = vsel %vm260_vm0, %v569_v16, 0.0 }
  0x14   : > { %v265_v11 = vadd.f32 %v264_v6, %v263_v8  ;;  %v322_v6 = vld [vmem:[%s635_s5] sm:$0x1] }
  0x15   : > { %vm323_vm1 = vcmp.gt.f32.partialorder %v322_v6, 0.5 }
  0x16   : > { %v267_v14 = vadd.f32 %v266_v9, %v265_v11  ;;  %v329_v9 = vlaneseq  ;;  %v326_v11 = vld [vmem:[%s634_s4] sm:$0x1] }
  0x18   : > { %v269_v17 = vadd.f32 %v268_v12, %v267_v14 }
  0x1a   : > { %v271_v19 = vadd.f32 %v270_v15, %v269_v17  ;;  %v330_v15 = vshrl.u32 %v329_v9, 7 }
  0x1c   : > { %v273_v21 = vadd.f32 %v272_v18, %v271_v19  ;;  %v324_v18 = vld [vmem:[%s633_s3] sm:$0x1]  ;;  %v331_v19 = vsub.s32 0, %v330_v15 }
  0x1e   : > { %v275_v22 = vadd.f32 %v274_v20, %v273_v21 }
  0x20   : > { %v276_v23 = vrot.slane %v275_v22, 4 }
  0x22   : > { %v277_v24 = vadd.f32 %v276_v23, %v275_v22 }
  0x24   : > { %v278_v25 = vrot.slane %v277_v24, 2 }
  0x26   : > { %v279_v26 = vadd.f32 %v278_v25, %v277_v24 }
  0x28   : > { %v280_v27 = vrot.slane %v279_v26, 1 }
  0x2a   : > { %v281_v28 = vadd.f32 %v280_v27, %v279_v26 }
  0x2c   : > { %v283_v29 = vmul.f32 0.015625, %v281_v28 }
  0x2e   : > { %v284_v30 = vsub.f32 %v543_v0, %v283_v29  ;;  %v285_v31 = vsub.f32 %v545_v1, %v283_v29  ;;  %v286_v32 = vsub.f32 %v547_v2, %v283_v29  ;;  %v287_v33 = vsub.f32 %v549_v3, %v283_v29 }
  0x2f   : > { %v288_v34 = vsub.f32 %v557_v7, %v283_v29  ;;  %v289_v35 = vsub.f32 %v561_v10, %v283_v29  ;;  %v290_v40 = vsub.f32 %v565_v13, %v283_v29  ;;  %v291_v46 = vsub.f32 %v569_v16, %v283_v29 }
  0x30   : > { %v292_v36 = vmul.f32 %v284_v30, %v284_v30  ;;  %v293_v37 = vmul.f32 %v285_v31, %v285_v31  ;;  %v294_v38 = vmul.f32 %v286_v32, %v286_v32  ;;  %v295_v39 = vmul.f32 %v287_v33, %v287_v33 }
  0x31   : > { %v296_v41 = vmul.f32 %v288_v34, %v288_v34  ;;  %v297_v47 = vmul.f32 %v289_v35, %v289_v35  ;;  %v298_v50 = vmul.f32 %v290_v40, %v290_v40  ;;  %v299_v53 = vmul.f32 %v291_v46, %v291_v46 }
  0x32   : > { %v300_v42 = vsel %vm260_vm0, %v292_v36, 0.0  ;;  %v301_v43 = vsel %vm260_vm0, %v293_v37, 0.0  ;;  %v303_v44 = vsel %vm260_vm0, %v294_v38, 0.0  ;;  %v305_v48 = vsel %vm260_vm0, %v295_v39, 0.0 }
  0x33   : > { %v302_v45 = vadd.f32 %v301_v43, %v300_v42  ;;  %v307_v51 = vsel %vm260_vm0, %v296_v41, 0.0  ;;  %v309_v54 = vsel %vm260_vm0, %v297_v47, 0.0  ;;  %v311_v56 = vsel %vm260_vm0, %v298_v50, 0.0 }
  0x34   : > { %v313_v58 = vsel %vm260_vm0, %v299_v53, 0.0  ;;  %v325_v20 = vsel %vm323_vm1, %v283_v29, %v324_v18 }
  0x35   : > { %v304_v49 = vadd.f32 %v303_v44, %v302_v45  ;;  %v332_v21 = vrot.slane %v325_v20, %v331_v19 }
  0x37   : > { %v306_v52 = vadd.f32 %v305_v48, %v304_v49  ;;  %v334_v22 = vsub.f32 %v543_v0, %v332_v21  ;;  %v335_v23 = vsub.f32 %v545_v1, %v332_v21  ;;  %v336_v24 = vsub.f32 %v547_v2, %v332_v21  ;;  %v468_v0 = vld [vmem:[%s631_s1] ss:$0 sm:$0xff] }
  0x38   : > { %v337_v25 = vsub.f32 %v549_v3, %v332_v21  ;;  %v338_v27 = vsub.f32 %v557_v7, %v332_v21  ;;  %v339_v28 = vsub.f32 %v561_v10, %v332_v21  ;;  %v340_v30 = vsub.f32 %v565_v13, %v332_v21  ;;  %v469_v3 = vld [vmem:[%s632_s2] ss:$0 sm:$0xff] }
  0x39   : > { %v308_v55 = vadd.f32 %v307_v51, %v306_v52  ;;  %v341_v31 = vsub.f32 %v569_v16, %v332_v21 }
  0x3b   : > { %v310_v57 = vadd.f32 %v309_v54, %v308_v55 }
  0x3d   : > { %v312_v59 = vadd.f32 %v311_v56, %v310_v57 }
  0x3f   : > { %v314_v60 = vadd.f32 %v313_v58, %v312_v59 }
  0x41   : > { %v315_v61 = vrot.slane %v314_v60, 4 }
  0x43   : > { %v316_v62 = vadd.f32 %v315_v61, %v314_v60 }
  0x45   : > { %v317_v63 = vrot.slane %v316_v62, 2 }
  0x47   : > { %v318_v4 = vadd.f32 %v317_v63, %v316_v62 }
  0x49   : > { %v319_v5 = vrot.slane %v318_v4, 1 }
  0x4b   : > { %v320_v8 = vadd.f32 %v319_v5, %v318_v4 }
  0x4d   : > { %v321_v12 = vmul.f32 0.015625, %v320_v8 }
  0x4f   : > { %v327_v14 = vsel %vm323_vm1, %v321_v12, %v326_v11 }
  0x50   : > { %v342_v17 = vadd.f32 1e-05, %v327_v14 }
  0x52   : > { %482 = vrsqrt.f32 %v342_v17 }
  0x5c   : > { %v483_v26 = vpop.eup %482 }
  0x5d   : > { %v348_v32 = vrot.slane %v483_v26, %v331_v19 }
  0x5f   : > { %v350_v29 = vmul.f32 %v348_v32, %v334_v22  ;;  %v351_v1 = vmul.f32 %v348_v32, %v335_v23  ;;  %v352_v33 = vmul.f32 %v348_v32, %v336_v24  ;;  %v353_v2 = vmul.f32 %v348_v32, %v337_v25 }
  0x60   : > { %v354_v7 = vmul.f32 %v348_v32, %v338_v27  ;;  %v355_v10 = vmul.f32 %v348_v32, %v339_v28  ;;  %v356_v34 = vmul.f32 %v348_v32, %v340_v30  ;;  %v357_v13 = vmul.f32 %v348_v32, %v341_v31 }
  0x61   : > { %v365_v35 = vmul.f32 %v468_v0, %v350_v29  ;;  %v366_v16 = vmul.f32 %v468_v0, %v351_v1  ;;  %v367_v36 = vmul.f32 %v468_v0, %v352_v33  ;;  %v368_v37 = vmul.f32 %v468_v0, %v353_v2 }
  0x62   : > { %v369_v38 = vmul.f32 %v468_v0, %v354_v7  ;;  %v370_v39 = vmul.f32 %v468_v0, %v355_v10  ;;  %v371_v40 = vmul.f32 %v468_v0, %v356_v34  ;;  %v372_v41 = vmul.f32 %v468_v0, %v357_v13 }
  0x63   : > { %v380_v42 = vadd.f32 %v469_v3, %v365_v35  ;;  %v381_v43 = vadd.f32 %v469_v3, %v366_v16  ;;  %v382_v44 = vadd.f32 %v469_v3, %v367_v36  ;;  %v383_v45 = vadd.f32 %v469_v3, %v368_v37 }
  0x64   : > { %v384_v46 = vadd.f32 %v469_v3, %v369_v38  ;;  %v385_v47 = vadd.f32 %v469_v3, %v370_v39  ;;  %v386_v48 = vadd.f32 %v469_v3, %v371_v40  ;;  %v387_v49 = vadd.f32 %v469_v3, %v372_v41 }
  0x65   : > { %v388_v50 = vmax.f32 %v380_v42, 0.0  ;;  %v389_v51 = vmax.f32 %v381_v43, 0.0  ;;  %v390_v52 = vmax.f32 %v382_v44, 0.0  ;;  %v391_v53 = vmax.f32 %v383_v45, 0.0 }
  0x66   : > { %v392_v54 = vmax.f32 %v384_v46, 0.0  ;;  %v393_v55 = vmax.f32 %v385_v47, 0.0  ;;  %v394_v56 = vmax.f32 %v386_v48, 0.0  ;;  %v395_v57 = vmax.f32 %v387_v49, 0.0 }
  0x67   : > { %396 = vst.msk [vmem:[%s251_s15] sm:$0xff] %vm260_vm0, %v388_v50  ;;  %397 = vst.msk [vmem:[%s251_s15 + $0x8] sm:$0xff] %vm260_vm0, %v389_v51 }
  0x68   : > { %398 = vst.msk [vmem:[%s251_s15 + $0x10] sm:$0xff] %vm260_vm0, %v390_v52  ;;  %399 = vst.msk [vmem:[%s251_s15 + $0x18] sm:$0xff] %vm260_vm0, %v391_v53 }
  0x69   : > { %400 = vst.msk [vmem:[%s251_s15 + $0x20] sm:$0xff] %vm260_vm0, %v392_v54  ;;  %401 = vst.msk [vmem:[%s251_s15 + $0x28] sm:$0xff] %vm260_vm0, %v393_v55 }
  0x6a   : > { %402 = vst.msk [vmem:[%s251_s15 + $0x30] sm:$0xff] %vm260_vm0, %v394_v56  ;;  %403 = vst.msk [vmem:[%s251_s15 + $0x38] sm:$0xff] %vm260_vm0, %v395_v57 }
  0x6b PF: > { %s16_s21 = sadd.s32 1, %s490_s21  }
  0x6c   : > { %p13_p4 = scmp.ge.s32.totalorder %s16_s21, 4  }
  0x6e   :  { %15 = sbr.rel (!%p13_p4) target bundleno = 1 (0x1), region = 74 }

// kernel: _lambda_.32
= control target key start
LH: loop header
LB: loop body
LE: loop exit
PB: predicated region body
PF: predicated region fallthrough
CT: control target
= control target key end

     0   :  { %s701_s15 = smov 0   ;;  %s703_s16 = smov 0   ;;  %s774_s0 = inlined_call_operand.vmem [shape: f32[4,32,72], index: 0, kind: input, shape index: {}]   ;;  %s775_s1 = inlined_call_operand.vmem [shape: f32[4,72,8], index: 1, kind: input, shape index: {}]   ;;  %s776_s2 = inlined_call_operand.vmem [shape: f32[4,1,8], index: 2, kind: input, shape index: {}]   ;;  %s777_s3 = inlined_call_operand.vmem [shape: f32[4,1,8], index: 3, kind: input, shape index: {}]   ;;  %s778_s4 = inlined_call_operand.vmem [shape: f32[4,32,8], index: 4, kind: output, shape index: {}]  }
   0x1   :  { %s705_s17 = smov 0  }
   0x2 LB: > { %s23_s18 = sadd.s32 1, %s670_s16  ;;  %p548_p0 = scmp.ge.s32.totalorder %s674_s17, 1  ;;  %s674_s17 = sphi %s705_s17, %s14_s17   ;;  %s670_s16 = sphi %s703_s16, %s780_s16   ;;  %s666_s15 = sphi %s701_s15, %s779_s15  }
   0x3   : > { %p24_p1 = scmp.ge.s32.totalorder %s23_s18, 4  ;;  %p209_p2 = scmp.lt.s32.totalorder %s674_s17, 5 }
   0x5   : > { %s782_s18 = smov (%p24_p1, %s23_s18), 0  ;;  %p210_p3 = pnand %p548_p0, %p209_p2 }
   0x6   : > { %p255_p4 = scmp.lt.s32.totalorder (!%p210_p3), %s666_s15, 3  ;;  %vm298_vm0 = vcmask (!%p210_p3), 588800   ;;  %vm422_vm1 = vcmask (!%p210_p3), 64512  }
   0x7   : > { %213 = sbr.rel (%p210_p3) target bundleno = 259 (0x103), region = 36 }
   0xe   : > { %s784_s15 = smov (!%p255_p4, %s666_s15), 3 }
   0xf   : > { %s627_s19 = smul.u32 72, %s784_s15  ;;  %s562_s20 = sshll.u32 %s784_s15, 5 }
  0x10   : > { %s728_s23 = scalar_lea.vmem %s774_s0, %s562_s20  ;;  %s271_s29 = scalar_lea.vmem %s776_s2, %s784_s15 }
  0x11   : > { %s733_s26 = scalar_lea.vmem %s775_s1, %s627_s19  ;;  %v285_v0 = vld [vmem:[%s728_s23] sm:$0xff]  ;;  %v287_v1 = vld [vmem:[%s728_s23 + $0x10] sm:$0xff]  ;;  %v286_v15 = vld [vmem:[%s728_s23 + $0x8] sm:$0xff]  ;;  %s274_s6 = scalar_lea.vmem %s777_s3, %s784_s15 }
  0x12   : > { %v289_v2 = vld [vmem:[%s733_s26] sm:$0xff]  ;;  %v290_v3 = vld [vmem:[%s733_s26 + $0x8] sm:$0xff]  ;;  %v291_v4 = vld [vmem:[%s733_s26 + $0x10] sm:$0xff]  ;;  %595 = vmatprep.mubr.msk.f32.mxu0 %vm298_vm0, %v285_v0  ;;  %598 = vmatprep.mubr.msk.f32.mxu1 %vm298_vm0, %v287_v1  ;;  %s283_s9 = scalar_lea.vmem %s778_s4, %s562_s20 }
  0x13   : > { %v601_v5 = vpack.c.bf16 %v290_v3, %v289_v2  ;;  %v292_v6 = vld [vmem:[%s733_s26 + $0x18] sm:$0xff]  ;;  %v293_v8 = vld [vmem:[%s733_s26 + $0x20] sm:$0xff]  ;;  %v294_v9 = vld [vmem:[%s733_s26 + $0x28] sm:$0xff] }
  0x14   : > { %v605_v7 = vpack.c.bf16 %v292_v6, %v291_v4  ;;  %v609_v10 = vpack.c.bf16 %v294_v9, %v293_v8  ;;  %v295_v11 = vld [vmem:[%s733_s26 + $0x30] sm:$0xff]  ;;  %v296_v12 = vld [vmem:[%s733_s26 + $0x38] sm:$0xff]  ;;  %v297_v14 = vld [vmem:[%s733_s26 + $0x40] sm:$0xff] }
  0x15   : > { %602 = vmatprep.subr.bf16.mxu0 %v601_v5  ;;  %617 = vmatprep.subr.bf16.mxu1 %v601_v5  ;;  %v613_v13 = vpack.c.bf16 %v296_v12, %v295_v11  ;;  %v288_v16 = vld [vmem:[%s728_s23 + $0x18] sm:$0xff]  ;;  %v558_v17 = vld [vmem:[%s271_s29] ss:$0 sm:$0xff] }
  0x16   : > { %604 = vmatpush3.bf16.msra.mxu0 %v601_v5  ;;  %622 = vmatpush3.bf16.msra.mxu1 %v601_v5  ;;  %v559_v19 = vld [vmem:[%s274_s6] ss:$0 sm:$0xff] }
  0x17   : > { %606 = vmatprep.subr.bf16.mxu0 %v605_v7  ;;  %618 = vmatprep.subr.bf16.mxu1 %v605_v7 }
  0x1a   : > { %608 = vmatpush3.bf16.msra.mxu0 %v605_v7  ;;  %623 = vmatpush3.bf16.msra.mxu1 %v605_v7 }
  0x1b   : > { %610 = vmatprep.subr.bf16.mxu0 %v609_v10  ;;  %619 = vmatprep.subr.bf16.mxu1 %v609_v10 }
  0x1e   : > { %612 = vmatpush3.bf16.msra.mxu0 %v609_v10  ;;  %624 = vmatpush3.bf16.msra.mxu1 %v609_v10 }
  0x1f   : > { %614 = vmatprep.subr.bf16.mxu0 %v613_v13  ;;  %620 = vmatprep.subr.bf16.mxu1 %v613_v13 }
  0x22   : > { %616 = vmatpush3.bf16.msra.mxu0 %v613_v13  ;;  %625 = vmatpush3.bf16.msra.mxu1 %v613_v13 }
  0x23   : > { %593 = vmatprep.subr.mxu0 %v297_v14  ;;  %621 = vmatprep.subr.mxu1 %v297_v14 }
  0x26   : > { %594 = vmatpush3.msra.mxu0 %v297_v14  ;;  %626 = vmatpush3.msra.mxu1 %v297_v14 }
  0x27   : > { %596 = vmatmul.mubr.msk.f32.vlgmr.msra.gmra.mrb[0].mxu0 %vm298_vm0, %v286_v15  ;;  %599 = vmatmul.mubr.msk.f32.vlgmr.msra.gmra.mrb[0].mxu1 %vm298_vm0, %v288_v16 }
  0xfa   : > { %v597_v18 = vpop.f32.mrb[0].mxu0  ;;  %v600_v20 = vpop.f32.mrb[0].mxu1 }
  0xfb   : > { %v404_v21 = vmul.f32 %v597_v18, %v558_v17  ;;  %v406_v22 = vmul.f32 %v600_v20, %v558_v17  ;;  %v377_v23 = vpop.f32.mrb[1].mxu0  ;;  %v387_v24 = vpop.f32.mrb[1].mxu1 }
  0xfc   : > { %v403_v25 = vmul.f32 %v558_v17, %v377_v23  ;;  %v405_v26 = vmul.f32 %v558_v17, %v387_v24 }
  0xfd   : > { %v415_v27 = vadd.f32 %v559_v19, %v404_v21  ;;  %v417_v28 = vadd.f32 %v559_v19, %v406_v22 }
  0xfe   : > { %v414_v29 = vadd.f32 %v559_v19, %v403_v25  ;;  %v416_v30 = vadd.f32 %v559_v19, %v405_v26 }
  0xff   : > { %v419_v31 = vmax.f32 %v415_v27, 0.0  ;;  %v421_v32 = vmax.f32 %v417_v28, 0.0 }
 0x100   : > { %v418_v33 = vmax.f32 %v414_v29, 0.0  ;;  %v420_v34 = vmax.f32 %v416_v30, 0.0 }
 0x101   : > { %424 = vst.msk [vmem:[%s283_s9 + $0x8] sm:$0xff] %vm422_vm1, %v419_v31  ;;  %426 = vst.msk [vmem:[%s283_s9 + $0x18] sm:$0xff] %vm422_vm1, %v421_v32 }
 0x102   : > { %423 = vst.msk [vmem:[%s283_s9] sm:$0xff] %vm422_vm1, %v418_v33  ;;  %425 = vst.msk [vmem:[%s283_s9 + $0x10] sm:$0xff] %vm422_vm1, %v420_v34 }
 0x103 PF: > { %s14_s17 = sadd.s32 1, %s674_s17   ;;  %s779_s15 = smov %s670_s16 }
 0x104   : > { %p11_p5 = scmp.ge.s32.totalorder %s14_s17, 6   ;;  %s780_s16 = smov %s782_s18 }
 0x106   :  { %13 = sbr.rel (!%p11_p5) target bundleno = 2 (0x2), region = 75 }

// kernel: _lambda_.33
= control target key start
LH: loop header
LB: loop body
LE: loop exit
PB: predicated region body
PF: predicated region fallthrough
CT: control target
= control target key end

     0   :  { %vm25_vm0 = vcmask 261120   ;;  %vm145_vm1 = vcmask 523264   ;;  %s265_s1 = inlined_call_operand.vmem [shape: f32[32,64], index: 1, kind: input, shape index: {}]   ;;  %s266_s0 = inlined_call_operand.vmem [shape: f32[32,32], index: 0, kind: input, shape index: {}]   ;;  %s267_s2 = inlined_call_operand.vmem [shape: f32[1,64], index: 2, kind: input, shape index: {}]   ;;  %s268_s3 = inlined_call_operand.vmem [shape: f32[1,64], index: 3, kind: input, shape index: {}]   ;;  %s269_s4 = inlined_call_operand.vmem [shape: f32[32,64], index: 4, kind: output, shape index: {}]  }
   0x1   :  { %v21_v0 = vld [vmem:[%s265_s1] sm:$0xff]  ;;  %v22_v1 = vld [vmem:[%s265_s1 + $0x8] sm:$0xff]  ;;  %v23_v2 = vld [vmem:[%s265_s1 + $0x10] sm:$0xff] }
   0x2   :  { %v182_v3 = vpack.c.bf16 %v22_v1, %v21_v0  ;;  %v24_v4 = vld [vmem:[%s265_s1 + $0x18] sm:$0xff]  ;;  %v17_v5 = vld [vmem:[%s266_s0] sm:$0xff]  ;;  %v19_v6 = vld [vmem:[%s266_s0 + $0x10] sm:$0xff] }
   0x3   :  { %v186_v7 = vpack.c.bf16 %v24_v4, %v23_v2  ;;  %176 = vmatprep.mubr.msk.f32.mxu0 %vm25_vm0, %v17_v5  ;;  %179 = vmatprep.mubr.msk.f32.mxu1 %vm25_vm0, %v19_v6  ;;  %v18_v8 = vld [vmem:[%s266_s0 + $0x8] sm:$0xff]  ;;  %v20_v9 = vld [vmem:[%s266_s0 + $0x18] sm:$0xff]  ;;  %v158_v10 = vld [vmem:[%s267_s2] ss:$0 sm:$0xff] }
   0x4   :  { %183 = vmatprep.subr.bf16.mxu0 %v182_v3  ;;  %190 = vmatprep.subr.bf16.mxu1 %v182_v3  ;;  %v159_v12 = vld [vmem:[%s268_s3] ss:$0 sm:$0xff] }
   0x5   :  { %185 = vmatpush3.bf16.msra.mxu0 %v182_v3  ;;  %192 = vmatpush3.bf16.msra.mxu1 %v182_v3 }
   0x6   :  { %187 = vmatprep.subr.bf16.mxu0 %v186_v7  ;;  %191 = vmatprep.subr.bf16.mxu1 %v186_v7 }
   0x9   :  { %189 = vmatpush3.bf16.msra.mxu0 %v186_v7  ;;  %193 = vmatpush3.bf16.msra.mxu1 %v186_v7 }
   0xc   :  { %177 = vmatmul.mubr.msk.f32.vlgmr.msra.gmra.mrb[0].mxu0 %vm25_vm0, %v18_v8  ;;  %180 = vmatmul.mubr.msk.f32.vlgmr.msra.gmra.mrb[0].mxu1 %vm25_vm0, %v20_v9 }
  0xdf   :  { %v178_v11 = vpop.f32.mrb[0].mxu0  ;;  %v181_v13 = vpop.f32.mrb[0].mxu1 }
  0xe0   :  { %v131_v14 = vmul.f32 %v178_v11, %v158_v10  ;;  %v133_v15 = vmul.f32 %v181_v13, %v158_v10  ;;  %v104_v16 = vpop.f32.mrb[1].mxu0  ;;  %v114_v17 = vpop.f32.mrb[1].mxu1 }
  0xe1   :  { %v130_v18 = vmul.f32 %v158_v10, %v104_v16  ;;  %v132_v19 = vmul.f32 %v158_v10, %v114_v17 }
  0xe2   :  { %v142_v20 = vadd.f32 %v159_v12, %v131_v14  ;;  %v144_v21 = vadd.f32 %v159_v12, %v133_v15 }
  0xe3   :  { %v141_v22 = vadd.f32 %v159_v12, %v130_v18  ;;  %v143_v23 = vadd.f32 %v159_v12, %v132_v19 }
  0xe4   :  { %147 = vst.msk [vmem:[%s269_s4 + $0x8] sm:$0xff] %vm145_vm1, %v142_v20  ;;  %149 = vst.msk [vmem:[%s269_s4 + $0x18] sm:$0xff] %vm145_vm1, %v144_v21 }
  0xe5   :  { %146 = vst.msk [vmem:[%s269_s4] sm:$0xff] %vm145_vm1, %v141_v22  ;;  %148 = vst.msk [vmem:[%s269_s4 + $0x10] sm:$0xff] %vm145_vm1, %v143_v23 }

// kernel: _lambda_.34
= control target key start
LH: loop header
LB: loop body
LE: loop exit
PB: predicated region body
PF: predicated region fallthrough
CT: control target
= control target key end

     0   :  { %s675_s18 = smov 0   ;;  %s677_s19 = smov 0   ;;  %s752_s0 = inlined_call_operand.vmem [shape: f32[4,32,8], index: 0, kind: input, shape index: {}]   ;;  %s753_s1 = inlined_call_operand.vmem [shape: f32[4,8,64], index: 1, kind: input, shape index: {}]   ;;  %s754_s2 = inlined_call_operand.vmem [shape: f32[1,64], index: 2, kind: input, shape index: {}]   ;;  %s755_s3 = inlined_call_operand.vmem [shape: f32[1,64], index: 3, kind: input, shape index: {}]   ;;  %s756_s4 = inlined_call_operand.vmem [shape: f32[32,64], index: 4, kind: input, shape index: {}]   ;;  %s757_s5 = inlined_call_operand.vmem [shape: f32[32,64], index: 5, kind: output, shape index: {}]  }
   0x1   :  { %s679_s20 = smov 0  }
   0x2 LB: > { %s24_s21 = sadd.s32 1, %s638_s19  ;;  %p563_p0 = scmp.ge.s32.totalorder %s642_s20, 1  ;;  %s642_s20 = sphi %s679_s20, %s15_s20   ;;  %s638_s19 = sphi %s677_s19, %s759_s19   ;;  %s634_s18 = sphi %s675_s18, %s758_s18  }
   0x3   : > { %p25_p1 = scmp.ge.s32.totalorder %s24_s21, 4  ;;  %p226_p2 = scmp.lt.s32.totalorder %s642_s20, 5 }
   0x5   : > { %s761_s21 = smov (%p25_p1, %s24_s21), 0  ;;  %p227_p3 = pnand %p563_p0, %p226_p2 }
   0x6   : > { %p268_p4 = scmp.lt.s32.totalorder (!%p227_p3), %s634_s18, 3  ;;  %p567_p5 = scmp.ne.s32.totalorder (!%p227_p3), %s634_s18, 0 }
   0x7   : > { %230 = sbr.rel (%p227_p3) target bundleno = 258 (0x102), region = 40 }
   0xe   : > { %s269_s22 = scalar_select %p268_p4, %s634_s18, 3 }
   0xf   : > { %296 = sbr.rel (%p567_p5) target bundleno = 22 (0x16), region = 44  ;;  %vm297_vm0 = vcmask (!%p567_p5), 523264   ;;  %v644_v0 = vmov (!%p567_p5), 0.0  }
  0x10   : > { %s579_s23 = sshll.u32 %s269_s22, 5  ;;  %s566_s24 = sshll.u32 %s269_s22, 3  ;;  %298 = vst.msk [vmem:[#allocation2] sm:$0xff] (!%p567_p5), %vm297_vm0, %v644_v0  ;;  %299 = vst.msk [vmem:[#allocation2 + $0x8] sm:$0xff] (!%p567_p5), %vm297_vm0, %v644_v0 }
  0x11   : > { %s275_s27 = scalar_lea.vmem %s752_s0, %s579_s23  ;;  %s280_s30 = scalar_lea.vmem %s753_s1, %s566_s24  ;;  %300 = vst.msk [vmem:[#allocation2 + $0x10] sm:$0xff] (!%p567_p5), %vm297_vm0, %v644_v0  ;;  %301 = vst.msk [vmem:[#allocation2 + $0x18] sm:$0xff] (!%p567_p5), %vm297_vm0, %v644_v0 }
  0x16 PF: > { %v310_v1 = vld [vmem:[%s280_s30] sm:$0xff]  ;;  %vm311_vm1 = vcmask 64512   ;;  %v308_v3 = vld [vmem:[%s275_s27 + $0x10] sm:$0xff]  ;;  %v307_v4 = vld [vmem:[%s275_s27 + $0x8] sm:$0xff]  ;;  %vm413_vm2 = vcmask 523264   ;;  %p572_p6 = scmp.ne.s32.totalorder %s634_s18, 3 }
  0x17   : > { %v306_v2 = vld [vmem:[%s275_s27] sm:$0xff]  ;;  %585 = vmatprep.subr.mxu0 %v310_v1  ;;  %593 = vmatprep.subr.mxu1 %v310_v1  ;;  %v309_v5 = vld [vmem:[%s275_s27 + $0x18] sm:$0xff]  ;;  %v303_v6 = vld [vmem:[#allocation2 + $0x8] sm:$0xff] }
  0x18   : > { %586 = vmatpush3.msra.mxu0 %v310_v1  ;;  %594 = vmatpush3.msra.mxu1 %v310_v1  ;;  %v305_v7 = vld [vmem:[#allocation2 + $0x18] sm:$0xff]  ;;  %v302_v8 = vld [vmem:[#allocation2] sm:$0xff]  ;;  %v304_v9 = vld [vmem:[#allocation2 + $0x10] sm:$0xff] }
  0x19   : > { %587 = vmatprep.mubr.msk.f32.mxu0 %vm311_vm1, %v306_v2  ;;  %590 = vmatprep.mubr.msk.f32.mxu1 %vm311_vm1, %v308_v3  ;;  %v573_v19 = vld [vmem:[%s754_s2] ss:$0 sm:$0xff] (!%p572_p6)  ;;  %v449_v28 = vld [vmem:[%s756_s4 + $0x8] sm:$0xff] (!%p572_p6)  ;;  %v450_v32 = vld [vmem:[%s756_s4 + $0x10] sm:$0xff] (!%p572_p6) }
  0x1a   : > { %588 = vmatmul.mubr.msk.f32.vlgmr.msra.gmra.mrb[0].mxu0 %vm311_vm1, %v307_v4  ;;  %591 = vmatmul.mubr.msk.f32.vlgmr.msra.gmra.mrb[0].mxu1 %vm311_vm1, %v309_v5  ;;  %v574_v20 = vld [vmem:[%s755_s3] ss:$0 sm:$0xff] (!%p572_p6)  ;;  %v451_v33 = vld [vmem:[%s756_s4 + $0x18] sm:$0xff] (!%p572_p6) }
  0x1b   : > { %v448_v23 = vld [vmem:[%s756_s4] sm:$0xff] (!%p572_p6) }
  0xeb   : > { %421 = sbr.rel (%p572_p6) target bundleno = 258 (0x102), region = 48 }
  0xed   : > { %v589_v10 = vpop.f32.mrb[0].mxu0  ;;  %v592_v11 = vpop.f32.mrb[0].mxu1 }
  0xee   : > { %v410_v12 = vadd.f32 %v589_v10, %v303_v6  ;;  %v412_v13 = vadd.f32 %v592_v11, %v305_v7  ;;  %v390_v14 = vpop.f32.mrb[1].mxu0  ;;  %v400_v15 = vpop.f32.mrb[1].mxu1 }
  0xef   : > { %v409_v16 = vadd.f32 %v390_v14, %v302_v8  ;;  %v411_v17 = vadd.f32 %v400_v15, %v304_v9 }
  0xf0   : > { %415 = vst.msk [vmem:[#allocation2 + $0x8] sm:$0xff] %vm413_vm2, %v410_v12  ;;  %417 = vst.msk [vmem:[#allocation2 + $0x18] sm:$0xff] %vm413_vm2, %v412_v13 }
  0xf1   : > { %414 = vst.msk [vmem:[#allocation2] sm:$0xff] %vm413_vm2, %v409_v16  ;;  %416 = vst.msk [vmem:[#allocation2 + $0x10] sm:$0xff] %vm413_vm2, %v411_v17 }
  0xf7   : > { %v423_v22 = vld [vmem:[#allocation2 + $0x8] sm:$0xff]  ;;  %v425_v26 = vld [vmem:[#allocation2 + $0x18] sm:$0xff] }
  0xf8   : > { %v422_v18 = vld [vmem:[#allocation2] sm:$0xff]  ;;  %v434_v24 = vmul.f32 %v573_v19, %v423_v22  ;;  %v424_v25 = vld [vmem:[#allocation2 + $0x10] sm:$0xff]  ;;  %v436_v30 = vmul.f32 %v573_v19, %v425_v26 }
  0xf9   : > { %v433_v21 = vmul.f32 %v573_v19, %v422_v18  ;;  %v435_v29 = vmul.f32 %v573_v19, %v424_v25 }
  0xfa   : > { %v445_v31 = vadd.f32 %v574_v20, %v434_v24  ;;  %v447_v36 = vadd.f32 %v574_v20, %v436_v30 }
  0xfb   : > { %v444_v27 = vadd.f32 %v574_v20, %v433_v21  ;;  %v446_v35 = vadd.f32 %v574_v20, %v435_v29 }
  0xfc   : > { %v453_v37 = vadd.f32 %v449_v28, %v445_v31  ;;  %v455_v40 = vadd.f32 %v451_v33, %v447_v36 }
  0xfd   : > { %v452_v34 = vadd.f32 %v448_v23, %v444_v27  ;;  %v454_v39 = vadd.f32 %v450_v32, %v446_v35 }
  0xfe   : > { %v457_v41 = vmax.f32 %v453_v37, 0.0  ;;  %v459_v43 = vmax.f32 %v455_v40, 0.0 }
  0xff   : > { %v456_v38 = vmax.f32 %v452_v34, 0.0  ;;  %v458_v42 = vmax.f32 %v454_v39, 0.0 }
 0x100   : > { %461 = vst.msk [vmem:[%s757_s5 + $0x8] sm:$0xff] %vm413_vm2, %v457_v41  ;;  %463 = vst.msk [vmem:[%s757_s5 + $0x18] sm:$0xff] %vm413_vm2, %v459_v43 }
 0x101   : > { %460 = vst.msk [vmem:[%s757_s5] sm:$0xff] %vm413_vm2, %v456_v38  ;;  %462 = vst.msk [vmem:[%s757_s5 + $0x10] sm:$0xff] %vm413_vm2, %v458_v42 }
 0x102 PF: > { %s15_s20 = sadd.s32 1, %s642_s20   ;;  %s758_s18 = smov %s638_s19 }
 0x103   : > { %p12_p7 = scmp.ge.s32.totalorder %s15_s20, 6   ;;  %s759_s19 = smov %s761_s21 }
 0x105   :  { %14 = sbr.rel (!%p12_p7) target bundleno = 2 (0x2), region = 84 }

// kernel: _lambda_.35
= control target key start
LH: loop header
LB: loop body
LE: loop exit
PB: predicated region body
PF: predicated region fallthrough
CT: control target
= control target key end

     0   :  { %vm23_vm0 = vcmask 523264   ;;  %s262_s1 = inlined_call_operand.vmem [shape: f32[64,64], index: 1, kind: input, shape index: {}]   ;;  %s263_s0 = inlined_call_operand.vmem [shape: f32[32,64], index: 0, kind: input, shape index: {}]   ;;  %s264_s2 = inlined_call_operand.vmem [shape: f32[32,64], index: 2, kind: output, shape index: {}]  }
   0x1   :  { %v15_v0 = vld [vmem:[%s262_s1] sm:$0xff]  ;;  %v16_v1 = vld [vmem:[%s262_s1 + $0x8] sm:$0xff]  ;;  %v17_v2 = vld [vmem:[%s262_s1 + $0x10] sm:$0xff] }
   0x2   :  { %v167_v3 = vpack.c.bf16 %v16_v1, %v15_v0  ;;  %v18_v4 = vld [vmem:[%s262_s1 + $0x18] sm:$0xff]  ;;  %v19_v6 = vld [vmem:[%s262_s1 + $0x20] sm:$0xff]  ;;  %v20_v7 = vld [vmem:[%s262_s1 + $0x28] sm:$0xff] }
   0x3   :  { %v171_v5 = vpack.c.bf16 %v18_v4, %v17_v2  ;;  %v11_v8 = vld [vmem:[%s263_s0] sm:$0xff]  ;;  %v13_v9 = vld [vmem:[%s263_s0 + $0x10] sm:$0xff]  ;;  %v175_v10 = vpack.c.bf16 %v20_v7, %v19_v6  ;;  %v22_v12 = vld [vmem:[%s262_s1 + $0x38] sm:$0xff] }
   0x4   :  { %168 = vmatprep.subr.bf16.mxu0 %v167_v3  ;;  %183 = vmatprep.subr.bf16.mxu1 %v167_v3  ;;  %v21_v11 = vld [vmem:[%s262_s1 + $0x30] sm:$0xff]  ;;  %v12_v14 = vld [vmem:[%s263_s0 + $0x8] sm:$0xff]  ;;  %v14_v15 = vld [vmem:[%s263_s0 + $0x18] sm:$0xff] }
   0x5   :  { %170 = vmatpush3.bf16.msra.mxu0 %v167_v3  ;;  %187 = vmatpush3.bf16.msra.mxu1 %v167_v3  ;;  %v179_v13 = vpack.c.bf16 %v22_v12, %v21_v11 }
   0x6   :  { %172 = vmatprep.subr.bf16.mxu0 %v171_v5  ;;  %184 = vmatprep.subr.bf16.mxu1 %v171_v5 }
   0x7   :  { %161 = vmatprep.mubr.msk.f32.mxu0 %vm23_vm0, %v11_v8  ;;  %164 = vmatprep.mubr.msk.f32.mxu1 %vm23_vm0, %v13_v9 }
   0x9   :  { %174 = vmatpush3.bf16.msra.mxu0 %v171_v5  ;;  %188 = vmatpush3.bf16.msra.mxu1 %v171_v5 }
   0xa   :  { %176 = vmatprep.subr.bf16.mxu0 %v175_v10  ;;  %185 = vmatprep.subr.bf16.mxu1 %v175_v10 }
   0xd   :  { %178 = vmatpush3.bf16.msra.mxu0 %v175_v10  ;;  %189 = vmatpush3.bf16.msra.mxu1 %v175_v10 }
   0xe   :  { %180 = vmatprep.subr.bf16.mxu0 %v179_v13  ;;  %186 = vmatprep.subr.bf16.mxu1 %v179_v13 }
  0x11   :  { %182 = vmatpush3.bf16.msra.mxu0 %v179_v13  ;;  %190 = vmatpush3.bf16.msra.mxu1 %v179_v13 }
  0x14   :  { %162 = vmatmul.mubr.msk.f32.vlgmr.msra.gmra.mrb[0].mxu0 %vm23_vm0, %v12_v14  ;;  %165 = vmatmul.mubr.msk.f32.vlgmr.msra.gmra.mrb[0].mxu1 %vm23_vm0, %v14_v15 }
  0xe7   :  { %v163_v16 = vpop.f32.mrb[0].mxu0  ;;  %v166_v17 = vpop.f32.mrb[0].mxu1 }
  0xe8   :  { %122 = vst.msk [vmem:[%s264_s2 + $0x8] sm:$0xff] %vm23_vm0, %v163_v16  ;;  %124 = vst.msk [vmem:[%s264_s2 + $0x18] sm:$0xff] %vm23_vm0, %v166_v17  ;;  %v102_v18 = vpop.f32.mrb[1].mxu0  ;;  %v112_v19 = vpop.f32.mrb[1].mxu1 }
  0xe9   :  { %121 = vst.msk [vmem:[%s264_s2] sm:$0xff] %vm23_vm0, %v102_v18  ;;  %123 = vst.msk [vmem:[%s264_s2 + $0x10] sm:$0xff] %vm23_vm0, %v112_v19 }

// kernel: _lambda_.36
= control target key start
LH: loop header
LB: loop body
LE: loop exit
PB: predicated region body
PF: predicated region fallthrough
CT: control target
= control target key end

     0   :  { %s449_s21 = smov 0   ;;  %s494_s0 = inlined_call_operand.vmem [shape: f32[2,16,64], index: 0, kind: input, shape index: {}]   ;;  %s495_s1 = inlined_call_operand.vmem [shape: f32[1,64], index: 1, kind: input, shape index: {}]   ;;  %s496_s2 = inlined_call_operand.vmem [shape: f32[1,64], index: 2, kind: input, shape index: {}]   ;;  %s497_s3 = inlined_call_operand.vmem [shape: f32[1,64], index: 3, kind: input, shape index: {}]   ;;  %s498_s4 = inlined_call_operand.vmem [shape: f32[1,64], index: 4, kind: input, shape index: {}]   ;;  %s499_s5 = inlined_call_operand.vmem [shape: f32[1,64], index: 5, kind: input, shape index: {}]   ;;  %s500_s6 = inlined_call_operand.vmem [shape: f32[2,16,64], index: 6, kind: output, shape index: {}]  }
   0x1 LB: > { %s381_s22 = sadd.s32 4294967295, %s412_s21   ;;  %p385_p0 = scmp.ge.s32.totalorder %s412_s21, 1  ;;  %s412_s21 = sphi %s449_s21, %s16_s21  }
   0x2   : > { %p212_p1 = scmp.lt.s32.totalorder %s412_s21, 3 }
   0x4   : > { %p213_p2 = pnand %p385_p0, %p212_p1 }
   0x5   : > { %p242_p3 = scmp.lt.s32.totalorder (!%p213_p2), %s381_s22, 1  ;;  %vm254_vm0 = vcmask (!%p213_p2), 523264   ;;  %v280_v24 = vld [vmem:[%s499_s5] sm:$0x1] (!%p213_p2)  ;;  %v287_v26 = vlaneseq (!%p213_p2) }
   0x6   : > { %216 = sbr.rel (%p213_p2) target bundleno = 80 (0x50), region = 44  ;;  %vm281_vm1 = vcmp.gt.f32.partialorder (!%p213_p2), %v280_v24, 0.5  ;;  %v284_v27 = vld [vmem:[%s498_s4] sm:$0x1] (!%p213_p2) }
   0x7   : > { %v288_v30 = vshrl.u32 (!%p213_p2), %v287_v26, 7  ;;  %v282_v32 = vld [vmem:[%s497_s3] sm:$0x1] (!%p213_p2) }
   0x8   : > { %v390_v40 = vld [vmem:[%s495_s1] ss:$0 sm:$0xff] (!%p213_p2) }
   0x9   : > { %v289_v33 = vsub.s32 (!%p213_p2), 0, %v288_v30  ;;  %v391_v43 = vld [vmem:[%s496_s2] ss:$0 sm:$0xff] (!%p213_p2) }
   0xd   : > { %s502_s22 = smov (!%p242_p3, %s381_s22), 1 }
   0xe   : > { %s394_s23 = sshll.u32 %s502_s22, 4 }
   0xf   : > { %s246_s26 = scalar_lea.vmem %s494_s0, %s394_s23  ;;  %s251_s15 = scalar_lea.vmem %s500_s6, %s394_s23 }
  0x10   : > { %v252_v0 = vld [vmem:[%s246_s26] sm:$0xff]  ;;  %v253_v1 = vld [vmem:[%s246_s26 + $0x8] sm:$0xff] }
  0x11   : > { %v255_v2 = vsel %vm254_vm0, %v252_v0, 0.0  ;;  %v256_v3 = vsel %vm254_vm0, %v253_v1, 0.0 }
  0x12   : > { %v257_v4 = vadd.f32 %v256_v3, %v255_v2 }
  0x14   : > { %v258_v5 = vrot.slane %v257_v4, 4 }
  0x16   : > { %v259_v6 = vadd.f32 %v258_v5, %v257_v4 }
  0x18   : > { %v260_v7 = vrot.slane %v259_v6, 2 }
  0x1a   : > { %v261_v8 = vadd.f32 %v260_v7, %v259_v6 }
  0x1c   : > { %v262_v9 = vrot.slane %v261_v8, 1 }
  0x1e   : > { %v263_v10 = vadd.f32 %v262_v9, %v261_v8 }
  0x20   : > { %v265_v11 = vmul.f32 0.0625, %v263_v10 }
  0x22   : > { %v266_v12 = vsub.f32 %v252_v0, %v265_v11  ;;  %v267_v13 = vsub.f32 %v253_v1, %v265_v11  ;;  %v283_v34 = vsel %vm281_vm1, %v265_v11, %v282_v32 }
  0x23   : > { %v290_v35 = vrot.slane %v283_v34, %v289_v33 }
  0x24   : > { %v268_v14 = vmul.f32 %v266_v12, %v266_v12  ;;  %v269_v15 = vmul.f32 %v267_v13, %v267_v13 }
  0x25   : > { %v292_v36 = vsub.f32 %v252_v0, %v290_v35  ;;  %v293_v37 = vsub.f32 %v253_v1, %v290_v35 }
  0x26   : > { %v270_v16 = vsel %vm254_vm0, %v268_v14, 0.0  ;;  %v271_v17 = vsel %vm254_vm0, %v269_v15, 0.0 }
  0x27   : > { %v272_v18 = vadd.f32 %v271_v17, %v270_v16 }
  0x29   : > { %v273_v19 = vrot.slane %v272_v18, 4 }
  0x2b   : > { %v274_v20 = vadd.f32 %v273_v19, %v272_v18 }
  0x2d   : > { %v275_v21 = vrot.slane %v274_v20, 2 }
  0x2f   : > { %v276_v22 = vadd.f32 %v275_v21, %v274_v20 }
  0x31   : > { %v277_v23 = vrot.slane %v276_v22, 1 }
  0x33   : > { %v278_v25 = vadd.f32 %v277_v23, %v276_v22 }
  0x35   : > { %v279_v28 = vmul.f32 0.0625, %v278_v25 }
  0x37   : > { %v285_v29 = vsel %vm281_vm1, %v279_v28, %v284_v27 }
  0x38   : > { %v294_v31 = vadd.f32 1e-05, %v285_v29 }
  0x3a   : > { %404 = vrsqrt.f32 %v294_v31 }
  0x44   : > { %v405_v38 = vpop.eup %404 }
  0x45   : > { %v300_v39 = vrot.slane %v405_v38, %v289_v33 }
  0x47   : > { %v302_v41 = vmul.f32 %v300_v39, %v292_v36  ;;  %v303_v42 = vmul.f32 %v300_v39, %v293_v37 }
  0x49   : > { %v311_v44 = vmul.f32 %v390_v40, %v302_v41  ;;  %v312_v45 = vmul.f32 %v390_v40, %v303_v42 }
  0x4b   : > { %v320_v46 = vadd.f32 %v391_v43, %v311_v44  ;;  %v321_v47 = vadd.f32 %v391_v43, %v312_v45 }
  0x4d   : > { %v322_v48 = vmax.f32 %v320_v46, 0.0  ;;  %v323_v49 = vmax.f32 %v321_v47, 0.0 }
  0x4f   : > { %324 = vst.msk [vmem:[%s251_s15] sm:$0xff] %vm254_vm0, %v322_v48  ;;  %325 = vst.msk [vmem:[%s251_s15 + $0x8] sm:$0xff] %vm254_vm0, %v323_v49 }
  0x50 PF: > { %s16_s21 = sadd.s32 1, %s412_s21  }
  0x51   : > { %p13_p4 = scmp.ge.s32.totalorder %s16_s21, 4  }
  0x53   :  { %15 = sbr.rel (!%p13_p4) target bundleno = 1 (0x1), region = 74 }

// kernel: _lambda_.37
= control target key start
LH: loop header
LB: loop body
LE: loop exit
PB: predicated region body
PF: predicated region fallthrough
CT: control target
= control target key end

     0   :  { %s618_s15 = smov 0   ;;  %s620_s16 = smov 0   ;;  %s693_s0 = inlined_call_operand.vmem [shape: f32[4,8,144], index: 0, kind: input, shape index: {}]   ;;  %s694_s1 = inlined_call_operand.vmem [shape: f32[4,144,16], index: 1, kind: input, shape index: {}]   ;;  %s695_s2 = inlined_call_operand.vmem [shape: f32[4,1,16], index: 2, kind: input, shape index: {}]   ;;  %s696_s3 = inlined_call_operand.vmem [shape: f32[4,1,16], index: 3, kind: input, shape index: {}]   ;;  %s697_s4 = inlined_call_operand.vmem [shape: f32[4,8,16], index: 4, kind: output, shape index: {}]  }
   0x1   :  { %s622_s17 = smov 0  }
   0x2 LB: > { %s23_s18 = sadd.s32 1, %s586_s16  ;;  %p504_p0 = scmp.ge.s32.totalorder %s590_s17, 1  ;;  %s590_s17 = sphi %s622_s17, %s14_s17   ;;  %s586_s16 = sphi %s620_s16, %s699_s16   ;;  %s582_s15 = sphi %s618_s15, %s698_s15  }
   0x3   : > { %p24_p1 = scmp.ge.s32.totalorder %s23_s18, 4  ;;  %p208_p2 = scmp.lt.s32.totalorder %s590_s17, 5 }
   0x5   : > { %s701_s18 = smov (%p24_p1, %s23_s18), 0  ;;  %p209_p3 = pnand %p504_p0, %p208_p2 }
   0x6   : > { %p251_p4 = scmp.lt.s32.totalorder (!%p209_p3), %s582_s15, 3  ;;  %v592_v0 = vmov (!%p209_p3), 0.0|0.0   ;;  %vm298_vm0 = vcmask (!%p209_p3), 130048  }
   0x7   : > { %212 = sbr.rel (%p209_p3) target bundleno = 275 (0x113), region = 36  ;;  %515 = vmatprep.subr.bf16.mxu0 (!%p209_p3), %v592_v0 }
   0xe   : > { %s703_s15 = smov (!%p251_p4, %s582_s15), 3 }
   0xf   : > { %s542_s19 = smul.u32 144, %s703_s15  ;;  %s514_s20 = sshll.u32 %s703_s15, 4 }
  0x10   : > { %s643_s23 = scalar_lea.vmem %s693_s0, %s514_s20  ;;  %s267_s29 = scalar_lea.vmem %s695_s2, %s703_s15 }
  0x11   : > { %s648_s26 = scalar_lea.vmem %s694_s1, %s542_s19  ;;  %v279_v1 = vld [vmem:[%s643_s23 + $0x8] sm:$0xff]  ;;  %v278_v29 = vld [vmem:[%s643_s23] sm:$0xff]  ;;  %s270_s6 = scalar_lea.vmem %s696_s3, %s703_s15 }
  0x12   : > { %v280_v2 = vld [vmem:[%s648_s26] sm:$0xff]  ;;  %v281_v3 = vld [vmem:[%s648_s26 + $0x8] sm:$0xff]  ;;  %v282_v4 = vld [vmem:[%s648_s26 + $0x10] sm:$0xff]  ;;  %509 = vmatprep.mubr.msk.f32.mxu0 %vm298_vm0, %v279_v1  ;;  %s508_s7 = sshll.u32 %s703_s15, 3 }
  0x13   : > { %v516_v5 = vpack.c.bf16 %v281_v3, %v280_v2  ;;  %v283_v6 = vld [vmem:[%s648_s26 + $0x18] sm:$0xff]  ;;  %v284_v8 = vld [vmem:[%s648_s26 + $0x20] sm:$0xff]  ;;  %v285_v9 = vld [vmem:[%s648_s26 + $0x28] sm:$0xff]  ;;  %s277_s10 = scalar_lea.vmem %s697_s4, %s508_s7 }
  0x14   : > { %v519_v7 = vpack.c.bf16 %v283_v6, %v282_v4  ;;  %v522_v10 = vpack.c.bf16 %v285_v9, %v284_v8  ;;  %v286_v11 = vld [vmem:[%s648_s26 + $0x30] sm:$0xff]  ;;  %v287_v12 = vld [vmem:[%s648_s26 + $0x38] sm:$0xff]  ;;  %v288_v14 = vld [vmem:[%s648_s26 + $0x40] sm:$0xff] }
  0x15   : > { %517 = vmatpush1.bf16.msra.mxu0 %v516_v5  ;;  %v525_v13 = vpack.c.bf16 %v287_v12, %v286_v11  ;;  %v289_v15 = vld [vmem:[%s648_s26 + $0x48] sm:$0xff]  ;;  %v290_v17 = vld [vmem:[%s648_s26 + $0x50] sm:$0xff]  ;;  %v291_v18 = vld [vmem:[%s648_s26 + $0x58] sm:$0xff] }
  0x16   : > { %518 = vmatprep.subr.bf16.mxu0 %v592_v0  ;;  %v528_v16 = vpack.c.bf16 %v289_v15, %v288_v14  ;;  %v531_v19 = vpack.c.bf16 %v291_v18, %v290_v17  ;;  %v292_v20 = vld [vmem:[%s648_s26 + $0x60] sm:$0xff]  ;;  %v293_v21 = vld [vmem:[%s648_s26 + $0x68] sm:$0xff]  ;;  %v294_v23 = vld [vmem:[%s648_s26 + $0x70] sm:$0xff] }
  0x17   : > { %v534_v22 = vpack.c.bf16 %v293_v21, %v292_v20  ;;  %v295_v24 = vld [vmem:[%s648_s26 + $0x78] sm:$0xff]  ;;  %v296_v26 = vld [vmem:[%s648_s26 + $0x80] sm:$0xff]  ;;  %v297_v27 = vld [vmem:[%s648_s26 + $0x88] sm:$0xff] }
  0x18   : > { %v537_v25 = vpack.c.bf16 %v295_v24, %v294_v23  ;;  %v540_v28 = vpack.c.bf16 %v297_v27, %v296_v26  ;;  %v510_v30 = vld [vmem:[%s267_s29] ss:$0 sm:$0xff] }
  0x19   : > { %520 = vmatpush1.bf16.msra.mxu0 %v519_v7  ;;  %v511_v32 = vld [vmem:[%s270_s6] ss:$0 sm:$0xff] }
  0x1a   : > { %521 = vmatprep.subr.bf16.mxu0 %v592_v0 }
  0x1d   : > { %523 = vmatpush1.bf16.msra.mxu0 %v522_v10 }
  0x1e   : > { %524 = vmatprep.subr.bf16.mxu0 %v592_v0 }
  0x21   : > { %526 = vmatpush1.bf16.msra.mxu0 %v525_v13 }
  0x22   : > { %527 = vmatprep.subr.bf16.mxu0 %v592_v0 }
  0x25   : > { %529 = vmatpush1.bf16.msra.mxu0 %v528_v16 }
  0x26   : > { %530 = vmatprep.subr.bf16.mxu0 %v592_v0 }
  0x29   : > { %532 = vmatpush1.bf16.msra.mxu0 %v531_v19 }
  0x2a   : > { %533 = vmatprep.subr.bf16.mxu0 %v592_v0 }
  0x2d   : > { %535 = vmatpush1.bf16.msra.mxu0 %v534_v22 }
  0x2e   : > { %536 = vmatprep.subr.bf16.mxu0 %v592_v0 }
  0x31   : > { %538 = vmatpush1.bf16.msra.mxu0 %v537_v25 }
  0x32   : > { %539 = vmatprep.subr.bf16.mxu0 %v592_v0 }
  0x35   : > { %541 = vmatpush1.bf16.msra.mxu0 %v540_v28 }
  0x38   : > { %367 = vmatmul.mubr.f32.vlgmr.msra.gmra.mrb[0].mxu0 %v278_v29 }
 0x10b   : > { %v368_v31 = vpop.f32.mrb[0].mxu0 }
 0x10c   : > { %v379_v33 = vmul.f32 %v510_v30, %v368_v31  ;;  %v370_v34 = vpop.f32.mrb[1].mxu0 }
 0x10e   : > { %v387_v35 = vadd.f32 %v511_v32, %v379_v33 }
 0x110   : > { %v388_v36 = vmax.f32 %v387_v35, 0.0 }
 0x112   : > { %389 = vst.msk [vmem:[%s277_s10] sm:$0xff] %vm298_vm0, %v388_v36 }
 0x113 PF: > { %s14_s17 = sadd.s32 1, %s590_s17   ;;  %s698_s15 = smov %s586_s16 }
 0x114   : > { %p11_p5 = scmp.ge.s32.totalorder %s14_s17, 6   ;;  %s699_s16 = smov %s701_s18 }
 0x116   :  { %13 = sbr.rel (!%p11_p5) target bundleno = 2 (0x2), region = 75 }

// kernel: _lambda_.38
= control target key start
LH: loop header
LB: loop body
LE: loop exit
PB: predicated region body
PF: predicated region fallthrough
CT: control target
= control target key end

     0   :  { %v167_v0 = vmov 0.0|0.0   ;;  %vm168_vm0 = vmmov 0   ;;  %v169_v4 = vmov 0.0   ;;  %vm26_vm1 = vcmask 523264   ;;  %s231_s1 = inlined_call_operand.vmem [shape: f32[64,128], index: 1, kind: input, shape index: {}]   ;;  %s232_s0 = inlined_call_operand.vmem [shape: f32[8,64], index: 0, kind: input, shape index: {}]   ;;  %s233_s2 = inlined_call_operand.vmem [shape: f32[1,128], index: 2, kind: input, shape index: {}]   ;;  %s234_s3 = inlined_call_operand.vmem [shape: f32[1,128], index: 3, kind: input, shape index: {}]   ;;  %s235_s4 = inlined_call_operand.vmem [shape: f32[8,128], index: 4, kind: output, shape index: {}]  }
   0x1   :  { %152 = vmatprep.subr.bf16.mxu0 %v167_v0  ;;  %v18_v1 = vld [vmem:[%s231_s1] sm:$0xff]  ;;  %v19_v2 = vld [vmem:[%s231_s1 + $0x8] sm:$0xff]  ;;  %v20_v3 = vld [vmem:[%s231_s1 + $0x10] sm:$0xff]  ;;  %149 = vmatprep.mubr.msk.f32.mxu0 %vm168_vm0, %v169_v4 }
   0x2   :  { %v153_v5 = vpack.c.bf16 %v19_v2, %v18_v1  ;;  %v21_v6 = vld [vmem:[%s231_s1 + $0x18] sm:$0xff]  ;;  %v22_v8 = vld [vmem:[%s231_s1 + $0x20] sm:$0xff]  ;;  %v23_v9 = vld [vmem:[%s231_s1 + $0x28] sm:$0xff] }
   0x3   :  { %v156_v7 = vpack.c.bf16 %v21_v6, %v20_v3  ;;  %v159_v10 = vpack.c.bf16 %v23_v9, %v22_v8  ;;  %v24_v11 = vld [vmem:[%s231_s1 + $0x30] sm:$0xff]  ;;  %v25_v12 = vld [vmem:[%s231_s1 + $0x38] sm:$0xff]  ;;  %v17_v14 = vld [vmem:[%s232_s0] sm:$0xff] }
   0x4   :  { %154 = vmatpush3.bf16.msra.mxu0 %v153_v5  ;;  %v162_v13 = vpack.c.bf16 %v25_v12, %v24_v11  ;;  %v122_v15 = vld [vmem:[%s233_s2] ss:$0 sm:$0xff] }
   0x5   :  { %155 = vmatprep.subr.bf16.mxu0 %v167_v0  ;;  %v123_v17 = vld [vmem:[%s234_s3] ss:$0 sm:$0xff] }
   0x8   :  { %157 = vmatpush3.bf16.msra.mxu0 %v156_v7 }
   0x9   :  { %158 = vmatprep.subr.bf16.mxu0 %v167_v0 }
   0xc   :  { %160 = vmatpush3.bf16.msra.mxu0 %v159_v10 }
   0xd   :  { %161 = vmatprep.subr.bf16.mxu0 %v167_v0 }
  0x10   :  { %163 = vmatpush3.bf16.msra.mxu0 %v162_v13 }
  0x13   :  { %150 = vmatmul.mubr.msk.f32.vlgmr.msra.gmra.mrb[0].mxu0 %vm26_vm1, %v17_v14 }
  0xe6   :  { %v96_v16 = vpop.f32.mrb[0].mxu0 }
  0xe7   :  { %v107_v18 = vmul.f32 %v122_v15, %v96_v16  ;;  %v151_v19 = vpop.f32.mrb[1].mxu0 }
  0xe9   :  { %v115_v20 = vadd.f32 %v123_v17, %v107_v18 }
  0xeb   :  { %116 = vst [vmem:[%s235_s4] sm:$0xff] %v115_v20 }

// kernel: _lambda_.39
= control target key start
LH: loop header
LB: loop body
LE: loop exit
PB: predicated region body
PF: predicated region fallthrough
CT: control target
= control target key end

     0   :  { %s595_s18 = smov 0   ;;  %s597_s19 = smov 0   ;;  %s646_s0 = inlined_call_operand.vmem [shape: f32[4,8,16], index: 0, kind: input, shape index: {}]   ;;  %s647_s1 = inlined_call_operand.vmem [shape: f32[4,16,128], index: 1, kind: input, shape index: {}]   ;;  %s648_s2 = inlined_call_operand.vmem [shape: f32[1,128], index: 2, kind: input, shape index: {}]   ;;  %s649_s3 = inlined_call_operand.vmem [shape: f32[1,128], index: 3, kind: input, shape index: {}]   ;;  %s650_s4 = inlined_call_operand.vmem [shape: f32[8,128], index: 4, kind: input, shape index: {}]   ;;  %s651_s5 = inlined_call_operand.vmem [shape: f32[8,128], index: 5, kind: output, shape index: {}]  }
   0x1   :  { %s599_s20 = smov 0  }
   0x2 LB: > { %s24_s21 = sadd.s32 1, %s555_s19  ;;  %p483_p0 = scmp.ge.s32.totalorder %s559_s20, 1  ;;  %s559_s20 = sphi %s599_s20, %s15_s20   ;;  %s555_s19 = sphi %s597_s19, %s653_s19   ;;  %s551_s18 = sphi %s595_s18, %s652_s18  }
   0x3   : > { %p25_p1 = scmp.ge.s32.totalorder %s24_s21, 4  ;;  %p222_p2 = scmp.lt.s32.totalorder %s559_s20, 5 }
   0x5   : > { %s655_s21 = smov (%p25_p1, %s24_s21), 0  ;;  %p223_p3 = pnand %p483_p0, %p222_p2 }
   0x6   : > { %p260_p4 = scmp.lt.s32.totalorder (!%p223_p3), %s551_s18, 3  ;;  %p487_p5 = scmp.ne.s32.totalorder (!%p223_p3), %s551_s18, 0 }
   0x7   : > { %226 = sbr.rel (%p223_p3) target bundleno = 259 (0x103), region = 40 }
   0xe   : > { %s261_s22 = scalar_select %p260_p4, %s551_s18, 3 }
   0xf   : > { %283 = sbr.rel (%p487_p5) target bundleno = 22 (0x16), region = 44  ;;  %v561_v0 = vmov (!%p487_p5), 0.0  }
  0x10   : > { %s484_s23 = sshll.u32 %s261_s22, 3  ;;  %s495_s24 = sshll.u32 %s261_s22, 4  ;;  %284 = vst [vmem:[#allocation2] sm:$0xff] (!%p487_p5), %v561_v0 }
  0x11   : > { %s266_s27 = scalar_lea.vmem %s646_s0, %s484_s23  ;;  %s271_s30 = scalar_lea.vmem %s647_s1, %s495_s24 }
  0x16 PF: > { %v287_v1 = vld [vmem:[%s271_s30] sm:$0xff]  ;;  %v288_v2 = vld [vmem:[%s271_s30 + $0x8] sm:$0xff]  ;;  %v562_v3 = vmov 0.0|0.0   ;;  %vm563_vm0 = vmmov 0   ;;  %v564_v5 = vmov 0.0   ;;  %vm289_vm1 = vcmask 130048  }
  0x17   : > { %506 = vmatprep.subr.bf16.mxu0 %v562_v3  ;;  %v507_v4 = vpack.c.bf16 %v288_v2, %v287_v1  ;;  %503 = vmatprep.mubr.msk.f32.mxu0 %vm563_vm0, %v564_v5  ;;  %v286_v6 = vld [vmem:[%s266_s27] sm:$0xff]  ;;  %p489_p6 = scmp.ne.s32.totalorder %s551_s18, 3 }
  0x18   : > { %v285_v7 = vld [vmem:[#allocation2] sm:$0xff] }
  0x19   : > { %508 = vmatpush3.bf16.msra.mxu0 %v507_v4  ;;  %v490_v12 = vld [vmem:[%s648_s2] ss:$0 sm:$0xff] (!%p489_p6) }
  0x1a   : > { %v491_v13 = vld [vmem:[%s649_s3] ss:$0 sm:$0xff] (!%p489_p6) }
  0x1b   : > { %v386_v15 = vld [vmem:[%s650_s4] sm:$0xff] (!%p489_p6) }
  0x1c   : > { %504 = vmatmul.mubr.msk.f32.vlgmr.msra.gmra.mrb[0].mxu0 %vm289_vm1, %v286_v6 }
  0xec   : > { %368 = sbr.rel (%p489_p6) target bundleno = 259 (0x103), region = 48 }
  0xef   : > { %v359_v8 = vpop.f32.mrb[0].mxu0 }
  0xf0   : > { %v363_v9 = vadd.f32 %v359_v8, %v285_v7  ;;  %v505_v10 = vpop.f32.mrb[1].mxu0 }
  0xf2   : > { %364 = vst [vmem:[#allocation2] sm:$0xff] %v363_v9 }
  0xf9   : > { %v369_v11 = vld [vmem:[#allocation2] sm:$0xff] }
  0xfa   : > { %v377_v14 = vmul.f32 %v490_v12, %v369_v11 }
  0xfc   : > { %v385_v16 = vadd.f32 %v491_v13, %v377_v14 }
  0xfe   : > { %v387_v17 = vadd.f32 %v386_v15, %v385_v16 }
 0x100   : > { %v388_v18 = vmax.f32 %v387_v17, 0.0 }
 0x102   : > { %389 = vst [vmem:[%s651_s5] sm:$0xff] %v388_v18 }
 0x103 PF: > { %s15_s20 = sadd.s32 1, %s559_s20   ;;  %s652_s18 = smov %s555_s19 }
 0x104   : > { %p12_p7 = scmp.ge.s32.totalorder %s15_s20, 6   ;;  %s653_s19 = smov %s655_s21 }
 0x106   :  { %14 = sbr.rel (!%p12_p7) target bundleno = 2 (0x2), region = 84 }

// kernel: _lambda_.40
= control target key start
LH: loop header
LB: loop body
LE: loop exit
PB: predicated region body
PF: predicated region fallthrough
CT: control target
= control target key end

     0   :  { %v207_v0 = vmov 0.0|0.0   ;;  %vm208_vm0 = vmmov 0   ;;  %v209_v4 = vmov 0.0   ;;  %s295_s1 = inlined_call_operand.vmem [shape: f32[128,128], index: 1, kind: input, shape index: {}]   ;;  %s296_s0 = inlined_call_operand.vmem [shape: f32[8,128], index: 0, kind: input, shape index: {}]   ;;  %s297_s2 = inlined_call_operand.vmem [shape: f32[1,128], index: 2, kind: input, shape index: {}]   ;;  %s298_s3 = inlined_call_operand.vmem [shape: f32[1,128], index: 3, kind: input, shape index: {}]   ;;  %s299_s4 = inlined_call_operand.vmem [shape: f32[8,128], index: 4, kind: output, shape index: {}]  }
   0x1   :  { %180 = vmatprep.subr.bf16.mxu0 %v207_v0  ;;  %v18_v1 = vld [vmem:[%s295_s1] sm:$0xff]  ;;  %v19_v2 = vld [vmem:[%s295_s1 + $0x8] sm:$0xff]  ;;  %v20_v3 = vld [vmem:[%s295_s1 + $0x10] sm:$0xff]  ;;  %177 = vmatprep.mubr.msk.f32.mxu0 %vm208_vm0, %v209_v4 }
   0x2   :  { %v181_v5 = vpack.c.bf16 %v19_v2, %v18_v1  ;;  %v21_v6 = vld [vmem:[%s295_s1 + $0x18] sm:$0xff]  ;;  %v22_v8 = vld [vmem:[%s295_s1 + $0x20] sm:$0xff]  ;;  %v23_v9 = vld [vmem:[%s295_s1 + $0x28] sm:$0xff] }
   0x3   :  { %v184_v7 = vpack.c.bf16 %v21_v6, %v20_v3  ;;  %v187_v10 = vpack.c.bf16 %v23_v9, %v22_v8  ;;  %v24_v11 = vld [vmem:[%s295_s1 + $0x30] sm:$0xff]  ;;  %v25_v12 = vld [vmem:[%s295_s1 + $0x38] sm:$0xff]  ;;  %v26_v14 = vld [vmem:[%s295_s1 + $0x40] sm:$0xff] }
   0x4   :  { %182 = vmatpush3.bf16.msra.mxu0 %v181_v5  ;;  %v190_v13 = vpack.c.bf16 %v25_v12, %v24_v11  ;;  %v27_v15 = vld [vmem:[%s295_s1 + $0x48] sm:$0xff]  ;;  %v28_v17 = vld [vmem:[%s295_s1 + $0x50] sm:$0xff]  ;;  %v29_v18 = vld [vmem:[%s295_s1 + $0x58] sm:$0xff] }
   0x5   :  { %183 = vmatprep.subr.bf16.mxu0 %v207_v0  ;;  %v193_v16 = vpack.c.bf16 %v27_v15, %v26_v14  ;;  %v196_v19 = vpack.c.bf16 %v29_v18, %v28_v17  ;;  %v30_v20 = vld [vmem:[%s295_s1 + $0x60] sm:$0xff]  ;;  %v31_v21 = vld [vmem:[%s295_s1 + $0x68] sm:$0xff]  ;;  %v32_v23 = vld [vmem:[%s295_s1 + $0x70] sm:$0xff] }
   0x6   :  { %v199_v22 = vpack.c.bf16 %v31_v21, %v30_v20  ;;  %v33_v24 = vld [vmem:[%s295_s1 + $0x78] sm:$0xff]  ;;  %v17_v26 = vld [vmem:[%s296_s0] sm:$0xff] }
   0x7   :  { %v202_v25 = vpack.c.bf16 %v33_v24, %v32_v23  ;;  %v126_v27 = vld [vmem:[%s297_s2] ss:$0 sm:$0xff] }
   0x8   :  { %185 = vmatpush3.bf16.msra.mxu0 %v184_v7  ;;  %v127_v29 = vld [vmem:[%s298_s3] ss:$0 sm:$0xff] }
   0x9   :  { %186 = vmatprep.subr.bf16.mxu0 %v207_v0 }
   0xc   :  { %188 = vmatpush3.bf16.msra.mxu0 %v187_v10 }
   0xd   :  { %189 = vmatprep.subr.bf16.mxu0 %v207_v0 }
  0x10   :  { %191 = vmatpush3.bf16.msra.mxu0 %v190_v13 }
  0x11   :  { %192 = vmatprep.subr.bf16.mxu0 %v207_v0 }
  0x14   :  { %194 = vmatpush3.bf16.msra.mxu0 %v193_v16 }
  0x15   :  { %195 = vmatprep.subr.bf16.mxu0 %v207_v0 }
  0x18   :  { %197 = vmatpush3.bf16.msra.mxu0 %v196_v19 }
  0x19   :  { %198 = vmatprep.subr.bf16.mxu0 %v207_v0 }
  0x1c   :  { %200 = vmatpush3.bf16.msra.mxu0 %v199_v22 }
  0x1d   :  { %201 = vmatprep.subr.bf16.mxu0 %v207_v0 }
  0x20   :  { %203 = vmatpush3.bf16.msra.mxu0 %v202_v25 }
  0x23   :  { %178 = vmatmul.mubr.f32.vlgmr.msra.gmra.mrb[0].mxu0 %v17_v26 }
  0xf6   :  { %v100_v28 = vpop.f32.mrb[0].mxu0 }
  0xf7   :  { %v111_v30 = vmul.f32 %v126_v27, %v100_v28  ;;  %v179_v31 = vpop.f32.mrb[1].mxu0 }
  0xf9   :  { %v119_v32 = vadd.f32 %v127_v29, %v111_v30 }
  0xfb   :  { %v120_v33 = vmax.f32 %v119_v32, 0.0 }
  0xfd   :  { %121 = vst [vmem:[%s299_s4] sm:$0xff] %v120_v33 }

// kernel: _lambda_.41
= control target key start
LH: loop header
LB: loop body
LE: loop exit
PB: predicated region body
PF: predicated region fallthrough
CT: control target
= control target key end

     0   :  { %s772_s15 = smov 0   ;;  %s774_s16 = smov 0   ;;  %s866_s0 = inlined_call_operand.vmem [shape: f32[4,8,288], index: 0, kind: input, shape index: {}]   ;;  %s867_s1 = inlined_call_operand.vmem [shape: f32[4,288,32], index: 1, kind: input, shape index: {}]   ;;  %s868_s2 = inlined_call_operand.vmem [shape: f32[4,1,32], index: 2, kind: input, shape index: {}]   ;;  %s869_s3 = inlined_call_operand.vmem [shape: f32[4,1,32], index: 3, kind: input, shape index: {}]   ;;  %s870_s4 = inlined_call_operand.vmem [shape: f32[4,8,32], index: 4, kind: output, shape index: {}]  }
   0x1   :  { %s776_s17 = smov 0  }
   0x2 LB: > { %s23_s18 = sadd.s32 1, %s738_s16  ;;  %p593_p0 = scmp.ge.s32.totalorder %s742_s17, 1  ;;  %s742_s17 = sphi %s776_s17, %s14_s17   ;;  %s738_s16 = sphi %s774_s16, %s872_s16   ;;  %s734_s15 = sphi %s772_s15, %s871_s15  }
   0x3   : > { %p24_p1 = scmp.ge.s32.totalorder %s23_s18, 4  ;;  %p208_p2 = scmp.lt.s32.totalorder %s742_s17, 5 }
   0x5   : > { %s874_s18 = smov (%p24_p1, %s23_s18), 0  ;;  %p209_p3 = pnand %p593_p0, %p208_p2 }
   0x6   : > { %p251_p4 = scmp.lt.s32.totalorder (!%p209_p3), %s734_s15, 3  ;;  %v744_v0 = vmov (!%p209_p3), 0.0|0.0   ;;  %vm745_vm0 = vmmov (!%p209_p3), 0   ;;  %v746_v1 = vmov (!%p209_p3), 0.0   ;;  %vm317_vm1 = vcmask (!%p209_p3), 261120  }
   0x7   : > { %212 = sbr.rel (%p209_p3) target bundleno = 277 (0x115), region = 36  ;;  %685 = vmatprep.subr.bf16.mxu1 (!%p209_p3), %v744_v0  ;;  %650 = vmatprep.mubr.msk.f32.mxu1 (!%p209_p3), %vm745_vm0, %v746_v1 }
   0xe   : > { %s876_s15 = smov (!%p251_p4, %s734_s15), 3 }
   0xf   : > { %s692_s19 = smul.u32 288, %s876_s15  ;;  %s267_s29 = scalar_lea.vmem %s868_s2, %s876_s15 }
  0x10   : > { %s691_s23 = smul.u32 24, %s876_s15  ;;  %s270_s6 = scalar_lea.vmem %s869_s3, %s876_s15 }
  0x11   : > { %s796_s22 = scalar_lea.vmem %s867_s1, %s692_s19  ;;  %s596_s7 = sshll.u32 %s876_s15, 3 }
  0x12   : > { %v297_v2 = vld [vmem:[%s796_s22 + $0x80] sm:$0xff]  ;;  %v298_v3 = vld [vmem:[%s796_s22 + $0x88] sm:$0xff]  ;;  %v299_v7 = vld [vmem:[%s796_s22 + $0x90] sm:$0xff]  ;;  %s817_s26 = scalar_lea.vmem %s866_s0, %s691_s23  ;;  %s277_s10 = scalar_lea.vmem %s870_s4, %s596_s7 }
  0x13   : > { %v281_v4 = vld [vmem:[%s796_s22] sm:$0xff]  ;;  %v653_v5 = vpack.c.bf16 %v298_v3, %v297_v2  ;;  %v282_v6 = vld [vmem:[%s796_s22 + $0x8] sm:$0xff]  ;;  %v300_v8 = vld [vmem:[%s796_s22 + $0x98] sm:$0xff] }
  0x14   : > { %v655_v9 = vpack.c.bf16 %v282_v6, %v281_v4  ;;  %v657_v10 = vpack.c.bf16 %v300_v8, %v299_v7  ;;  %v283_v11 = vld [vmem:[%s796_s22 + $0x10] sm:$0xff]  ;;  %v284_v12 = vld [vmem:[%s796_s22 + $0x18] sm:$0xff]  ;;  %v301_v13 = vld [vmem:[%s796_s22 + $0xa0] sm:$0xff] }
  0x15   : > { %654 = vmatprep.subr.bf16.mxu0 %v653_v5  ;;  %v302_v14 = vld [vmem:[%s796_s22 + $0xa8] sm:$0xff]  ;;  %v659_v15 = vpack.c.bf16 %v284_v12, %v283_v11  ;;  %v285_v17 = vld [vmem:[%s796_s22 + $0x20] sm:$0xff]  ;;  %v303_v19 = vld [vmem:[%s796_s22 + $0xb0] sm:$0xff] }
  0x16   : > { %656 = vmatpush3.bf16.msra.mxu0 %v655_v9  ;;  %v661_v16 = vpack.c.bf16 %v302_v14, %v301_v13  ;;  %v286_v18 = vld [vmem:[%s796_s22 + $0x28] sm:$0xff]  ;;  %v304_v20 = vld [vmem:[%s796_s22 + $0xb8] sm:$0xff]  ;;  %v287_v22 = vld [vmem:[%s796_s22 + $0x30] sm:$0xff] }
  0x17   : > { %658 = vmatprep.subr.bf16.mxu0 %v657_v10  ;;  %v663_v21 = vpack.c.bf16 %v286_v18, %v285_v17  ;;  %v665_v23 = vpack.c.bf16 %v304_v20, %v303_v19  ;;  %v288_v24 = vld [vmem:[%s796_s22 + $0x38] sm:$0xff]  ;;  %v313_v25 = vld [vmem:[%s796_s22 + $0x100] sm:$0xff]  ;;  %v314_v26 = vld [vmem:[%s796_s22 + $0x108] sm:$0xff] }
  0x18   : > { %v305_v27 = vld [vmem:[%s796_s22 + $0xc0] sm:$0xff]  ;;  %v306_v28 = vld [vmem:[%s796_s22 + $0xc8] sm:$0xff]  ;;  %v686_v29 = vpack.c.bf16 %v314_v26, %v313_v25  ;;  %v315_v31 = vld [vmem:[%s796_s22 + $0x110] sm:$0xff]  ;;  %v667_v32 = vpack.c.bf16 %v288_v24, %v287_v22 }
  0x19   : > { %v279_v30 = vld [vmem:[%s817_s26 + $0x8] sm:$0xff]  ;;  %v316_v33 = vld [vmem:[%s796_s22 + $0x118] sm:$0xff]  ;;  %v669_v34 = vpack.c.bf16 %v306_v28, %v305_v27  ;;  %v289_v35 = vld [vmem:[%s796_s22 + $0x40] sm:$0xff] }
  0x1a   : > { %660 = vmatpush3.bf16.msra.mxu0 %v659_v15  ;;  %687 = vmatpush3.bf16.msra.mxu1 %v686_v29  ;;  %v290_v36 = vld [vmem:[%s796_s22 + $0x48] sm:$0xff]  ;;  %v689_v37 = vpack.c.bf16 %v316_v33, %v315_v31  ;;  %v307_v38 = vld [vmem:[%s796_s22 + $0xd0] sm:$0xff]  ;;  %v308_v39 = vld [vmem:[%s796_s22 + $0xd8] sm:$0xff] }
  0x1b   : > { %662 = vmatprep.subr.bf16.mxu0 %v661_v16  ;;  %688 = vmatprep.subr.bf16.mxu1 %v744_v0  ;;  %v671_v40 = vpack.c.bf16 %v290_v36, %v289_v35  ;;  %v280_v41 = vld [vmem:[%s817_s26 + $0x10] sm:$0xff]  ;;  %v673_v42 = vpack.c.bf16 %v308_v39, %v307_v38  ;;  %v292_v44 = vld [vmem:[%s796_s22 + $0x58] sm:$0xff]  ;;  %v309_v45 = vld [vmem:[%s796_s22 + $0xe0] sm:$0xff] }
  0x1c   : > { %385 = vmatprep.mubr.f32.mxu0 %v279_v30  ;;  %v291_v43 = vld [vmem:[%s796_s22 + $0x50] sm:$0xff]  ;;  %v310_v46 = vld [vmem:[%s796_s22 + $0xe8] sm:$0xff]  ;;  %v293_v49 = vld [vmem:[%s796_s22 + $0x60] sm:$0xff] }
  0x1d   : > { %v675_v47 = vpack.c.bf16 %v292_v44, %v291_v43  ;;  %v677_v48 = vpack.c.bf16 %v310_v46, %v309_v45  ;;  %v294_v50 = vld [vmem:[%s796_s22 + $0x68] sm:$0xff]  ;;  %v311_v51 = vld [vmem:[%s796_s22 + $0xf0] sm:$0xff]  ;;  %v312_v52 = vld [vmem:[%s796_s22 + $0xf8] sm:$0xff] }
  0x1e   : > { %664 = vmatpush3.bf16.msra.mxu0 %v663_v21  ;;  %690 = vmatpush3.bf16.msra.mxu1 %v689_v37  ;;  %v679_v53 = vpack.c.bf16 %v294_v50, %v293_v49  ;;  %v681_v54 = vpack.c.bf16 %v312_v52, %v311_v51  ;;  %v295_v55 = vld [vmem:[%s796_s22 + $0x70] sm:$0xff]  ;;  %v296_v56 = vld [vmem:[%s796_s22 + $0x78] sm:$0xff]  ;;  %v278_v58 = vld [vmem:[%s817_s26] sm:$0xff] }
  0x1f   : > { %666 = vmatprep.subr.bf16.mxu0 %v665_v23  ;;  %v683_v57 = vpack.c.bf16 %v296_v56, %v295_v55  ;;  %v598_v0 = vld [vmem:[%s267_s29] ss:$0 sm:$0xff] }
  0x20   : > { %v599_v2 = vld [vmem:[%s270_s6] ss:$0 sm:$0xff] }
  0x21   : > { %651 = vmatmul.mubr.msk.f32.vlgmr.msra.gmra.mrb[0].mxu1 %vm317_vm1, %v280_v41 }
  0x22   : > { %668 = vmatpush3.bf16.msra.mxu0 %v667_v32 }
  0x23   : > { %670 = vmatprep.subr.bf16.mxu0 %v669_v34 }
  0x26   : > { %672 = vmatpush3.bf16.msra.mxu0 %v671_v40 }
  0x27   : > { %674 = vmatprep.subr.bf16.mxu0 %v673_v42 }
  0x2a   : > { %676 = vmatpush3.bf16.msra.mxu0 %v675_v47 }
  0x2b   : > { %678 = vmatprep.subr.bf16.mxu0 %v677_v48 }
  0x2e   : > { %680 = vmatpush3.bf16.msra.mxu0 %v679_v53 }
  0x2f   : > { %682 = vmatprep.subr.bf16.mxu0 %v681_v54 }
  0x32   : > { %684 = vmatpush3.bf16.msra.mxu0 %v683_v57 }
  0x35   : > { %386 = vmatmul.mubr.f32.vlgmr.msra.gmra.mrb[0].mxu0 %v278_v58 }
  0xf4   : > { %v457_v59 = vpop.f32.mrb[0].mxu1 }
  0xf5   : > { %v652_v60 = vpop.f32.mrb[1].mxu1 }
 0x108   : > { %v634_v61 = vpop.f32.mrb[0].mxu0 }
 0x109   : > { %v635_v62 = vpop.f32.mrb[1].mxu0 }
 0x10a   : > { %v636_v63 = vadd.f32 %v635_v62, %v634_v61 }
 0x10c   : > { %v458_v1 = vadd.f32 %v636_v63, %v457_v59 }
 0x10e   : > { %v468_v3 = vmul.f32 %v598_v0, %v458_v1 }
 0x110   : > { %v476_v4 = vadd.f32 %v599_v2, %v468_v3 }
 0x112   : > { %v477_v5 = vmax.f32 %v476_v4, 0.0 }
 0x114   : > { %478 = vst.msk [vmem:[%s277_s10] sm:$0xff] %vm317_vm1, %v477_v5 }
 0x115 PF: > { %s14_s17 = sadd.s32 1, %s742_s17   ;;  %s871_s15 = smov %s738_s16 }
 0x116   : > { %p11_p5 = scmp.ge.s32.totalorder %s14_s17, 6   ;;  %s872_s16 = smov %s874_s18 }
 0x118   :  { %13 = sbr.rel (!%p11_p5) target bundleno = 2 (0x2), region = 75 }

// kernel: _lambda_.42
= control target key start
LH: loop header
LB: loop body
LE: loop exit
PB: predicated region body
PF: predicated region fallthrough
CT: control target
= control target key end

     0   :  { %v188_v3 = vmov 0.0   ;;  %v123_v50 = vlaneseq  ;;  %s325_s1 = inlined_call_operand.vmem [shape: f32[128,256], index: 1, kind: input, shape index: {}]   ;;  %s326_s0 = inlined_call_operand.vmem [shape: f32[8,128], index: 0, kind: input, shape index: {}]   ;;  %s327_s2 = inlined_call_operand.vmem [shape: f32[1,256], index: 2, kind: input, shape index: {}]   ;;  %s328_s3 = inlined_call_operand.vmem [shape: f32[1,256], index: 3, kind: input, shape index: {}]   ;;  %s329_s4 = inlined_call_operand.vmem [shape: f32[8,256], index: 4, kind: output, shape index: {}]  }
   0x1   :  { %v19_v0 = vld [vmem:[%s325_s1 + $0x8] sm:$0xff]  ;;  %v21_v1 = vld [vmem:[%s325_s1 + $0x18] sm:$0xff]  ;;  %v18_v2 = vld [vmem:[%s325_s1] sm:$0xff]  ;;  %114 = vmatprep.mubr.f32.mxu0 %v188_v3 }
   0x2   :  { %v155_v4 = vpack.c.bf16 %v21_v1, %v19_v0  ;;  %v20_v5 = vld [vmem:[%s325_s1 + $0x10] sm:$0xff]  ;;  %v23_v6 = vld [vmem:[%s325_s1 + $0x28] sm:$0xff]  ;;  %v25_v7 = vld [vmem:[%s325_s1 + $0x38] sm:$0xff]  ;;  %v124_v51 = vshrl.u32 %v123_v50, 7 }
   0x3   :  { %v157_v8 = vpack.c.bf16 %v20_v5, %v18_v2  ;;  %v159_v9 = vpack.c.bf16 %v25_v7, %v23_v6  ;;  %v22_v10 = vld [vmem:[%s325_s1 + $0x20] sm:$0xff]  ;;  %v24_v11 = vld [vmem:[%s325_s1 + $0x30] sm:$0xff]  ;;  %v27_v12 = vld [vmem:[%s325_s1 + $0x48] sm:$0xff] }
   0x4   :  { %156 = vmatprep.subr.bf16.mxu0 %v155_v4  ;;  %v29_v13 = vld [vmem:[%s325_s1 + $0x58] sm:$0xff]  ;;  %v161_v14 = vpack.c.bf16 %v24_v11, %v22_v10  ;;  %v26_v16 = vld [vmem:[%s325_s1 + $0x40] sm:$0xff]  ;;  %v28_v17 = vld [vmem:[%s325_s1 + $0x50] sm:$0xff]  ;;  %v125_v52 = vsub.s32 0, %v124_v51  ;;  %v129_v54 = vsub.s32 1, %v124_v51 }
   0x5   :  { %158 = vmatpush1.bf16.msra.mxu0 %v157_v8  ;;  %v163_v15 = vpack.c.bf16 %v29_v13, %v27_v12  ;;  %v31_v18 = vld [vmem:[%s325_s1 + $0x68] sm:$0xff]  ;;  %v33_v19 = vld [vmem:[%s325_s1 + $0x78] sm:$0xff]  ;;  %v165_v20 = vpack.c.bf16 %v28_v17, %v26_v16  ;;  %v30_v22 = vld [vmem:[%s325_s1 + $0x60] sm:$0xff] }
   0x6   :  { %160 = vmatprep.subr.bf16.mxu0 %v159_v9  ;;  %v167_v21 = vpack.c.bf16 %v33_v19, %v31_v18  ;;  %v32_v23 = vld [vmem:[%s325_s1 + $0x70] sm:$0xff]  ;;  %v35_v24 = vld [vmem:[%s325_s1 + $0x88] sm:$0xff]  ;;  %v37_v25 = vld [vmem:[%s325_s1 + $0x98] sm:$0xff] }
   0x7   :  { %v169_v26 = vpack.c.bf16 %v32_v23, %v30_v22  ;;  %v171_v27 = vpack.c.bf16 %v37_v25, %v35_v24  ;;  %v34_v28 = vld [vmem:[%s325_s1 + $0x80] sm:$0xff]  ;;  %v36_v29 = vld [vmem:[%s325_s1 + $0x90] sm:$0xff]  ;;  %v39_v30 = vld [vmem:[%s325_s1 + $0xa8] sm:$0xff] }
   0x8   :  { %v41_v31 = vld [vmem:[%s325_s1 + $0xb8] sm:$0xff]  ;;  %v173_v32 = vpack.c.bf16 %v36_v29, %v34_v28  ;;  %v38_v34 = vld [vmem:[%s325_s1 + $0xa0] sm:$0xff]  ;;  %v40_v35 = vld [vmem:[%s325_s1 + $0xb0] sm:$0xff] }
   0x9   :  { %162 = vmatpush1.bf16.msra.mxu0 %v161_v14  ;;  %v175_v33 = vpack.c.bf16 %v41_v31, %v39_v30  ;;  %v43_v36 = vld [vmem:[%s325_s1 + $0xc8] sm:$0xff]  ;;  %v45_v37 = vld [vmem:[%s325_s1 + $0xd8] sm:$0xff]  ;;  %v177_v38 = vpack.c.bf16 %v40_v35, %v38_v34  ;;  %v42_v40 = vld [vmem:[%s325_s1 + $0xc0] sm:$0xff] }
   0xa   :  { %164 = vmatprep.subr.bf16.mxu0 %v163_v15  ;;  %v179_v39 = vpack.c.bf16 %v45_v37, %v43_v36  ;;  %v44_v41 = vld [vmem:[%s325_s1 + $0xd0] sm:$0xff]  ;;  %v47_v42 = vld [vmem:[%s325_s1 + $0xe8] sm:$0xff]  ;;  %v49_v43 = vld [vmem:[%s325_s1 + $0xf8] sm:$0xff] }
   0xb   :  { %v181_v44 = vpack.c.bf16 %v44_v41, %v42_v40  ;;  %v183_v45 = vpack.c.bf16 %v49_v43, %v47_v42  ;;  %v46_v46 = vld [vmem:[%s325_s1 + $0xe0] sm:$0xff]  ;;  %v48_v47 = vld [vmem:[%s325_s1 + $0xf0] sm:$0xff] }
   0xc   :  { %v185_v48 = vpack.c.bf16 %v48_v47, %v46_v46  ;;  %v17_v49 = vld [vmem:[%s326_s0] sm:$0xff] }
   0xd   :  { %166 = vmatpush1.bf16.msra.mxu0 %v165_v20  ;;  %v121_v53 = vld [vmem:[%s327_s2] sm:$0x3] }
   0xe   :  { %168 = vmatprep.subr.bf16.mxu0 %v167_v21  ;;  %v135_v55 = vld [vmem:[%s328_s3] sm:$0x3]  ;;  %v126_v56 = vrot.slane %v121_v53, %v125_v52  ;;  %v130_v57 = vrot.slane %v121_v53, %v129_v54 }
   0xf   :  { %v140_v58 = vrot.slane %v135_v55, %v125_v52  ;;  %v144_v60 = vrot.slane %v135_v55, %v129_v54 }
  0x11   :  { %170 = vmatpush1.bf16.msra.mxu0 %v169_v26 }
  0x12   :  { %172 = vmatprep.subr.bf16.mxu0 %v171_v27 }
  0x15   :  { %174 = vmatpush1.bf16.msra.mxu0 %v173_v32 }
  0x16   :  { %176 = vmatprep.subr.bf16.mxu0 %v175_v33 }
  0x19   :  { %178 = vmatpush1.bf16.msra.mxu0 %v177_v38 }
  0x1a   :  { %180 = vmatprep.subr.bf16.mxu0 %v179_v39 }
  0x1d   :  { %182 = vmatpush1.bf16.msra.mxu0 %v181_v44 }
  0x1e   :  { %184 = vmatprep.subr.bf16.mxu0 %v183_v45 }
  0x21   :  { %186 = vmatpush1.bf16.msra.mxu0 %v185_v48 }
  0x24   :  { %115 = vmatmul.mubr.f32.vlgmr.msra.gmra.mrb[0].mxu0 %v17_v49 }
  0xf7   :  { %v116_v59 = vpop.f32.mrb[0].mxu0 }
  0xf8   :  { %v133_v61 = vmul.f32 %v126_v56, %v116_v59  ;;  %v118_v62 = vpop.f32.mrb[1].mxu0 }
  0xf9   :  { %v134_v63 = vmul.f32 %v130_v57, %v118_v62 }
  0xfa   :  { %v147_v0 = vadd.f32 %v140_v58, %v133_v61 }
  0xfb   :  { %v148_v1 = vadd.f32 %v144_v60, %v134_v63 }
  0xfc   :  { %149 = vst [vmem:[%s329_s4] sm:$0xff] %v147_v0 }
  0xfd   :  { %150 = vst [vmem:[%s329_s4 + $0x8] sm:$0xff] %v148_v1 }

// kernel: _lambda_.43
= control target key start
LH: loop header
LB: loop body
LE: loop exit
PB: predicated region body
PF: predicated region fallthrough
CT: control target
= control target key end

     0   :  { %s619_s18 = smov 0   ;;  %s621_s19 = smov 0   ;;  %s676_s0 = inlined_call_operand.vmem [shape: f32[4,8,32], index: 0, kind: input, shape index: {}]   ;;  %s677_s1 = inlined_call_operand.vmem [shape: f32[4,32,256], index: 1, kind: input, shape index: {}]   ;;  %s678_s2 = inlined_call_operand.vmem [shape: f32[1,256], index: 2, kind: input, shape index: {}]   ;;  %s679_s3 = inlined_call_operand.vmem [shape: f32[1,256], index: 3, kind: input, shape index: {}]   ;;  %s680_s4 = inlined_call_operand.vmem [shape: f32[8,256], index: 4, kind: input, shape index: {}]   ;;  %s681_s5 = inlined_call_operand.vmem [shape: f32[8,256], index: 5, kind: output, shape index: {}]  }
   0x1   :  { %s623_s20 = smov 0  }
   0x2 LB: > { %s24_s21 = sadd.s32 1, %s581_s19  ;;  %p518_p0 = scmp.ge.s32.totalorder %s585_s20, 1  ;;  %s585_s20 = sphi %s623_s20, %s15_s20   ;;  %s581_s19 = sphi %s621_s19, %s683_s19   ;;  %s577_s18 = sphi %s619_s18, %s682_s18  }
   0x3   : > { %p25_p1 = scmp.ge.s32.totalorder %s24_s21, 4  ;;  %p223_p2 = scmp.lt.s32.totalorder %s585_s20, 5 }
   0x5   : > { %s685_s21 = smov (%p25_p1, %s24_s21), 0  ;;  %p224_p3 = pnand %p518_p0, %p223_p2 }
   0x6   : > { %p263_p4 = scmp.lt.s32.totalorder (!%p224_p3), %s577_s18, 3  ;;  %p522_p5 = scmp.ne.s32.totalorder (!%p224_p3), %s577_s18, 0 }
   0x7   : > { %227 = sbr.rel (%p224_p3) target bundleno = 265 (0x109), region = 40 }
   0xe   : > { %s264_s22 = scalar_select %p263_p4, %s577_s18, 3 }
   0xf   : > { %288 = sbr.rel (%p522_p5) target bundleno = 22 (0x16), region = 44  ;;  %v587_v0 = vmov (!%p522_p5), 0.0  }
  0x10   : > { %s519_s23 = sshll.u32 %s264_s22, 3  ;;  %s528_s24 = sshll.u32 %s264_s22, 6  ;;  %289 = vst [vmem:[#allocation2] sm:$0xff] (!%p522_p5), %v587_v0  ;;  %290 = vst [vmem:[#allocation2 + $0x8] sm:$0xff] (!%p522_p5), %v587_v0 }
  0x11   : > { %s269_s27 = scalar_lea.vmem %s676_s0, %s519_s23  ;;  %s274_s30 = scalar_lea.vmem %s677_s1, %s528_s24 }
  0x16 PF: > { %v295_v1 = vld [vmem:[%s274_s30 + $0x8] sm:$0xff]  ;;  %v297_v2 = vld [vmem:[%s274_s30 + $0x18] sm:$0xff]  ;;  %v294_v3 = vld [vmem:[%s274_s30] sm:$0xff]  ;;  %v588_v8 = vmov 0.0   ;;  %vm302_vm0 = vcmask 261120   ;;  %p524_p6 = scmp.ne.s32.totalorder %s577_s18, 3 }
  0x17   : > { %v529_v4 = vpack.c.bf16 %v297_v2, %v295_v1  ;;  %v296_v5 = vld [vmem:[%s274_s30 + $0x10] sm:$0xff]  ;;  %v299_v6 = vld [vmem:[%s274_s30 + $0x28] sm:$0xff]  ;;  %v301_v7 = vld [vmem:[%s274_s30 + $0x38] sm:$0xff]  ;;  %370 = vmatprep.mubr.f32.mxu0 %v588_v8  ;;  %v389_v21 = vlaneseq (!%p524_p6) }
  0x18   : > { %v531_v9 = vpack.c.bf16 %v296_v5, %v294_v3  ;;  %v533_v10 = vpack.c.bf16 %v301_v7, %v299_v6  ;;  %v298_v11 = vld [vmem:[%s274_s30 + $0x20] sm:$0xff]  ;;  %v300_v12 = vld [vmem:[%s274_s30 + $0x30] sm:$0xff]  ;;  %v292_v16 = vld [vmem:[#allocation2 + $0x8] sm:$0xff] }
  0x19   : > { %530 = vmatprep.subr.bf16.mxu0 %v529_v4  ;;  %v535_v13 = vpack.c.bf16 %v300_v12, %v298_v11  ;;  %v293_v14 = vld [vmem:[%s269_s27] sm:$0xff]  ;;  %v390_v22 = vshrl.u32 (!%p524_p6), %v389_v21, 7  ;;  %v416_v36 = vld [vmem:[%s680_s4 + $0x8] sm:$0xff] (!%p524_p6) }
  0x1a   : > { %532 = vmatpush1.bf16.msra.mxu0 %v531_v9  ;;  %v291_v15 = vld [vmem:[#allocation2] sm:$0xff] }
  0x1b   : > { %534 = vmatprep.subr.bf16.mxu0 %v533_v10  ;;  %v387_v23 = vld [vmem:[%s678_s2] sm:$0x3] (!%p524_p6)  ;;  %v391_v25 = vsub.s32 (!%p524_p6), 0, %v390_v22  ;;  %v395_v26 = vsub.s32 (!%p524_p6), 1, %v390_v22 }
  0x1c   : > { %v401_v24 = vld [vmem:[%s679_s3] sm:$0x3] (!%p524_p6) }
  0x1d   : > { %v392_v29 = vrot.slane (!%p524_p6), %v387_v23, %v391_v25  ;;  %v406_v30 = vrot.slane (!%p524_p6), %v401_v24, %v391_v25  ;;  %v396_v31 = vrot.slane (!%p524_p6), %v387_v23, %v395_v26  ;;  %v410_v32 = vrot.slane (!%p524_p6), %v401_v24, %v395_v26  ;;  %v415_v35 = vld [vmem:[%s680_s4] sm:$0xff] (!%p524_p6) }
  0x1e   : > { %536 = vmatpush1.bf16.msra.mxu0 %v535_v13 }
  0x21   : > { %523 = vmatmul.mubr.msk.f32.vlgmr.msra.gmra.mrb[0].mxu0 %vm302_vm0, %v293_v14 }
  0xf2   : > { %384 = sbr.rel (%p524_p6) target bundleno = 265 (0x109), region = 48 }
  0xf4   : > { %v372_v17 = vpop.f32.mrb[0].mxu0 }
  0xf5   : > { %v377_v18 = vadd.f32 %v372_v17, %v291_v15  ;;  %v374_v19 = vpop.f32.mrb[1].mxu0 }
  0xf6   : > { %v378_v20 = vadd.f32 %v374_v19, %v292_v16 }
  0xf7   : > { %379 = vst [vmem:[#allocation2] sm:$0xff] %v377_v18 }
  0xf8   : > { %380 = vst [vmem:[#allocation2 + $0x8] sm:$0xff] %v378_v20 }
  0xfe   : > { %v385_v27 = vld [vmem:[#allocation2] sm:$0xff] }
  0xff   : > { %v386_v28 = vld [vmem:[#allocation2 + $0x8] sm:$0xff]  ;;  %v399_v33 = vmul.f32 %v392_v29, %v385_v27 }
 0x100   : > { %v400_v34 = vmul.f32 %v396_v31, %v386_v28 }
 0x101   : > { %v413_v37 = vadd.f32 %v406_v30, %v399_v33 }
 0x102   : > { %v414_v38 = vadd.f32 %v410_v32, %v400_v34 }
 0x103   : > { %v417_v39 = vadd.f32 %v415_v35, %v413_v37 }
 0x104   : > { %v418_v40 = vadd.f32 %v416_v36, %v414_v38 }
 0x105   : > { %v419_v41 = vmax.f32 %v417_v39, 0.0 }
 0x106   : > { %v420_v42 = vmax.f32 %v418_v40, 0.0 }
 0x107   : > { %421 = vst [vmem:[%s681_s5] sm:$0xff] %v419_v41 }
 0x108   : > { %422 = vst [vmem:[%s681_s5 + $0x8] sm:$0xff] %v420_v42 }
 0x109 PF: > { %s15_s20 = sadd.s32 1, %s585_s20   ;;  %s682_s18 = smov %s581_s19 }
 0x10a   : > { %p12_p7 = scmp.ge.s32.totalorder %s15_s20, 6   ;;  %s683_s19 = smov %s685_s21 }
 0x10c   :  { %14 = sbr.rel (!%p12_p7) target bundleno = 2 (0x2), region = 84 }

// kernel: _lambda_.44
= control target key start
LH: loop header
LB: loop body
LE: loop exit
PB: predicated region body
PF: predicated region fallthrough
CT: control target
= control target key end

     0   :  { %s253_s6 = smov 0   ;;  %s274_s0 = inlined_call_operand.vmem [shape: f32[2,4,256], index: 0, kind: input, shape index: {}]   ;;  %s275_s1 = inlined_call_operand.vmem [shape: f32[2,1,256], index: 1, kind: output, shape index: {}]  }
   0x1 LB: > { %s213_s7 = sadd.s32 4294967295, %s240_s6   ;;  %p217_p0 = scmp.ge.s32.totalorder %s240_s6, 1  ;;  %s240_s6 = sphi %s253_s6, %s11_s6  }
   0x2   : > { %p87_p1 = scmp.lt.s32.totalorder %s240_s6, 3 }
   0x4   : > { %p88_p2 = pnand %p217_p0, %p87_p1 }
   0x5   : > { %p106_p3 = scmp.lt.s32.totalorder (!%p88_p2), %s213_s7, 1  ;;  %vm119_vm0 = vcmask (!%p88_p2), 1043456   ;;  %v242_v11 = vmov (!%p88_p2), 1966171168   ;;  %v143_v13 = vlaneseq (!%p88_p2) }
   0x6   : > { %91 = sbr.rel (%p88_p2) target bundleno = 41 (0x29), region = 24  ;;  %v141_v12 = vunpack.c.l.s4 (!%p88_p2), %v242_v11 }
   0x7   : > { %v144_v19 = vshrl.u32 (!%p88_p2), %v143_v13, 7  ;;  %vm157_vm1 = vcmp.lt.s32.totalorder (!%p88_p2), %v143_v13, 256 }
   0x8   : > { %v142_v18 = vunpack.c.0.s8 (!%p88_p2), %v141_v12 }
   0xa   : > { %v145_v23 = vsub.s32 (!%p88_p2), %v142_v18, %v144_v19 }
   0xd   : > { %s277_s7 = smov (!%p106_p3, %s213_s7), 1 }
   0xe   : > { %s223_s8 = sshll.u32 %s277_s7, 3  ;;  %s220_s12 = sshll.u32 %s277_s7, 1 }
   0xf   : > { %s110_s11 = scalar_lea.vmem %s274_s0, %s223_s8  ;;  %s114_s15 = scalar_lea.vmem %s275_s1, %s220_s12 }
  0x10   : > { %v115_v0 = vld [vmem:[%s110_s11] sm:$0xff] }
  0x11   : > { %v117_v1 = vcombine.high %v115_v0, %v115_v0  ;;  %v120_v2 = vsel %vm119_vm0, %v115_v0, 0.0 }
  0x12   : > { %v121_v3 = vrot.slane %v120_v2, 4 }
  0x13   : > { %v127_v4 = vsel %vm119_vm0, %v117_v1, 0.0 }
  0x14   : > { %v122_v5 = vadd.f32 %v121_v3, %v120_v2  ;;  %v128_v6 = vrot.slane %v127_v4, 4 }
  0x16   : > { %v123_v7 = vrot.slane %v122_v5, 2  ;;  %v129_v8 = vadd.f32 %v128_v6, %v127_v4 }
  0x18   : > { %v124_v9 = vadd.f32 %v123_v7, %v122_v5  ;;  %v130_v10 = vrot.slane %v129_v8, 2 }
  0x1a   : > { %v125_v14 = vrot.slane %v124_v9, 1  ;;  %v131_v15 = vadd.f32 %v130_v10, %v129_v8 }
  0x1c   : > { %v126_v16 = vadd.f32 %v125_v14, %v124_v9  ;;  %v132_v17 = vrot.slane %v131_v15, 1 }
  0x1e   : > { %v133_v20 = vadd.f32 %v132_v17, %v131_v15  ;;  %v135_v21 = vmul.f32 0.25, %v126_v16 }
  0x20   : > { %v136_v22 = vmul.f32 0.25, %v133_v20 }
  0x22   : > { %v139_v24 = vcombine.low %v135_v21, %v136_v22 }
  0x24   : > { %v146_v25 = vrot.slane %v139_v24, %v145_v23 }
  0x26   : > { %v153_v26 = vrot.slane %v146_v25, %v145_v23 }
  0x28   : > { %159 = vst.msk [vmem:[%s114_s15] sm:$0x3] %vm157_vm1, %v153_v26 }
  0x29 PF: > { %s11_s6 = sadd.s32 1, %s240_s6  }
  0x2a   : > { %p8_p4 = scmp.ge.s32.totalorder %s11_s6, 4  }
  0x2c   :  { %10 = sbr.rel (!%p8_p4) target bundleno = 1 (0x1), region = 54 }

// kernel: _lambda_.45
= control target key start
LH: loop header
LB: loop body
LE: loop exit
PB: predicated region body
PF: predicated region fallthrough
CT: control target
= control target key end

     0   :  { %v18_v0 = vlaneseq  ;;  %v139_v1 = vmov 1983009808   ;;  %s183_s0 = inlined_call_operand.vmem [shape: f32[2,256], index: 0, kind: input, shape index: {}]   ;;  %s184_s1 = inlined_call_operand.vmem [shape: f32[1,256], index: 1, kind: input, shape index: {}]   ;;  %s185_s2 = inlined_call_operand.vmem [shape: f32[1,256], index: 2, kind: input, shape index: {}]   ;;  %s186_s3 = inlined_call_operand.hbm [shape: f32[2,256], index: 3, kind: output, shape index: {}]  }
   0x1   :  { %v28_v2 = vunpack.c.l.s4 %v139_v1 }
   0x2   :  { %8 = vsyncpa [#allocation3], 0  ;;  %v19_v3 = vshrl.u32 %v18_v0, 7  ;;  %v16_v4 = vld [vmem:[%s184_s1] sm:$0x3]  ;;  %vm68_vm0 = vcmask 1041408  }
   0x3   :  { %v29_v5 = vunpack.c.0.s8 %v28_v2  ;;  %v36_v6 = vld [vmem:[%s185_s2] sm:$0x3]  ;;  %v140_v28 = vmov 269488144  }
   0x4   :  { %v20_v7 = vsub.s32 0, %v19_v3  ;;  %v24_v8 = vsub.s32 1, %v19_v3  ;;  %v15_v16 = vld [vmem:[%s183_s0] sm:$0xf]  ;;  %v84_v29 = vunpack.c.l.s4 %v140_v28  ;;  %s141_s0 = smov [#allocation2]  }
   0x5   :  { %v32_v9 = vsub.s32 %v29_v5, %v19_v3  ;;  %s100_s1 = sshll.u32 %s141_s0, 4  ;;  %s101_s1 = int_to_ptr.vmem [resolvable:$true] %s100_s1 }
   0x6   :  { %v21_v10 = vrot.slane %v16_v4, %v20_v7  ;;  %v25_v11 = vrot.slane %v16_v4, %v24_v8  ;;  %v41_v12 = vrot.slane %v36_v6, %v20_v7  ;;  %v45_v13 = vrot.slane %v36_v6, %v24_v8  ;;  %s115_s2 = scalar_lea.vmem %s101_s1, 64  ;;  %p120_p1 = scmp.lt.s32.totalorder %s101_s1, %s101_s1 }
   0x7   :  { %v85_v30 = vunpack.c.0.s8 %v84_v29  ;;  %p116_p0 = scmp.ne.s32.totalorder %s101_s1, %s115_s2  ;;  %p121_p2 = scmp.lt.s32.totalorder %s115_s2, %s115_s2 }
   0x8   :  { %v26_v14 = vcombine.low %v21_v10, %v25_v11  ;;  %v46_v15 = vcombine.low %v41_v12, %v45_v13 }
   0x9   :  { %v88_v35 = vsub.s32 %v85_v30, %v19_v3  ;;  %p122_p3 = por %p121_p2, %p120_p1 }
   0xa   :  { %v33_v17 = vrot.slane %v26_v14, %v32_v9  ;;  %v53_v18 = vrot.slane %v46_v15, %v32_v9 }
   0xb   :  { %p123_p4 = pnand %p122_p3, %p116_p0 }
   0xc   :  { %v35_v19 = vmul.f32 %v33_v17, %v15_v16 }
   0xe   :  { %v55_v20 = vadd.f32 %v53_v18, %v35_v19 }
  0x10   :  { %v56_v21 = vmul.f32 %v55_v20, %v55_v20 }
  0x12   :  { %v64_v22 = vrot.slane %v56_v21, %v32_v9 }
  0x14   :  { %v65_v23 = vcombine.high %v64_v22, %v64_v22  ;;  %v69_v24 = vsel %vm68_vm0, %v64_v22, 0.0 }
  0x16   :  { %v70_v25 = vsel %vm68_vm0, %v65_v23, 0.0 }
  0x17   :  { %v71_v26 = vadd.f32 %v70_v25, %v69_v24 }
  0x19   :  { %72 = vadd.xlane.f32.xlu0 %v71_v26 }
  0xa6   :  { %v73_v27 = vpop.xlane.xlu0 %72 }
  0xa7   :  { %111 = vrsqrt.f32 %v73_v27  ;;  %vm76_vm1 = vcmp.eq.f32.partialorder %v73_v27, inf  ;;  %v79_v33 = vand.u32 2147483648, %v73_v27  ;;  %vm78_vm2 = vcmp.eq.f32.partialorder %v73_v27, 0.0 }
  0xb1   :  { %v112_v31 = vpop.eup %111 }
  0xb2   :  { %v75_v32 = vmul.f32 %v112_v31, %v73_v27 }
  0xb4   :  { %v77_v34 = vsel %vm76_vm1, %v73_v27, %v75_v32 }
  0xb5   :  { %v80_v36 = vsel %vm78_vm2, %v79_v33, %v77_v34 }
  0xb6   :  { %v81_v37 = vmax.f32 %v80_v36, 1e-12 }
  0xb8   :  { %v89_v38 = vrot.slane %v81_v37, %v88_v35 }
  0xba   :  { %113 = vrcp.f32 %v89_v38 }
  0xc4   :  { %v114_v39 = vpop.eup %113 }
  0xc5   :  { %v92_v40 = vmul.f32 %v114_v39, %v55_v20 }
  0xc7   :  { %93 = vst [vmem:[#allocation2] sm:$0xf] %v92_v40 }
  0xc8   :  { %126 = shalt.err (!%p123_p4)
}
  0xc9   :  { %s127_s20 = scalar_lea.hbm %s186_s3, 64 }
  0xca   :  { %p128_p5 = scmp.ne.s32.totalorder %s186_s3, %s127_s20  ;;  %p131_p6 = scmp.lt.u32.totalorder %s127_s20, %s186_s3 }
  0xcc   :  { %p133_p7 = pnand %p131_p6, %p128_p5 }
  0xce   :  { %136 = shalt.err (!%p133_p7)
}
  0xcf   :  { %103 = dma.vmem_to_hbm [thread:$0]  %s101_s1, 64, %s186_s3, [#allocation3]  }
  0xd0   :  { %137 = dma.done.wait [#allocation3], 64  }
  0xd1   :  { %138 = vsyncadd [#allocation3], 4294967232 }
  0xd2   :  { %107 = vsyncpa [#allocation3], 1 }

</bundles_post_ra>
